<compile_context>
chip_gen: v5e
topology: v5e:2x2
jax: 0.10.0
libtpu: 0.0.40
codegen_flags: <defaults>
</compile_context>

<pallas_src>
import functools

import jax
import jax.numpy as jnp
from jax import lax
from jax.experimental import pallas as pl
from jax.experimental.pallas import tpu as pltpu


def _round_up(a, b):
    return ((a + b - 1) // b) * b


# ---------------------------------------------------------------------------
# Fused LSTNet forward kernel: one batch tile per grid step.
# ---------------------------------------------------------------------------
def _lstnet_kernel(
    x_ref,        # (TB, P*m)             flattened input window
    wc_ref,       # (P*m, Cw_pad)         block-banded conv weight (im2col folded in)
    bc_ref,       # (1, Cw_pad)           conv bias, tiled per timestep
    wg_ref,       # (Cw_pad, GW)          block-diag gate weights (GRU1 + skip GRU)
    bg_ref,       # (1, GW)               gate bias (b_ih, with b_hh folded in for r/z)
    whh1_ref,     # (hidR, 3*hidR)        GRU1 recurrent weight (x @ W layout, [r|z|n])
    bhh1n_ref,    # (1, hidR)             GRU1 b_hh (n gate only)
    whhs_ref,     # (skip*hidS, 3*skip*hidS)  skip-GRU block-diag recurrent weight
    bhhsn_ref,    # (1, skip*hidS)        skip-GRU b_hh (n gate), tiled per chain
    w1_ref,       # (hidR + skip*hidS, m_pad)
    outb_ref,     # (1, m_pad)            lin1_b + highway bias, lane padded
    whw_ref,      # (P*m, m_pad)          banded highway weight
    o_ref,        # (TB, m_pad)
    gates_ref,    # scratch (TB, GW)      gate pre-activations, 128-lane blocks per step
    *, T, pt, skip, hidR, hidS, G1B, SB, mxu_dtype, unroll_t, unroll_s,
):
    f32 = jnp.float32
    TB = o_ref.shape[0]
    SH = skip * hidS

    x = x_ref[...].astype(mxu_dtype)

    # ---- Conv2d(1, hidC, (Ck, m)) + ReLU: one banded matmul, no relayout ---
    conv = jnp.dot(x, wc_ref[...], preferred_element_type=f32) + bc_ref[...]
    conv = jnp.maximum(conv, 0.0)

    # ---- all input-gate pre-activations (both GRUs, every step): 1 matmul --
    gates_ref[...] = (
        jnp.dot(conv.astype(mxu_dtype), wg_ref[...], preferred_element_type=f32)
        + bg_ref[...])

    whh1 = whh1_ref[...]
    whhs = whhs_ref[...]
    bhh1n = jnp.broadcast_to(bhh1n_ref[...], (TB, hidR))    # hoisted out of loops
    bhhsn = jnp.broadcast_to(bhhsn_ref[...], (TB, SH))

    def gru_step(gi, h, whh, bhn, H):
        # gi carries b_ih (+ b_hh for r/z) already; only b_hh_n is added here,
        # inside the r * (...) term, matching PyTorch GRU semantics.
        gh = jnp.dot(h.astype(mxu_dtype), whh, preferred_element_type=f32)
        r = jax.nn.sigmoid(gi[:, 0:H] + gh[:, 0:H])
        z = jax.nn.sigmoid(gi[:, H:2 * H] + gh[:, H:2 * H])
        n = jnp.tanh(gi[:, 2 * H:3 * H] + r * (gh[:, 2 * H:3 * H] + bhn))
        return (1.0 - z) * n + z * h

    # ---- main GRU over the T conv timesteps (final hidden state only) ------
    def gru1_body(t, h):
        off = pl.multiple_of(t * G1B, 128)
        gi = gates_ref[:, pl.ds(off, G1B)]
        return gru_step(gi, h, whh1, bhh1n, hidR)

    h1 = lax.fori_loop(0, T, gru1_body, jnp.zeros((TB, hidR), f32),
                       unroll=unroll_t)

    # ---- skip GRU: all `skip` chains batched along the lane axis -----------
    skip_off = T * G1B

    def grus_body(i, hs):
        off = pl.multiple_of(skip_off + i * SB, 128)
        gi = gates_ref[:, pl.ds(off, SB)]
        return gru_step(gi, hs, whhs, bhhsn, SH)

    hs = lax.fori_loop(0, pt, grus_body, jnp.zeros((TB, SH), f32),
                       unroll=unroll_s)

    # ---- linear1 + highway + sigmoid, all lane-dense (m padded to 128) -----
    res = jnp.dot(h1.astype(mxu_dtype), w1_ref[0:hidR, :],
                  preferred_element_type=f32)
    res = res + jnp.dot(hs.astype(mxu_dtype), w1_ref[hidR:, :],
                        preferred_element_type=f32)
    res = res + jnp.dot(x, whw_ref[...], preferred_element_type=f32)
    res = res + outb_ref[...]
    o_ref[...] = jax.nn.sigmoid(res).astype(o_ref.dtype)


# ---------------------------------------------------------------------------
# Wrapper: fold im2col / block-diag structure into the weights, tile the
# batch, call Pallas.
# ---------------------------------------------------------------------------
@functools.partial(jax.jit,
                   static_argnames=("Ck", "skip", "hw", "block_batch",
                                    "mxu_dtype"))
def lstnet_forward(x, params, *, Ck, skip, hw, block_batch=512,
                   mxu_dtype="float32"):
    """x: (batch, P, m) float32. Returns sigmoid LSTNet output (batch, m)."""
    assert skip > 0 and hw > 0
    f32 = jnp.float32
    mdt = jnp.dtype(mxu_dtype)

    batch, P, m = x.shape
    hidC = params["conv_w"].shape[0]
    hidR = params["gru1_w_hh"].shape[1]
    hidS = params["grus_w_hh"].shape[1]
    T = P - Ck + 1
    pt = (P - Ck) // skip
    base = T - pt * skip
    SH = skip * hidS
    G1B = _round_up(3 * hidR, 128)        # per-timestep GRU1 gate block (lane aligned)
    SB = _round_up(3 * SH, 128)           # per-step skip-GRU gate block
    Cw = T * hidC
    Cw_pad = _round_up(Cw, 128)
    m_pad = _round_up(m, 128)
    GW = T * G1B + pt * SB

    # ---- banded conv weight: im2col folded into the weight -----------------
    wc_flat = params["conv_w"].reshape(hidC, Ck * m).T.astype(f32)   # (Ck*m, hidC)
    wc_big = jnp.zeros((P * m, Cw_pad), f32)
    for t in range(T):
        wc_big = wc_big.at[t * m:t * m + Ck * m,
                           t * hidC:(t + 1) * hidC].set(wc_flat)
    bc_rep = jnp.zeros((1, Cw_pad), f32).at[0, :Cw].set(
        jnp.tile(params["conv_b"], T))

    # ---- fused block-diagonal gate weight for BOTH GRUs ---------------------
    wih1 = params["gru1_w_ih"].T.astype(f32)                         # (hidC, 3*hidR)
    wihs = params["grus_w_ih"].T.astype(f32)                         # (hidC, 3*hidS)
    bih1, bhh1 = params["gru1_b_ih"], params["gru1_b_hh"]
    bihs, bhhs = params["grus_b_ih"], params["grus_b_hh"]
    # fold b_hh into the gate bias for r/z; keep b_ih only for n
    b1_comb = jnp.concatenate([bih1[:2 * hidR] + bhh1[:2 * hidR],
                               bih1[2 * hidR:]])
    bs_comb = jnp.concatenate([bihs[:2 * hidS] + bhhs[:2 * hidS],
                               bihs[2 * hidS:]])

    wg_big = jnp.zeros((Cw_pad, GW), f32)
    bg_rep = jnp.zeros((1, GW), f32)
    for t in range(T):                                               # GRU1 blocks
        wg_big = wg_big.at[t * hidC:(t + 1) * hidC,
                           t * G1B:t * G1B + 3 * hidR].set(wih1)
        bg_rep = bg_rep.at[0, t * G1B:t * G1B + 3 * hidR].set(b1_comb)
    skip_off = T * G1B                                               # skip-GRU blocks
    # step i, chain j consumes conv time t = base + i*skip + j; layout per step
    # is gate-major then chain-major: [r(c0..c3) | z(c0..c3) | n(c0..c3)].
    for i in range(pt):
        for j in range(skip):
            t = base + i * skip + j
            for g in range(3):
                c0 = skip_off + i * SB + g * SH + j * hidS
                wg_big = wg_big.at[t * hidC:(t + 1) * hidC, c0:c0 + hidS].set(
                    wihs[:, g * hidS:(g + 1) * hidS])
                bg_rep = bg_rep.at[0, c0:c0 + hidS].set(
                    bs_comb[g * hidS:(g + 1) * hidS])

    # ---- recurrent weights ---------------------------------------------------
    whh1 = params["gru1_w_hh"].T.astype(f32)                         # (hidR, 3*hidR)
    bhh1n = bhh1[2 * hidR:].reshape(1, hidR)
    whhs_xw = params["grus_w_hh"].T.astype(f32)                      # (hidS, 3*hidS)
    whhs_bd = jnp.zeros((SH, 3 * SH), f32)
    for j in range(skip):
        for g in range(3):
            whhs_bd = whhs_bd.at[
                j * hidS:(j + 1) * hidS,
                g * SH + j * hidS:g * SH + (j + 1) * hidS].set(
                whhs_xw[:, g * hidS:(g + 1) * hidS])
    bhhsn = jnp.tile(bhhs[2 * hidS:], skip).reshape(1, SH)

    # ---- lane-dense output-path weights -------------------------------------
    w1_pad = jnp.zeros((hidR + SH, m_pad), f32).at[:, :m].set(params["lin1_w"].T)
    outb = jnp.zeros((1, m_pad), f32).at[0, :m].set(
        params["lin1_b"] + params["hw_b"][0])
    whw_big = jnp.zeros((P * m, m_pad), f32)
    eye_m = jnp.eye(m, dtype=f32)
    for k in range(hw):
        r0 = (P - hw + k) * m
        whw_big = whw_big.at[r0:r0 + m, :m].set(eye_m * params["hw_w"][0, k])

    weights = (wc_big.astype(mdt), bc_rep, wg_big.astype(mdt), bg_rep,
               whh1.astype(mdt), bhh1n, whhs_bd.astype(mdt), bhhsn,
               w1_pad.astype(mdt), outb, whw_big.astype(mdt))

    # ---- batch tiling & VMEM budget -----------------------------------------
    # Rough per-batch-element VMEM footprint (f32): x (double buffered), conv,
    # gate scratch (+ matmul result), output and small temporaries.
    per_elem_bytes = 4 * (2 * P * m + Cw_pad + 2 * GW + 2 * m_pad + 8 * G1B)
    act_budget = 24 * 1024 * 1024                 # keeps tb ~1-2k: fits v7x 64 MiB
    tb_cap = max(8, (act_budget // per_elem_bytes) // 8 * 8)
    tb = max(8, min(block_batch, _round_up(batch, 8), tb_cap) // 8 * 8)
    b_pad = _round_up(batch, tb)
    grid = (b_pad // tb,)
    # NOTE: on v7x keep batch large enough that grid >= 2 "parallel" steps so
    # both TensorCores are used; on v5e/v6e fewer, bigger steps are better.

    weight_bytes = sum(int(w.size) * jnp.dtype(w.dtype).itemsize for w in weights)
    vmem_est = 2 * weight_bytes + 2 * tb * per_elem_bytes + (4 << 20)
    vmem_limit = int(min(60 << 20, max(32 << 20, vmem_est)))

    x2 = x.reshape(batch, P * m)                  # contiguous flatten (as .view)
    if b_pad != batch:
        x2 = jnp.pad(x2, ((0, b_pad - batch), (0, 0)))

    kernel = functools.partial(
        _lstnet_kernel, T=T, pt=pt, skip=skip, hidR=hidR, hidS=hidS,
        G1B=G1B, SB=SB, mxu_dtype=mdt,
        unroll_t=bool(T <= 32), unroll_s=bool(pt <= 32))

    # ---- advisory cost estimate for the XLA scheduler ------------------------
    flops = 2 * b_pad * (P * m * Cw_pad          # banded conv
                         + Cw_pad * GW           # fused gate matmul
                         + T * hidR * 3 * hidR   # GRU1 recurrence
                         + pt * SH * 3 * SH      # skip-GRU recurrence
                         + (hidR + SH) * m_pad   # linear1
                         + P * m * m_pad)        # highway
    trans = b_pad * (T * 3 * hidR + pt * 3 * SH + m_pad)
    bytes_accessed = 4 * (x2.size + b_pad * m_pad) + weight_bytes

    const2d = lambda i: (0, 0)                    # weights stay VMEM-resident
    in_specs = [pl.BlockSpec((tb, P * m), lambda i: (i, 0))]
    in_specs += [pl.BlockSpec(w.shape, const2d) for w in weights]

    out = pl.pallas_call(
        kernel,
        out_shape=jax.ShapeDtypeStruct((b_pad, m_pad), x.dtype),
        grid=grid,
        in_specs=in_specs,
        out_specs=pl.BlockSpec((tb, m_pad), lambda i: (i, 0)),
        scratch_shapes=[pltpu.VMEM((tb, GW), jnp.float32)],
        compiler_params=pltpu.CompilerParams(
            dimension_semantics=("parallel",),
            vmem_limit_bytes=vmem_limit),
        cost_estimate=pl.CostEstimate(
            flops=int(flops), transcendentals=int(trans),
            bytes_accessed=int(bytes_accessed)),
    )(x2, *weights)
    return out[:batch, :m]


# ---------------------------------------------------------------------------
# Pure-JAX reference (mirrors the PyTorch forward op-by-op) + init helpers.
# ---------------------------------------------------------------------------
def _gru_seq_ref(seq, w_ih, w_hh, b_ih, b_hh):
    """seq: (T, B, in). Returns final hidden (B, H). PyTorch gate order [r|z|n]."""
    H = w_hh.shape[1]
    h = jnp.zeros((seq.shape[1], H), jnp.float32)
    for t in range(seq.shape[0]):
        gi = seq[t] @ w_ih.T + b_ih
        gh = h @ w_hh.T + b_hh
        r = jax.nn.sigmoid(gi[:, :H] + gh[:, :H])
        z = jax.nn.sigmoid(gi[:, H:2 * H] + gh[:, H:2 * H])
        n = jnp.tanh(gi[:, 2 * H:] + r * gh[:, 2 * H:])
        h = (1.0 - z) * n + z * h
    return h


def lstnet_reference(x, params, *, Ck, skip, hw):
    batch, P, m = x.shape
    hidC = params["conv_w"].shape[0]
    hidS = params["grus_w_hh"].shape[1]
    T = P - Ck + 1
    pt = (P - Ck) // skip

    wc = params["conv_w"].reshape(hidC, Ck * m)
    win = jnp.stack([x[:, t:t + Ck, :].reshape(batch, Ck * m) for t in range(T)],
                    axis=2)                                            # (B, Ck*m, T)
    c = jax.nn.relu(jnp.einsum("hk,bkt->bht", wc, win)
                    + params["conv_b"][None, :, None])                 # (B, hidC, T)

    r = _gru_seq_ref(jnp.transpose(c, (2, 0, 1)),
                     params["gru1_w_ih"], params["gru1_w_hh"],
                     params["gru1_b_ih"], params["gru1_b_hh"])

    s = c[:, :, -pt * skip:].reshape(batch, hidC, pt, skip)
    s = jnp.transpose(s, (2, 0, 3, 1)).reshape(pt, batch * skip, hidC)
    hs = _gru_seq_ref(s, params["grus_w_ih"], params["grus_w_hh"],
                      params["grus_b_ih"], params["grus_b_hh"])
    hs = hs.reshape(batch, skip * hidS)

    res = jnp.concatenate([r, hs], axis=1) @ params["lin1_w"].T + params["lin1_b"]

    z = jnp.transpose(x[:, -hw:, :], (0, 2, 1)).reshape(batch * m, hw)
    z = (z @ params["hw_w"].T + params["hw_b"]).reshape(batch, m)
    return jax.nn.sigmoid(res + z)


def init_params(key, *, P, m, Ck, hidC, hidR, hidS, skip, hw):
    ks = jax.random.split(key, 14)

    def u(k, shape, fan_in):
        b = 1.0 / jnp.sqrt(jnp.float32(fan_in))
        return jax.random.uniform(k, shape, jnp.float32, -b, b)

    return {
        "conv_w": u(ks[0], (hidC, 1, Ck, m), Ck * m),
        "conv_b": u(ks[1], (hidC,), Ck * m),
        "gru1_w_ih": u(ks[2], (3 * hidR, hidC), hidR),
        "gru1_w_hh": u(ks[3], (3 * hidR, hidR), hidR),
        "gru1_b_ih": u(ks[4], (3 * hidR,), hidR),
        "gru1_b_hh": u(ks[5], (3 * hidR,), hidR),
        "grus_w_ih": u(ks[6], (3 * hidS, hidC), hidS),
        "grus_w_hh": u(ks[7], (3 * hidS, hidS), hidS),
        "grus_b_ih": u(ks[8], (3 * hidS,), hidS),
        "grus_b_hh": u(ks[9], (3 * hidS,), hidS),
        "lin1_w": u(ks[10], (m, hidR + skip * hidS), hidR + skip * hidS),
        "lin1_b": u(ks[11], (m,), hidR + skip * hidS),
        "hw_w": u(ks[12], (1, hw), hw),
        "hw_b": u(ks[13], (1,), hw),
    }


if __name__ == "__main__":
    # Small LSTNet config: window P=16, m=8 series, Ck=4 conv kernel,
    # hidC=16, hidR=32, hidS=8, skip=4 (=> pt=3), highway window hw=4.
    batch, P, m = 24, 16, 8
    Ck, hidC, hidR, hidS, skip, hw = 4, 16, 32, 8, 4, 4

    key = jax.random.PRNGKey(0)
    kx, kp = jax.random.split(key)
    x = jax.random.normal(kx, (batch, P, m), dtype=jnp.float32)
    params = init_params(kp, P=P, m=m, Ck=Ck, hidC=hidC, hidR=hidR,
                         hidS=hidS, skip=skip, hw=hw)

    ref = lstnet_reference(x, params, Ck=Ck, skip=skip, hw=hw)

    # Default tiling: tiny batch => whole batch in one grid step.
    out = lstnet_forward(x, params, Ck=Ck, skip=skip, hw=hw)
    jax.block_until_ready(out)
    assert out.shape == (batch, m)
    assert jnp.allclose(out, ref, atol=3e-3, rtol=3e-3), float(
        jnp.max(jnp.abs(out - ref)))

    # Also exercise batch tiling / padding / a multi-step "parallel" grid.
    out2 = lstnet_forward(x, params, Ck=Ck, skip=skip, hw=hw, block_batch=16)
    jax.block_until_ready(out2)
    assert jnp.allclose(out2, ref, atol=3e-3, rtol=3e-3), float(
        jnp.max(jnp.abs(out2 - ref)))

    print("KERNEL_OK")
</pallas_src>

<mosaic_0001>
module attributes {stable_mosaic.version = 11 : i64} {
  func.func @_lstnet_kernel(%arg0: i32, %arg1: memref<24x128xf32, #tpu.memory_space<vmem>>, %arg2: memref<128x256xf32, #tpu.memory_space<vmem>>, %arg3: memref<1x256xf32, #tpu.memory_space<vmem>>, %arg4: memref<256x2048xf32, #tpu.memory_space<vmem>>, %arg5: memref<1x2048xf32, #tpu.memory_space<vmem>>, %arg6: memref<32x96xf32, #tpu.memory_space<vmem>>, %arg7: memref<1x32xf32, #tpu.memory_space<vmem>>, %arg8: memref<32x96xf32, #tpu.memory_space<vmem>>, %arg9: memref<1x32xf32, #tpu.memory_space<vmem>>, %arg10: memref<64x128xf32, #tpu.memory_space<vmem>>, %arg11: memref<1x128xf32, #tpu.memory_space<vmem>>, %arg12: memref<128x128xf32, #tpu.memory_space<vmem>>, %arg13: memref<24x128xf32, #tpu.memory_space<vmem>>, %arg14: memref<24x2048xf32, #tpu.memory_space<vmem>>) attributes {dimension_semantics = [#tpu.dimension_semantics<parallel>], iteration_bounds = array<i64: 1>, scalar_prefetch = 0 : i64, scratch_operands = 1 : i64, tpu.core_type = #tpu.core_type<tc>, window_params = [{transform_indices = @transform_0, window_bounds = array<i64: 24, 128>}, {pipeline_mode = #tpu.pipeline_mode<synchronous>, transform_indices = @transform_1, window_bounds = array<i64: 128, 256>}, {pipeline_mode = #tpu.pipeline_mode<synchronous>, transform_indices = @transform_2, window_bounds = array<i64: 1, 256>}, {pipeline_mode = #tpu.pipeline_mode<synchronous>, transform_indices = @transform_3, window_bounds = array<i64: 256, 2048>}, {pipeline_mode = #tpu.pipeline_mode<synchronous>, transform_indices = @transform_4, window_bounds = array<i64: 1, 2048>}, {pipeline_mode = #tpu.pipeline_mode<synchronous>, transform_indices = @transform_5, window_bounds = array<i64: 32, 96>}, {pipeline_mode = #tpu.pipeline_mode<synchronous>, transform_indices = @transform_6, window_bounds = array<i64: 1, 32>}, {pipeline_mode = #tpu.pipeline_mode<synchronous>, transform_indices = @transform_7, window_bounds = array<i64: 32, 96>}, {pipeline_mode = #tpu.pipeline_mode<synchronous>, transform_indices = @transform_8, window_bounds = array<i64: 1, 32>}, {pipeline_mode = #tpu.pipeline_mode<synchronous>, transform_indices = @transform_9, window_bounds = array<i64: 64, 128>}, {pipeline_mode = #tpu.pipeline_mode<synchronous>, transform_indices = @transform_10, window_bounds = array<i64: 1, 128>}, {pipeline_mode = #tpu.pipeline_mode<synchronous>, transform_indices = @transform_11, window_bounds = array<i64: 128, 128>}, {transform_indices = @transform_12, window_bounds = array<i64: 24, 128>}]} {
    %c0 = arith.constant 0 : index
    %c0_0 = arith.constant 0 : index
    %0 = vector.load %arg1[%c0, %c0_0] : memref<24x128xf32, #tpu.memory_space<vmem>>, vector<24x128xf32>
    %c0_1 = arith.constant 0 : index
    %c0_2 = arith.constant 0 : index
    %1 = vector.load %arg2[%c0_1, %c0_2] : memref<128x256xf32, #tpu.memory_space<vmem>>, vector<128x256xf32>
    %cst = arith.constant dense<0.000000e+00> : vector<24x256xf32>
    %2 = tpu.matmul %0, %1, %cst {dimension_numbers = #tpu.dot_dimension_numbers<[1], [0], [0], [1], [0, 0, 1, 1], [], []>} : vector<24x128xf32>, vector<128x256xf32>, vector<24x256xf32> -> vector<24x256xf32>
    %c0_3 = arith.constant 0 : index
    %c0_4 = arith.constant 0 : index
    %3 = vector.load %arg3[%c0_3, %c0_4] : memref<1x256xf32, #tpu.memory_space<vmem>>, vector<1x256xf32>
    %4 = vector.broadcast %3 : vector<1x256xf32> to vector<24x256xf32>
    %5 = arith.addf %2, %4 : vector<24x256xf32>
    %cst_5 = arith.constant 0.000000e+00 : f32
    %6 = vector.broadcast %cst_5 : f32 to vector<24x256xf32>
    %7 = arith.maximumf %5, %6 : vector<24x256xf32>
    %c0_6 = arith.constant 0 : index
    %c0_7 = arith.constant 0 : index
    %8 = vector.load %arg4[%c0_6, %c0_7] : memref<256x2048xf32, #tpu.memory_space<vmem>>, vector<256x2048xf32>
    %cst_8 = arith.constant dense<0.000000e+00> : vector<24x2048xf32>
    %9 = tpu.matmul %7, %8, %cst_8 {dimension_numbers = #tpu.dot_dimension_numbers<[1], [0], [0], [1], [0, 0, 1, 1], [], []>} : vector<24x256xf32>, vector<256x2048xf32>, vector<24x2048xf32> -> vector<24x2048xf32>
    %c0_9 = arith.constant 0 : index
    %c0_10 = arith.constant 0 : index
    %10 = vector.load %arg5[%c0_9, %c0_10] : memref<1x2048xf32, #tpu.memory_space<vmem>>, vector<1x2048xf32>
    %11 = vector.broadcast %10 : vector<1x2048xf32> to vector<24x2048xf32>
    %12 = arith.addf %9, %11 : vector<24x2048xf32>
    %c0_11 = arith.constant 0 : index
    %c0_12 = arith.constant 0 : index
    %13 = vector.load %arg14[%c0_11, %c0_12] : memref<24x2048xf32, #tpu.memory_space<vmem>>, vector<24x2048xf32>
    tpu.vector_store %arg14[%c0_11, %c0_12], %12 {strides = array<i32>} : memref<24x2048xf32, #tpu.memory_space<vmem>>, vector<24x2048xf32>,
    %c0_13 = arith.constant 0 : index
    %c0_14 = arith.constant 0 : index
    %14 = vector.load %arg6[%c0_13, %c0_14] : memref<32x96xf32, #tpu.memory_space<vmem>>, vector<32x96xf32>
    %c0_15 = arith.constant 0 : index
    %c0_16 = arith.constant 0 : index
    %15 = vector.load %arg8[%c0_15, %c0_16] : memref<32x96xf32, #tpu.memory_space<vmem>>, vector<32x96xf32>
    %c0_17 = arith.constant 0 : index
    %c0_18 = arith.constant 0 : index
    %16 = vector.load %arg7[%c0_17, %c0_18] : memref<1x32xf32, #tpu.memory_space<vmem>>, vector<1x32xf32>
    %17 = vector.shape_cast %16 : vector<1x32xf32> to vector<1x32xf32>
    %18 = vector.broadcast %17 : vector<1x32xf32> to vector<24x32xf32>
    %c0_19 = arith.constant 0 : index
    %c0_20 = arith.constant 0 : index
    %19 = vector.load %arg9[%c0_19, %c0_20] : memref<1x32xf32, #tpu.memory_space<vmem>>, vector<1x32xf32>
    %20 = vector.shape_cast %19 : vector<1x32xf32> to vector<1x32xf32>
    %21 = vector.broadcast %20 : vector<1x32xf32> to vector<24x32xf32>
    %cst_21 = arith.constant 0.000000e+00 : f32
    %22 = vector.broadcast %cst_21 : f32 to vector<24x32xf32>
    %c0_i32 = arith.constant 0 : i32
    %c128_i32 = arith.constant 128 : i32
    %23 = arith.muli %c0_i32, %c128_i32 : i32
    %24 = tpu.assume_multiple %23, 128 : i32
    %c0_22 = arith.constant 0 : index
    %25 = arith.index_cast %24 : i32 to index
    %26 = vector.load %arg14[%c0_22, %25] : memref<24x2048xf32, #tpu.memory_space<vmem>>, vector<24x128xf32>
    %cst_23 = arith.constant dense<0.000000e+00> : vector<24x96xf32>
    %27 = tpu.matmul %22, %14, %cst_23 {dimension_numbers = #tpu.dot_dimension_numbers<[1], [0], [0], [1], [0, 0, 1, 1], [], []>} : vector<24x32xf32>, vector<32x96xf32>, vector<24x96xf32> -> vector<24x96xf32>
    %28 = vector.extract_strided_slice %26 {offsets = [0, 0], sizes = [24, 32], strides = [1, 1]} : vector<24x128xf32> to vector<24x32xf32>
    %29 = vector.extract_strided_slice %27 {offsets = [0, 0], sizes = [24, 32], strides = [1, 1]} : vector<24x96xf32> to vector<24x32xf32>
    %30 = arith.addf %28, %29 : vector<24x32xf32>
    %31 = arith.negf %30 : vector<24x32xf32>
    %32 = math.exp %31 : vector<24x32xf32>
    %cst_24 = arith.constant 1.000000e+00 : f32
    %33 = vector.broadcast %cst_24 : f32 to vector<24x32xf32>
    %34 = arith.addf %33, %32 : vector<24x32xf32>
    %35 = arith.divf %33, %34 : vector<24x32xf32>
    %36 = vector.extract_strided_slice %26 {offsets = [0, 32], sizes = [24, 32], strides = [1, 1]} : vector<24x128xf32> to vector<24x32xf32>
    %37 = vector.extract_strided_slice %27 {offsets = [0, 32], sizes = [24, 32], strides = [1, 1]} : vector<24x96xf32> to vector<24x32xf32>
    %38 = arith.addf %36, %37 : vector<24x32xf32>
    %39 = arith.negf %38 : vector<24x32xf32>
    %40 = math.exp %39 : vector<24x32xf32>
    %cst_25 = arith.constant 1.000000e+00 : f32
    %41 = vector.broadcast %cst_25 : f32 to vector<24x32xf32>
    %42 = arith.addf %41, %40 : vector<24x32xf32>
    %43 = arith.divf %41, %42 : vector<24x32xf32>
    %44 = vector.extract_strided_slice %26 {offsets = [0, 64], sizes = [24, 32], strides = [1, 1]} : vector<24x128xf32> to vector<24x32xf32>
    %45 = vector.extract_strided_slice %27 {offsets = [0, 64], sizes = [24, 32], strides = [1, 1]} : vector<24x96xf32> to vector<24x32xf32>
    %46 = arith.addf %45, %18 : vector<24x32xf32>
    %47 = arith.mulf %35, %46 : vector<24x32xf32>
    %48 = arith.addf %44, %47 : vector<24x32xf32>
    %49 = math.tanh %48 : vector<24x32xf32>
    %cst_26 = arith.constant 1.000000e+00 : f32
    %50 = vector.broadcast %cst_26 : f32 to vector<24x32xf32>
    %51 = arith.subf %50, %43 : vector<24x32xf32>
    %52 = arith.mulf %51, %49 : vector<24x32xf32>
    %53 = arith.mulf %43, %22 : vector<24x32xf32>
    %54 = arith.addf %52, %53 : vector<24x32xf32>
    %c1_i32 = arith.constant 1 : i32
    %c128_i32_27 = arith.constant 128 : i32
    %55 = arith.muli %c1_i32, %c128_i32_27 : i32
    %56 = tpu.assume_multiple %55, 128 : i32
    %c0_28 = arith.constant 0 : index
    %57 = arith.index_cast %56 : i32 to index
    %58 = vector.load %arg14[%c0_28, %57] : memref<24x2048xf32, #tpu.memory_space<vmem>>, vector<24x128xf32>
    %cst_29 = arith.constant dense<0.000000e+00> : vector<24x96xf32>
    %59 = tpu.matmul %54, %14, %cst_29 {dimension_numbers = #tpu.dot_dimension_numbers<[1], [0], [0], [1], [0, 0, 1, 1], [], []>} : vector<24x32xf32>, vector<32x96xf32>, vector<24x96xf32> -> vector<24x96xf32>
    %60 = vector.extract_strided_slice %58 {offsets = [0, 0], sizes = [24, 32], strides = [1, 1]} : vector<24x128xf32> to vector<24x32xf32>
    %61 = vector.extract_strided_slice %59 {offsets = [0, 0], sizes = [24, 32], strides = [1, 1]} : vector<24x96xf32> to vector<24x32xf32>
    %62 = arith.addf %60, %61 : vector<24x32xf32>
    %63 = arith.negf %62 : vector<24x32xf32>
    %64 = math.exp %63 : vector<24x32xf32>
    %cst_30 = arith.constant 1.000000e+00 : f32
    %65 = vector.broadcast %cst_30 : f32 to vector<24x32xf32>
    %66 = arith.addf %65, %64 : vector<24x32xf32>
    %67 = arith.divf %65, %66 : vector<24x32xf32>
    %68 = vector.extract_strided_slice %58 {offsets = [0, 32], sizes = [24, 32], strides = [1, 1]} : vector<24x128xf32> to vector<24x32xf32>
    %69 = vector.extract_strided_slice %59 {offsets = [0, 32], sizes = [24, 32], strides = [1, 1]} : vector<24x96xf32> to vector<24x32xf32>
    %70 = arith.addf %68, %69 : vector<24x32xf32>
    %71 = arith.negf %70 : vector<24x32xf32>
    %72 = math.exp %71 : vector<24x32xf32>
    %cst_31 = arith.constant 1.000000e+00 : f32
    %73 = vector.broadcast %cst_31 : f32 to vector<24x32xf32>
    %74 = arith.addf %73, %72 : vector<24x32xf32>
    %75 = arith.divf %73, %74 : vector<24x32xf32>
    %76 = vector.extract_strided_slice %58 {offsets = [0, 64], sizes = [24, 32], strides = [1, 1]} : vector<24x128xf32> to vector<24x32xf32>
    %77 = vector.extract_strided_slice %59 {offsets = [0, 64], sizes = [24, 32], strides = [1, 1]} : vector<24x96xf32> to vector<24x32xf32>
    %78 = arith.addf %77, %18 : vector<24x32xf32>
    %79 = arith.mulf %67, %78 : vector<24x32xf32>
    %80 = arith.addf %76, %79 : vector<24x32xf32>
    %81 = math.tanh %80 : vector<24x32xf32>
    %cst_32 = arith.constant 1.000000e+00 : f32
    %82 = vector.broadcast %cst_32 : f32 to vector<24x32xf32>
    %83 = arith.subf %82, %75 : vector<24x32xf32>
    %84 = arith.mulf %83, %81 : vector<24x32xf32>
    %85 = arith.mulf %75, %54 : vector<24x32xf32>
    %86 = arith.addf %84, %85 : vector<24x32xf32>
    %c2_i32 = arith.constant 2 : i32
    %c128_i32_33 = arith.constant 128 : i32
    %87 = arith.muli %c2_i32, %c128_i32_33 : i32
    %88 = tpu.assume_multiple %87, 128 : i32
    %c0_34 = arith.constant 0 : index
    %89 = arith.index_cast %88 : i32 to index
    %90 = vector.load %arg14[%c0_34, %89] : memref<24x2048xf32, #tpu.memory_space<vmem>>, vector<24x128xf32>
    %cst_35 = arith.constant dense<0.000000e+00> : vector<24x96xf32>
    %91 = tpu.matmul %86, %14, %cst_35 {dimension_numbers = #tpu.dot_dimension_numbers<[1], [0], [0], [1], [0, 0, 1, 1], [], []>} : vector<24x32xf32>, vector<32x96xf32>, vector<24x96xf32> -> vector<24x96xf32>
    %92 = vector.extract_strided_slice %90 {offsets = [0, 0], sizes = [24, 32], strides = [1, 1]} : vector<24x128xf32> to vector<24x32xf32>
    %93 = vector.extract_strided_slice %91 {offsets = [0, 0], sizes = [24, 32], strides = [1, 1]} : vector<24x96xf32> to vector<24x32xf32>
    %94 = arith.addf %92, %93 : vector<24x32xf32>
    %95 = arith.negf %94 : vector<24x32xf32>
    %96 = math.exp %95 : vector<24x32xf32>
    %cst_36 = arith.constant 1.000000e+00 : f32
    %97 = vector.broadcast %cst_36 : f32 to vector<24x32xf32>
    %98 = arith.addf %97, %96 : vector<24x32xf32>
    %99 = arith.divf %97, %98 : vector<24x32xf32>
    %100 = vector.extract_strided_slice %90 {offsets = [0, 32], sizes = [24, 32], strides = [1, 1]} : vector<24x128xf32> to vector<24x32xf32>
    %101 = vector.extract_strided_slice %91 {offsets = [0, 32], sizes = [24, 32], strides = [1, 1]} : vector<24x96xf32> to vector<24x32xf32>
    %102 = arith.addf %100, %101 : vector<24x32xf32>
    %103 = arith.negf %102 : vector<24x32xf32>
    %104 = math.exp %103 : vector<24x32xf32>
    %cst_37 = arith.constant 1.000000e+00 : f32
    %105 = vector.broadcast %cst_37 : f32 to vector<24x32xf32>
    %106 = arith.addf %105, %104 : vector<24x32xf32>
    %107 = arith.divf %105, %106 : vector<24x32xf32>
    %108 = vector.extract_strided_slice %90 {offsets = [0, 64], sizes = [24, 32], strides = [1, 1]} : vector<24x128xf32> to vector<24x32xf32>
    %109 = vector.extract_strided_slice %91 {offsets = [0, 64], sizes = [24, 32], strides = [1, 1]} : vector<24x96xf32> to vector<24x32xf32>
    %110 = arith.addf %109, %18 : vector<24x32xf32>
    %111 = arith.mulf %99, %110 : vector<24x32xf32>
    %112 = arith.addf %108, %111 : vector<24x32xf32>
    %113 = math.tanh %112 : vector<24x32xf32>
    %cst_38 = arith.constant 1.000000e+00 : f32
    %114 = vector.broadcast %cst_38 : f32 to vector<24x32xf32>
    %115 = arith.subf %114, %107 : vector<24x32xf32>
    %116 = arith.mulf %115, %113 : vector<24x32xf32>
    %117 = arith.mulf %107, %86 : vector<24x32xf32>
    %118 = arith.addf %116, %117 : vector<24x32xf32>
    %c3_i32 = arith.constant 3 : i32
    %c128_i32_39 = arith.constant 128 : i32
    %119 = arith.muli %c3_i32, %c128_i32_39 : i32
    %120 = tpu.assume_multiple %119, 128 : i32
    %c0_40 = arith.constant 0 : index
    %121 = arith.index_cast %120 : i32 to index
    %122 = vector.load %arg14[%c0_40, %121] : memref<24x2048xf32, #tpu.memory_space<vmem>>, vector<24x128xf32>
    %cst_41 = arith.constant dense<0.000000e+00> : vector<24x96xf32>
    %123 = tpu.matmul %118, %14, %cst_41 {dimension_numbers = #tpu.dot_dimension_numbers<[1], [0], [0], [1], [0, 0, 1, 1], [], []>} : vector<24x32xf32>, vector<32x96xf32>, vector<24x96xf32> -> vector<24x96xf32>
    %124 = vector.extract_strided_slice %122 {offsets = [0, 0], sizes = [24, 32], strides = [1, 1]} : vector<24x128xf32> to vector<24x32xf32>
    %125 = vector.extract_strided_slice %123 {offsets = [0, 0], sizes = [24, 32], strides = [1, 1]} : vector<24x96xf32> to vector<24x32xf32>
    %126 = arith.addf %124, %125 : vector<24x32xf32>
    %127 = arith.negf %126 : vector<24x32xf32>
    %128 = math.exp %127 : vector<24x32xf32>
    %cst_42 = arith.constant 1.000000e+00 : f32
    %129 = vector.broadcast %cst_42 : f32 to vector<24x32xf32>
    %130 = arith.addf %129, %128 : vector<24x32xf32>
    %131 = arith.divf %129, %130 : vector<24x32xf32>
    %132 = vector.extract_strided_slice %122 {offsets = [0, 32], sizes = [24, 32], strides = [1, 1]} : vector<24x128xf32> to vector<24x32xf32>
    %133 = vector.extract_strided_slice %123 {offsets = [0, 32], sizes = [24, 32], strides = [1, 1]} : vector<24x96xf32> to vector<24x32xf32>
    %134 = arith.addf %132, %133 : vector<24x32xf32>
    %135 = arith.negf %134 : vector<24x32xf32>
    %136 = math.exp %135 : vector<24x32xf32>
    %cst_43 = arith.constant 1.000000e+00 : f32
    %137 = vector.broadcast %cst_43 : f32 to vector<24x32xf32>
    %138 = arith.addf %137, %136 : vector<24x32xf32>
    %139 = arith.divf %137, %138 : vector<24x32xf32>
    %140 = vector.extract_strided_slice %122 {offsets = [0, 64], sizes = [24, 32], strides = [1, 1]} : vector<24x128xf32> to vector<24x32xf32>
    %141 = vector.extract_strided_slice %123 {offsets = [0, 64], sizes = [24, 32], strides = [1, 1]} : vector<24x96xf32> to vector<24x32xf32>
    %142 = arith.addf %141, %18 : vector<24x32xf32>
    %143 = arith.mulf %131, %142 : vector<24x32xf32>
    %144 = arith.addf %140, %143 : vector<24x32xf32>
    %145 = math.tanh %144 : vector<24x32xf32>
    %cst_44 = arith.constant 1.000000e+00 : f32
    %146 = vector.broadcast %cst_44 : f32 to vector<24x32xf32>
    %147 = arith.subf %146, %139 : vector<24x32xf32>
    %148 = arith.mulf %147, %145 : vector<24x32xf32>
    %149 = arith.mulf %139, %118 : vector<24x32xf32>
    %150 = arith.addf %148, %149 : vector<24x32xf32>
    %c4_i32 = arith.constant 4 : i32
    %c128_i32_45 = arith.constant 128 : i32
    %151 = arith.muli %c4_i32, %c128_i32_45 : i32
    %152 = tpu.assume_multiple %151, 128 : i32
    %c0_46 = arith.constant 0 : index
    %153 = arith.index_cast %152 : i32 to index
    %154 = vector.load %arg14[%c0_46, %153] : memref<24x2048xf32, #tpu.memory_space<vmem>>, vector<24x128xf32>
    %cst_47 = arith.constant dense<0.000000e+00> : vector<24x96xf32>
    %155 = tpu.matmul %150, %14, %cst_47 {dimension_numbers = #tpu.dot_dimension_numbers<[1], [0], [0], [1], [0, 0, 1, 1], [], []>} : vector<24x32xf32>, vector<32x96xf32>, vector<24x96xf32> -> vector<24x96xf32>
    %156 = vector.extract_strided_slice %154 {offsets = [0, 0], sizes = [24, 32], strides = [1, 1]} : vector<24x128xf32> to vector<24x32xf32>
    %157 = vector.extract_strided_slice %155 {offsets = [0, 0], sizes = [24, 32], strides = [1, 1]} : vector<24x96xf32> to vector<24x32xf32>
    %158 = arith.addf %156, %157 : vector<24x32xf32>
    %159 = arith.negf %158 : vector<24x32xf32>
    %160 = math.exp %159 : vector<24x32xf32>
    %cst_48 = arith.constant 1.000000e+00 : f32
    %161 = vector.broadcast %cst_48 : f32 to vector<24x32xf32>
    %162 = arith.addf %161, %160 : vector<24x32xf32>
    %163 = arith.divf %161, %162 : vector<24x32xf32>
    %164 = vector.extract_strided_slice %154 {offsets = [0, 32], sizes = [24, 32], strides = [1, 1]} : vector<24x128xf32> to vector<24x32xf32>
    %165 = vector.extract_strided_slice %155 {offsets = [0, 32], sizes = [24, 32], strides = [1, 1]} : vector<24x96xf32> to vector<24x32xf32>
    %166 = arith.addf %164, %165 : vector<24x32xf32>
    %167 = arith.negf %166 : vector<24x32xf32>
    %168 = math.exp %167 : vector<24x32xf32>
    %cst_49 = arith.constant 1.000000e+00 : f32
    %169 = vector.broadcast %cst_49 : f32 to vector<24x32xf32>
    %170 = arith.addf %169, %168 : vector<24x32xf32>
    %171 = arith.divf %169, %170 : vector<24x32xf32>
    %172 = vector.extract_strided_slice %154 {offsets = [0, 64], sizes = [24, 32], strides = [1, 1]} : vector<24x128xf32> to vector<24x32xf32>
    %173 = vector.extract_strided_slice %155 {offsets = [0, 64], sizes = [24, 32], strides = [1, 1]} : vector<24x96xf32> to vector<24x32xf32>
    %174 = arith.addf %173, %18 : vector<24x32xf32>
    %175 = arith.mulf %163, %174 : vector<24x32xf32>
    %176 = arith.addf %172, %175 : vector<24x32xf32>
    %177 = math.tanh %176 : vector<24x32xf32>
    %cst_50 = arith.constant 1.000000e+00 : f32
    %178 = vector.broadcast %cst_50 : f32 to vector<24x32xf32>
    %179 = arith.subf %178, %171 : vector<24x32xf32>
    %180 = arith.mulf %179, %177 : vector<24x32xf32>
    %181 = arith.mulf %171, %150 : vector<24x32xf32>
    %182 = arith.addf %180, %181 : vector<24x32xf32>
    %c5_i32 = arith.constant 5 : i32
    %c128_i32_51 = arith.constant 128 : i32
    %183 = arith.muli %c5_i32, %c128_i32_51 : i32
    %184 = tpu.assume_multiple %183, 128 : i32
    %c0_52 = arith.constant 0 : index
    %185 = arith.index_cast %184 : i32 to index
    %186 = vector.load %arg14[%c0_52, %185] : memref<24x2048xf32, #tpu.memory_space<vmem>>, vector<24x128xf32>
    %cst_53 = arith.constant dense<0.000000e+00> : vector<24x96xf32>
    %187 = tpu.matmul %182, %14, %cst_53 {dimension_numbers = #tpu.dot_dimension_numbers<[1], [0], [0], [1], [0, 0, 1, 1], [], []>} : vector<24x32xf32>, vector<32x96xf32>, vector<24x96xf32> -> vector<24x96xf32>
    %188 = vector.extract_strided_slice %186 {offsets = [0, 0], sizes = [24, 32], strides = [1, 1]} : vector<24x128xf32> to vector<24x32xf32>
    %189 = vector.extract_strided_slice %187 {offsets = [0, 0], sizes = [24, 32], strides = [1, 1]} : vector<24x96xf32> to vector<24x32xf32>
    %190 = arith.addf %188, %189 : vector<24x32xf32>
    %191 = arith.negf %190 : vector<24x32xf32>
    %192 = math.exp %191 : vector<24x32xf32>
    %cst_54 = arith.constant 1.000000e+00 : f32
    %193 = vector.broadcast %cst_54 : f32 to vector<24x32xf32>
    %194 = arith.addf %193, %192 : vector<24x32xf32>
    %195 = arith.divf %193, %194 : vector<24x32xf32>
    %196 = vector.extract_strided_slice %186 {offsets = [0, 32], sizes = [24, 32], strides = [1, 1]} : vector<24x128xf32> to vector<24x32xf32>
    %197 = vector.extract_strided_slice %187 {offsets = [0, 32], sizes = [24, 32], strides = [1, 1]} : vector<24x96xf32> to vector<24x32xf32>
    %198 = arith.addf %196, %197 : vector<24x32xf32>
    %199 = arith.negf %198 : vector<24x32xf32>
    %200 = math.exp %199 : vector<24x32xf32>
    %cst_55 = arith.constant 1.000000e+00 : f32
    %201 = vector.broadcast %cst_55 : f32 to vector<24x32xf32>
    %202 = arith.addf %201, %200 : vector<24x32xf32>
    %203 = arith.divf %201, %202 : vector<24x32xf32>
    %204 = vector.extract_strided_slice %186 {offsets = [0, 64], sizes = [24, 32], strides = [1, 1]} : vector<24x128xf32> to vector<24x32xf32>
    %205 = vector.extract_strided_slice %187 {offsets = [0, 64], sizes = [24, 32], strides = [1, 1]} : vector<24x96xf32> to vector<24x32xf32>
    %206 = arith.addf %205, %18 : vector<24x32xf32>
    %207 = arith.mulf %195, %206 : vector<24x32xf32>
    %208 = arith.addf %204, %207 : vector<24x32xf32>
    %209 = math.tanh %208 : vector<24x32xf32>
    %cst_56 = arith.constant 1.000000e+00 : f32
    %210 = vector.broadcast %cst_56 : f32 to vector<24x32xf32>
    %211 = arith.subf %210, %203 : vector<24x32xf32>
    %212 = arith.mulf %211, %209 : vector<24x32xf32>
    %213 = arith.mulf %203, %182 : vector<24x32xf32>
    %214 = arith.addf %212, %213 : vector<24x32xf32>
    %c6_i32 = arith.constant 6 : i32
    %c128_i32_57 = arith.constant 128 : i32
    %215 = arith.muli %c6_i32, %c128_i32_57 : i32
    %216 = tpu.assume_multiple %215, 128 : i32
    %c0_58 = arith.constant 0 : index
    %217 = arith.index_cast %216 : i32 to index
    %218 = vector.load %arg14[%c0_58, %217] : memref<24x2048xf32, #tpu.memory_space<vmem>>, vector<24x128xf32>
    %cst_59 = arith.constant dense<0.000000e+00> : vector<24x96xf32>
    %219 = tpu.matmul %214, %14, %cst_59 {dimension_numbers = #tpu.dot_dimension_numbers<[1], [0], [0], [1], [0, 0, 1, 1], [], []>} : vector<24x32xf32>, vector<32x96xf32>, vector<24x96xf32> -> vector<24x96xf32>
    %220 = vector.extract_strided_slice %218 {offsets = [0, 0], sizes = [24, 32], strides = [1, 1]} : vector<24x128xf32> to vector<24x32xf32>
    %221 = vector.extract_strided_slice %219 {offsets = [0, 0], sizes = [24, 32], strides = [1, 1]} : vector<24x96xf32> to vector<24x32xf32>
    %222 = arith.addf %220, %221 : vector<24x32xf32>
    %223 = arith.negf %222 : vector<24x32xf32>
    %224 = math.exp %223 : vector<24x32xf32>
    %cst_60 = arith.constant 1.000000e+00 : f32
    %225 = vector.broadcast %cst_60 : f32 to vector<24x32xf32>
    %226 = arith.addf %225, %224 : vector<24x32xf32>
    %227 = arith.divf %225, %226 : vector<24x32xf32>
    %228 = vector.extract_strided_slice %218 {offsets = [0, 32], sizes = [24, 32], strides = [1, 1]} : vector<24x128xf32> to vector<24x32xf32>
    %229 = vector.extract_strided_slice %219 {offsets = [0, 32], sizes = [24, 32], strides = [1, 1]} : vector<24x96xf32> to vector<24x32xf32>
    %230 = arith.addf %228, %229 : vector<24x32xf32>
    %231 = arith.negf %230 : vector<24x32xf32>
    %232 = math.exp %231 : vector<24x32xf32>
    %cst_61 = arith.constant 1.000000e+00 : f32
    %233 = vector.broadcast %cst_61 : f32 to vector<24x32xf32>
    %234 = arith.addf %233, %232 : vector<24x32xf32>
    %235 = arith.divf %233, %234 : vector<24x32xf32>
    %236 = vector.extract_strided_slice %218 {offsets = [0, 64], sizes = [24, 32], strides = [1, 1]} : vector<24x128xf32> to vector<24x32xf32>
    %237 = vector.extract_strided_slice %219 {offsets = [0, 64], sizes = [24, 32], strides = [1, 1]} : vector<24x96xf32> to vector<24x32xf32>
    %238 = arith.addf %237, %18 : vector<24x32xf32>
    %239 = arith.mulf %227, %238 : vector<24x32xf32>
    %240 = arith.addf %236, %239 : vector<24x32xf32>
    %241 = math.tanh %240 : vector<24x32xf32>
    %cst_62 = arith.constant 1.000000e+00 : f32
    %242 = vector.broadcast %cst_62 : f32 to vector<24x32xf32>
    %243 = arith.subf %242, %235 : vector<24x32xf32>
    %244 = arith.mulf %243, %241 : vector<24x32xf32>
    %245 = arith.mulf %235, %214 : vector<24x32xf32>
    %246 = arith.addf %244, %245 : vector<24x32xf32>
    %c7_i32 = arith.constant 7 : i32
    %c128_i32_63 = arith.constant 128 : i32
    %247 = arith.muli %c7_i32, %c128_i32_63 : i32
    %248 = tpu.assume_multiple %247, 128 : i32
    %c0_64 = arith.constant 0 : index
    %249 = arith.index_cast %248 : i32 to index
    %250 = vector.load %arg14[%c0_64, %249] : memref<24x2048xf32, #tpu.memory_space<vmem>>, vector<24x128xf32>
    %cst_65 = arith.constant dense<0.000000e+00> : vector<24x96xf32>
    %251 = tpu.matmul %246, %14, %cst_65 {dimension_numbers = #tpu.dot_dimension_numbers<[1], [0], [0], [1], [0, 0, 1, 1], [], []>} : vector<24x32xf32>, vector<32x96xf32>, vector<24x96xf32> -> vector<24x96xf32>
    %252 = vector.extract_strided_slice %250 {offsets = [0, 0], sizes = [24, 32], strides = [1, 1]} : vector<24x128xf32> to vector<24x32xf32>
    %253 = vector.extract_strided_slice %251 {offsets = [0, 0], sizes = [24, 32], strides = [1, 1]} : vector<24x96xf32> to vector<24x32xf32>
    %254 = arith.addf %252, %253 : vector<24x32xf32>
    %255 = arith.negf %254 : vector<24x32xf32>
    %256 = math.exp %255 : vector<24x32xf32>
    %cst_66 = arith.constant 1.000000e+00 : f32
    %257 = vector.broadcast %cst_66 : f32 to vector<24x32xf32>
    %258 = arith.addf %257, %256 : vector<24x32xf32>
    %259 = arith.divf %257, %258 : vector<24x32xf32>
    %260 = vector.extract_strided_slice %250 {offsets = [0, 32], sizes = [24, 32], strides = [1, 1]} : vector<24x128xf32> to vector<24x32xf32>
    %261 = vector.extract_strided_slice %251 {offsets = [0, 32], sizes = [24, 32], strides = [1, 1]} : vector<24x96xf32> to vector<24x32xf32>
    %262 = arith.addf %260, %261 : vector<24x32xf32>
    %263 = arith.negf %262 : vector<24x32xf32>
    %264 = math.exp %263 : vector<24x32xf32>
    %cst_67 = arith.constant 1.000000e+00 : f32
    %265 = vector.broadcast %cst_67 : f32 to vector<24x32xf32>
    %266 = arith.addf %265, %264 : vector<24x32xf32>
    %267 = arith.divf %265, %266 : vector<24x32xf32>
    %268 = vector.extract_strided_slice %250 {offsets = [0, 64], sizes = [24, 32], strides = [1, 1]} : vector<24x128xf32> to vector<24x32xf32>
    %269 = vector.extract_strided_slice %251 {offsets = [0, 64], sizes = [24, 32], strides = [1, 1]} : vector<24x96xf32> to vector<24x32xf32>
    %270 = arith.addf %269, %18 : vector<24x32xf32>
    %271 = arith.mulf %259, %270 : vector<24x32xf32>
    %272 = arith.addf %268, %271 : vector<24x32xf32>
    %273 = math.tanh %272 : vector<24x32xf32>
    %cst_68 = arith.constant 1.000000e+00 : f32
    %274 = vector.broadcast %cst_68 : f32 to vector<24x32xf32>
    %275 = arith.subf %274, %267 : vector<24x32xf32>
    %276 = arith.mulf %275, %273 : vector<24x32xf32>
    %277 = arith.mulf %267, %246 : vector<24x32xf32>
    %278 = arith.addf %276, %277 : vector<24x32xf32>
    %c8_i32 = arith.constant 8 : i32
    %c128_i32_69 = arith.constant 128 : i32
    %279 = arith.muli %c8_i32, %c128_i32_69 : i32
    %280 = tpu.assume_multiple %279, 128 : i32
    %c0_70 = arith.constant 0 : index
    %281 = arith.index_cast %280 : i32 to index
    %282 = vector.load %arg14[%c0_70, %281] : memref<24x2048xf32, #tpu.memory_space<vmem>>, vector<24x128xf32>
    %cst_71 = arith.constant dense<0.000000e+00> : vector<24x96xf32>
    %283 = tpu.matmul %278, %14, %cst_71 {dimension_numbers = #tpu.dot_dimension_numbers<[1], [0], [0], [1], [0, 0, 1, 1], [], []>} : vector<24x32xf32>, vector<32x96xf32>, vector<24x96xf32> -> vector<24x96xf32>
    %284 = vector.extract_strided_slice %282 {offsets = [0, 0], sizes = [24, 32], strides = [1, 1]} : vector<24x128xf32> to vector<24x32xf32>
    %285 = vector.extract_strided_slice %283 {offsets = [0, 0], sizes = [24, 32], strides = [1, 1]} : vector<24x96xf32> to vector<24x32xf32>
    %286 = arith.addf %284, %285 : vector<24x32xf32>
    %287 = arith.negf %286 : vector<24x32xf32>
    %288 = math.exp %287 : vector<24x32xf32>
    %cst_72 = arith.constant 1.000000e+00 : f32
    %289 = vector.broadcast %cst_72 : f32 to vector<24x32xf32>
    %290 = arith.addf %289, %288 : vector<24x32xf32>
    %291 = arith.divf %289, %290 : vector<24x32xf32>
    %292 = vector.extract_strided_slice %282 {offsets = [0, 32], sizes = [24, 32], strides = [1, 1]} : vector<24x128xf32> to vector<24x32xf32>
    %293 = vector.extract_strided_slice %283 {offsets = [0, 32], sizes = [24, 32], strides = [1, 1]} : vector<24x96xf32> to vector<24x32xf32>
    %294 = arith.addf %292, %293 : vector<24x32xf32>
    %295 = arith.negf %294 : vector<24x32xf32>
    %296 = math.exp %295 : vector<24x32xf32>
    %cst_73 = arith.constant 1.000000e+00 : f32
    %297 = vector.broadcast %cst_73 : f32 to vector<24x32xf32>
    %298 = arith.addf %297, %296 : vector<24x32xf32>
    %299 = arith.divf %297, %298 : vector<24x32xf32>
    %300 = vector.extract_strided_slice %282 {offsets = [0, 64], sizes = [24, 32], strides = [1, 1]} : vector<24x128xf32> to vector<24x32xf32>
    %301 = vector.extract_strided_slice %283 {offsets = [0, 64], sizes = [24, 32], strides = [1, 1]} : vector<24x96xf32> to vector<24x32xf32>
    %302 = arith.addf %301, %18 : vector<24x32xf32>
    %303 = arith.mulf %291, %302 : vector<24x32xf32>
    %304 = arith.addf %300, %303 : vector<24x32xf32>
    %305 = math.tanh %304 : vector<24x32xf32>
    %cst_74 = arith.constant 1.000000e+00 : f32
    %306 = vector.broadcast %cst_74 : f32 to vector<24x32xf32>
    %307 = arith.subf %306, %299 : vector<24x32xf32>
    %308 = arith.mulf %307, %305 : vector<24x32xf32>
    %309 = arith.mulf %299, %278 : vector<24x32xf32>
    %310 = arith.addf %308, %309 : vector<24x32xf32>
    %c9_i32 = arith.constant 9 : i32
    %c128_i32_75 = arith.constant 128 : i32
    %311 = arith.muli %c9_i32, %c128_i32_75 : i32
    %312 = tpu.assume_multiple %311, 128 : i32
    %c0_76 = arith.constant 0 : index
    %313 = arith.index_cast %312 : i32 to index
    %314 = vector.load %arg14[%c0_76, %313] : memref<24x2048xf32, #tpu.memory_space<vmem>>, vector<24x128xf32>
    %cst_77 = arith.constant dense<0.000000e+00> : vector<24x96xf32>
    %315 = tpu.matmul %310, %14, %cst_77 {dimension_numbers = #tpu.dot_dimension_numbers<[1], [0], [0], [1], [0, 0, 1, 1], [], []>} : vector<24x32xf32>, vector<32x96xf32>, vector<24x96xf32> -> vector<24x96xf32>
    %316 = vector.extract_strided_slice %314 {offsets = [0, 0], sizes = [24, 32], strides = [1, 1]} : vector<24x128xf32> to vector<24x32xf32>
    %317 = vector.extract_strided_slice %315 {offsets = [0, 0], sizes = [24, 32], strides = [1, 1]} : vector<24x96xf32> to vector<24x32xf32>
    %318 = arith.addf %316, %317 : vector<24x32xf32>
    %319 = arith.negf %318 : vector<24x32xf32>
    %320 = math.exp %319 : vector<24x32xf32>
    %cst_78 = arith.constant 1.000000e+00 : f32
    %321 = vector.broadcast %cst_78 : f32 to vector<24x32xf32>
    %322 = arith.addf %321, %320 : vector<24x32xf32>
    %323 = arith.divf %321, %322 : vector<24x32xf32>
    %324 = vector.extract_strided_slice %314 {offsets = [0, 32], sizes = [24, 32], strides = [1, 1]} : vector<24x128xf32> to vector<24x32xf32>
    %325 = vector.extract_strided_slice %315 {offsets = [0, 32], sizes = [24, 32], strides = [1, 1]} : vector<24x96xf32> to vector<24x32xf32>
    %326 = arith.addf %324, %325 : vector<24x32xf32>
    %327 = arith.negf %326 : vector<24x32xf32>
    %328 = math.exp %327 : vector<24x32xf32>
    %cst_79 = arith.constant 1.000000e+00 : f32
    %329 = vector.broadcast %cst_79 : f32 to vector<24x32xf32>
    %330 = arith.addf %329, %328 : vector<24x32xf32>
    %331 = arith.divf %329, %330 : vector<24x32xf32>
    %332 = vector.extract_strided_slice %314 {offsets = [0, 64], sizes = [24, 32], strides = [1, 1]} : vector<24x128xf32> to vector<24x32xf32>
    %333 = vector.extract_strided_slice %315 {offsets = [0, 64], sizes = [24, 32], strides = [1, 1]} : vector<24x96xf32> to vector<24x32xf32>
    %334 = arith.addf %333, %18 : vector<24x32xf32>
    %335 = arith.mulf %323, %334 : vector<24x32xf32>
    %336 = arith.addf %332, %335 : vector<24x32xf32>
    %337 = math.tanh %336 : vector<24x32xf32>
    %cst_80 = arith.constant 1.000000e+00 : f32
    %338 = vector.broadcast %cst_80 : f32 to vector<24x32xf32>
    %339 = arith.subf %338, %331 : vector<24x32xf32>
    %340 = arith.mulf %339, %337 : vector<24x32xf32>
    %341 = arith.mulf %331, %310 : vector<24x32xf32>
    %342 = arith.addf %340, %341 : vector<24x32xf32>
    %c10_i32 = arith.constant 10 : i32
    %c128_i32_81 = arith.constant 128 : i32
    %343 = arith.muli %c10_i32, %c128_i32_81 : i32
    %344 = tpu.assume_multiple %343, 128 : i32
    %c0_82 = arith.constant 0 : index
    %345 = arith.index_cast %344 : i32 to index
    %346 = vector.load %arg14[%c0_82, %345] : memref<24x2048xf32, #tpu.memory_space<vmem>>, vector<24x128xf32>
    %cst_83 = arith.constant dense<0.000000e+00> : vector<24x96xf32>
    %347 = tpu.matmul %342, %14, %cst_83 {dimension_numbers = #tpu.dot_dimension_numbers<[1], [0], [0], [1], [0, 0, 1, 1], [], []>} : vector<24x32xf32>, vector<32x96xf32>, vector<24x96xf32> -> vector<24x96xf32>
    %348 = vector.extract_strided_slice %346 {offsets = [0, 0], sizes = [24, 32], strides = [1, 1]} : vector<24x128xf32> to vector<24x32xf32>
    %349 = vector.extract_strided_slice %347 {offsets = [0, 0], sizes = [24, 32], strides = [1, 1]} : vector<24x96xf32> to vector<24x32xf32>
    %350 = arith.addf %348, %349 : vector<24x32xf32>
    %351 = arith.negf %350 : vector<24x32xf32>
    %352 = math.exp %351 : vector<24x32xf32>
    %cst_84 = arith.constant 1.000000e+00 : f32
    %353 = vector.broadcast %cst_84 : f32 to vector<24x32xf32>
    %354 = arith.addf %353, %352 : vector<24x32xf32>
    %355 = arith.divf %353, %354 : vector<24x32xf32>
    %356 = vector.extract_strided_slice %346 {offsets = [0, 32], sizes = [24, 32], strides = [1, 1]} : vector<24x128xf32> to vector<24x32xf32>
    %357 = vector.extract_strided_slice %347 {offsets = [0, 32], sizes = [24, 32], strides = [1, 1]} : vector<24x96xf32> to vector<24x32xf32>
    %358 = arith.addf %356, %357 : vector<24x32xf32>
    %359 = arith.negf %358 : vector<24x32xf32>
    %360 = math.exp %359 : vector<24x32xf32>
    %cst_85 = arith.constant 1.000000e+00 : f32
    %361 = vector.broadcast %cst_85 : f32 to vector<24x32xf32>
    %362 = arith.addf %361, %360 : vector<24x32xf32>
    %363 = arith.divf %361, %362 : vector<24x32xf32>
    %364 = vector.extract_strided_slice %346 {offsets = [0, 64], sizes = [24, 32], strides = [1, 1]} : vector<24x128xf32> to vector<24x32xf32>
    %365 = vector.extract_strided_slice %347 {offsets = [0, 64], sizes = [24, 32], strides = [1, 1]} : vector<24x96xf32> to vector<24x32xf32>
    %366 = arith.addf %365, %18 : vector<24x32xf32>
    %367 = arith.mulf %355, %366 : vector<24x32xf32>
    %368 = arith.addf %364, %367 : vector<24x32xf32>
    %369 = math.tanh %368 : vector<24x32xf32>
    %cst_86 = arith.constant 1.000000e+00 : f32
    %370 = vector.broadcast %cst_86 : f32 to vector<24x32xf32>
    %371 = arith.subf %370, %363 : vector<24x32xf32>
    %372 = arith.mulf %371, %369 : vector<24x32xf32>
    %373 = arith.mulf %363, %342 : vector<24x32xf32>
    %374 = arith.addf %372, %373 : vector<24x32xf32>
    %c11_i32 = arith.constant 11 : i32
    %c128_i32_87 = arith.constant 128 : i32
    %375 = arith.muli %c11_i32, %c128_i32_87 : i32
    %376 = tpu.assume_multiple %375, 128 : i32
    %c0_88 = arith.constant 0 : index
    %377 = arith.index_cast %376 : i32 to index
    %378 = vector.load %arg14[%c0_88, %377] : memref<24x2048xf32, #tpu.memory_space<vmem>>, vector<24x128xf32>
    %cst_89 = arith.constant dense<0.000000e+00> : vector<24x96xf32>
    %379 = tpu.matmul %374, %14, %cst_89 {dimension_numbers = #tpu.dot_dimension_numbers<[1], [0], [0], [1], [0, 0, 1, 1], [], []>} : vector<24x32xf32>, vector<32x96xf32>, vector<24x96xf32> -> vector<24x96xf32>
    %380 = vector.extract_strided_slice %378 {offsets = [0, 0], sizes = [24, 32], strides = [1, 1]} : vector<24x128xf32> to vector<24x32xf32>
    %381 = vector.extract_strided_slice %379 {offsets = [0, 0], sizes = [24, 32], strides = [1, 1]} : vector<24x96xf32> to vector<24x32xf32>
    %382 = arith.addf %380, %381 : vector<24x32xf32>
    %383 = arith.negf %382 : vector<24x32xf32>
    %384 = math.exp %383 : vector<24x32xf32>
    %cst_90 = arith.constant 1.000000e+00 : f32
    %385 = vector.broadcast %cst_90 : f32 to vector<24x32xf32>
    %386 = arith.addf %385, %384 : vector<24x32xf32>
    %387 = arith.divf %385, %386 : vector<24x32xf32>
    %388 = vector.extract_strided_slice %378 {offsets = [0, 32], sizes = [24, 32], strides = [1, 1]} : vector<24x128xf32> to vector<24x32xf32>
    %389 = vector.extract_strided_slice %379 {offsets = [0, 32], sizes = [24, 32], strides = [1, 1]} : vector<24x96xf32> to vector<24x32xf32>
    %390 = arith.addf %388, %389 : vector<24x32xf32>
    %391 = arith.negf %390 : vector<24x32xf32>
    %392 = math.exp %391 : vector<24x32xf32>
    %cst_91 = arith.constant 1.000000e+00 : f32
    %393 = vector.broadcast %cst_91 : f32 to vector<24x32xf32>
    %394 = arith.addf %393, %392 : vector<24x32xf32>
    %395 = arith.divf %393, %394 : vector<24x32xf32>
    %396 = vector.extract_strided_slice %378 {offsets = [0, 64], sizes = [24, 32], strides = [1, 1]} : vector<24x128xf32> to vector<24x32xf32>
    %397 = vector.extract_strided_slice %379 {offsets = [0, 64], sizes = [24, 32], strides = [1, 1]} : vector<24x96xf32> to vector<24x32xf32>
    %398 = arith.addf %397, %18 : vector<24x32xf32>
    %399 = arith.mulf %387, %398 : vector<24x32xf32>
    %400 = arith.addf %396, %399 : vector<24x32xf32>
    %401 = math.tanh %400 : vector<24x32xf32>
    %cst_92 = arith.constant 1.000000e+00 : f32
    %402 = vector.broadcast %cst_92 : f32 to vector<24x32xf32>
    %403 = arith.subf %402, %395 : vector<24x32xf32>
    %404 = arith.mulf %403, %401 : vector<24x32xf32>
    %405 = arith.mulf %395, %374 : vector<24x32xf32>
    %406 = arith.addf %404, %405 : vector<24x32xf32>
    %c12_i32 = arith.constant 12 : i32
    %c128_i32_93 = arith.constant 128 : i32
    %407 = arith.muli %c12_i32, %c128_i32_93 : i32
    %408 = tpu.assume_multiple %407, 128 : i32
    %c0_94 = arith.constant 0 : index
    %409 = arith.index_cast %408 : i32 to index
    %410 = vector.load %arg14[%c0_94, %409] : memref<24x2048xf32, #tpu.memory_space<vmem>>, vector<24x128xf32>
    %cst_95 = arith.constant dense<0.000000e+00> : vector<24x96xf32>
    %411 = tpu.matmul %406, %14, %cst_95 {dimension_numbers = #tpu.dot_dimension_numbers<[1], [0], [0], [1], [0, 0, 1, 1], [], []>} : vector<24x32xf32>, vector<32x96xf32>, vector<24x96xf32> -> vector<24x96xf32>
    %412 = vector.extract_strided_slice %410 {offsets = [0, 0], sizes = [24, 32], strides = [1, 1]} : vector<24x128xf32> to vector<24x32xf32>
    %413 = vector.extract_strided_slice %411 {offsets = [0, 0], sizes = [24, 32], strides = [1, 1]} : vector<24x96xf32> to vector<24x32xf32>
    %414 = arith.addf %412, %413 : vector<24x32xf32>
    %415 = arith.negf %414 : vector<24x32xf32>
    %416 = math.exp %415 : vector<24x32xf32>
    %cst_96 = arith.constant 1.000000e+00 : f32
    %417 = vector.broadcast %cst_96 : f32 to vector<24x32xf32>
    %418 = arith.addf %417, %416 : vector<24x32xf32>
    %419 = arith.divf %417, %418 : vector<24x32xf32>
    %420 = vector.extract_strided_slice %410 {offsets = [0, 32], sizes = [24, 32], strides = [1, 1]} : vector<24x128xf32> to vector<24x32xf32>
    %421 = vector.extract_strided_slice %411 {offsets = [0, 32], sizes = [24, 32], strides = [1, 1]} : vector<24x96xf32> to vector<24x32xf32>
    %422 = arith.addf %420, %421 : vector<24x32xf32>
    %423 = arith.negf %422 : vector<24x32xf32>
    %424 = math.exp %423 : vector<24x32xf32>
    %cst_97 = arith.constant 1.000000e+00 : f32
    %425 = vector.broadcast %cst_97 : f32 to vector<24x32xf32>
    %426 = arith.addf %425, %424 : vector<24x32xf32>
    %427 = arith.divf %425, %426 : vector<24x32xf32>
    %428 = vector.extract_strided_slice %410 {offsets = [0, 64], sizes = [24, 32], strides = [1, 1]} : vector<24x128xf32> to vector<24x32xf32>
    %429 = vector.extract_strided_slice %411 {offsets = [0, 64], sizes = [24, 32], strides = [1, 1]} : vector<24x96xf32> to vector<24x32xf32>
    %430 = arith.addf %429, %18 : vector<24x32xf32>
    %431 = arith.mulf %419, %430 : vector<24x32xf32>
    %432 = arith.addf %428, %431 : vector<24x32xf32>
    %433 = math.tanh %432 : vector<24x32xf32>
    %cst_98 = arith.constant 1.000000e+00 : f32
    %434 = vector.broadcast %cst_98 : f32 to vector<24x32xf32>
    %435 = arith.subf %434, %427 : vector<24x32xf32>
    %436 = arith.mulf %435, %433 : vector<24x32xf32>
    %437 = arith.mulf %427, %406 : vector<24x32xf32>
    %438 = arith.addf %436, %437 : vector<24x32xf32>
    %c13_i32 = arith.constant 13 : i32
    %cst_99 = arith.constant 0.000000e+00 : f32
    %439 = vector.broadcast %cst_99 : f32 to vector<24x32xf32>
    %c0_i32_100 = arith.constant 0 : i32
    %c128_i32_101 = arith.constant 128 : i32
    %440 = arith.muli %c0_i32_100, %c128_i32_101 : i32
    %c1664_i32 = arith.constant 1664 : i32
    %441 = arith.addi %c1664_i32, %440 : i32
    %442 = tpu.assume_multiple %441, 128 : i32
    %c0_102 = arith.constant 0 : index
    %443 = arith.index_cast %442 : i32 to index
    %444 = vector.load %arg14[%c0_102, %443] : memref<24x2048xf32, #tpu.memory_space<vmem>>, vector<24x128xf32>
    %cst_103 = arith.constant dense<0.000000e+00> : vector<24x96xf32>
    %445 = tpu.matmul %439, %15, %cst_103 {dimension_numbers = #tpu.dot_dimension_numbers<[1], [0], [0], [1], [0, 0, 1, 1], [], []>} : vector<24x32xf32>, vector<32x96xf32>, vector<24x96xf32> -> vector<24x96xf32>
    %446 = vector.extract_strided_slice %444 {offsets = [0, 0], sizes = [24, 32], strides = [1, 1]} : vector<24x128xf32> to vector<24x32xf32>
    %447 = vector.extract_strided_slice %445 {offsets = [0, 0], sizes = [24, 32], strides = [1, 1]} : vector<24x96xf32> to vector<24x32xf32>
    %448 = arith.addf %446, %447 : vector<24x32xf32>
    %449 = arith.negf %448 : vector<24x32xf32>
    %450 = math.exp %449 : vector<24x32xf32>
    %cst_104 = arith.constant 1.000000e+00 : f32
    %451 = vector.broadcast %cst_104 : f32 to vector<24x32xf32>
    %452 = arith.addf %451, %450 : vector<24x32xf32>
    %453 = arith.divf %451, %452 : vector<24x32xf32>
    %454 = vector.extract_strided_slice %444 {offsets = [0, 32], sizes = [24, 32], strides = [1, 1]} : vector<24x128xf32> to vector<24x32xf32>
    %455 = vector.extract_strided_slice %445 {offsets = [0, 32], sizes = [24, 32], strides = [1, 1]} : vector<24x96xf32> to vector<24x32xf32>
    %456 = arith.addf %454, %455 : vector<24x32xf32>
    %457 = arith.negf %456 : vector<24x32xf32>
    %458 = math.exp %457 : vector<24x32xf32>
    %cst_105 = arith.constant 1.000000e+00 : f32
    %459 = vector.broadcast %cst_105 : f32 to vector<24x32xf32>
    %460 = arith.addf %459, %458 : vector<24x32xf32>
    %461 = arith.divf %459, %460 : vector<24x32xf32>
    %462 = vector.extract_strided_slice %444 {offsets = [0, 64], sizes = [24, 32], strides = [1, 1]} : vector<24x128xf32> to vector<24x32xf32>
    %463 = vector.extract_strided_slice %445 {offsets = [0, 64], sizes = [24, 32], strides = [1, 1]} : vector<24x96xf32> to vector<24x32xf32>
    %464 = arith.addf %463, %21 : vector<24x32xf32>
    %465 = arith.mulf %453, %464 : vector<24x32xf32>
    %466 = arith.addf %462, %465 : vector<24x32xf32>
    %467 = math.tanh %466 : vector<24x32xf32>
    %cst_106 = arith.constant 1.000000e+00 : f32
    %468 = vector.broadcast %cst_106 : f32 to vector<24x32xf32>
    %469 = arith.subf %468, %461 : vector<24x32xf32>
    %470 = arith.mulf %469, %467 : vector<24x32xf32>
    %471 = arith.mulf %461, %439 : vector<24x32xf32>
    %472 = arith.addf %470, %471 : vector<24x32xf32>
    %c1_i32_107 = arith.constant 1 : i32
    %c128_i32_108 = arith.constant 128 : i32
    %473 = arith.muli %c1_i32_107, %c128_i32_108 : i32
    %c1664_i32_109 = arith.constant 1664 : i32
    %474 = arith.addi %c1664_i32_109, %473 : i32
    %475 = tpu.assume_multiple %474, 128 : i32
    %c0_110 = arith.constant 0 : index
    %476 = arith.index_cast %475 : i32 to index
    %477 = vector.load %arg14[%c0_110, %476] : memref<24x2048xf32, #tpu.memory_space<vmem>>, vector<24x128xf32>
    %cst_111 = arith.constant dense<0.000000e+00> : vector<24x96xf32>
    %478 = tpu.matmul %472, %15, %cst_111 {dimension_numbers = #tpu.dot_dimension_numbers<[1], [0], [0], [1], [0, 0, 1, 1], [], []>} : vector<24x32xf32>, vector<32x96xf32>, vector<24x96xf32> -> vector<24x96xf32>
    %479 = vector.extract_strided_slice %477 {offsets = [0, 0], sizes = [24, 32], strides = [1, 1]} : vector<24x128xf32> to vector<24x32xf32>
    %480 = vector.extract_strided_slice %478 {offsets = [0, 0], sizes = [24, 32], strides = [1, 1]} : vector<24x96xf32> to vector<24x32xf32>
    %481 = arith.addf %479, %480 : vector<24x32xf32>
    %482 = arith.negf %481 : vector<24x32xf32>
    %483 = math.exp %482 : vector<24x32xf32>
    %cst_112 = arith.constant 1.000000e+00 : f32
    %484 = vector.broadcast %cst_112 : f32 to vector<24x32xf32>
    %485 = arith.addf %484, %483 : vector<24x32xf32>
    %486 = arith.divf %484, %485 : vector<24x32xf32>
    %487 = vector.extract_strided_slice %477 {offsets = [0, 32], sizes = [24, 32], strides = [1, 1]} : vector<24x128xf32> to vector<24x32xf32>
    %488 = vector.extract_strided_slice %478 {offsets = [0, 32], sizes = [24, 32], strides = [1, 1]} : vector<24x96xf32> to vector<24x32xf32>
    %489 = arith.addf %487, %488 : vector<24x32xf32>
    %490 = arith.negf %489 : vector<24x32xf32>
    %491 = math.exp %490 : vector<24x32xf32>
    %cst_113 = arith.constant 1.000000e+00 : f32
    %492 = vector.broadcast %cst_113 : f32 to vector<24x32xf32>
    %493 = arith.addf %492, %491 : vector<24x32xf32>
    %494 = arith.divf %492, %493 : vector<24x32xf32>
    %495 = vector.extract_strided_slice %477 {offsets = [0, 64], sizes = [24, 32], strides = [1, 1]} : vector<24x128xf32> to vector<24x32xf32>
    %496 = vector.extract_strided_slice %478 {offsets = [0, 64], sizes = [24, 32], strides = [1, 1]} : vector<24x96xf32> to vector<24x32xf32>
    %497 = arith.addf %496, %21 : vector<24x32xf32>
    %498 = arith.mulf %486, %497 : vector<24x32xf32>
    %499 = arith.addf %495, %498 : vector<24x32xf32>
    %500 = math.tanh %499 : vector<24x32xf32>
    %cst_114 = arith.constant 1.000000e+00 : f32
    %501 = vector.broadcast %cst_114 : f32 to vector<24x32xf32>
    %502 = arith.subf %501, %494 : vector<24x32xf32>
    %503 = arith.mulf %502, %500 : vector<24x32xf32>
    %504 = arith.mulf %494, %472 : vector<24x32xf32>
    %505 = arith.addf %503, %504 : vector<24x32xf32>
    %c2_i32_115 = arith.constant 2 : i32
    %c128_i32_116 = arith.constant 128 : i32
    %506 = arith.muli %c2_i32_115, %c128_i32_116 : i32
    %c1664_i32_117 = arith.constant 1664 : i32
    %507 = arith.addi %c1664_i32_117, %506 : i32
    %508 = tpu.assume_multiple %507, 128 : i32
    %c0_118 = arith.constant 0 : index
    %509 = arith.index_cast %508 : i32 to index
    %510 = vector.load %arg14[%c0_118, %509] : memref<24x2048xf32, #tpu.memory_space<vmem>>, vector<24x128xf32>
    %cst_119 = arith.constant dense<0.000000e+00> : vector<24x96xf32>
    %511 = tpu.matmul %505, %15, %cst_119 {dimension_numbers = #tpu.dot_dimension_numbers<[1], [0], [0], [1], [0, 0, 1, 1], [], []>} : vector<24x32xf32>, vector<32x96xf32>, vector<24x96xf32> -> vector<24x96xf32>
    %512 = vector.extract_strided_slice %510 {offsets = [0, 0], sizes = [24, 32], strides = [1, 1]} : vector<24x128xf32> to vector<24x32xf32>
    %513 = vector.extract_strided_slice %511 {offsets = [0, 0], sizes = [24, 32], strides = [1, 1]} : vector<24x96xf32> to vector<24x32xf32>
    %514 = arith.addf %512, %513 : vector<24x32xf32>
    %515 = arith.negf %514 : vector<24x32xf32>
    %516 = math.exp %515 : vector<24x32xf32>
    %cst_120 = arith.constant 1.000000e+00 : f32
    %517 = vector.broadcast %cst_120 : f32 to vector<24x32xf32>
    %518 = arith.addf %517, %516 : vector<24x32xf32>
    %519 = arith.divf %517, %518 : vector<24x32xf32>
    %520 = vector.extract_strided_slice %510 {offsets = [0, 32], sizes = [24, 32], strides = [1, 1]} : vector<24x128xf32> to vector<24x32xf32>
    %521 = vector.extract_strided_slice %511 {offsets = [0, 32], sizes = [24, 32], strides = [1, 1]} : vector<24x96xf32> to vector<24x32xf32>
    %522 = arith.addf %520, %521 : vector<24x32xf32>
    %523 = arith.negf %522 : vector<24x32xf32>
    %524 = math.exp %523 : vector<24x32xf32>
    %cst_121 = arith.constant 1.000000e+00 : f32
    %525 = vector.broadcast %cst_121 : f32 to vector<24x32xf32>
    %526 = arith.addf %525, %524 : vector<24x32xf32>
    %527 = arith.divf %525, %526 : vector<24x32xf32>
    %528 = vector.extract_strided_slice %510 {offsets = [0, 64], sizes = [24, 32], strides = [1, 1]} : vector<24x128xf32> to vector<24x32xf32>
    %529 = vector.extract_strided_slice %511 {offsets = [0, 64], sizes = [24, 32], strides = [1, 1]} : vector<24x96xf32> to vector<24x32xf32>
    %530 = arith.addf %529, %21 : vector<24x32xf32>
    %531 = arith.mulf %519, %530 : vector<24x32xf32>
    %532 = arith.addf %528, %531 : vector<24x32xf32>
    %533 = math.tanh %532 : vector<24x32xf32>
    %cst_122 = arith.constant 1.000000e+00 : f32
    %534 = vector.broadcast %cst_122 : f32 to vector<24x32xf32>
    %535 = arith.subf %534, %527 : vector<24x32xf32>
    %536 = arith.mulf %535, %533 : vector<24x32xf32>
    %537 = arith.mulf %527, %505 : vector<24x32xf32>
    %538 = arith.addf %536, %537 : vector<24x32xf32>
    %c3_i32_123 = arith.constant 3 : i32
    %c0_124 = arith.constant 0 : index
    %c0_125 = arith.constant 0 : index
    %539 = vector.load %arg10[%c0_124, %c0_125] : memref<64x128xf32, #tpu.memory_space<vmem>>, vector<32x128xf32>
    %cst_126 = arith.constant dense<0.000000e+00> : vector<24x128xf32>
    %540 = tpu.matmul %438, %539, %cst_126 {dimension_numbers = #tpu.dot_dimension_numbers<[1], [0], [0], [1], [0, 0, 1, 1], [], []>} : vector<24x32xf32>, vector<32x128xf32>, vector<24x128xf32> -> vector<24x128xf32>
    %c32 = arith.constant 32 : index
    %c0_127 = arith.constant 0 : index
    %541 = vector.load %arg10[%c32, %c0_127] : memref<64x128xf32, #tpu.memory_space<vmem>>, vector<32x128xf32>
    %cst_128 = arith.constant dense<0.000000e+00> : vector<24x128xf32>
    %542 = tpu.matmul %538, %541, %cst_128 {dimension_numbers = #tpu.dot_dimension_numbers<[1], [0], [0], [1], [0, 0, 1, 1], [], []>} : vector<24x32xf32>, vector<32x128xf32>, vector<24x128xf32> -> vector<24x128xf32>
    %543 = arith.addf %540, %542 : vector<24x128xf32>
    %c0_129 = arith.constant 0 : index
    %c0_130 = arith.constant 0 : index
    %544 = vector.load %arg12[%c0_129, %c0_130] : memref<128x128xf32, #tpu.memory_space<vmem>>, vector<128x128xf32>
    %cst_131 = arith.constant dense<0.000000e+00> : vector<24x128xf32>
    %545 = tpu.matmul %0, %544, %cst_131 {dimension_numbers = #tpu.dot_dimension_numbers<[1], [0], [0], [1], [0, 0, 1, 1], [], []>} : vector<24x128xf32>, vector<128x128xf32>, vector<24x128xf32> -> vector<24x128xf32>
    %546 = arith.addf %543, %545 : vector<24x128xf32>
    %c0_132 = arith.constant 0 : index
    %c0_133 = arith.constant 0 : index
    %547 = vector.load %arg11[%c0_132, %c0_133] : memref<1x128xf32, #tpu.memory_space<vmem>>, vector<1x128xf32>
    %548 = vector.broadcast %547 : vector<1x128xf32> to vector<24x128xf32>
    %549 = arith.addf %546, %548 : vector<24x128xf32>
    %550 = arith.negf %549 : vector<24x128xf32>
    %551 = math.exp %550 : vector<24x128xf32>
    %cst_134 = arith.constant 1.000000e+00 : f32
    %552 = vector.broadcast %cst_134 : f32 to vector<24x128xf32>
    %553 = arith.addf %552, %551 : vector<24x128xf32>
    %554 = arith.divf %552, %553 : vector<24x128xf32>
    %c0_135 = arith.constant 0 : index
    %c0_136 = arith.constant 0 : index
    %555 = vector.load %arg13[%c0_135, %c0_136] : memref<24x128xf32, #tpu.memory_space<vmem>>, vector<24x128xf32>
    tpu.vector_store %arg13[%c0_135, %c0_136], %554 {strides = array<i32>} : memref<24x128xf32, #tpu.memory_space<vmem>>, vector<24x128xf32>,
    return
  }
  func.func @transform_0(%arg0: i32) -> (i32, i32) {
    %c0_i32 = arith.constant 0 : i32
    %c0_i32_0 = arith.constant 0 : i32
    return %arg0, %c0_i32 : i32, i32
  }
  func.func @transform_1(%arg0: i32) -> (i32, i32) {
    %c0_i32 = arith.constant 0 : i32
    %c0_i32_0 = arith.constant 0 : i32
    %c0_i32_1 = arith.constant 0 : i32
    return %c0_i32, %c0_i32_0 : i32, i32
  }
  func.func @transform_2(%arg0: i32) -> (i32, i32) {
    %c0_i32 = arith.constant 0 : i32
    %c0_i32_0 = arith.constant 0 : i32
    %c0_i32_1 = arith.constant 0 : i32
    return %c0_i32, %c0_i32_0 : i32, i32
  }
  func.func @transform_3(%arg0: i32) -> (i32, i32) {
    %c0_i32 = arith.constant 0 : i32
    %c0_i32_0 = arith.constant 0 : i32
    %c0_i32_1 = arith.constant 0 : i32
    return %c0_i32, %c0_i32_0 : i32, i32
  }
  func.func @transform_4(%arg0: i32) -> (i32, i32) {
    %c0_i32 = arith.constant 0 : i32
    %c0_i32_0 = arith.constant 0 : i32
    %c0_i32_1 = arith.constant 0 : i32
    return %c0_i32, %c0_i32_0 : i32, i32
  }
  func.func @transform_5(%arg0: i32) -> (i32, i32) {
    %c0_i32 = arith.constant 0 : i32
    %c0_i32_0 = arith.constant 0 : i32
    %c0_i32_1 = arith.constant 0 : i32
    return %c0_i32, %c0_i32_0 : i32, i32
  }
  func.func @transform_6(%arg0: i32) -> (i32, i32) {
    %c0_i32 = arith.constant 0 : i32
    %c0_i32_0 = arith.constant 0 : i32
    %c0_i32_1 = arith.constant 0 : i32
    return %c0_i32, %c0_i32_0 : i32, i32
  }
  func.func @transform_7(%arg0: i32) -> (i32, i32) {
    %c0_i32 = arith.constant 0 : i32
    %c0_i32_0 = arith.constant 0 : i32
    %c0_i32_1 = arith.constant 0 : i32
    return %c0_i32, %c0_i32_0 : i32, i32
  }
  func.func @transform_8(%arg0: i32) -> (i32, i32) {
    %c0_i32 = arith.constant 0 : i32
    %c0_i32_0 = arith.constant 0 : i32
    %c0_i32_1 = arith.constant 0 : i32
    return %c0_i32, %c0_i32_0 : i32, i32
  }
  func.func @transform_9(%arg0: i32) -> (i32, i32) {
    %c0_i32 = arith.constant 0 : i32
    %c0_i32_0 = arith.constant 0 : i32
    %c0_i32_1 = arith.constant 0 : i32
    return %c0_i32, %c0_i32_0 : i32, i32
  }
  func.func @transform_10(%arg0: i32) -> (i32, i32) {
    %c0_i32 = arith.constant 0 : i32
    %c0_i32_0 = arith.constant 0 : i32
    %c0_i32_1 = arith.constant 0 : i32
    return %c0_i32, %c0_i32_0 : i32, i32
  }
  func.func @transform_11(%arg0: i32) -> (i32, i32) {
    %c0_i32 = arith.constant 0 : i32
    %c0_i32_0 = arith.constant 0 : i32
    %c0_i32_1 = arith.constant 0 : i32
    return %c0_i32, %c0_i32_0 : i32, i32
  }
  func.func @transform_12(%arg0: i32) -> (i32, i32) {
    %c0_i32 = arith.constant 0 : i32
    %c0_i32_0 = arith.constant 0 : i32
    return %arg0, %c0_i32 : i32, i32
  }
}

</mosaic_0001>

<bundles_post_ra>
// kernel: tile.18
= control target key start
LH: loop header
LB: loop body
LE: loop exit
PB: predicated region body
PF: predicated region fallthrough
CT: control target
= control target key end

     0   :  { %s22_s0 = inlined_call_operand.vmem [shape: f32[8], index: 0, kind: input, shape index: {}]   ;;  %s23_s1 = inlined_call_operand.vmem [shape: f32[4,8], index: 1, kind: output, shape index: {}]  }
   0x1   :  { %v4_v0 = vld [vmem:[%s22_s0] ss:$0 sm:$0xff] }
   0x2   :  { %5 = vst [vmem:[%s23_s1] sm:$0xf] %v4_v0 }

// kernel: tile.19
= control target key start
LH: loop header
LB: loop body
LE: loop exit
PB: predicated region body
PF: predicated region fallthrough
CT: control target
= control target key end

     0   :  { %s37_s8 = smov 8   ;;  %s38_s9 = smov 16   ;;  %vm7_vm0 = vcmask 64512   ;;  %vm13_vm1 = vcmask 261312   ;;  %vm19_vm2 = vcmask 195712   ;;  %vm25_vm3 = vcmask 130112   ;;  %s55_s0 = inlined_call_operand.vmem [shape: f32[4,8], index: 0, kind: input, shape index: {}]   ;;  %s56_s1 = inlined_call_operand.vmem [shape: f32[1,32], index: 1, kind: output, shape index: {}]  }
   0x1   :  { %v4_v0 = vld [vmem:[%s55_s0] sm:$0xf]  ;;  %s36_s0 = smov 24  }
   0x2   :  { %5 = vst [vmem:[#allocation1] sm:$0xf] %v4_v0 }
   0x9   :  { %v10_v1 = vld [vmem:[#allocation1 + $0x3] sm:$0x1]   ;;  %v22_v2 = vld [vmem:[#allocation1 + $0x1] sm:$0x1]   ;;  %v16_v3 = vld [vmem:[#allocation1 + $0x2] sm:$0x1]  }
   0xa   :  { %11 = vrot.lane.b32.xlu0 %v10_v1, %s36_s0  ;;  %23 = vrot.lane.b32.xlu1 %v22_v2, %s37_s8  ;;  %v6_v4 = vld [vmem:[#allocation1] sm:$0x1]  }
   0xb   :  { %8 = vst.msk [vmem:[#allocation0] sm:$0x1] %vm7_vm0, %v6_v4  }
  0x12   :  { %17 = vrot.lane.b32.xlu0 %v16_v3, %s38_s9 }
  0x7c   :  { %v12_v5 = vpop.permute.xlu0 %11   ;;  %v24_v6 = vpop.permute.xlu1 %23  }
  0x7d   :  { %14 = vst.msk [vmem:[#allocation0] sm:$0x1] %vm13_vm1, %v12_v5  }
  0x84   :  { %v18_v7 = vpop.permute.xlu0 %17  }
  0x85   :  { %20 = vst.msk [vmem:[#allocation0] sm:$0x1] %vm19_vm2, %v18_v7  }
  0x86   :  { %26 = vst.msk [vmem:[#allocation0] sm:$0x1] %vm25_vm3, %v24_v6  }
  0x8d   :  { %v29_v8 = vld [vmem:[#allocation0] sm:$0x1] }
  0x8e   :  { %32 = vst [vmem:[%s56_s1] sm:$0x1] %v29_v8 }

// kernel: lstnet_forward.1
= control target key start
LH: loop header
LB: loop body
LE: loop exit
PB: predicated region body
PF: predicated region fallthrough
CT: control target
= control target key end

     0   :  { %s4825_s26 = smov 64   ;;  %s4827_s13 = smov 96   ;;  %vm1585_vm12 = vcmask 261120   ;;  %s7807_s1 = inlined_call_operand.vmem [shape: f32[128,256], index: 1, kind: input, shape index: {}]   ;;  %s7808_s3 = inlined_call_operand.vmem [shape: f32[256,2048], index: 3, kind: input, shape index: {}]   ;;  %s7809_s0 = inlined_call_operand.vmem [shape: f32[24,128], index: 0, kind: input, shape index: {}]   ;;  %s7810_s2 = inlined_call_operand.vmem [shape: f32[1,256], index: 2, kind: input, shape index: {}]   ;;  %s7811_s6 = inlined_call_operand.vmem [shape: f32[1,32], index: 6, kind: input, shape index: {}]   ;;  %s7812_s5 = inlined_call_operand.vmem [shape: f32[32,96], index: 5, kind: input, shape index: {}]   ;;  %s7813_s4 = inlined_call_operand.vmem [shape: f32[1,2048], index: 4, kind: input, shape index: {}]   ;;  %s7814_s7 = inlined_call_operand.vmem [shape: f32[32,96], index: 7, kind: input, shape index: {}]   ;;  %s7815_s8 = inlined_call_operand.vmem [shape: f32[1,32], index: 8, kind: input, shape index: {}]   ;;  %s7816_s9 = inlined_call_operand.vmem [shape: f32[64,128], index: 9, kind: input, shape index: {}]   ;;  %s7817_s11 = inlined_call_operand.vmem [shape: f32[128,128], index: 11, kind: input, shape index: {}]   ;;  %s7818_s10 = inlined_call_operand.vmem [shape: f32[1,128], index: 10, kind: input, shape index: {}]   ;;  %s7819_s12 = inlined_call_operand.vmem [shape: f32[24,128], index: 12, kind: output, shape index: {}]  }
   0x1   :  { %v74_v0 = vld [vmem:[%s7807_s1 + $0xf0] sm:$0xff]  ;;  %v75_v1 = vld [vmem:[%s7807_s1 + $0xf8] sm:$0xff]  ;;  %v72_v2 = vld [vmem:[%s7807_s1 + $0xe0] sm:$0xff] }
   0x2   :  { %82 = vmatpush.msra.mxu0 %v74_v0  ;;  %108 = vmatpush.msra.mxu1 %v75_v1  ;;  %v73_v3 = vld [vmem:[%s7807_s1 + $0xe8] sm:$0xff]  ;;  %v70_v4 = vld [vmem:[%s7807_s1 + $0xd0] sm:$0xff]  ;;  %v71_v5 = vld [vmem:[%s7807_s1 + $0xd8] sm:$0xff] }
   0x3   :  { %v68_v6 = vld [vmem:[%s7807_s1 + $0xc0] sm:$0xff]  ;;  %v69_v7 = vld [vmem:[%s7807_s1 + $0xc8] sm:$0xff]  ;;  %v66_v8 = vld [vmem:[%s7807_s1 + $0xb0] sm:$0xff] }
   0x4   :  { %83 = vmatpush.msra.mxu0 %v72_v2  ;;  %109 = vmatpush.msra.mxu1 %v73_v3  ;;  %v67_v9 = vld [vmem:[%s7807_s1 + $0xb8] sm:$0xff]  ;;  %v64_v10 = vld [vmem:[%s7807_s1 + $0xa0] sm:$0xff]  ;;  %v65_v11 = vld [vmem:[%s7807_s1 + $0xa8] sm:$0xff] }
   0x5   :  { %v62_v12 = vld [vmem:[%s7807_s1 + $0x90] sm:$0xff]  ;;  %v63_v13 = vld [vmem:[%s7807_s1 + $0x98] sm:$0xff]  ;;  %v60_v14 = vld [vmem:[%s7807_s1 + $0x80] sm:$0xff] }
   0x6   :  { %84 = vmatpush.msra.mxu0 %v70_v4  ;;  %110 = vmatpush.msra.mxu1 %v71_v5  ;;  %v61_v15 = vld [vmem:[%s7807_s1 + $0x88] sm:$0xff]  ;;  %v58_v16 = vld [vmem:[%s7807_s1 + $0x70] sm:$0xff]  ;;  %v59_v17 = vld [vmem:[%s7807_s1 + $0x78] sm:$0xff] }
   0x7   :  { %v56_v18 = vld [vmem:[%s7807_s1 + $0x60] sm:$0xff]  ;;  %v57_v19 = vld [vmem:[%s7807_s1 + $0x68] sm:$0xff]  ;;  %v54_v24 = vld [vmem:[%s7807_s1 + $0x50] sm:$0xff] }
   0x8   :  { %85 = vmatpush.msra.mxu0 %v68_v6  ;;  %111 = vmatpush.msra.mxu1 %v69_v7  ;;  %v380_v20 = vld [vmem:[%s7808_s3 + $0x780] sm:$0xff]  ;;  %v55_v25 = vld [vmem:[%s7807_s1 + $0x58] sm:$0xff]  ;;  %v53_v29 = vld [vmem:[%s7807_s1 + $0x48] sm:$0xff] }
   0x9   :  { %v636_v21 = vld [vmem:[%s7808_s3 + $0xf80] sm:$0xff]  ;;  %688 = vmatpush.msra.mxu2 %v380_v20  ;;  %v50_v32 = vld [vmem:[%s7807_s1 + $0x30] sm:$0xff]  ;;  %v51_v33 = vld [vmem:[%s7807_s1 + $0x38] sm:$0xff] }
   0xa   :  { %86 = vmatpush.msra.mxu0 %v66_v8  ;;  %112 = vmatpush.msra.mxu1 %v67_v9  ;;  %v364_v22 = vld [vmem:[%s7808_s3 + $0x700] sm:$0xff]  ;;  %v49_v37 = vld [vmem:[%s7807_s1 + $0x28] sm:$0xff]  ;;  %v46_v40 = vld [vmem:[%s7807_s1 + $0x10] sm:$0xff] }
   0xb   :  { %v620_v23 = vld [vmem:[%s7808_s3 + $0xf00] sm:$0xff]  ;;  %714 = vmatpush.msra.mxu3 %v636_v21  ;;  %689 = vmatpush.msra.mxu2 %v364_v22  ;;  %v47_v41 = vld [vmem:[%s7807_s1 + $0x18] sm:$0xff]  ;;  %v45_v45 = vld [vmem:[%s7807_s1 + $0x8] sm:$0xff] }
   0xc   :  { %87 = vmatpush.msra.mxu0 %v64_v10  ;;  %113 = vmatpush.msra.mxu1 %v65_v11  ;;  %v348_v26 = vld [vmem:[%s7808_s3 + $0x680] sm:$0xff]  ;;  %v381_v47 = vld [vmem:[%s7808_s3 + $0x788] sm:$0xff] }
   0xd   :  { %v604_v27 = vld [vmem:[%s7808_s3 + $0xe80] sm:$0xff]  ;;  %715 = vmatpush.msra.mxu3 %v620_v23  ;;  %690 = vmatpush.msra.mxu2 %v348_v26  ;;  %v637_v48 = vld [vmem:[%s7808_s3 + $0xf88] sm:$0xff] }
   0xe   :  { %88 = vmatpush.msra.mxu0 %v62_v12  ;;  %114 = vmatpush.msra.mxu1 %v63_v13  ;;  %v52_v28 = vld [vmem:[%s7807_s1 + $0x40] sm:$0xff]  ;;  %v365_v51 = vld [vmem:[%s7808_s3 + $0x708] sm:$0xff]  ;;  %v43_v12 = vld [vmem:[%s7809_s0 + $0x10] sm:$0xff] }
   0xf   :  { %v332_v30 = vld [vmem:[%s7808_s3 + $0x600] sm:$0xff]  ;;  %716 = vmatpush.msra.mxu3 %v604_v27  ;;  %v621_v52 = vld [vmem:[%s7808_s3 + $0xf08] sm:$0xff]  ;;  %v382_v27 = vld [vmem:[%s7808_s3 + $0x790] sm:$0xff] }
  0x10   :  { %89 = vmatpush.msra.mxu0 %v60_v14  ;;  %115 = vmatpush.msra.mxu1 %v61_v15  ;;  %v588_v31 = vld [vmem:[%s7808_s3 + $0xe00] sm:$0xff]  ;;  %v349_v55 = vld [vmem:[%s7808_s3 + $0x688] sm:$0xff] }
  0x11   :  { %v316_v34 = vld [vmem:[%s7808_s3 + $0x580] sm:$0xff]  ;;  %691 = vmatpush.msra.mxu2 %v332_v30  ;;  %717 = vmatpush.msra.mxu3 %v588_v31  ;;  %v605_v56 = vld [vmem:[%s7808_s3 + $0xe88] sm:$0xff]  ;;  %v366_v31 = vld [vmem:[%s7808_s3 + $0x710] sm:$0xff] }
  0x12   :  { %90 = vmatpush.msra.mxu0 %v58_v16  ;;  %116 = vmatpush.msra.mxu1 %v59_v17  ;;  %v572_v35 = vld [vmem:[%s7808_s3 + $0xd80] sm:$0xff]  ;;  %v333_v59 = vld [vmem:[%s7808_s3 + $0x608] sm:$0xff] }
  0x13   :  { %v48_v36 = vld [vmem:[%s7807_s1 + $0x20] sm:$0xff]  ;;  %692 = vmatpush.msra.mxu2 %v316_v34  ;;  %718 = vmatpush.msra.mxu3 %v572_v35  ;;  %v589_v60 = vld [vmem:[%s7808_s3 + $0xe08] sm:$0xff]  ;;  %v350_v35 = vld [vmem:[%s7808_s3 + $0x690] sm:$0xff] }
  0x14   :  { %91 = vmatpush.msra.mxu0 %v56_v18  ;;  %117 = vmatpush.msra.mxu1 %v57_v19  ;;  %v300_v38 = vld [vmem:[%s7808_s3 + $0x500] sm:$0xff]  ;;  %v42_v61 = vld [vmem:[%s7809_s0 + $0x8] sm:$0xff] }
  0x15   :  { %v556_v39 = vld [vmem:[%s7808_s3 + $0xd00] sm:$0xff]  ;;  %693 = vmatpush.msra.mxu2 %v300_v38  ;;  %v317_v62 = vld [vmem:[%s7808_s3 + $0x588] sm:$0xff] }
  0x16   :  { %92 = vmatpush.msra.mxu0 %v54_v24  ;;  %118 = vmatpush.msra.mxu1 %v55_v25  ;;  %v284_v42 = vld [vmem:[%s7808_s3 + $0x480] sm:$0xff]  ;;  %v573_v63 = vld [vmem:[%s7808_s3 + $0xd88] sm:$0xff] }
  0x17   :  { %v540_v43 = vld [vmem:[%s7808_s3 + $0xc80] sm:$0xff]  ;;  %719 = vmatpush.msra.mxu3 %v556_v39  ;;  %694 = vmatpush.msra.mxu2 %v284_v42  ;;  %v301_v2 = vld [vmem:[%s7808_s3 + $0x508] sm:$0xff]  ;;  %v334_v39 = vld [vmem:[%s7808_s3 + $0x610] sm:$0xff] }
  0x18   :  { %93 = vmatpush.msra.mxu0 %v52_v28  ;;  %119 = vmatpush.msra.mxu1 %v53_v29  ;;  %v44_v44 = vld [vmem:[%s7807_s1] sm:$0xff]  ;;  %v557_v3 = vld [vmem:[%s7808_s3 + $0xd08] sm:$0xff]  ;;  %v638_v28 = vld [vmem:[%s7808_s3 + $0xf90] sm:$0xff] }
  0x19   :  { %v41_v46 = vld [vmem:[%s7809_s0] sm:$0xff]  ;;  %720 = vmatpush.msra.mxu3 %v540_v43  ;;  %v285_v6 = vld [vmem:[%s7808_s3 + $0x488] sm:$0xff]  ;;  %v383_v43 = vld [vmem:[%s7808_s3 + $0x798] sm:$0xff] }
  0x1a   :  { %94 = vmatpush.msra.mxu0 %v50_v32  ;;  %120 = vmatpush.msra.mxu1 %v51_v33  ;;  %v268_v49 = vld [vmem:[%s7808_s3 + $0x400] sm:$0xff]  ;;  %v541_v7 = vld [vmem:[%s7808_s3 + $0xc88] sm:$0xff]  ;;  %v622_v32 = vld [vmem:[%s7808_s3 + $0xf10] sm:$0xff] }
  0x1b   :  { %v524_v50 = vld [vmem:[%s7808_s3 + $0xc00] sm:$0xff]  ;;  %695 = vmatpush.msra.mxu2 %v268_v49  ;;  %v269_v10 = vld [vmem:[%s7808_s3 + $0x408] sm:$0xff]  ;;  %v302_v49 = vld [vmem:[%s7808_s3 + $0x510] sm:$0xff] }
  0x1c   :  { %95 = vmatpush.msra.mxu0 %v48_v36  ;;  %121 = vmatpush.msra.mxu1 %v49_v37  ;;  %v252_v53 = vld [vmem:[%s7808_s3 + $0x380] sm:$0xff]  ;;  %v525_v11 = vld [vmem:[%s7808_s3 + $0xc08] sm:$0xff]  ;;  %v606_v36 = vld [vmem:[%s7808_s3 + $0xe90] sm:$0xff] }
  0x1d   :  { %v508_v54 = vld [vmem:[%s7808_s3 + $0xb80] sm:$0xff]  ;;  %721 = vmatpush.msra.mxu3 %v524_v50  ;;  %696 = vmatpush.msra.mxu2 %v252_v53  ;;  %v253_v13 = vld [vmem:[%s7808_s3 + $0x388] sm:$0xff]  ;;  %v558_v50 = vld [vmem:[%s7808_s3 + $0xd10] sm:$0xff] }
  0x1e   :  { %96 = vmatpush.msra.mxu0 %v46_v40  ;;  %122 = vmatpush.msra.mxu1 %v47_v41  ;;  %v236_v57 = vld [vmem:[%s7808_s3 + $0x300] sm:$0xff]  ;;  %v509_v14 = vld [vmem:[%s7808_s3 + $0xb88] sm:$0xff]  ;;  %v590_v40 = vld [vmem:[%s7808_s3 + $0xe10] sm:$0xff] }
  0x1f   :  { %v492_v58 = vld [vmem:[%s7808_s3 + $0xb00] sm:$0xff]  ;;  %722 = vmatpush.msra.mxu3 %v508_v54  ;;  %697 = vmatpush.msra.mxu2 %v236_v57  ;;  %v237_v17 = vld [vmem:[%s7808_s3 + $0x308] sm:$0xff]  ;;  %v286_v53 = vld [vmem:[%s7808_s3 + $0x490] sm:$0xff] }
  0x20   :  { %97 = vmatpush.msra.mxu0 %v44_v44  ;;  %123 = vmatpush.msra.mxu1 %v45_v45  ;;  %v220_v0 = vld [vmem:[%s7808_s3 + $0x280] sm:$0xff]  ;;  %v493_v18 = vld [vmem:[%s7808_s3 + $0xb08] sm:$0xff]  ;;  %v639_v44 = vld [vmem:[%s7808_s3 + $0xf98] sm:$0xff] }
  0x21   :  { %98 = vmatmul.f32.vlgmr.msra.gmra.mxu0 %v41_v46  ;;  %124 = vmatmul.f32.vlgmr.msra.gmra.mxu1 %v41_v46  ;;  %v476_v1 = vld [vmem:[%s7808_s3 + $0xa80] sm:$0xff]  ;;  %v221_v21 = vld [vmem:[%s7808_s3 + $0x288] sm:$0xff]  ;;  %v318_v45 = vld [vmem:[%s7808_s3 + $0x590] sm:$0xff] }
  0x22   :  { %740 = vmatpush.msrb.mxu0 %v381_v47  ;;  %766 = vmatpush.msrb.mxu1 %v637_v48  ;;  %v204_v4 = vld [vmem:[%s7808_s3 + $0x200] sm:$0xff]  ;;  %v477_v22 = vld [vmem:[%s7808_s3 + $0xa88] sm:$0xff]  ;;  %v574_v46 = vld [vmem:[%s7808_s3 + $0xd90] sm:$0xff] }
  0x23   :  { %723 = vmatpush.msra.mxu3 %v492_v58  ;;  %v460_v5 = vld [vmem:[%s7808_s3 + $0xa00] sm:$0xff]  ;;  %698 = vmatpush.msra.mxu2 %v220_v0  ;;  %v205_v25 = vld [vmem:[%s7808_s3 + $0x208] sm:$0xff]  ;;  %v367_v47 = vld [vmem:[%s7808_s3 + $0x718] sm:$0xff] }
  0x24   :  { %741 = vmatpush.msrb.mxu0 %v365_v51  ;;  %767 = vmatpush.msrb.mxu1 %v621_v52  ;;  %v188_v8 = vld [vmem:[%s7808_s3 + $0x180] sm:$0xff]  ;;  %v461_v26 = vld [vmem:[%s7808_s3 + $0xa08] sm:$0xff]  ;;  %v623_v48 = vld [vmem:[%s7808_s3 + $0xf18] sm:$0xff] }
  0x25   :  { %724 = vmatpush.msra.mxu3 %v476_v1  ;;  %v444_v9 = vld [vmem:[%s7808_s3 + $0x980] sm:$0xff]  ;;  %699 = vmatpush.msra.mxu2 %v204_v4  ;;  %v189_v29 = vld [vmem:[%s7808_s3 + $0x188] sm:$0xff]  ;;  %v351_v51 = vld [vmem:[%s7808_s3 + $0x698] sm:$0xff] }
  0x26   :  { %742 = vmatpush.msrb.mxu0 %v349_v55  ;;  %768 = vmatpush.msrb.mxu1 %v605_v56  ;;  %v172_v15 = vld [vmem:[%s7808_s3 + $0x100] sm:$0xff]  ;;  %v445_v30 = vld [vmem:[%s7808_s3 + $0x988] sm:$0xff]  ;;  %v607_v52 = vld [vmem:[%s7808_s3 + $0xe98] sm:$0xff] }
  0x27   :  { %725 = vmatpush.msra.mxu3 %v460_v5  ;;  %700 = vmatpush.msra.mxu2 %v188_v8  ;;  %v428_v16 = vld [vmem:[%s7808_s3 + $0x900] sm:$0xff]  ;;  %v173_v33 = vld [vmem:[%s7808_s3 + $0x108] sm:$0xff]  ;;  %v542_v54 = vld [vmem:[%s7808_s3 + $0xc90] sm:$0xff] }
  0x28   :  { %743 = vmatpush.msrb.mxu0 %v333_v59  ;;  %769 = vmatpush.msrb.mxu1 %v589_v60  ;;  %v156_v19 = vld [vmem:[%s7808_s3 + $0x80] sm:$0xff]  ;;  %v429_v34 = vld [vmem:[%s7808_s3 + $0x908] sm:$0xff]  ;;  %v335_v55 = vld [vmem:[%s7808_s3 + $0x618] sm:$0xff] }
  0x29   :  { %101 = vmatmul.f32.gmra.mxu0 %v42_v61  ;;  %127 = vmatmul.f32.gmra.mxu1 %v42_v61  ;;  %v412_v20 = vld [vmem:[%s7808_s3 + $0x880] sm:$0xff]  ;;  %v157_v37 = vld [vmem:[%s7808_s3 + $0x88] sm:$0xff]  ;;  %v591_v56 = vld [vmem:[%s7808_s3 + $0xe18] sm:$0xff] }
  0x2a   :  { %744 = vmatpush.msrb.mxu0 %v317_v62  ;;  %770 = vmatpush.msrb.mxu1 %v573_v63  ;;  %v140_v23 = vld [vmem:[%s7808_s3] sm:$0xff]  ;;  %v413_v38 = vld [vmem:[%s7808_s3 + $0x888] sm:$0xff]  ;;  %v270_v57 = vld [vmem:[%s7808_s3 + $0x410] sm:$0xff] }
  0x2b   :  { %726 = vmatpush.msra.mxu3 %v444_v9  ;;  %701 = vmatpush.msra.mxu2 %v172_v15  ;;  %v396_v24 = vld [vmem:[%s7808_s3 + $0x800] sm:$0xff]  ;;  %v141_v41 = vld [vmem:[%s7808_s3 + $0x8] sm:$0xff]  ;;  %v526_v58 = vld [vmem:[%s7808_s3 + $0xc10] sm:$0xff] }
  0x2c   :  { %745 = vmatpush.msrb.mxu0 %v301_v2  ;;  %771 = vmatpush.msrb.mxu1 %v557_v3  ;;  %v397_v42 = vld [vmem:[%s7808_s3 + $0x808] sm:$0xff]  ;;  %v319_v59 = vld [vmem:[%s7808_s3 + $0x598] sm:$0xff]  ;;  %v254_v61 = vld [vmem:[%s7808_s3 + $0x390] sm:$0xff] }
  0x2d   :  { %727 = vmatpush.msra.mxu3 %v428_v16  ;;  %702 = vmatpush.msra.mxu2 %v156_v19  ;;  %v575_v60 = vld [vmem:[%s7808_s3 + $0xd98] sm:$0xff]  ;;  %v510_v62 = vld [vmem:[%s7808_s3 + $0xb90] sm:$0xff] }
  0x2e   :  { %746 = vmatpush.msrb.mxu0 %v285_v6  ;;  %772 = vmatpush.msrb.mxu1 %v541_v7  ;;  %v303_v63 = vld [vmem:[%s7808_s3 + $0x518] sm:$0xff]  ;;  %v238_v1 = vld [vmem:[%s7808_s3 + $0x310] sm:$0xff] }
  0x2f   :  { %728 = vmatpush.msra.mxu3 %v412_v20  ;;  %703 = vmatpush.msra.mxu2 %v140_v23  ;;  %v559_v0 = vld [vmem:[%s7808_s3 + $0xd18] sm:$0xff]  ;;  %v494_v2 = vld [vmem:[%s7808_s3 + $0xb10] sm:$0xff] }
  0x30   :  { %747 = vmatpush.msrb.mxu0 %v269_v10  ;;  %773 = vmatpush.msrb.mxu1 %v525_v11  ;;  %v287_v3 = vld [vmem:[%s7808_s3 + $0x498] sm:$0xff]  ;;  %v222_v5 = vld [vmem:[%s7808_s3 + $0x290] sm:$0xff] }
  0x31   :  { %104 = vmatmul.f32.gmra.mxu0 %v43_v12  ;;  %130 = vmatmul.f32.gmra.mxu1 %v43_v12  ;;  %v543_v4 = vld [vmem:[%s7808_s3 + $0xc98] sm:$0xff]  ;;  %v478_v6 = vld [vmem:[%s7808_s3 + $0xa90] sm:$0xff] }
  0x32   :  { %748 = vmatpush.msrb.mxu0 %v253_v13  ;;  %774 = vmatpush.msrb.mxu1 %v509_v14  ;;  %v271_v7 = vld [vmem:[%s7808_s3 + $0x418] sm:$0xff]  ;;  %v206_v9 = vld [vmem:[%s7808_s3 + $0x210] sm:$0xff] }
  0x33   :  { %729 = vmatpush.msra.mxu3 %v396_v24  ;;  %792 = vmatpush.msrb.mxu2 %v382_v27  ;;  %v527_v8 = vld [vmem:[%s7808_s3 + $0xc18] sm:$0xff]  ;;  %v462_v10 = vld [vmem:[%s7808_s3 + $0xa10] sm:$0xff] }
  0x34   :  { %749 = vmatpush.msrb.mxu0 %v237_v17  ;;  %775 = vmatpush.msrb.mxu1 %v493_v18  ;;  %v255_v11 = vld [vmem:[%s7808_s3 + $0x398] sm:$0xff]  ;;  %v190_v13 = vld [vmem:[%s7808_s3 + $0x190] sm:$0xff] }
  0x35   :  { %818 = vmatpush.msrb.mxu3 %v638_v28  ;;  %793 = vmatpush.msrb.mxu2 %v366_v31  ;;  %v511_v12 = vld [vmem:[%s7808_s3 + $0xb98] sm:$0xff]  ;;  %v446_v14 = vld [vmem:[%s7808_s3 + $0x990] sm:$0xff] }
  0x36   :  { %750 = vmatpush.msrb.mxu0 %v221_v21  ;;  %776 = vmatpush.msrb.mxu1 %v477_v22  ;;  %v239_v15 = vld [vmem:[%s7808_s3 + $0x318] sm:$0xff]  ;;  %v174_v23 = vld [vmem:[%s7808_s3 + $0x110] sm:$0xff] }
  0x37   :  { %819 = vmatpush.msrb.mxu3 %v622_v32  ;;  %794 = vmatpush.msrb.mxu2 %v350_v35  ;;  %v495_v16 = vld [vmem:[%s7808_s3 + $0xb18] sm:$0xff]  ;;  %v430_v24 = vld [vmem:[%s7808_s3 + $0x910] sm:$0xff]  ;;  %v76_v35 = vld [vmem:[%s7810_s2] sm:$0x3] }
  0x38   :  { %751 = vmatpush.msrb.mxu0 %v205_v25  ;;  %777 = vmatpush.msrb.mxu1 %v461_v26  ;;  %v223_v17 = vld [vmem:[%s7808_s3 + $0x298] sm:$0xff]  ;;  %v158_v27 = vld [vmem:[%s7808_s3 + $0x90] sm:$0xff] }
  0x39   :  { %820 = vmatpush.msrb.mxu3 %v606_v36  ;;  %795 = vmatpush.msrb.mxu2 %v334_v39  ;;  %v479_v18 = vld [vmem:[%s7808_s3 + $0xa98] sm:$0xff]  ;;  %v414_v28 = vld [vmem:[%s7808_s3 + $0x890] sm:$0xff]  ;;  %v5385_v36 = vperm.slane %v76_v35, 0 }
  0x3a   :  { %752 = vmatpush.msrb.mxu0 %v189_v29  ;;  %778 = vmatpush.msrb.mxu1 %v445_v30  ;;  %v207_v19 = vld [vmem:[%s7808_s3 + $0x218] sm:$0xff]  ;;  %v142_v31 = vld [vmem:[%s7808_s3 + $0x10] sm:$0xff] }
  0x3b   :  { %821 = vmatpush.msrb.mxu3 %v590_v40  ;;  %796 = vmatpush.msrb.mxu2 %v318_v45  ;;  %v463_v20 = vld [vmem:[%s7808_s3 + $0xa18] sm:$0xff]  ;;  %v398_v32 = vld [vmem:[%s7808_s3 + $0x810] sm:$0xff]  ;;  %v640_v45 = vld [vmem:[%s7808_s3 + $0xfa0] sm:$0xff] }
  0x3c   :  { %753 = vmatpush.msrb.mxu0 %v173_v33  ;;  %779 = vmatpush.msrb.mxu1 %v429_v34  ;;  %v191_v21 = vld [vmem:[%s7808_s3 + $0x198] sm:$0xff] }
  0x3d   :  { %822 = vmatpush.msrb.mxu3 %v574_v46  ;;  %797 = vmatpush.msrb.mxu2 %v302_v49  ;;  %v447_v22 = vld [vmem:[%s7808_s3 + $0x998] sm:$0xff]  ;;  %v385_v46 = vld [vmem:[%s7808_s3 + $0x7a8] sm:$0xff]  ;;  %v624_v49 = vld [vmem:[%s7808_s3 + $0xf20] sm:$0xff] }
  0x3e   :  { %754 = vmatpush.msrb.mxu0 %v157_v37  ;;  %780 = vmatpush.msrb.mxu1 %v413_v38  ;;  %v175_v25 = vld [vmem:[%s7808_s3 + $0x118] sm:$0xff]  ;;  %v5387_v37 = vperm.slane %v76_v35, 1  ;;  %v481_v35 = vld [vmem:[%s7808_s3 + $0xaa8] sm:$0xff] }
  0x3f   :  { %823 = vmatpush.msrb.mxu3 %v558_v50  ;;  %798 = vmatpush.msrb.mxu2 %v286_v53  ;;  %v431_v26 = vld [vmem:[%s7808_s3 + $0x918] sm:$0xff]  ;;  %v369_v50 = vld [vmem:[%s7808_s3 + $0x728] sm:$0xff] }
  0x40   :  { %755 = vmatpush.msrb.mxu0 %v141_v41  ;;  %781 = vmatpush.msrb.mxu1 %v397_v42  ;;  %v159_v29 = vld [vmem:[%s7808_s3 + $0x98] sm:$0xff] }
  0x41   :  { %824 = vmatpush.msrb.mxu3 %v542_v54  ;;  %799 = vmatpush.msrb.mxu2 %v270_v57  ;;  %v415_v30 = vld [vmem:[%s7808_s3 + $0x898] sm:$0xff]  ;;  %v352_v54 = vld [vmem:[%s7808_s3 + $0x6a0] sm:$0xff] }
  0x42   :  { %844 = vmatpush.msra.mxu0 %v383_v43  ;;  %870 = vmatpush.msra.mxu1 %v639_v44  ;;  %v143_v33 = vld [vmem:[%s7808_s3 + $0x18] sm:$0xff]  ;;  %v384_v44 = vld [vmem:[%s7808_s3 + $0x7a0] sm:$0xff] }
  0x43   :  { %825 = vmatpush.msrb.mxu3 %v526_v58  ;;  %800 = vmatpush.msrb.mxu2 %v254_v61  ;;  %v399_v34 = vld [vmem:[%s7808_s3 + $0x818] sm:$0xff]  ;;  %v353_v58 = vld [vmem:[%s7808_s3 + $0x6a8] sm:$0xff]  ;;  %v592_v61 = vld [vmem:[%s7808_s3 + $0xe20] sm:$0xff] }
  0x44   :  { %845 = vmatpush.msra.mxu0 %v367_v47  ;;  %871 = vmatpush.msra.mxu1 %v623_v48  ;;  %v641_v47 = vld [vmem:[%s7808_s3 + $0xfa8] sm:$0xff]  ;;  %v368_v48 = vld [vmem:[%s7808_s3 + $0x720] sm:$0xff] }
  0x45   :  { %826 = vmatpush.msrb.mxu3 %v510_v62  ;;  %801 = vmatpush.msrb.mxu2 %v238_v1  ;;  %v593_v1 = vld [vmem:[%s7808_s3 + $0xe28] sm:$0xff] }
  0x46   :  { %846 = vmatpush.msra.mxu0 %v351_v51  ;;  %872 = vmatpush.msra.mxu1 %v607_v52  ;;  %v625_v51 = vld [vmem:[%s7808_s3 + $0xf28] sm:$0xff] }
  0x47   :  { %827 = vmatpush.msrb.mxu3 %v494_v2  ;;  %802 = vmatpush.msrb.mxu2 %v222_v5  ;;  %v320_v2 = vld [vmem:[%s7808_s3 + $0x5a0] sm:$0xff]  ;;  %v577_v5 = vld [vmem:[%s7808_s3 + $0xda8] sm:$0xff] }
  0x48   :  { %847 = vmatpush.msra.mxu0 %v335_v55  ;;  %873 = vmatpush.msra.mxu1 %v591_v56  ;;  %v608_v55 = vld [vmem:[%s7808_s3 + $0xea0] sm:$0xff] }
  0x49   :  { %828 = vmatpush.msrb.mxu3 %v478_v6  ;;  %803 = vmatpush.msrb.mxu2 %v206_v9  ;;  %v304_v6 = vld [vmem:[%s7808_s3 + $0x520] sm:$0xff] }
  0x4a   :  { %848 = vmatpush.msra.mxu0 %v319_v59  ;;  %874 = vmatpush.msra.mxu1 %v575_v60  ;;  %v609_v59 = vld [vmem:[%s7808_s3 + $0xea8] sm:$0xff]  ;;  %v336_v60 = vld [vmem:[%s7808_s3 + $0x620] sm:$0xff] }
  0x4b   :  { %829 = vmatpush.msrb.mxu3 %v462_v10  ;;  %804 = vmatpush.msrb.mxu2 %v190_v13  ;;  %v305_v10 = vld [vmem:[%s7808_s3 + $0x528] sm:$0xff] }
  0x4c   :  { %849 = vmatpush.msra.mxu0 %v303_v63  ;;  %875 = vmatpush.msra.mxu1 %v559_v0  ;;  %v337_v0 = vld [vmem:[%s7808_s3 + $0x628] sm:$0xff] }
  0x4d   :  { %830 = vmatpush.msrb.mxu3 %v446_v14  ;;  %805 = vmatpush.msrb.mxu2 %v174_v23  ;;  %v288_v14 = vld [vmem:[%s7808_s3 + $0x4a0] sm:$0xff]  ;;  %v529_v23 = vld [vmem:[%s7808_s3 + $0xc28] sm:$0xff] }
  0x4e   :  { %850 = vmatpush.msra.mxu0 %v287_v3  ;;  %876 = vmatpush.msra.mxu1 %v543_v4  ;;  %v576_v3 = vld [vmem:[%s7808_s3 + $0xda0] sm:$0xff]  ;;  %v321_v4 = vld [vmem:[%s7808_s3 + $0x5a8] sm:$0xff] }
  0x4f   :  { %831 = vmatpush.msrb.mxu3 %v430_v24  ;;  %806 = vmatpush.msrb.mxu2 %v158_v27  ;;  %v256_v24 = vld [vmem:[%s7808_s3 + $0x3a0] sm:$0xff]  ;;  %v513_v27 = vld [vmem:[%s7808_s3 + $0xba8] sm:$0xff] }
  0x50   :  { %851 = vmatpush.msra.mxu0 %v271_v7  ;;  %877 = vmatpush.msra.mxu1 %v527_v8  ;;  %v560_v7 = vld [vmem:[%s7808_s3 + $0xd20] sm:$0xff] }
  0x51   :  { %832 = vmatpush.msrb.mxu3 %v414_v28  ;;  %807 = vmatpush.msrb.mxu2 %v142_v31  ;;  %v240_v28 = vld [vmem:[%s7808_s3 + $0x320] sm:$0xff]  ;;  %v497_v31 = vld [vmem:[%s7808_s3 + $0xb28] sm:$0xff] }
  0x52   :  { %852 = vmatpush.msra.mxu0 %v255_v11  ;;  %878 = vmatpush.msra.mxu1 %v511_v12  ;;  %v561_v11 = vld [vmem:[%s7808_s3 + $0xd28] sm:$0xff] }
  0x53   :  { %833 = vmatpush.msrb.mxu3 %v398_v32  ;;  %v224_v32 = vld [vmem:[%s7808_s3 + $0x2a0] sm:$0xff] }
  0x54   :  { %853 = vmatpush.msra.mxu0 %v239_v15  ;;  %879 = vmatpush.msra.mxu1 %v495_v16  ;;  %v544_v15 = vld [vmem:[%s7808_s3 + $0xca0] sm:$0xff]  ;;  %v289_v16 = vld [vmem:[%s7808_s3 + $0x4a8] sm:$0xff] }
  0x56   :  { %854 = vmatpush.msra.mxu0 %v223_v17  ;;  %880 = vmatpush.msra.mxu1 %v479_v18  ;;  %v545_v17 = vld [vmem:[%s7808_s3 + $0xca8] sm:$0xff]  ;;  %v272_v18 = vld [vmem:[%s7808_s3 + $0x420] sm:$0xff] }
  0x58   :  { %855 = vmatpush.msra.mxu0 %v207_v19  ;;  %881 = vmatpush.msra.mxu1 %v463_v20  ;;  %v528_v19 = vld [vmem:[%s7808_s3 + $0xc20] sm:$0xff] }
  0x5a   :  { %856 = vmatpush.msra.mxu0 %v191_v21  ;;  %882 = vmatpush.msra.mxu1 %v447_v22  ;;  %v273_v22 = vld [vmem:[%s7808_s3 + $0x428] sm:$0xff] }
  0x5c   :  { %857 = vmatpush.msra.mxu0 %v175_v25  ;;  %883 = vmatpush.msra.mxu1 %v431_v26  ;;  %v512_v25 = vld [vmem:[%s7808_s3 + $0xba0] sm:$0xff]  ;;  %v257_v26 = vld [vmem:[%s7808_s3 + $0x3a8] sm:$0xff] }
  0x5e   :  { %858 = vmatpush.msra.mxu0 %v159_v29  ;;  %884 = vmatpush.msra.mxu1 %v415_v30  ;;  %v496_v29 = vld [vmem:[%s7808_s3 + $0xb20] sm:$0xff]  ;;  %v241_v30 = vld [vmem:[%s7808_s3 + $0x328] sm:$0xff] }
  0x60   :  { %859 = vmatpush.msra.mxu0 %v143_v33  ;;  %885 = vmatpush.msra.mxu1 %v399_v34  ;;  %v480_v33 = vld [vmem:[%s7808_s3 + $0xaa0] sm:$0xff]  ;;  %v225_v34 = vld [vmem:[%s7808_s3 + $0x2a8] sm:$0xff] }
  0x9e   :  { %v99_v38 = vpop.f32.mrf.mxu0  ;;  %v125_v39 = vpop.f32.mrf.mxu1 }
  0x9f   :  { %v100_v40 = vadd.f32 %v99_v38, %v5385_v36  ;;  %v126_v41 = vadd.f32 %v125_v39, %v5387_v37  ;;  %v209_v38 = vld [vmem:[%s7808_s3 + $0x228] sm:$0xff] }
  0xa0   :  { %v465_v39 = vld [vmem:[%s7808_s3 + $0xa28] sm:$0xff] }
  0xa1   :  { %v5391_v42 = vmax.f32 %v100_v40, 0.0  ;;  %v5393_v43 = vmax.f32 %v126_v41, 0.0  ;;  %v192_v40 = vld [vmem:[%s7808_s3 + $0x1a0] sm:$0xff] }
  0xa2   :  { %v448_v41 = vld [vmem:[%s7808_s3 + $0x9a0] sm:$0xff] }
  0xa3   :  { %704 = vmatmul.f32.vlgmr.msra.gmra.mxu2 %v5391_v42  ;;  %730 = vmatmul.f32.vlgmr.msra.gmra.mxu3 %v5393_v43 }
  0xa4   :  { %756 = vmatmul.f32.vlgmr.msrb.gmra.mxu0 %v5391_v42  ;;  %782 = vmatmul.f32.vlgmr.msrb.gmra.mxu1 %v5393_v43 }
  0xa5   :  { %896 = vmatpush.msra.mxu2 %v384_v44  ;;  %922 = vmatpush.msra.mxu3 %v640_v45  ;;  %v193_v44 = vld [vmem:[%s7808_s3 + $0x1a8] sm:$0xff] }
  0xa6   :  { %948 = vmatpush.msrb.mxu0 %v385_v46  ;;  %974 = vmatpush.msrb.mxu1 %v641_v47  ;;  %v102_v52 = vpop.f32.mrf.mxu0  ;;  %v128_v53 = vpop.f32.mrf.mxu1  ;;  %v449_v45 = vld [vmem:[%s7808_s3 + $0x9a8] sm:$0xff]  ;;  %v176_v46 = vld [vmem:[%s7808_s3 + $0x120] sm:$0xff] }
  0xa7   :  { %897 = vmatpush.msra.mxu2 %v368_v48  ;;  %923 = vmatpush.msra.mxu3 %v624_v49  ;;  %v103_v56 = vadd.f32 %v102_v52, %v5385_v36  ;;  %v129_v57 = vadd.f32 %v128_v53, %v5387_v37  ;;  %v432_v47 = vld [vmem:[%s7808_s3 + $0x920] sm:$0xff]  ;;  %v177_v48 = vld [vmem:[%s7808_s3 + $0x128] sm:$0xff] }
  0xa8   :  { %949 = vmatpush.msrb.mxu0 %v369_v50  ;;  %975 = vmatpush.msrb.mxu1 %v625_v51  ;;  %v433_v49 = vld [vmem:[%s7808_s3 + $0x928] sm:$0xff]  ;;  %v160_v50 = vld [vmem:[%s7808_s3 + $0xa0] sm:$0xff] }
  0xa9   :  { %v5443_v62 = vmax.f32 %v103_v56, 0.0  ;;  %v5445_v63 = vmax.f32 %v129_v57, 0.0  ;;  %898 = vmatpush.msra.mxu2 %v352_v54  ;;  %924 = vmatpush.msra.mxu3 %v608_v55  ;;  %v416_v51 = vld [vmem:[%s7808_s3 + $0x8a0] sm:$0xff]  ;;  %v161_v52 = vld [vmem:[%s7808_s3 + $0xa8] sm:$0xff] }
  0xaa   :  { %950 = vmatpush.msrb.mxu0 %v353_v58  ;;  %976 = vmatpush.msrb.mxu1 %v609_v59  ;;  %v417_v53 = vld [vmem:[%s7808_s3 + $0x8a8] sm:$0xff]  ;;  %v144_v54 = vld [vmem:[%s7808_s3 + $0x20] sm:$0xff]  ;;  %v386_v58 = vld [vmem:[%s7808_s3 + $0x7b0] sm:$0xff] }
  0xab   :  { %899 = vmatpush.msra.mxu2 %v336_v60  ;;  %925 = vmatpush.msra.mxu3 %v592_v61  ;;  %v400_v55 = vld [vmem:[%s7808_s3 + $0x820] sm:$0xff]  ;;  %v145_v56 = vld [vmem:[%s7808_s3 + $0x28] sm:$0xff]  ;;  %v642_v59 = vld [vmem:[%s7808_s3 + $0xfb0] sm:$0xff] }
  0xac   :  { %951 = vmatpush.msrb.mxu0 %v337_v0  ;;  %977 = vmatpush.msrb.mxu1 %v593_v1  ;;  %v401_v57 = vld [vmem:[%s7808_s3 + $0x828] sm:$0xff]  ;;  %v387_v60 = vld [vmem:[%s7808_s3 + $0x7b8] sm:$0xff]  ;;  %v370_v0 = vld [vmem:[%s7808_s3 + $0x730] sm:$0xff] }
  0xad   :  { %707 = vmatmul.f32.gmra.mxu2 %v5443_v62  ;;  %733 = vmatmul.f32.gmra.mxu3 %v5445_v63  ;;  %v643_v61 = vld [vmem:[%s7808_s3 + $0xfb8] sm:$0xff]  ;;  %v626_v1 = vld [vmem:[%s7808_s3 + $0xf30] sm:$0xff] }
  0xae   :  { %759 = vmatmul.f32.gmra.mxu0 %v5443_v62  ;;  %785 = vmatmul.f32.gmra.mxu1 %v5445_v63  ;;  %v105_v8 = vpop.f32.mrf.mxu0  ;;  %v131_v9 = vpop.f32.mrf.mxu1 }
  0xaf   :  { %900 = vmatpush.msra.mxu2 %v320_v2  ;;  %926 = vmatpush.msra.mxu3 %v576_v3  ;;  %v106_v12 = vadd.f32 %v105_v8, %v5385_v36  ;;  %v132_v13 = vadd.f32 %v131_v9, %v5387_v37  ;;  %v208_v36 = vld [vmem:[%s7808_s3 + $0x220] sm:$0xff]  ;;  %v371_v2 = vld [vmem:[%s7808_s3 + $0x738] sm:$0xff]  ;;  %v338_v8 = vld [vmem:[%s7808_s3 + $0x630] sm:$0xff] }
  0xb0   :  { %952 = vmatpush.msrb.mxu0 %v321_v4  ;;  %978 = vmatpush.msrb.mxu1 %v577_v5  ;;  %v464_v37 = vld [vmem:[%s7808_s3 + $0xa20] sm:$0xff]  ;;  %v627_v3 = vld [vmem:[%s7808_s3 + $0xf38] sm:$0xff]  ;;  %v354_v4 = vld [vmem:[%s7808_s3 + $0x6b0] sm:$0xff] }
  0xb1   :  { %901 = vmatpush.msra.mxu2 %v304_v6  ;;  %927 = vmatpush.msra.mxu3 %v560_v7  ;;  %v5501_v20 = vmax.f32 %v106_v12, 0.0  ;;  %v5503_v21 = vmax.f32 %v132_v13, 0.0  ;;  %v610_v5 = vld [vmem:[%s7808_s3 + $0xeb0] sm:$0xff]  ;;  %v355_v6 = vld [vmem:[%s7808_s3 + $0x6b8] sm:$0xff] }
  0xb2   :  { %953 = vmatpush.msrb.mxu0 %v305_v10  ;;  %979 = vmatpush.msrb.mxu1 %v561_v11  ;;  %v611_v7 = vld [vmem:[%s7808_s3 + $0xeb8] sm:$0xff]  ;;  %v594_v9 = vld [vmem:[%s7808_s3 + $0xe30] sm:$0xff] }
  0xb3   :  { %902 = vmatpush.msra.mxu2 %v288_v14  ;;  %928 = vmatpush.msra.mxu3 %v544_v15  ;;  %v339_v10 = vld [vmem:[%s7808_s3 + $0x638] sm:$0xff]  ;;  %v322_v12 = vld [vmem:[%s7808_s3 + $0x5b0] sm:$0xff] }
  0xb4   :  { %954 = vmatpush.msrb.mxu0 %v289_v16  ;;  %980 = vmatpush.msrb.mxu1 %v545_v17  ;;  %v595_v11 = vld [vmem:[%s7808_s3 + $0xe38] sm:$0xff]  ;;  %v578_v13 = vld [vmem:[%s7808_s3 + $0xdb0] sm:$0xff] }
  0xb5   :  { %903 = vmatpush.msra.mxu2 %v272_v18  ;;  %929 = vmatpush.msra.mxu3 %v528_v19  ;;  %v323_v14 = vld [vmem:[%s7808_s3 + $0x5b8] sm:$0xff]  ;;  %v306_v16 = vld [vmem:[%s7808_s3 + $0x530] sm:$0xff] }
  0xb6   :  { %955 = vmatpush.msrb.mxu0 %v273_v22  ;;  %981 = vmatpush.msrb.mxu1 %v529_v23  ;;  %v579_v15 = vld [vmem:[%s7808_s3 + $0xdb8] sm:$0xff]  ;;  %v562_v17 = vld [vmem:[%s7808_s3 + $0xd30] sm:$0xff] }
  0xb7   :  { %710 = vmatmul.f32.gmra.mxu2 %v5501_v20  ;;  %736 = vmatmul.f32.gmra.mxu3 %v5503_v21  ;;  %v307_v18 = vld [vmem:[%s7808_s3 + $0x538] sm:$0xff]  ;;  %v290_v22 = vld [vmem:[%s7808_s3 + $0x4b0] sm:$0xff] }
  0xb8   :  { %762 = vmatmul.f32.gmra.mxu0 %v5501_v20  ;;  %788 = vmatmul.f32.gmra.mxu1 %v5503_v21  ;;  %v563_v19 = vld [vmem:[%s7808_s3 + $0xd38] sm:$0xff]  ;;  %v546_v23 = vld [vmem:[%s7808_s3 + $0xcb0] sm:$0xff] }
  0xb9   :  { %904 = vmatpush.msra.mxu2 %v256_v24  ;;  %930 = vmatpush.msra.mxu3 %v512_v25  ;;  %v291_v24 = vld [vmem:[%s7808_s3 + $0x4b8] sm:$0xff] }
  0xba   :  { %956 = vmatpush.msrb.mxu0 %v257_v26  ;;  %982 = vmatpush.msrb.mxu1 %v513_v27  ;;  %v547_v25 = vld [vmem:[%s7808_s3 + $0xcb8] sm:$0xff]  ;;  %v274_v26 = vld [vmem:[%s7808_s3 + $0x430] sm:$0xff] }
  0xbb   :  { %905 = vmatpush.msra.mxu2 %v240_v28  ;;  %931 = vmatpush.msra.mxu3 %v496_v29  ;;  %v530_v27 = vld [vmem:[%s7808_s3 + $0xc30] sm:$0xff]  ;;  %v275_v28 = vld [vmem:[%s7808_s3 + $0x438] sm:$0xff] }
  0xbc   :  { %957 = vmatpush.msrb.mxu0 %v241_v30  ;;  %983 = vmatpush.msrb.mxu1 %v497_v31  ;;  %v531_v29 = vld [vmem:[%s7808_s3 + $0xc38] sm:$0xff]  ;;  %v258_v30 = vld [vmem:[%s7808_s3 + $0x3b0] sm:$0xff] }
  0xbd   :  { %906 = vmatpush.msra.mxu2 %v224_v32  ;;  %932 = vmatpush.msra.mxu3 %v480_v33  ;;  %v514_v31 = vld [vmem:[%s7808_s3 + $0xbb0] sm:$0xff]  ;;  %v259_v32 = vld [vmem:[%s7808_s3 + $0x3b8] sm:$0xff] }
  0xbe   :  { %958 = vmatpush.msrb.mxu0 %v225_v34  ;;  %984 = vmatpush.msrb.mxu1 %v481_v35  ;;  %v515_v33 = vld [vmem:[%s7808_s3 + $0xbb8] sm:$0xff]  ;;  %v242_v34 = vld [vmem:[%s7808_s3 + $0x330] sm:$0xff] }
  0xbf   :  { %907 = vmatpush.msra.mxu2 %v208_v36  ;;  %933 = vmatpush.msra.mxu3 %v464_v37  ;;  %v498_v35 = vld [vmem:[%s7808_s3 + $0xb30] sm:$0xff]  ;;  %v243_v36 = vld [vmem:[%s7808_s3 + $0x338] sm:$0xff] }
  0xc0   :  { %959 = vmatpush.msrb.mxu0 %v209_v38  ;;  %985 = vmatpush.msrb.mxu1 %v465_v39  ;;  %v499_v37 = vld [vmem:[%s7808_s3 + $0xb38] sm:$0xff]  ;;  %v226_v38 = vld [vmem:[%s7808_s3 + $0x2b0] sm:$0xff] }
  0xc1   :  { %808 = vmatmul.f32.vlgmr.msrb.gmra.mxu2 %v5391_v42  ;;  %834 = vmatmul.f32.vlgmr.msrb.gmra.mxu3 %v5393_v43  ;;  %v482_v39 = vld [vmem:[%s7808_s3 + $0xab0] sm:$0xff] }
  0xc2   :  { %860 = vmatmul.f32.vlgmr.msra.gmra.mxu0 %v5391_v42  ;;  %886 = vmatmul.f32.vlgmr.msra.gmra.mxu1 %v5393_v43 }
  0xc3   :  { %908 = vmatpush.msra.mxu2 %v192_v40  ;;  %934 = vmatpush.msra.mxu3 %v448_v41  ;;  %v227_v40 = vld [vmem:[%s7808_s3 + $0x2b8] sm:$0xff] }
  0xc4   :  { %960 = vmatpush.msrb.mxu0 %v193_v44  ;;  %986 = vmatpush.msrb.mxu1 %v449_v45  ;;  %v483_v41 = vld [vmem:[%s7808_s3 + $0xab8] sm:$0xff]  ;;  %v210_v44 = vld [vmem:[%s7808_s3 + $0x230] sm:$0xff] }
  0xc5   :  { %909 = vmatpush.msra.mxu2 %v176_v46  ;;  %935 = vmatpush.msra.mxu3 %v432_v47  ;;  %v466_v45 = vld [vmem:[%s7808_s3 + $0xa30] sm:$0xff]  ;;  %v211_v46 = vld [vmem:[%s7808_s3 + $0x238] sm:$0xff] }
  0xc6   :  { %961 = vmatpush.msrb.mxu0 %v177_v48  ;;  %987 = vmatpush.msrb.mxu1 %v433_v49  ;;  %v467_v47 = vld [vmem:[%s7808_s3 + $0xa38] sm:$0xff]  ;;  %v194_v48 = vld [vmem:[%s7808_s3 + $0x1b0] sm:$0xff] }
  0xc7   :  { %910 = vmatpush.msra.mxu2 %v160_v50  ;;  %936 = vmatpush.msra.mxu3 %v416_v51  ;;  %v450_v49 = vld [vmem:[%s7808_s3 + $0x9b0] sm:$0xff]  ;;  %v195_v50 = vld [vmem:[%s7808_s3 + $0x1b8] sm:$0xff] }
  0xc8   :  { %962 = vmatpush.msrb.mxu0 %v161_v52  ;;  %988 = vmatpush.msrb.mxu1 %v417_v53  ;;  %v451_v51 = vld [vmem:[%s7808_s3 + $0x9b8] sm:$0xff]  ;;  %v178_v52 = vld [vmem:[%s7808_s3 + $0x130] sm:$0xff] }
  0xc9   :  { %911 = vmatpush.msra.mxu2 %v144_v54  ;;  %937 = vmatpush.msra.mxu3 %v400_v55  ;;  %v434_v53 = vld [vmem:[%s7808_s3 + $0x930] sm:$0xff]  ;;  %v179_v54 = vld [vmem:[%s7808_s3 + $0x138] sm:$0xff] }
  0xca   :  { %963 = vmatpush.msrb.mxu0 %v145_v56  ;;  %989 = vmatpush.msrb.mxu1 %v401_v57  ;;  %v435_v55 = vld [vmem:[%s7808_s3 + $0x938] sm:$0xff]  ;;  %v162_v56 = vld [vmem:[%s7808_s3 + $0xb0] sm:$0xff] }
  0xcb   :  { %1000 = vmatpush.msrb.mxu2 %v386_v58  ;;  %1026 = vmatpush.msrb.mxu3 %v642_v59  ;;  %v418_v57 = vld [vmem:[%s7808_s3 + $0x8b0] sm:$0xff]  ;;  %v163_v58 = vld [vmem:[%s7808_s3 + $0xb8] sm:$0xff] }
  0xcc   :  { %1052 = vmatpush.msra.mxu0 %v387_v60  ;;  %1078 = vmatpush.msra.mxu1 %v643_v61  ;;  %v419_v59 = vld [vmem:[%s7808_s3 + $0x8b8] sm:$0xff]  ;;  %v146_v60 = vld [vmem:[%s7808_s3 + $0x30] sm:$0xff] }
  0xcd   :  { %811 = vmatmul.f32.gmra.mxu2 %v5443_v62  ;;  %837 = vmatmul.f32.gmra.mxu3 %v5445_v63  ;;  %v402_v61 = vld [vmem:[%s7808_s3 + $0x830] sm:$0xff] }
  0xce   :  { %863 = vmatmul.f32.gmra.mxu0 %v5443_v62  ;;  %889 = vmatmul.f32.gmra.mxu1 %v5445_v63 }
  0xcf   :  { %1001 = vmatpush.msrb.mxu2 %v370_v0  ;;  %1027 = vmatpush.msrb.mxu3 %v626_v1  ;;  %v147_v0 = vld [vmem:[%s7808_s3 + $0x38] sm:$0xff] }
  0xd0   :  { %1053 = vmatpush.msra.mxu0 %v371_v2  ;;  %1079 = vmatpush.msra.mxu1 %v627_v3  ;;  %v403_v1 = vld [vmem:[%s7808_s3 + $0x838] sm:$0xff]  ;;  %v388_v2 = vld [vmem:[%s7808_s3 + $0x7c0] sm:$0xff] }
  0xd1   :  { %1002 = vmatpush.msrb.mxu2 %v354_v4  ;;  %1028 = vmatpush.msrb.mxu3 %v610_v5  ;;  %v644_v3 = vld [vmem:[%s7808_s3 + $0xfc0] sm:$0xff]  ;;  %v389_v4 = vld [vmem:[%s7808_s3 + $0x7c8] sm:$0xff] }
  0xd2   :  { %1054 = vmatpush.msra.mxu0 %v355_v6  ;;  %1080 = vmatpush.msra.mxu1 %v611_v7  ;;  %v645_v5 = vld [vmem:[%s7808_s3 + $0xfc8] sm:$0xff]  ;;  %v372_v6 = vld [vmem:[%s7808_s3 + $0x740] sm:$0xff] }
  0xd3   :  { %1003 = vmatpush.msrb.mxu2 %v338_v8  ;;  %1029 = vmatpush.msrb.mxu3 %v594_v9  ;;  %v628_v7 = vld [vmem:[%s7808_s3 + $0xf40] sm:$0xff]  ;;  %v373_v8 = vld [vmem:[%s7808_s3 + $0x748] sm:$0xff] }
  0xd4   :  { %1055 = vmatpush.msra.mxu0 %v339_v10  ;;  %1081 = vmatpush.msra.mxu1 %v595_v11  ;;  %v629_v9 = vld [vmem:[%s7808_s3 + $0xf48] sm:$0xff]  ;;  %v356_v10 = vld [vmem:[%s7808_s3 + $0x6c0] sm:$0xff] }
  0xd5   :  { %1004 = vmatpush.msrb.mxu2 %v322_v12  ;;  %1030 = vmatpush.msrb.mxu3 %v578_v13  ;;  %v612_v11 = vld [vmem:[%s7808_s3 + $0xec0] sm:$0xff]  ;;  %v357_v12 = vld [vmem:[%s7808_s3 + $0x6c8] sm:$0xff] }
  0xd6   :  { %1056 = vmatpush.msra.mxu0 %v323_v14  ;;  %1082 = vmatpush.msra.mxu1 %v579_v15  ;;  %v613_v13 = vld [vmem:[%s7808_s3 + $0xec8] sm:$0xff]  ;;  %v340_v14 = vld [vmem:[%s7808_s3 + $0x640] sm:$0xff] }
  0xd7   :  { %814 = vmatmul.f32.gmra.mxu2 %v5501_v20  ;;  %840 = vmatmul.f32.gmra.mxu3 %v5503_v21  ;;  %v596_v15 = vld [vmem:[%s7808_s3 + $0xe40] sm:$0xff] }
  0xd8   :  { %866 = vmatmul.f32.gmra.mxu0 %v5501_v20  ;;  %892 = vmatmul.f32.gmra.mxu1 %v5503_v21 }
  0xd9   :  { %1005 = vmatpush.msrb.mxu2 %v306_v16  ;;  %1031 = vmatpush.msrb.mxu3 %v562_v17  ;;  %v341_v16 = vld [vmem:[%s7808_s3 + $0x648] sm:$0xff] }
  0xda   :  { %1057 = vmatpush.msra.mxu0 %v307_v18  ;;  %1083 = vmatpush.msra.mxu1 %v563_v19  ;;  %v597_v17 = vld [vmem:[%s7808_s3 + $0xe48] sm:$0xff]  ;;  %v324_v18 = vld [vmem:[%s7808_s3 + $0x5c0] sm:$0xff] }
  0xdb   :  { %1006 = vmatpush.msrb.mxu2 %v290_v22  ;;  %1032 = vmatpush.msrb.mxu3 %v546_v23  ;;  %v580_v19 = vld [vmem:[%s7808_s3 + $0xdc0] sm:$0xff]  ;;  %v325_v22 = vld [vmem:[%s7808_s3 + $0x5c8] sm:$0xff] }
  0xdc   :  { %1058 = vmatpush.msra.mxu0 %v291_v24  ;;  %1084 = vmatpush.msra.mxu1 %v547_v25  ;;  %v581_v23 = vld [vmem:[%s7808_s3 + $0xdc8] sm:$0xff]  ;;  %v308_v24 = vld [vmem:[%s7808_s3 + $0x540] sm:$0xff] }
  0xdd   :  { %1007 = vmatpush.msrb.mxu2 %v274_v26  ;;  %1033 = vmatpush.msrb.mxu3 %v530_v27  ;;  %v564_v25 = vld [vmem:[%s7808_s3 + $0xd40] sm:$0xff]  ;;  %v309_v26 = vld [vmem:[%s7808_s3 + $0x548] sm:$0xff] }
  0xde   :  { %1059 = vmatpush.msra.mxu0 %v275_v28  ;;  %1085 = vmatpush.msra.mxu1 %v531_v29  ;;  %v565_v27 = vld [vmem:[%s7808_s3 + $0xd48] sm:$0xff]  ;;  %v292_v28 = vld [vmem:[%s7808_s3 + $0x4c0] sm:$0xff] }
  0xdf   :  { %1008 = vmatpush.msrb.mxu2 %v258_v30  ;;  %1034 = vmatpush.msrb.mxu3 %v514_v31  ;;  %v548_v29 = vld [vmem:[%s7808_s3 + $0xcc0] sm:$0xff]  ;;  %v293_v30 = vld [vmem:[%s7808_s3 + $0x4c8] sm:$0xff] }
  0xe0   :  { %1060 = vmatpush.msra.mxu0 %v259_v32  ;;  %1086 = vmatpush.msra.mxu1 %v515_v33  ;;  %v549_v31 = vld [vmem:[%s7808_s3 + $0xcc8] sm:$0xff]  ;;  %v276_v32 = vld [vmem:[%s7808_s3 + $0x440] sm:$0xff] }
  0xe1   :  { %912 = vmatmul.f32.vlgmr.msra.gmra.mxu2 %v5391_v42  ;;  %938 = vmatmul.f32.vlgmr.msra.gmra.mxu3 %v5393_v43  ;;  %v532_v33 = vld [vmem:[%s7808_s3 + $0xc40] sm:$0xff] }
  0xe2   :  { %964 = vmatmul.f32.vlgmr.msrb.gmra.mxu0 %v5391_v42  ;;  %990 = vmatmul.f32.vlgmr.msrb.gmra.mxu1 %v5393_v43 }
  0xe3   :  { %1009 = vmatpush.msrb.mxu2 %v242_v34  ;;  %1035 = vmatpush.msrb.mxu3 %v498_v35  ;;  %v277_v34 = vld [vmem:[%s7808_s3 + $0x448] sm:$0xff] }
  0xe4   :  { %1061 = vmatpush.msra.mxu0 %v243_v36  ;;  %1087 = vmatpush.msra.mxu1 %v499_v37  ;;  %v533_v35 = vld [vmem:[%s7808_s3 + $0xc48] sm:$0xff]  ;;  %v260_v36 = vld [vmem:[%s7808_s3 + $0x3c0] sm:$0xff] }
  0xe5   :  { %1010 = vmatpush.msrb.mxu2 %v226_v38  ;;  %1036 = vmatpush.msrb.mxu3 %v482_v39  ;;  %v516_v37 = vld [vmem:[%s7808_s3 + $0xbc0] sm:$0xff]  ;;  %v261_v38 = vld [vmem:[%s7808_s3 + $0x3c8] sm:$0xff] }
  0xe6   :  { %1062 = vmatpush.msra.mxu0 %v227_v40  ;;  %1088 = vmatpush.msra.mxu1 %v483_v41  ;;  %v517_v39 = vld [vmem:[%s7808_s3 + $0xbc8] sm:$0xff]  ;;  %v244_v40 = vld [vmem:[%s7808_s3 + $0x340] sm:$0xff] }
  0xe7   :  { %1011 = vmatpush.msrb.mxu2 %v210_v44  ;;  %1037 = vmatpush.msrb.mxu3 %v466_v45  ;;  %v500_v41 = vld [vmem:[%s7808_s3 + $0xb40] sm:$0xff]  ;;  %v245_v44 = vld [vmem:[%s7808_s3 + $0x348] sm:$0xff] }
  0xe8   :  { %1063 = vmatpush.msra.mxu0 %v211_v46  ;;  %1089 = vmatpush.msra.mxu1 %v467_v47  ;;  %v501_v45 = vld [vmem:[%s7808_s3 + $0xb48] sm:$0xff]  ;;  %v228_v46 = vld [vmem:[%s7808_s3 + $0x2c0] sm:$0xff] }
  0xe9   :  { %1012 = vmatpush.msrb.mxu2 %v194_v48  ;;  %1038 = vmatpush.msrb.mxu3 %v450_v49  ;;  %v484_v47 = vld [vmem:[%s7808_s3 + $0xac0] sm:$0xff]  ;;  %v229_v48 = vld [vmem:[%s7808_s3 + $0x2c8] sm:$0xff] }
  0xea   :  { %1064 = vmatpush.msra.mxu0 %v195_v50  ;;  %1090 = vmatpush.msra.mxu1 %v451_v51  ;;  %v485_v49 = vld [vmem:[%s7808_s3 + $0xac8] sm:$0xff]  ;;  %v212_v50 = vld [vmem:[%s7808_s3 + $0x240] sm:$0xff] }
  0xeb   :  { %915 = vmatmul.f32.gmra.mxu2 %v5443_v62  ;;  %941 = vmatmul.f32.gmra.mxu3 %v5445_v63  ;;  %v468_v51 = vld [vmem:[%s7808_s3 + $0xa40] sm:$0xff] }
  0xec   :  { %967 = vmatmul.f32.gmra.mxu0 %v5443_v62  ;;  %993 = vmatmul.f32.gmra.mxu1 %v5445_v63 }
  0xed   :  { %1013 = vmatpush.msrb.mxu2 %v178_v52  ;;  %1039 = vmatpush.msrb.mxu3 %v434_v53  ;;  %v213_v52 = vld [vmem:[%s7808_s3 + $0x248] sm:$0xff] }
  0xee   :  { %1065 = vmatpush.msra.mxu0 %v179_v54  ;;  %1091 = vmatpush.msra.mxu1 %v435_v55  ;;  %v469_v53 = vld [vmem:[%s7808_s3 + $0xa48] sm:$0xff]  ;;  %v196_v54 = vld [vmem:[%s7808_s3 + $0x1c0] sm:$0xff] }
  0xef   :  { %1014 = vmatpush.msrb.mxu2 %v162_v56  ;;  %1040 = vmatpush.msrb.mxu3 %v418_v57  ;;  %v452_v55 = vld [vmem:[%s7808_s3 + $0x9c0] sm:$0xff]  ;;  %v197_v56 = vld [vmem:[%s7808_s3 + $0x1c8] sm:$0xff] }
  0xf0   :  { %1066 = vmatpush.msra.mxu0 %v163_v58  ;;  %1092 = vmatpush.msra.mxu1 %v419_v59  ;;  %v453_v57 = vld [vmem:[%s7808_s3 + $0x9c8] sm:$0xff]  ;;  %v180_v58 = vld [vmem:[%s7808_s3 + $0x140] sm:$0xff] }
  0xf1   :  { %1015 = vmatpush.msrb.mxu2 %v146_v60  ;;  %1041 = vmatpush.msrb.mxu3 %v402_v61  ;;  %v436_v59 = vld [vmem:[%s7808_s3 + $0x940] sm:$0xff]  ;;  %v181_v60 = vld [vmem:[%s7808_s3 + $0x148] sm:$0xff] }
  0xf2   :  { %1067 = vmatpush.msra.mxu0 %v147_v0  ;;  %1093 = vmatpush.msra.mxu1 %v403_v1  ;;  %v437_v61 = vld [vmem:[%s7808_s3 + $0x948] sm:$0xff]  ;;  %v164_v0 = vld [vmem:[%s7808_s3 + $0xc0] sm:$0xff] }
  0xf3   :  { %1104 = vmatpush.msra.mxu2 %v388_v2  ;;  %1130 = vmatpush.msra.mxu3 %v644_v3  ;;  %v420_v1 = vld [vmem:[%s7808_s3 + $0x8c0] sm:$0xff]  ;;  %v165_v2 = vld [vmem:[%s7808_s3 + $0xc8] sm:$0xff] }
  0xf4   :  { %1156 = vmatpush.msrb.mxu0 %v389_v4  ;;  %1182 = vmatpush.msrb.mxu1 %v645_v5  ;;  %v421_v3 = vld [vmem:[%s7808_s3 + $0x8c8] sm:$0xff]  ;;  %v148_v4 = vld [vmem:[%s7808_s3 + $0x40] sm:$0xff] }
  0xf5   :  { %918 = vmatmul.f32.gmra.mxu2 %v5501_v20  ;;  %944 = vmatmul.f32.gmra.mxu3 %v5503_v21  ;;  %v404_v5 = vld [vmem:[%s7808_s3 + $0x840] sm:$0xff] }
  0xf6   :  { %970 = vmatmul.f32.gmra.mxu0 %v5501_v20  ;;  %996 = vmatmul.f32.gmra.mxu1 %v5503_v21 }
  0xf7   :  { %1105 = vmatpush.msra.mxu2 %v372_v6  ;;  %1131 = vmatpush.msra.mxu3 %v628_v7  ;;  %v149_v6 = vld [vmem:[%s7808_s3 + $0x48] sm:$0xff] }
  0xf8   :  { %1157 = vmatpush.msrb.mxu0 %v373_v8  ;;  %1183 = vmatpush.msrb.mxu1 %v629_v9  ;;  %v405_v7 = vld [vmem:[%s7808_s3 + $0x848] sm:$0xff]  ;;  %v390_v8 = vld [vmem:[%s7808_s3 + $0x7d0] sm:$0xff] }
  0xf9   :  { %1106 = vmatpush.msra.mxu2 %v356_v10  ;;  %1132 = vmatpush.msra.mxu3 %v612_v11  ;;  %v646_v9 = vld [vmem:[%s7808_s3 + $0xfd0] sm:$0xff]  ;;  %v391_v10 = vld [vmem:[%s7808_s3 + $0x7d8] sm:$0xff] }
  0xfa   :  { %1158 = vmatpush.msrb.mxu0 %v357_v12  ;;  %1184 = vmatpush.msrb.mxu1 %v613_v13  ;;  %v647_v11 = vld [vmem:[%s7808_s3 + $0xfd8] sm:$0xff]  ;;  %v374_v12 = vld [vmem:[%s7808_s3 + $0x750] sm:$0xff] }
  0xfb   :  { %1107 = vmatpush.msra.mxu2 %v340_v14  ;;  %1133 = vmatpush.msra.mxu3 %v596_v15  ;;  %v630_v13 = vld [vmem:[%s7808_s3 + $0xf50] sm:$0xff]  ;;  %v375_v14 = vld [vmem:[%s7808_s3 + $0x758] sm:$0xff] }
  0xfc   :  { %1159 = vmatpush.msrb.mxu0 %v341_v16  ;;  %1185 = vmatpush.msrb.mxu1 %v597_v17  ;;  %v631_v15 = vld [vmem:[%s7808_s3 + $0xf58] sm:$0xff]  ;;  %v358_v16 = vld [vmem:[%s7808_s3 + $0x6d0] sm:$0xff] }
  0xfd   :  { %1108 = vmatpush.msra.mxu2 %v324_v18  ;;  %1134 = vmatpush.msra.mxu3 %v580_v19  ;;  %v614_v17 = vld [vmem:[%s7808_s3 + $0xed0] sm:$0xff]  ;;  %v359_v18 = vld [vmem:[%s7808_s3 + $0x6d8] sm:$0xff] }
  0xfe   :  { %1160 = vmatpush.msrb.mxu0 %v325_v22  ;;  %1186 = vmatpush.msrb.mxu1 %v581_v23  ;;  %v615_v19 = vld [vmem:[%s7808_s3 + $0xed8] sm:$0xff]  ;;  %v342_v22 = vld [vmem:[%s7808_s3 + $0x650] sm:$0xff] }
  0xff   :  { %1016 = vmatmul.f32.vlgmr.msrb.gmra.mxu2 %v5391_v42  ;;  %1042 = vmatmul.f32.vlgmr.msrb.gmra.mxu3 %v5393_v43  ;;  %v598_v23 = vld [vmem:[%s7808_s3 + $0xe50] sm:$0xff] }
 0x100   :  { %1068 = vmatmul.f32.vlgmr.msra.gmra.mxu0 %v5391_v42  ;;  %1094 = vmatmul.f32.vlgmr.msra.gmra.mxu1 %v5393_v43 }
 0x101   :  { %1109 = vmatpush.msra.mxu2 %v308_v24  ;;  %1135 = vmatpush.msra.mxu3 %v564_v25  ;;  %v343_v24 = vld [vmem:[%s7808_s3 + $0x658] sm:$0xff] }
 0x102   :  { %1161 = vmatpush.msrb.mxu0 %v309_v26  ;;  %1187 = vmatpush.msrb.mxu1 %v565_v27  ;;  %v599_v25 = vld [vmem:[%s7808_s3 + $0xe58] sm:$0xff]  ;;  %v326_v26 = vld [vmem:[%s7808_s3 + $0x5d0] sm:$0xff] }
 0x103   :  { %1110 = vmatpush.msra.mxu2 %v292_v28  ;;  %1136 = vmatpush.msra.mxu3 %v548_v29  ;;  %v582_v27 = vld [vmem:[%s7808_s3 + $0xdd0] sm:$0xff]  ;;  %v327_v28 = vld [vmem:[%s7808_s3 + $0x5d8] sm:$0xff] }
 0x104   :  { %1162 = vmatpush.msrb.mxu0 %v293_v30  ;;  %1188 = vmatpush.msrb.mxu1 %v549_v31  ;;  %v583_v29 = vld [vmem:[%s7808_s3 + $0xdd8] sm:$0xff]  ;;  %v310_v30 = vld [vmem:[%s7808_s3 + $0x550] sm:$0xff] }
 0x105   :  { %1111 = vmatpush.msra.mxu2 %v276_v32  ;;  %1137 = vmatpush.msra.mxu3 %v532_v33  ;;  %v566_v31 = vld [vmem:[%s7808_s3 + $0xd50] sm:$0xff]  ;;  %v311_v32 = vld [vmem:[%s7808_s3 + $0x558] sm:$0xff] }
 0x106   :  { %1163 = vmatpush.msrb.mxu0 %v277_v34  ;;  %1189 = vmatpush.msrb.mxu1 %v533_v35  ;;  %v567_v33 = vld [vmem:[%s7808_s3 + $0xd58] sm:$0xff] }
 0x107   :  { %1112 = vmatpush.msra.mxu2 %v260_v36  ;;  %1138 = vmatpush.msra.mxu3 %v516_v37  ;;  %v294_v36 = vld [vmem:[%s7808_s3 + $0x4d0] sm:$0xff] }
 0x108   :  { %1164 = vmatpush.msrb.mxu0 %v261_v38  ;;  %1190 = vmatpush.msrb.mxu1 %v517_v39  ;;  %v550_v37 = vld [vmem:[%s7808_s3 + $0xcd0] sm:$0xff]  ;;  %v295_v38 = vld [vmem:[%s7808_s3 + $0x4d8] sm:$0xff] }
 0x109   :  { %1019 = vmatmul.f32.gmra.mxu2 %v5443_v62  ;;  %1045 = vmatmul.f32.gmra.mxu3 %v5445_v63  ;;  %v551_v39 = vld [vmem:[%s7808_s3 + $0xcd8] sm:$0xff] }
 0x10a   :  { %1071 = vmatmul.f32.gmra.mxu0 %v5443_v62  ;;  %1097 = vmatmul.f32.gmra.mxu1 %v5445_v63 }
 0x10b   :  { %1113 = vmatpush.msra.mxu2 %v244_v40  ;;  %1139 = vmatpush.msra.mxu3 %v500_v41  ;;  %v278_v40 = vld [vmem:[%s7808_s3 + $0x450] sm:$0xff] }
 0x10c   :  { %1165 = vmatpush.msrb.mxu0 %v245_v44  ;;  %1191 = vmatpush.msrb.mxu1 %v501_v45  ;;  %v534_v41 = vld [vmem:[%s7808_s3 + $0xc50] sm:$0xff]  ;;  %v279_v44 = vld [vmem:[%s7808_s3 + $0x458] sm:$0xff] }
 0x10d   :  { %1114 = vmatpush.msra.mxu2 %v228_v46  ;;  %1140 = vmatpush.msra.mxu3 %v484_v47  ;;  %v535_v45 = vld [vmem:[%s7808_s3 + $0xc58] sm:$0xff]  ;;  %v262_v46 = vld [vmem:[%s7808_s3 + $0x3d0] sm:$0xff] }
 0x10e   :  { %1166 = vmatpush.msrb.mxu0 %v229_v48  ;;  %1192 = vmatpush.msrb.mxu1 %v485_v49  ;;  %v518_v47 = vld [vmem:[%s7808_s3 + $0xbd0] sm:$0xff]  ;;  %v263_v48 = vld [vmem:[%s7808_s3 + $0x3d8] sm:$0xff] }
 0x10f   :  { %1115 = vmatpush.msra.mxu2 %v212_v50  ;;  %1141 = vmatpush.msra.mxu3 %v468_v51  ;;  %v519_v49 = vld [vmem:[%s7808_s3 + $0xbd8] sm:$0xff]  ;;  %v246_v50 = vld [vmem:[%s7808_s3 + $0x350] sm:$0xff] }
 0x110   :  { %1167 = vmatpush.msrb.mxu0 %v213_v52  ;;  %1193 = vmatpush.msrb.mxu1 %v469_v53  ;;  %v502_v51 = vld [vmem:[%s7808_s3 + $0xb50] sm:$0xff]  ;;  %v247_v52 = vld [vmem:[%s7808_s3 + $0x358] sm:$0xff] }
 0x111   :  { %1116 = vmatpush.msra.mxu2 %v196_v54  ;;  %1142 = vmatpush.msra.mxu3 %v452_v55  ;;  %v503_v53 = vld [vmem:[%s7808_s3 + $0xb58] sm:$0xff] }
 0x112   :  { %1168 = vmatpush.msrb.mxu0 %v197_v56  ;;  %1194 = vmatpush.msrb.mxu1 %v453_v57  ;;  %v230_v57 = vld [vmem:[%s7808_s3 + $0x2d0] sm:$0xff] }
 0x113   :  { %1022 = vmatmul.f32.gmra.mxu2 %v5501_v20  ;;  %1048 = vmatmul.f32.gmra.mxu3 %v5503_v21 }
 0x114   :  { %1074 = vmatmul.f32.gmra.mxu0 %v5501_v20  ;;  %1100 = vmatmul.f32.gmra.mxu1 %v5503_v21 }
 0x115   :  { %1117 = vmatpush.msra.mxu2 %v180_v58  ;;  %1143 = vmatpush.msra.mxu3 %v436_v59  ;;  %v486_v58 = vld [vmem:[%s7808_s3 + $0xad0] sm:$0xff] }
 0x116   :  { %1169 = vmatpush.msrb.mxu0 %v181_v60  ;;  %1195 = vmatpush.msrb.mxu1 %v437_v61  ;;  %v231_v60 = vld [vmem:[%s7808_s3 + $0x2d8] sm:$0xff] }
 0x117   :  { %1118 = vmatpush.msra.mxu2 %v164_v0  ;;  %1144 = vmatpush.msra.mxu3 %v420_v1  ;;  %v487_v61 = vld [vmem:[%s7808_s3 + $0xad8] sm:$0xff]  ;;  %v214_v0 = vld [vmem:[%s7808_s3 + $0x250] sm:$0xff] }
 0x118   :  { %1170 = vmatpush.msrb.mxu0 %v165_v2  ;;  %1196 = vmatpush.msrb.mxu1 %v421_v3  ;;  %v470_v1 = vld [vmem:[%s7808_s3 + $0xa50] sm:$0xff]  ;;  %v215_v2 = vld [vmem:[%s7808_s3 + $0x258] sm:$0xff] }
 0x119   :  { %1119 = vmatpush.msra.mxu2 %v148_v4  ;;  %1145 = vmatpush.msra.mxu3 %v404_v5  ;;  %v471_v3 = vld [vmem:[%s7808_s3 + $0xa58] sm:$0xff]  ;;  %v198_v4 = vld [vmem:[%s7808_s3 + $0x1d0] sm:$0xff] }
 0x11a   :  { %1171 = vmatpush.msrb.mxu0 %v149_v6  ;;  %1197 = vmatpush.msrb.mxu1 %v405_v7  ;;  %v454_v5 = vld [vmem:[%s7808_s3 + $0x9d0] sm:$0xff]  ;;  %v199_v6 = vld [vmem:[%s7808_s3 + $0x1d8] sm:$0xff] }
 0x11b   :  { %1208 = vmatpush.msrb.mxu2 %v390_v8  ;;  %1234 = vmatpush.msrb.mxu3 %v646_v9  ;;  %v455_v7 = vld [vmem:[%s7808_s3 + $0x9d8] sm:$0xff]  ;;  %v182_v8 = vld [vmem:[%s7808_s3 + $0x150] sm:$0xff] }
 0x11c   :  { %1260 = vmatpush.msra.mxu0 %v391_v10  ;;  %1286 = vmatpush.msra.mxu1 %v647_v11  ;;  %v438_v9 = vld [vmem:[%s7808_s3 + $0x950] sm:$0xff]  ;;  %v183_v10 = vld [vmem:[%s7808_s3 + $0x158] sm:$0xff] }
 0x11d   :  { %1209 = vmatpush.msrb.mxu2 %v374_v12  ;;  %1235 = vmatpush.msrb.mxu3 %v630_v13  ;;  %v439_v11 = vld [vmem:[%s7808_s3 + $0x958] sm:$0xff]  ;;  %v166_v13 = vld [vmem:[%s7808_s3 + $0xd0] sm:$0xff] }
 0x11e   :  { %1261 = vmatpush.msra.mxu0 %v375_v14  ;;  %1287 = vmatpush.msra.mxu1 %v631_v15  ;;  %v422_v14 = vld [vmem:[%s7808_s3 + $0x8d0] sm:$0xff] }
 0x11f   :  { %1120 = vmatmul.f32.vlgmr.msra.gmra.mxu2 %v5391_v42  ;;  %1146 = vmatmul.f32.vlgmr.msra.gmra.mxu3 %v5393_v43 }
 0x120   :  { %1172 = vmatmul.f32.vlgmr.msrb.gmra.mxu0 %v5391_v42  ;;  %1198 = vmatmul.f32.vlgmr.msrb.gmra.mxu1 %v5393_v43 }
 0x121   :  { %1210 = vmatpush.msrb.mxu2 %v358_v16  ;;  %1236 = vmatpush.msrb.mxu3 %v614_v17  ;;  %v6107_v34 = vpop.f32.mrf.mxu0  ;;  %v6109_v35 = vpop.f32.mrf.mxu1  ;;  %v167_v16 = vld [vmem:[%s7808_s3 + $0xd8] sm:$0xff] }
 0x122   :  { %1262 = vmatpush.msra.mxu0 %v359_v18  ;;  %1288 = vmatpush.msra.mxu1 %v615_v19  ;;  %v423_v17 = vld [vmem:[%s7808_s3 + $0x8d8] sm:$0xff]  ;;  %v150_v19 = vld [vmem:[%s7808_s3 + $0x50] sm:$0xff] }
 0x123   :  { %1211 = vmatpush.msrb.mxu2 %v342_v22  ;;  %1237 = vmatpush.msrb.mxu3 %v598_v23  ;;  %v406_v22 = vld [vmem:[%s7808_s3 + $0x850] sm:$0xff] }
 0x124   :  { %1263 = vmatpush.msra.mxu0 %v343_v24  ;;  %1289 = vmatpush.msra.mxu1 %v599_v25  ;;  %v151_v24 = vld [vmem:[%s7808_s3 + $0x58] sm:$0xff] }
 0x125   :  { %1212 = vmatpush.msrb.mxu2 %v326_v26  ;;  %1238 = vmatpush.msrb.mxu3 %v582_v27  ;;  %v407_v25 = vld [vmem:[%s7808_s3 + $0x858] sm:$0xff]  ;;  %v392_v26 = vld [vmem:[%s7808_s3 + $0x7e0] sm:$0xff] }
 0x126   :  { %1264 = vmatpush.msra.mxu0 %v327_v28  ;;  %1290 = vmatpush.msra.mxu1 %v583_v29  ;;  %v6165_v55 = vpop.f32.mrf.mxu2  ;;  %v6175_v59 = vpop.f32.mrf.mxu3  ;;  %v648_v27 = vld [vmem:[%s7808_s3 + $0xfe0] sm:$0xff]  ;;  %v393_v28 = vld [vmem:[%s7808_s3 + $0x7e8] sm:$0xff] }
 0x127   :  { %1213 = vmatpush.msrb.mxu2 %v310_v30  ;;  %1239 = vmatpush.msrb.mxu3 %v566_v31  ;;  %v649_v29 = vld [vmem:[%s7808_s3 + $0xfe8] sm:$0xff]  ;;  %v376_v30 = vld [vmem:[%s7808_s3 + $0x760] sm:$0xff] }
 0x128   :  { %1265 = vmatpush.msra.mxu0 %v311_v32  ;;  %1291 = vmatpush.msra.mxu1 %v567_v33  ;;  %v632_v31 = vld [vmem:[%s7808_s3 + $0xf60] sm:$0xff]  ;;  %v377_v32 = vld [vmem:[%s7808_s3 + $0x768] sm:$0xff] }
 0x129   :  { %1123 = vmatmul.f32.gmra.mxu2 %v5443_v62  ;;  %1149 = vmatmul.f32.gmra.mxu3 %v5445_v63  ;;  %v633_v33 = vld [vmem:[%s7808_s3 + $0xf68] sm:$0xff] }
 0x12a   :  { %1175 = vmatmul.f32.gmra.mxu0 %v5443_v62  ;;  %1201 = vmatmul.f32.gmra.mxu1 %v5445_v63 }
 0x12b   :  { %1214 = vmatpush.msrb.mxu2 %v294_v36  ;;  %1240 = vmatpush.msrb.mxu3 %v550_v37  ;;  %v6163_v54 = vpop.f32.mrf.mxu0  ;;  %v6167_v56 = vpop.f32.mrf.mxu1  ;;  %v360_v37 = vld [vmem:[%s7808_s3 + $0x6e0] sm:$0xff] }
 0x12c   :  { %1266 = vmatpush.msra.mxu0 %v295_v38  ;;  %1292 = vmatpush.msra.mxu1 %v551_v39  ;;  %v616_v38 = vld [vmem:[%s7808_s3 + $0xee0] sm:$0xff] }
 0x12d   :  { %1215 = vmatpush.msrb.mxu2 %v278_v40  ;;  %1241 = vmatpush.msrb.mxu3 %v534_v41  ;;  %v361_v40 = vld [vmem:[%s7808_s3 + $0x6e8] sm:$0xff] }
 0x12e   :  { %1267 = vmatpush.msra.mxu0 %v279_v44  ;;  %1293 = vmatpush.msra.mxu1 %v535_v45  ;;  %v617_v41 = vld [vmem:[%s7808_s3 + $0xee8] sm:$0xff]  ;;  %v344_v45 = vld [vmem:[%s7808_s3 + $0x660] sm:$0xff] }
 0x12f   :  { %1216 = vmatpush.msrb.mxu2 %v262_v46  ;;  %1242 = vmatpush.msrb.mxu3 %v518_v47  ;;  %v600_v46 = vld [vmem:[%s7808_s3 + $0xe60] sm:$0xff] }
 0x130   :  { %1268 = vmatpush.msra.mxu0 %v263_v48  ;;  %1294 = vmatpush.msra.mxu1 %v519_v49  ;;  %v6231_v15 = vpop.f32.mrf.mxu2  ;;  %v6247_v23 = vpop.f32.mrf.mxu3  ;;  %v345_v48 = vld [vmem:[%s7808_s3 + $0x668] sm:$0xff] }
 0x131   :  { %1217 = vmatpush.msrb.mxu2 %v246_v50  ;;  %1243 = vmatpush.msrb.mxu3 %v502_v51  ;;  %v601_v49 = vld [vmem:[%s7808_s3 + $0xe68] sm:$0xff]  ;;  %v328_v50 = vld [vmem:[%s7808_s3 + $0x5e0] sm:$0xff] }
 0x132   :  { %1269 = vmatpush.msra.mxu0 %v247_v52  ;;  %1295 = vmatpush.msra.mxu1 %v503_v53  ;;  %v584_v51 = vld [vmem:[%s7808_s3 + $0xde0] sm:$0xff]  ;;  %v329_v52 = vld [vmem:[%s7808_s3 + $0x5e8] sm:$0xff] }
 0x133   :  { %1126 = vmatmul.f32.gmra.mxu2 %v5501_v20  ;;  %1152 = vmatmul.f32.gmra.mxu3 %v5503_v21  ;;  %v585_v53 = vld [vmem:[%s7808_s3 + $0xde8] sm:$0xff] }
 0x134   :  { %1178 = vmatmul.f32.gmra.mxu0 %v5501_v20  ;;  %1204 = vmatmul.f32.gmra.mxu1 %v5503_v21 }
 0x135   :  { %1218 = vmatpush.msrb.mxu2 %v230_v57  ;;  %1244 = vmatpush.msrb.mxu3 %v486_v58  ;;  %v6223_v12 = vpop.f32.mrf.mxu0  ;;  %v6239_v18 = vpop.f32.mrf.mxu1  ;;  %v312_v57 = vld [vmem:[%s7808_s3 + $0x560] sm:$0xff] }
 0x136   :  { %1270 = vmatpush.msra.mxu0 %v231_v60  ;;  %1296 = vmatpush.msra.mxu1 %v487_v61  ;;  %v568_v58 = vld [vmem:[%s7808_s3 + $0xd60] sm:$0xff]  ;;  %v313_v60 = vld [vmem:[%s7808_s3 + $0x568] sm:$0xff] }
 0x137   :  { %1219 = vmatpush.msrb.mxu2 %v214_v0  ;;  %1245 = vmatpush.msrb.mxu3 %v470_v1  ;;  %v569_v61 = vld [vmem:[%s7808_s3 + $0xd68] sm:$0xff]  ;;  %v296_v1 = vld [vmem:[%s7808_s3 + $0x4e0] sm:$0xff] }
 0x138   :  { %1271 = vmatpush.msra.mxu0 %v215_v2  ;;  %1297 = vmatpush.msra.mxu1 %v471_v3  ;;  %v552_v2 = vld [vmem:[%s7808_s3 + $0xce0] sm:$0xff] }
 0x139   :  { %1220 = vmatpush.msrb.mxu2 %v198_v4  ;;  %1246 = vmatpush.msrb.mxu3 %v454_v5  ;;  %v297_v4 = vld [vmem:[%s7808_s3 + $0x4e8] sm:$0xff] }
 0x13a   :  { %1272 = vmatpush.msra.mxu0 %v199_v6  ;;  %1298 = vmatpush.msra.mxu1 %v455_v7  ;;  %v6291_v39 = vpop.f32.mrf.mxu2  ;;  %v6307_v47 = vpop.f32.mrf.mxu3  ;;  %v553_v5 = vld [vmem:[%s7808_s3 + $0xce8] sm:$0xff]  ;;  %v280_v7 = vld [vmem:[%s7808_s3 + $0x460] sm:$0xff] }
 0x13b   :  { %1221 = vmatpush.msrb.mxu2 %v182_v8  ;;  %1247 = vmatpush.msrb.mxu3 %v438_v9  ;;  %v536_v8 = vld [vmem:[%s7808_s3 + $0xc60] sm:$0xff] }
 0x13c   :  { %1273 = vmatpush.msra.mxu0 %v183_v10  ;;  %1299 = vmatpush.msra.mxu1 %v439_v11  ;;  %v281_v10 = vld [vmem:[%s7808_s3 + $0x468] sm:$0xff] }
 0x13d   :  { %1222 = vmatpush.msrb.mxu2 %v166_v13  ;;  %1248 = vmatpush.msrb.mxu3 %v422_v14  ;;  %v537_v11 = vld [vmem:[%s7808_s3 + $0xc68] sm:$0xff]  ;;  %v264_v13 = vld [vmem:[%s7808_s3 + $0x3e0] sm:$0xff] }
 0x13e   :  { %1274 = vmatpush.msra.mxu0 %v167_v16  ;;  %1300 = vmatpush.msra.mxu1 %v423_v17  ;;  %v520_v14 = vld [vmem:[%s7808_s3 + $0xbe0] sm:$0xff]  ;;  %v265_v16 = vld [vmem:[%s7808_s3 + $0x3e8] sm:$0xff] }
 0x13f   :  { %1223 = vmatpush.msrb.mxu2 %v150_v19  ;;  %1249 = vmatpush.msrb.mxu3 %v406_v22  ;;  %v6283_v36 = vpop.f32.mrf.mxu0  ;;  %v6299_v44 = vpop.f32.mrf.mxu1  ;;  %v521_v17 = vld [vmem:[%s7808_s3 + $0xbe8] sm:$0xff]  ;;  %v248_v19 = vld [vmem:[%s7808_s3 + $0x360] sm:$0xff] }
 0x140   :  { %1275 = vmatpush.msra.mxu0 %v151_v24  ;;  %1301 = vmatpush.msra.mxu1 %v407_v25  ;;  %v504_v22 = vld [vmem:[%s7808_s3 + $0xb60] sm:$0xff]  ;;  %v249_v24 = vld [vmem:[%s7808_s3 + $0x368] sm:$0xff] }
 0x141   :  { %1224 = vmatmul.f32.vlgmr.msrb.gmra.mxu2 %v5391_v42  ;;  %1250 = vmatmul.f32.vlgmr.msrb.gmra.mxu3 %v5393_v43  ;;  %v505_v25 = vld [vmem:[%s7808_s3 + $0xb68] sm:$0xff] }
 0x142   :  { %1276 = vmatmul.f32.vlgmr.msra.gmra.mxu0 %v5391_v42  ;;  %1302 = vmatmul.f32.vlgmr.msra.gmra.mxu1 %v5393_v43 }
 0x143   :  { %1312 = vmatpush.msra.mxu2 %v392_v26  ;;  %1338 = vmatpush.msra.mxu3 %v648_v27  ;;  %v232_v27 = vld [vmem:[%s7808_s3 + $0x2e0] sm:$0xff] }
 0x144   :  { %1364 = vmatpush.msrb.mxu0 %v393_v28  ;;  %1390 = vmatpush.msrb.mxu1 %v649_v29  ;;  %v6351_v3 = vpop.f32.mrf.mxu2  ;;  %v6367_v9 = vpop.f32.mrf.mxu3  ;;  %v488_v28 = vld [vmem:[%s7808_s3 + $0xae0] sm:$0xff] }
 0x145   :  { %1313 = vmatpush.msra.mxu2 %v376_v30  ;;  %1339 = vmatpush.msra.mxu3 %v632_v31  ;;  %v233_v30 = vld [vmem:[%s7808_s3 + $0x2e8] sm:$0xff] }
 0x146   :  { %1365 = vmatpush.msrb.mxu0 %v377_v32  ;;  %1391 = vmatpush.msrb.mxu1 %v633_v33  ;;  %v489_v31 = vld [vmem:[%s7808_s3 + $0xae8] sm:$0xff]  ;;  %v216_v33 = vld [vmem:[%s7808_s3 + $0x260] sm:$0xff] }
 0x147   :  { %1314 = vmatpush.msra.mxu2 %v360_v37  ;;  %1340 = vmatpush.msra.mxu3 %v616_v38  ;;  %v472_v37 = vld [vmem:[%s7808_s3 + $0xa60] sm:$0xff] }
 0x148   :  { %1366 = vmatpush.msrb.mxu0 %v361_v40  ;;  %1392 = vmatpush.msrb.mxu1 %v617_v41  ;;  %v217_v40 = vld [vmem:[%s7808_s3 + $0x268] sm:$0xff] }
 0x149   :  { %1315 = vmatpush.msra.mxu2 %v344_v45  ;;  %1341 = vmatpush.msra.mxu3 %v600_v46  ;;  %v473_v41 = vld [vmem:[%s7808_s3 + $0xa68] sm:$0xff]  ;;  %v200_v45 = vld [vmem:[%s7808_s3 + $0x1e0] sm:$0xff] }
 0x14a   :  { %1367 = vmatpush.msrb.mxu0 %v345_v48  ;;  %1393 = vmatpush.msrb.mxu1 %v601_v49  ;;  %v456_v46 = vld [vmem:[%s7808_s3 + $0x9e0] sm:$0xff]  ;;  %v201_v48 = vld [vmem:[%s7808_s3 + $0x1e8] sm:$0xff] }
 0x14b   :  { %1227 = vmatmul.f32.gmra.mxu2 %v5443_v62  ;;  %1253 = vmatmul.f32.gmra.mxu3 %v5445_v63  ;;  %v6343_v0 = vpop.f32.mrf.mxu0  ;;  %v6359_v6 = vpop.f32.mrf.mxu1  ;;  %v457_v49 = vld [vmem:[%s7808_s3 + $0x9e8] sm:$0xff] }
 0x14c   :  { %1279 = vmatmul.f32.gmra.mxu0 %v5443_v62  ;;  %1305 = vmatmul.f32.gmra.mxu1 %v5445_v63 }
 0x14d   :  { %1316 = vmatpush.msra.mxu2 %v328_v50  ;;  %1342 = vmatpush.msra.mxu3 %v584_v51  ;;  %v184_v50 = vld [vmem:[%s7808_s3 + $0x160] sm:$0xff] }
 0x14e   :  { %1368 = vmatpush.msrb.mxu0 %v329_v52  ;;  %1394 = vmatpush.msrb.mxu1 %v585_v53  ;;  %v440_v51 = vld [vmem:[%s7808_s3 + $0x960] sm:$0xff]  ;;  %v185_v52 = vld [vmem:[%s7808_s3 + $0x168] sm:$0xff] }
 0x14f   :  { %1317 = vmatpush.msra.mxu2 %v312_v57  ;;  %1343 = vmatpush.msra.mxu3 %v568_v58  ;;  %v441_v53 = vld [vmem:[%s7808_s3 + $0x968] sm:$0xff]  ;;  %v168_v57 = vld [vmem:[%s7808_s3 + $0xe0] sm:$0xff] }
 0x150   :  { %1369 = vmatpush.msrb.mxu0 %v313_v60  ;;  %1395 = vmatpush.msrb.mxu1 %v569_v61  ;;  %v6411_v29 = vpop.f32.mrf.mxu2  ;;  %v6427_v38 = vpop.f32.mrf.mxu3  ;;  %v424_v58 = vld [vmem:[%s7808_s3 + $0x8e0] sm:$0xff]  ;;  %v169_v60 = vld [vmem:[%s7808_s3 + $0xe8] sm:$0xff] }
 0x151   :  { %1318 = vmatpush.msra.mxu2 %v296_v1  ;;  %1344 = vmatpush.msra.mxu3 %v552_v2  ;;  %v425_v61 = vld [vmem:[%s7808_s3 + $0x8e8] sm:$0xff]  ;;  %v152_v2 = vld [vmem:[%s7808_s3 + $0x60] sm:$0xff] }
 0x152   :  { %1370 = vmatpush.msrb.mxu0 %v297_v4  ;;  %1396 = vmatpush.msrb.mxu1 %v553_v5  ;;  %v408_v4 = vld [vmem:[%s7808_s3 + $0x860] sm:$0xff] }
 0x153   :  { %1319 = vmatpush.msra.mxu2 %v280_v7  ;;  %1345 = vmatpush.msra.mxu3 %v536_v8  ;;  %v153_v7 = vld [vmem:[%s7808_s3 + $0x68] sm:$0xff] }
 0x154   :  { %1371 = vmatpush.msrb.mxu0 %v281_v10  ;;  %1397 = vmatpush.msrb.mxu1 %v537_v11  ;;  %v409_v8 = vld [vmem:[%s7808_s3 + $0x868] sm:$0xff] }
 0x155   :  { %1230 = vmatmul.f32.gmra.mxu2 %v5501_v20  ;;  %1256 = vmatmul.f32.gmra.mxu3 %v5503_v21  ;;  %v6403_v26 = vpop.f32.mrf.mxu0  ;;  %v6419_v32 = vpop.f32.mrf.mxu1 }
 0x156   :  { %1282 = vmatmul.f32.gmra.mxu0 %v5501_v20  ;;  %1308 = vmatmul.f32.gmra.mxu1 %v5503_v21 }
 0x157   :  { %1320 = vmatpush.msra.mxu2 %v264_v13  ;;  %1346 = vmatpush.msra.mxu3 %v520_v14  ;;  %v394_v13 = vld [vmem:[%s7808_s3 + $0x7f0] sm:$0xff] }
 0x158   :  { %1372 = vmatpush.msrb.mxu0 %v265_v16  ;;  %1398 = vmatpush.msrb.mxu1 %v521_v17  ;;  %v650_v14 = vld [vmem:[%s7808_s3 + $0xff0] sm:$0xff]  ;;  %v395_v16 = vld [vmem:[%s7808_s3 + $0x7f8] sm:$0xff] }
 0x159   :  { %1321 = vmatpush.msra.mxu2 %v248_v19  ;;  %1347 = vmatpush.msra.mxu3 %v504_v22  ;;  %v651_v17 = vld [vmem:[%s7808_s3 + $0xff8] sm:$0xff]  ;;  %v378_v19 = vld [vmem:[%s7808_s3 + $0x770] sm:$0xff] }
 0x15a   :  { %1373 = vmatpush.msrb.mxu0 %v249_v24  ;;  %1399 = vmatpush.msrb.mxu1 %v505_v25  ;;  %v6479_v5 = vpop.f32.mrf.mxu2  ;;  %v6489_v11 = vpop.f32.mrf.mxu3  ;;  %v634_v22 = vld [vmem:[%s7808_s3 + $0xf70] sm:$0xff]  ;;  %v379_v24 = vld [vmem:[%s7808_s3 + $0x778] sm:$0xff] }
 0x15b   :  { %1322 = vmatpush.msra.mxu2 %v232_v27  ;;  %1348 = vmatpush.msra.mxu3 %v488_v28  ;;  %v635_v25 = vld [vmem:[%s7808_s3 + $0xf78] sm:$0xff]  ;;  %v362_v27 = vld [vmem:[%s7808_s3 + $0x6f0] sm:$0xff] }
 0x15c   :  { %1374 = vmatpush.msrb.mxu0 %v233_v30  ;;  %1400 = vmatpush.msrb.mxu1 %v489_v31  ;;  %v618_v28 = vld [vmem:[%s7808_s3 + $0xef0] sm:$0xff]  ;;  %v363_v30 = vld [vmem:[%s7808_s3 + $0x6f8] sm:$0xff] }
 0x15d   :  { %1323 = vmatpush.msra.mxu2 %v216_v33  ;;  %1349 = vmatpush.msra.mxu3 %v472_v37  ;;  %v619_v31 = vld [vmem:[%s7808_s3 + $0xef8] sm:$0xff]  ;;  %v346_v37 = vld [vmem:[%s7808_s3 + $0x670] sm:$0xff] }
 0x15e   :  { %1375 = vmatpush.msrb.mxu0 %v217_v40  ;;  %1401 = vmatpush.msrb.mxu1 %v473_v41  ;;  %v602_v40 = vld [vmem:[%s7808_s3 + $0xe70] sm:$0xff] }
 0x15f   :  { %1324 = vmatpush.msra.mxu2 %v200_v45  ;;  %1350 = vmatpush.msra.mxu3 %v456_v46  ;;  %v6471_v1 = vpop.f32.mrf.mxu0  ;;  %v6487_v10 = vpop.f32.mrf.mxu1  ;;  %v347_v45 = vld [vmem:[%s7808_s3 + $0x678] sm:$0xff] }
 0x160   :  { %1376 = vmatpush.msrb.mxu0 %v201_v48  ;;  %1402 = vmatpush.msrb.mxu1 %v457_v49  ;;  %v603_v46 = vld [vmem:[%s7808_s3 + $0xe78] sm:$0xff] }
 0x161   :  { %1325 = vmatpush.msra.mxu2 %v184_v50  ;;  %1351 = vmatpush.msra.mxu3 %v440_v51  ;;  %v330_v50 = vld [vmem:[%s7808_s3 + $0x5f0] sm:$0xff] }
 0x162   :  { %1377 = vmatpush.msrb.mxu0 %v185_v52  ;;  %1403 = vmatpush.msrb.mxu1 %v441_v53  ;;  %v586_v51 = vld [vmem:[%s7808_s3 + $0xdf0] sm:$0xff]  ;;  %v331_v52 = vld [vmem:[%s7808_s3 + $0x5f8] sm:$0xff] }
 0x163   :  { %1326 = vmatpush.msra.mxu2 %v168_v57  ;;  %1352 = vmatpush.msra.mxu3 %v424_v58  ;;  %v587_v53 = vld [vmem:[%s7808_s3 + $0xdf8] sm:$0xff]  ;;  %v314_v57 = vld [vmem:[%s7808_s3 + $0x570] sm:$0xff] }
 0x164   :  { %1378 = vmatpush.msrb.mxu0 %v169_v60  ;;  %1404 = vmatpush.msrb.mxu1 %v425_v61  ;;  %v6539_v41 = vpop.f32.mrf.mxu2  ;;  %v6549_v49 = vpop.f32.mrf.mxu3  ;;  %v570_v58 = vld [vmem:[%s7808_s3 + $0xd70] sm:$0xff]  ;;  %v315_v60 = vld [vmem:[%s7808_s3 + $0x578] sm:$0xff] }
 0x165   :  { %1327 = vmatpush.msra.mxu2 %v152_v2  ;;  %1353 = vmatpush.msra.mxu3 %v408_v4  ;;  %v571_v61 = vld [vmem:[%s7808_s3 + $0xd78] sm:$0xff]  ;;  %v298_v2 = vld [vmem:[%s7808_s3 + $0x4f0] sm:$0xff] }
 0x166   :  { %1379 = vmatpush.msrb.mxu0 %v153_v7  ;;  %1405 = vmatpush.msrb.mxu1 %v409_v8  ;;  %v554_v4 = vld [vmem:[%s7808_s3 + $0xcf0] sm:$0xff]  ;;  %v299_v7 = vld [vmem:[%s7808_s3 + $0x4f8] sm:$0xff] }
 0x167   :  { %1328 = vmatmul.f32.vlgmr.msra.gmra.mxu2 %v5391_v42  ;;  %1354 = vmatmul.f32.vlgmr.msra.gmra.mxu3 %v5393_v43  ;;  %v555_v8 = vld [vmem:[%s7808_s3 + $0xcf8] sm:$0xff] }
 0x168   :  { %1380 = vmatmul.f32.vlgmr.msrb.gmra.mxu0 %v5391_v42  ;;  %1406 = vmatmul.f32.vlgmr.msrb.gmra.mxu1 %v5393_v43 }
 0x169   :  { %1416 = vmatpush.msrb.mxu2 %v394_v13  ;;  %1442 = vmatpush.msrb.mxu3 %v650_v14  ;;  %v6531_v33 = vpop.f32.mrf.mxu0  ;;  %v6547_v48 = vpop.f32.mrf.mxu1  ;;  %v282_v14 = vld [vmem:[%s7808_s3 + $0x470] sm:$0xff] }
 0x16a   :  { %1468 = vmatpush.msra.mxu0 %v395_v16  ;;  %1494 = vmatpush.msra.mxu1 %v651_v17  ;;  %v538_v16 = vld [vmem:[%s7808_s3 + $0xc70] sm:$0xff] }
 0x16b   :  { %1417 = vmatpush.msrb.mxu2 %v378_v19  ;;  %1443 = vmatpush.msrb.mxu3 %v634_v22  ;;  %v283_v19 = vld [vmem:[%s7808_s3 + $0x478] sm:$0xff] }
 0x16c   :  { %1469 = vmatpush.msra.mxu0 %v379_v24  ;;  %1495 = vmatpush.msra.mxu1 %v635_v25  ;;  %v539_v22 = vld [vmem:[%s7808_s3 + $0xc78] sm:$0xff] }
 0x16d   :  { %1418 = vmatpush.msrb.mxu2 %v362_v27  ;;  %1444 = vmatpush.msrb.mxu3 %v618_v28  ;;  %v266_v27 = vld [vmem:[%s7808_s3 + $0x3f0] sm:$0xff] }
 0x16e   :  { %1470 = vmatpush.msra.mxu0 %v363_v30  ;;  %1496 = vmatpush.msra.mxu1 %v619_v31  ;;  %v6599_v17 = vpop.f32.mrf.mxu2  ;;  %v6609_v25 = vpop.f32.mrf.mxu3  ;;  %v522_v28 = vld [vmem:[%s7808_s3 + $0xbf0] sm:$0xff]  ;;  %v267_v30 = vld [vmem:[%s7808_s3 + $0x3f8] sm:$0xff] }
 0x16f   :  { %1419 = vmatpush.msrb.mxu2 %v346_v37  ;;  %1445 = vmatpush.msrb.mxu3 %v602_v40  ;;  %v523_v31 = vld [vmem:[%s7808_s3 + $0xbf8] sm:$0xff]  ;;  %v250_v37 = vld [vmem:[%s7808_s3 + $0x370] sm:$0xff] }
 0x170   :  { %1471 = vmatpush.msra.mxu0 %v347_v45  ;;  %1497 = vmatpush.msra.mxu1 %v603_v46  ;;  %v506_v40 = vld [vmem:[%s7808_s3 + $0xb70] sm:$0xff]  ;;  %v251_v45 = vld [vmem:[%s7808_s3 + $0x378] sm:$0xff] }
 0x171   :  { %1331 = vmatmul.f32.gmra.mxu2 %v5443_v62  ;;  %1357 = vmatmul.f32.gmra.mxu3 %v5445_v63  ;;  %v507_v46 = vld [vmem:[%s7808_s3 + $0xb78] sm:$0xff] }
 0x172   :  { %1383 = vmatmul.f32.gmra.mxu0 %v5443_v62  ;;  %1409 = vmatmul.f32.gmra.mxu1 %v5445_v63 }
 0x173   :  { %1420 = vmatpush.msrb.mxu2 %v330_v50  ;;  %1446 = vmatpush.msrb.mxu3 %v586_v51  ;;  %v6591_v13 = vpop.f32.mrf.mxu0  ;;  %v6607_v24 = vpop.f32.mrf.mxu1  ;;  %v234_v50 = vld [vmem:[%s7808_s3 + $0x2f0] sm:$0xff] }
 0x174   :  { %1472 = vmatpush.msra.mxu0 %v331_v52  ;;  %1498 = vmatpush.msra.mxu1 %v587_v53  ;;  %v490_v51 = vld [vmem:[%s7808_s3 + $0xaf0] sm:$0xff]  ;;  %v235_v52 = vld [vmem:[%s7808_s3 + $0x2f8] sm:$0xff] }
 0x175   :  { %1421 = vmatpush.msrb.mxu2 %v314_v57  ;;  %1447 = vmatpush.msrb.mxu3 %v570_v58  ;;  %v491_v53 = vld [vmem:[%s7808_s3 + $0xaf8] sm:$0xff]  ;;  %v218_v58 = vld [vmem:[%s7808_s3 + $0x270] sm:$0xff] }
 0x176   :  { %1473 = vmatpush.msra.mxu0 %v315_v60  ;;  %1499 = vmatpush.msra.mxu1 %v571_v61  ;;  %v474_v60 = vld [vmem:[%s7808_s3 + $0xa70] sm:$0xff] }
 0x177   :  { %1422 = vmatpush.msrb.mxu2 %v298_v2  ;;  %1448 = vmatpush.msrb.mxu3 %v554_v4  ;;  %v219_v2 = vld [vmem:[%s7808_s3 + $0x278] sm:$0xff] }
 0x178   :  { %1474 = vmatpush.msra.mxu0 %v299_v7  ;;  %1500 = vmatpush.msra.mxu1 %v555_v8  ;;  %v6659_v61 = vpop.f32.mrf.mxu2  ;;  %v475_v4 = vld [vmem:[%s7808_s3 + $0xa78] sm:$0xff]  ;;  %v202_v8 = vld [vmem:[%s7808_s3 + $0x1f0] sm:$0xff] }
 0x179   :  { %1423 = vmatpush.msrb.mxu2 %v282_v14  ;;  %1449 = vmatpush.msrb.mxu3 %v538_v16  ;;  %v458_v14 = vld [vmem:[%s7808_s3 + $0x9f0] sm:$0xff]  ;;  %v6675_v16 = vpop.f32.mrf.mxu3 }
 0x17a   :  { %1475 = vmatpush.msra.mxu0 %v283_v19  ;;  %1501 = vmatpush.msra.mxu1 %v539_v22  ;;  %v203_v19 = vld [vmem:[%s7808_s3 + $0x1f8] sm:$0xff] }
 0x17b   :  { %1334 = vmatmul.f32.gmra.mxu2 %v5501_v20  ;;  %1360 = vmatmul.f32.gmra.mxu3 %v5503_v21  ;;  %v459_v22 = vld [vmem:[%s7808_s3 + $0x9f8] sm:$0xff] }
 0x17c   :  { %1386 = vmatmul.f32.gmra.mxu0 %v5501_v20  ;;  %1412 = vmatmul.f32.gmra.mxu1 %v5503_v21 }
 0x17d   :  { %1424 = vmatpush.msrb.mxu2 %v266_v27  ;;  %1450 = vmatpush.msrb.mxu3 %v522_v28  ;;  %v6651_v57 = vpop.f32.mrf.mxu0  ;;  %v6667_v7 = vpop.f32.mrf.mxu1  ;;  %v186_v27 = vld [vmem:[%s7808_s3 + $0x170] sm:$0xff] }
 0x17e   :  { %1476 = vmatpush.msra.mxu0 %v267_v30  ;;  %1502 = vmatpush.msra.mxu1 %v523_v31  ;;  %7843 = vst [vmem:[#allocation3_spill] sm:$0xff] %v6651_v57  ;;  %v442_v28 = vld [vmem:[%s7808_s3 + $0x970] sm:$0xff]  ;;  %v187_v30 = vld [vmem:[%s7808_s3 + $0x178] sm:$0xff] }
 0x17f   :  { %1425 = vmatpush.msrb.mxu2 %v250_v37  ;;  %1451 = vmatpush.msrb.mxu3 %v506_v40  ;;  %7844 = vst [vmem:[#allocation4_spill] sm:$0xff] %v6667_v7  ;;  %v443_v31 = vld [vmem:[%s7808_s3 + $0x978] sm:$0xff]  ;;  %v170_v37 = vld [vmem:[%s7808_s3 + $0xf0] sm:$0xff] }
 0x180   :  { %1477 = vmatpush.msra.mxu0 %v251_v45  ;;  %1503 = vmatpush.msra.mxu1 %v507_v46  ;;  %v426_v40 = vld [vmem:[%s7808_s3 + $0x8f0] sm:$0xff]  ;;  %v171_v45 = vld [vmem:[%s7808_s3 + $0xf8] sm:$0xff] }
 0x181   :  { %1426 = vmatpush.msrb.mxu2 %v234_v50  ;;  %1452 = vmatpush.msrb.mxu3 %v490_v51  ;;  %v427_v46 = vld [vmem:[%s7808_s3 + $0x8f8] sm:$0xff]  ;;  %v154_v50 = vld [vmem:[%s7808_s3 + $0x70] sm:$0xff] }
 0x182   :  { %1478 = vmatpush.msra.mxu0 %v235_v52  ;;  %1504 = vmatpush.msra.mxu1 %v491_v53  ;;  %v410_v51 = vld [vmem:[%s7808_s3 + $0x870] sm:$0xff]  ;;  %v155_v52 = vld [vmem:[%s7808_s3 + $0x78] sm:$0xff] }
 0x183   :  { %1427 = vmatpush.msrb.mxu2 %v218_v58  ;;  %1453 = vmatpush.msrb.mxu3 %v474_v60  ;;  %v411_v53 = vld [vmem:[%s7808_s3 + $0x878] sm:$0xff]  ;;  %v6721_v60 = vpop.f32.mrf.mxu2 }
 0x184   :  { %1479 = vmatpush.msra.mxu0 %v219_v2  ;;  %1505 = vmatpush.msra.mxu1 %v475_v4  ;;  %7846 = vst [vmem:[#allocation6_spill] sm:$0xff] %v6721_v60  ;;  %v6728_v4 = vld [vmem:[%s7812_s5 + $0x18] sm:$0xff] }
 0x185   :  { %1428 = vmatpush.msrb.mxu2 %v202_v8  ;;  %1454 = vmatpush.msrb.mxu3 %v458_v14  ;;  %v6730_v8 = vpop.f32.mrf.mxu3  ;;  %v4513_v14 = vld [vmem:[%s7811_s6] ss:$0 sm:$0xff] }
 0x186   :  { %1480 = vmatpush.msra.mxu0 %v203_v19  ;;  %1506 = vmatpush.msra.mxu1 %v459_v22  ;;  %7848 = vst [vmem:[#allocation8_spill] sm:$0xff] %v6730_v8  ;;  %v6742_v19 = vld [vmem:[%s7812_s5 + $0x10] sm:$0xff]  ;;  %v6749_v22 = vld [vmem:[%s7812_s5 + $0x8] sm:$0xff] }
 0x187   :  { %1429 = vmatpush.msrb.mxu2 %v186_v27  ;;  %1455 = vmatpush.msrb.mxu3 %v442_v28  ;;  %v6719_v58 = vpop.f32.mrf.mxu0  ;;  %v6723_v2 = vpop.f32.mrf.mxu1 }
 0x188   :  { %1481 = vmatpush.msra.mxu0 %v187_v30  ;;  %1507 = vmatpush.msra.mxu1 %v443_v31  ;;  %7845 = vst [vmem:[#allocation5_spill] sm:$0xff] %v6719_v58  ;;  %v6783_v31 = vld [vmem:[%s7813_s4 + $0x8] sm:$0xff] }
 0x189   :  { %1430 = vmatpush.msrb.mxu2 %v170_v37  ;;  %1456 = vmatpush.msrb.mxu3 %v426_v40  ;;  %7847 = vst [vmem:[#allocation7_spill] sm:$0xff] %v6723_v2 }
 0x18a   :  { %1482 = vmatpush.msra.mxu0 %v171_v45  ;;  %1508 = vmatpush.msra.mxu1 %v427_v46 }
 0x18b   :  { %1431 = vmatpush.msrb.mxu2 %v154_v50  ;;  %1457 = vmatpush.msrb.mxu3 %v410_v51 }
 0x18c   :  { %1483 = vmatpush.msra.mxu0 %v155_v52  ;;  %1509 = vmatpush.msra.mxu1 %v411_v53  ;;  %v6766_v27 = vpop.f32.mrf.mxu2 }
 0x18d   :  { %1432 = vmatmul.f32.vlgmr.msrb.gmra.mxu2 %v5391_v42  ;;  %1458 = vmatmul.f32.vlgmr.msrb.gmra.mxu3 %v5393_v43  ;;  %v6776_v30 = vpop.f32.mrf.mxu3 }
 0x18e   :  { %1484 = vmatmul.f32.vlgmr.msra.gmra.mxu0 %v5391_v42  ;;  %1510 = vmatmul.f32.vlgmr.msra.gmra.mxu1 %v5393_v43  ;;  %v6764_v43 = vld [vmem:[%s7812_s5] sm:$0xff]  ;;  %7851 = vst [vmem:[#allocation11_spill] sm:$0xff] %v6776_v30 }
 0x18f   :  { %4506 = vmatpush.msra.mxu3 %v6728_v4  ;;  %1601 = vmatpush.msra.mxu2 %v6728_v4 }
 0x190   :  { %1675 = vrot.lane.b32.xlu0 %v4513_v14, %s4825_s26  ;;  %2264 = vmatpush.msrb.mxu0 %v6728_v4 }
 0x191   :  { %4507 = vmatpush.msra.mxu3 %v6742_v19  ;;  %1602 = vmatpush.msra.mxu2 %v6742_v19  ;;  %v6759_v42 = vpop.f32.mrf.mxu0  ;;  %v6772_v28 = vpop.f32.mrf.mxu1 }
 0x192   :  { %2265 = vmatpush.msrb.mxu0 %v6742_v19  ;;  %2429 = vmatpush.msrb.mxu1 %v6728_v4  ;;  %7849 = vst [vmem:[#allocation9_spill] sm:$0xff] %v6759_v42 }
 0x193   :  { %4508 = vmatpush.msra.mxu3 %v6749_v22  ;;  %1603 = vmatpush.msra.mxu2 %v6749_v22  ;;  %7850 = vst [vmem:[#allocation10_spill] sm:$0xff] %v6772_v28 }
 0x194   :  { %2266 = vmatpush.msrb.mxu0 %v6749_v22  ;;  %2430 = vmatpush.msrb.mxu1 %v6742_v19 }
 0x195   :  { %1435 = vmatmul.f32.gmra.mxu2 %v5443_v62  ;;  %1461 = vmatmul.f32.gmra.mxu3 %v5445_v63 }
 0x196   :  { %1487 = vmatmul.f32.gmra.mxu0 %v5443_v62  ;;  %1513 = vmatmul.f32.gmra.mxu1 %v5445_v63  ;;  %v665_v62 = vperm.slane %v6783_v31, 1  ;;  %v6800_v37 = vpop.f32.mrf.mxu2  ;;  %v6804_v46 = vpop.f32.mrf.mxu3 }
 0x197   :  { %4509 = vmatpush.msra.mxu3 %v6764_v43  ;;  %1604 = vmatpush.msra.mxu2 %v6764_v43  ;;  %7852 = vst [vmem:[#allocation12_spill] sm:$0xff] %v6800_v37 }
 0x198   :  { %2267 = vmatpush.msrb.mxu0 %v6764_v43  ;;  %2431 = vmatpush.msrb.mxu1 %v6749_v22  ;;  %7853 = vst [vmem:[#allocation13_spill] sm:$0xff] %v6804_v46 }
 0x199   :  { %1769 = vmatpush.msrb.mxu3 %v6728_v4  ;;  %1934 = vmatpush.msrb.mxu2 %v6728_v4 }
 0x19a   :  { %2432 = vmatpush.msrb.mxu1 %v6764_v43  ;;  %2924 = vmatpush.msra.mxu0 %v6728_v4 }
 0x19b   :  { %1770 = vmatpush.msrb.mxu3 %v6742_v19  ;;  %1935 = vmatpush.msrb.mxu2 %v6742_v19 }
 0x19c   :  { %2925 = vmatpush.msra.mxu0 %v6742_v19  ;;  %3089 = vmatpush.msra.mxu1 %v6728_v4 }
 0x19d   :  { %1771 = vmatpush.msrb.mxu3 %v6749_v22  ;;  %1936 = vmatpush.msrb.mxu2 %v6749_v22  ;;  %v1173_v63 = vpop.f32.mrf.mxu0  ;;  %v1199_v45 = vpop.f32.mrf.mxu1 }
 0x19e   :  { %1438 = vmatmul.f32.gmra.mxu2 %v5501_v20  ;;  %1464 = vmatmul.f32.gmra.mxu3 %v5503_v21  ;;  %v1174_v40 = vadd.f32 %v1173_v63, %v665_v62 }
 0x19f   :  { %1490 = vmatmul.f32.gmra.mxu0 %v5501_v20  ;;  %1516 = vmatmul.f32.gmra.mxu1 %v5503_v21  ;;  %v7822_v20 = vmov 0.0  }
 0x1a0   :  { %1772 = vmatpush.msrb.mxu3 %v6764_v43  ;;  %1937 = vmatpush.msrb.mxu2 %v6764_v43  ;;  %v6806_v50 = vadd.f32 %v1199_v45, %v1174_v40 }
 0x1a1   :  { %2926 = vmatpush.msra.mxu0 %v6749_v22  ;;  %3090 = vmatpush.msra.mxu1 %v6742_v19 }
 0x1a2   :  { %7854 = vst [vmem:[#allocation14_spill] sm:$0xff] %v6806_v50  ;;  %v6819_v51 = vpop.f32.mrf.mxu2  ;;  %v6823_v14 = vpop.f32.mrf.mxu3 }
 0x1a3   :  { %2927 = vmatpush.msra.mxu0 %v6764_v43  ;;  %3091 = vmatpush.msra.mxu1 %v6749_v22  ;;  %7855 = vst [vmem:[#allocation15_spill] sm:$0xff] %v6819_v51 }
 0x1a4   :  { %7856 = vst [vmem:[#allocation16_spill] sm:$0xff] %v6823_v14 }
 0x1a5   :  { %3092 = vmatpush.msra.mxu1 %v6764_v43 }
 0x1a6   :  { %1605 = vmatmul.f32.vlgmr.msra.gmra.mxu2 %v7822_v20  ;;  %1608 = vmatmul.f32.vlgmr.msra.gmra.mxu3 %v7822_v20 }
 0x1a7   :  { %2099 = vmatpush.msra.mxu3 %v6728_v4  ;;  %2594 = vmatpush.msra.mxu2 %v6728_v4  ;;  %v1176_v21 = vpop.f32.mrf.mxu0  ;;  %v1202_v53 = vpop.f32.mrf.mxu1 }
 0x1a8   :  { %v1177_v52 = vadd.f32 %v1176_v21, %v665_v62 }
 0x1a9   :  { %2100 = vmatpush.msra.mxu3 %v6742_v19  ;;  %2595 = vmatpush.msra.mxu2 %v6742_v19 }
 0x1aa   :  { %v6825_v63 = vadd.f32 %v1202_v53, %v1177_v52  ;;  %v667_v53 = vperm.slane %v6783_v31, 3 }
 0x1ab   :  { %2101 = vmatpush.msra.mxu3 %v6749_v22  ;;  %2596 = vmatpush.msra.mxu2 %v6749_v22 }
 0x1ac   :  { %7857 = vst [vmem:[#allocation17_spill] sm:$0xff] %v6825_v63  ;;  %v6832_v45 = vpop.f32.mrf.mxu2  ;;  %v6834_v51 = vpop.f32.mrf.mxu3 }
 0x1ad   :  { %2102 = vmatpush.msra.mxu3 %v6764_v43  ;;  %2597 = vmatpush.msra.mxu2 %v6764_v43  ;;  %7858 = vst [vmem:[#allocation18_spill] sm:$0xff] %v6832_v45 }
 0x1ae   :  { %1611 = vmatmul.f32.gmra.mxu3 %v7822_v20  ;;  %7859 = vst [vmem:[#allocation19_spill] sm:$0xff] %v6834_v51 }
 0x1b1   :  { %v1179_v40 = vpop.f32.mrf.mxu0  ;;  %v1205_v50 = vpop.f32.mrf.mxu1 }
 0x1b2   :  { %v1180_v21 = vadd.f32 %v1179_v40, %v665_v62 }
 0x1b4   :  { %v6836_v14 = vadd.f32 %v1205_v50, %v1180_v21 }
 0x1b6   :  { %7860 = vst [vmem:[#allocation20_spill] sm:$0xff] %v6836_v14  ;;  %v6838_v52 = vpop.f32.mrf.mxu2  ;;  %v6841_v63 = vpop.f32.mrf.mxu3 }
 0x1b7   :  { %7861 = vst [vmem:[#allocation21_spill] sm:$0xff] %v6838_v52 }
 0x1b8   :  { %7862 = vst [vmem:[#allocation22_spill] sm:$0xff] %v6841_v63 }
 0x1bf   :  { %v1277_v28 = vpop.f32.mrf.mxu0  ;;  %v1303_v7 = vpop.f32.mrf.mxu1 }
 0x1c0   :  { %v1278_v42 = vadd.f32 %v1277_v28, %v667_v53 }
 0x1c2   :  { %v6843_v57 = vadd.f32 %v1303_v7, %v1278_v42  ;;  %v6858_v7 = vperm.slane %v6783_v31, 2 }
 0x1c4   :  { %7863 = vst [vmem:[#allocation23_spill] sm:$0xff] %v6843_v57  ;;  %v6845_v20 = vpop.f32.mrf.mxu2  ;;  %v6847_v45 = vpop.f32.mrf.mxu3 }
 0x1c5   :  { %7864 = vst [vmem:[#allocation24_spill] sm:$0xff] %v6845_v20 }
 0x1c6   :  { %7865 = vst [vmem:[#allocation25_spill] sm:$0xff] %v6847_v45 }
 0x1c7   :  { %7870 = vst [vmem:[#allocation30_spill] sm:$0xff] %v6858_v7 }
 0x1c9   :  { %v1280_v62 = vpop.f32.mrf.mxu0  ;;  %v1306_v51 = vpop.f32.mrf.mxu1 }
 0x1ca   :  { %v1281_v40 = vadd.f32 %v1280_v62, %v667_v53 }
 0x1cc   :  { %v6849_v50 = vadd.f32 %v1306_v51, %v1281_v40  ;;  %v669_v51 = vperm.slane %v6783_v31, 5 }
 0x1ce   :  { %7866 = vst [vmem:[#allocation26_spill] sm:$0xff] %v6849_v50  ;;  %v6851_v21 = vpop.f32.mrf.mxu2  ;;  %v6853_v14 = vpop.f32.mrf.mxu3 }
 0x1cf   :  { %7867 = vst [vmem:[#allocation27_spill] sm:$0xff] %v6851_v21 }
 0x1d0   :  { %7868 = vst [vmem:[#allocation28_spill] sm:$0xff] %v6853_v14  ;;  %v668_v14 = vperm.slane %v6783_v31, 4 }
 0x1d3   :  { %v1283_v52 = vpop.f32.mrf.mxu0  ;;  %v1309_v2 = vpop.f32.mrf.mxu1 }
 0x1d4   :  { %v1284_v63 = vadd.f32 %v1283_v52, %v667_v53 }
 0x1d6   :  { %v6855_v28 = vadd.f32 %v1309_v2, %v1284_v63 }
 0x1d8   :  { %7869 = vst [vmem:[#allocation29_spill] sm:$0xff] %v6855_v28  ;;  %v1231_v42 = vpop.f32.mrf.mxu2  ;;  %v1257_v45 = vpop.f32.mrf.mxu3 }
 0x1d9   :  { %v1232_v57 = vadd.f32 %v1231_v42, %v6858_v7 }
 0x1db   :  { %v6861_v62 = vadd.f32 %v1257_v45, %v1232_v57 }
 0x1dd   :  { %7871 = vst [vmem:[#allocation31_spill] sm:$0xff] %v6861_v62 }
 0x1e5   :  { %v1381_v40 = vpop.f32.mrf.mxu0  ;;  %v1407_v20 = vpop.f32.mrf.mxu1 }
 0x1e6   :  { %v1382_v50 = vadd.f32 %v1381_v40, %v669_v51 }
 0x1e8   :  { %v6865_v52 = vadd.f32 %v1407_v20, %v1382_v50 }
 0x1ea   :  { %7872 = vst [vmem:[#allocation32_spill] sm:$0xff] %v6865_v52  ;;  %v1329_v2 = vpop.f32.mrf.mxu2  ;;  %v1355_v53 = vpop.f32.mrf.mxu3 }
 0x1eb   :  { %v1330_v63 = vadd.f32 %v1329_v2, %v668_v14 }
 0x1ed   :  { %v6867_v28 = vadd.f32 %v1355_v53, %v1330_v63 }
 0x1ef   :  { %7873 = vst [vmem:[#allocation33_spill] sm:$0xff] %v6867_v28  ;;  %v1384_v21 = vpop.f32.mrf.mxu0  ;;  %v1410_v42 = vpop.f32.mrf.mxu1 }
 0x1f0   :  { %v1385_v58 = vadd.f32 %v1384_v21, %v669_v51  ;;  %v6878_v21 = vperm.slane %v6783_v31, 7 }
 0x1f2   :  { %v6869_v7 = vadd.f32 %v1410_v42, %v1385_v58  ;;  %7878 = vst [vmem:[#allocation38_spill] sm:$0xff] %v6878_v21 }
 0x1f4   :  { %7874 = vst [vmem:[#allocation34_spill] sm:$0xff] %v6869_v7  ;;  %v1332_v57 = vpop.f32.mrf.mxu2  ;;  %v1358_v62 = vpop.f32.mrf.mxu3 }
 0x1f5   :  { %v1333_v45 = vadd.f32 %v1332_v57, %v668_v14 }
 0x1f7   :  { %v6871_v46 = vadd.f32 %v1358_v62, %v1333_v45  ;;  %v670_v62 = vperm.slane %v6783_v31, 6 }
 0x1f9   :  { %7875 = vst [vmem:[#allocation35_spill] sm:$0xff] %v6871_v46  ;;  %v1387_v40 = vpop.f32.mrf.mxu0  ;;  %v1413_v8 = vpop.f32.mrf.mxu1 }
 0x1fa   :  { %v1388_v37 = vadd.f32 %v1387_v40, %v669_v51 }
 0x1fc   :  { %v6873_v20 = vadd.f32 %v1413_v8, %v1388_v37 }
 0x1fe   :  { %7876 = vst [vmem:[#allocation36_spill] sm:$0xff] %v6873_v20  ;;  %v1335_v50 = vpop.f32.mrf.mxu2  ;;  %v1361_v52 = vpop.f32.mrf.mxu3 }
 0x1ff   :  { %v1336_v2 = vadd.f32 %v1335_v50, %v668_v14 }
 0x201   :  { %v6875_v63 = vadd.f32 %v1361_v52, %v1336_v2 }
 0x203   :  { %7877 = vst [vmem:[#allocation37_spill] sm:$0xff] %v6875_v63 }
 0x20b   :  { %v1485_v58 = vpop.f32.mrf.mxu0  ;;  %v1511_v53 = vpop.f32.mrf.mxu1 }
 0x20c   :  { %v1486_v42 = vadd.f32 %v1485_v58, %v6878_v21 }
 0x20e   :  { %v6882_v57 = vadd.f32 %v1511_v53, %v1486_v42 }
 0x210   :  { %7879 = vst [vmem:[#allocation39_spill] sm:$0xff] %v6882_v57  ;;  %v1433_v51 = vpop.f32.mrf.mxu2  ;;  %v1459_v45 = vpop.f32.mrf.mxu3 }
 0x211   :  { %v1434_v8 = vadd.f32 %v1433_v51, %v670_v62  ;;  %v6893_v57 = vpop.permute.xlu0 %1675 }
 0x213   :  { %v6884_v37 = vadd.f32 %v1459_v45, %v1434_v8  ;;  %v1488_v14 = vpop.f32.mrf.mxu0  ;;  %v1514_v40 = vpop.f32.mrf.mxu1 }
 0x214   :  { %v1489_v52 = vadd.f32 %v1488_v14, %v6878_v21 }
 0x215   :  { %7880 = vst [vmem:[#allocation40_spill] sm:$0xff] %v6884_v37 }
 0x216   :  { %v6887_v50 = vadd.f32 %v1514_v40, %v1489_v52 }
 0x218   :  { %7881 = vst [vmem:[#allocation41_spill] sm:$0xff] %v6887_v50  ;;  %v1436_v2 = vpop.f32.mrf.mxu2  ;;  %v1462_v63 = vpop.f32.mrf.mxu3 }
 0x219   :  { %v1437_v46 = vadd.f32 %v1436_v2, %v670_v62 }
 0x21b   :  { %v6889_v28 = vadd.f32 %v1462_v63, %v1437_v46  ;;  %v6904_v63 = vld [vmem:[%s7813_s4] sm:$0xff] }
 0x21d   :  { %7882 = vst [vmem:[#allocation42_spill] sm:$0xff] %v6889_v28 }
 0x221   :  { %v1439_v58 = vpop.f32.mrf.mxu2  ;;  %v1465_v31 = vpop.f32.mrf.mxu3 }
 0x222   :  { %v1440_v53 = vadd.f32 %v1439_v58, %v670_v62  ;;  %v656_v62 = vperm.slane %v6904_v63, 0 }
 0x224   :  { %v6891_v42 = vadd.f32 %v1465_v31, %v1440_v53  ;;  %v706_v40 = vadd.f32 %v6165_v55, %v656_v62  ;;  %v709_v31 = vadd.f32 %v6231_v15, %v656_v62  ;;  %v712_v53 = vadd.f32 %v6291_v39, %v656_v62 }
 0x226   :  { %7883 = vst [vmem:[#allocation43_spill] sm:$0xff] %v6891_v42  ;;  %v6909_v2 = vadd.f32 %v6175_v59, %v706_v40 }
 0x229   :  { %v1606_v51 = vpop.f32.mrf.mxu2  ;;  %v1609_v45 = vpop.f32.mrf.mxu3 }
 0x22a   :  { %v1678_v8 = vadd.f32 %v6893_v57, %v1606_v51  ;;  %v1679_v14 = vadd.f32 %v6893_v57, %v1609_v45  ;;  %v1615_v58 = vadd.f32 %v1606_v51, %v6909_v2 }
 0x22c   :  { %1686 = vrot.lane.b32.xlu1 %v1679_v14, %s4825_s26  ;;  %1684 = vrot.lane.b32.xlu0 %v1678_v8, %s4825_s26  ;;  %v4407_v8 = vmul.f32 -1.442695, %v1615_v58  ;;  %v6915_v14 = vadd.f32 %v6247_v23, %v709_v31 }
 0x22e   :  { %v1616_v21 = vadd.f32 %v1609_v45, %v6915_v14  ;;  %4516 = vpow2.f32 %v4407_v8 }
 0x230   :  { %v4408_v59 = vmul.f32 -1.442695, %v1616_v21 }
 0x231   :  { %v1612_v52 = vpop.f32.mrf.mxu3 }
 0x232   :  { %v1680_v46 = vadd.f32 %v6893_v57, %v1612_v52  ;;  %4518 = vpow2.f32 %v4408_v59 }
 0x234   :  { %1688 = vrot.lane.b32.xlu1 %v1680_v46, %s4825_s26  ;;  %v6918_v46 = vadd.f32 %v6307_v47, %v712_v53  ;;  %v4517_v50 = vpop.eup %4516 }
 0x235   :  { %v1627_v15 = vadd.f32 1.0, %v4517_v50 }
 0x236   :  { %v1617_v55 = vadd.f32 %v1612_v52, %v6918_v46 }
 0x237   :  { %v1641_v50 = vand.u32 2147483648, %v1627_v15  ;;  %vm1635_vm1 = vweird.f32 %v1627_v15 }
 0x238   :  { %v4409_v40 = vmul.f32 -1.442695, %v1617_v55  ;;  %v4519_v51 = vpop.eup %4518 }
 0x239   :  { %v1628_v62 = vadd.f32 1.0, %v4519_v51  ;;  %v1642_v37 = vor.u32 1.1754944e-38, %v1641_v50 }
 0x23a   :  { %4520 = vpow2.f32 %v4409_v40  ;;  %v1639_v40 = vand.u32 2147483647, %v1627_v15 }
 0x23b   :  { %4522 = vrcp.f32 %v1627_v15  ;;  %vm1650_vm6 = vweird.f32 %v1628_v62 }
 0x23c   :  { %4524 = vrcp.f32 %v1628_v62  ;;  %vm1640_vm3 = vcmp.eq.f32.partialorder %v1639_v40, 8.507059e+37 }
 0x240   :  { %v4521_v39 = vpop.eup %4520 }
 0x241   :  { %v1629_v23 = vadd.f32 1.0, %v4521_v39  ;;  %v4523_v58 = vpop.eup %4522 }
 0x242   :  { %v1631_v47 = vmul.f32 %v4523_v58, %v1627_v15  ;;  %v4525_v31 = vpop.eup %4524  ;;  %vm1636_vm0 = vweird.f32 %v4523_v58 }
 0x243   :  { %4526 = vrcp.f32 %v1629_v23  ;;  %v1646_v8 = vmul.f32 %v4525_v31, %v1628_v62  ;;  %vm1637_vm2 = vmor %vm1635_vm1, %vm1636_vm0  ;;  %vm1651_vm4 = vweird.f32 %v4525_v31  ;;  %vm1665_vm8 = vweird.f32 %v1629_v23 }
 0x244   :  { %v1632_v45 = vsub.f32 1.0, %v1631_v47  ;;  %vm1652_vm7 = vmor %vm1650_vm6, %vm1651_vm4 }
 0x245   :  { %v1647_v55 = vsub.f32 1.0, %v1646_v8  ;;  %v1656_v8 = vand.u32 2147483648, %v1628_v62 }
 0x246   :  { %v1633_v52 = vmul.f32 %v4523_v58, %v1632_v45 }
 0x247   :  { %v1648_v51 = vmul.f32 %v4525_v31, %v1647_v55  ;;  %v1657_v55 = vor.u32 1.1754944e-38, %v1656_v8 }
 0x248   :  { %v1634_v42 = vadd.f32 %v4523_v58, %v1633_v52  ;;  %v1671_v52 = vand.u32 2147483648, %v1629_v23 }
 0x249   :  { %v4527_v53 = vpop.eup %4526  ;;  %v1649_v60 = vadd.f32 %v4525_v31, %v1648_v51 }
 0x24a   :  { %v1661_v21 = vmul.f32 %v4527_v53, %v1629_v23  ;;  %v1638_v39 = vsel %vm1637_vm2, %v4523_v58, %v1634_v42  ;;  %vm1666_vm5 = vweird.f32 %v4527_v53  ;;  %v1669_v42 = vand.u32 2147483647, %v1629_v23 }
 0x24b   :  { %v1643_v7 = vsel %vm1640_vm3, %v1642_v37, %v1638_v39  ;;  %vm1667_vm9 = vmor %vm1665_vm8, %vm1666_vm5  ;;  %v1653_v15 = vsel %vm1652_vm7, %v4525_v31, %v1649_v60 }
 0x24c   :  { %v1662_v59 = vsub.f32 1.0, %v1661_v21  ;;  %v1654_v21 = vand.u32 2147483647, %v1628_v62  ;;  %vm1670_vm11 = vcmp.eq.f32.partialorder %v1669_v42, 8.507059e+37 }
 0x24e   :  { %v1663_v28 = vmul.f32 %v4527_v53, %v1662_v59  ;;  %v1672_v59 = vor.u32 1.1754944e-38, %v1671_v52  ;;  %vm1655_vm10 = vcmp.eq.f32.partialorder %v1654_v21, 8.507059e+37 }
 0x24f   :  { %v1658_v37 = vsel %vm1655_vm10, %v1657_v55, %v1653_v15  ;;  %v1732_v15 = vmul.f32 0.0, %v1643_v7 }
 0x250   :  { %v1664_v30 = vadd.f32 %v4527_v53, %v1663_v28  ;;  %v1733_v8 = vmul.f32 0.0, %v1658_v37 }
 0x252   :  { %v1668_v58 = vsel %vm1667_vm9, %v4527_v53, %v1664_v30 }
 0x253   :  { %v1673_v28 = vsel %vm1670_vm11, %v1672_v59, %v1668_v58 }
 0x29e   :  { %v1687_v20 = vpop.permute.xlu1 %1686  ;;  %v1685_v47 = vpop.permute.xlu0 %1684 }
 0x29f   :  { %v1693_v45 = vmul.f32 %v1685_v47, %v1643_v7  ;;  %v1694_v40 = vmul.f32 %v1687_v20, %v1658_v37 }
 0x2a1   :  { %1699 = vrot.lane.b32.xlu2 %v1693_v45, %s4825_s26 }
 0x2a6   :  { %v1689_v50 = vpop.permute.xlu1 %1688 }
 0x2a7   :  { %v1695_v51 = vmul.f32 %v1689_v50, %v1673_v28  ;;  %v1734_v50 = vmul.f32 0.0, %v1673_v28 }
 0x2a9   :  { %1703 = vrot.lane.b32.xlu0 %v1695_v51, %s4825_s26  ;;  %1701 = vrot.lane.b32.xlu2 %v1694_v40, %s4825_s26 }
 0x2fb   :  { %v1700_v62 = vpop.permute.xlu2 %1699 }
 0x2fc   :  { %v1708_v39 = vadd.f32 %v1700_v62, %v6909_v2  ;;  %v1715_v2 = vsub.f32 1.0, %v1658_v37 }
 0x2fe   :  { %4528 = vtanh.f32 %v1708_v39 }
 0x303   :  { %v1702_v23 = vpop.permute.xlu2 %1701 }
 0x304   :  { %v4529_v60 = vpop.eup %4528  ;;  %v1709_v30 = vadd.f32 %v1702_v23, %v6915_v14  ;;  %v1714_v14 = vsub.f32 1.0, %v1643_v7 }
 0x305   :  { %1720 = vrot.lane.b32.xlu1 %v4529_v60, %s4827_s13 }
 0x306   :  { %4530 = vtanh.f32 %v1709_v30 }
 0x30c   :  { %v4531_v31 = vpop.eup %4530 }
 0x30d   :  { %1722 = vrot.lane.b32.xlu2 %v4531_v31, %s4827_s13 }
 0x31b   :  { %v1704_v20 = vpop.permute.xlu0 %1703 }
 0x31c   :  { %v1710_v53 = vadd.f32 %v1704_v20, %v6918_v46  ;;  %v1716_v46 = vsub.f32 1.0, %v1673_v28  ;;  %v657_v20 = vperm.slane %v6904_v63, 1 }
 0x31e   :  { %4532 = vtanh.f32 %v1710_v53  ;;  %v761_v53 = vadd.f32 %v6163_v54, %v657_v20 }
 0x324   :  { %v4533_v47 = vpop.eup %4532 }
 0x325   :  { %1724 = vrot.lane.b32.xlu0 %v4533_v47, %s4827_s13  ;;  %v6959_v47 = vadd.f32 %v6167_v56, %v761_v53 }
 0x367   :  { %v1723_v45 = vpop.permute.xlu2 %1722 }
 0x368   :  { %v1730_v52 = vmul.f32 %v1723_v45, %v1715_v2 }
 0x36a   :  { %v6931_v21 = vadd.f32 %v1733_v8, %v1730_v52  ;;  %v758_v8 = vadd.f32 %v6107_v34, %v657_v20 }
 0x36c   :  { %1747 = vrot.lane.b32.xlu2 %v6931_v21, %s4827_s13 }
 0x377   :  { %v1721_v42 = vpop.permute.xlu1 %1720 }
 0x378   :  { %v1729_v58 = vmul.f32 %v1721_v42, %v1714_v14  ;;  %v6964_v14 = vadd.f32 %v6109_v35, %v758_v8 }
 0x37a   :  { %v6935_v55 = vadd.f32 %v1732_v15, %v1729_v58 }
 0x37c   :  { %1745 = vrot.lane.b32.xlu1 %v6935_v55, %s4827_s13 }
 0x397   :  { %v1725_v59 = vpop.permute.xlu0 %1724 }
 0x398   :  { %v1731_v40 = vmul.f32 %v1725_v59, %v1716_v46 }
 0x39a   :  { %v6939_v37 = vadd.f32 %v1734_v50, %v1731_v40 }
 0x39c   :  { %1749 = vrot.lane.b32.xlu0 %v6939_v37, %s4827_s13 }
 0x3c6   :  { %v1748_v7 = vpop.permute.xlu2 %1747 }
 0x3ee   :  { %v1746_v51 = vpop.permute.xlu1 %1745 }
 0x3ef   :  { %4410 = vmatmul.msk.f32.vlgmr.msrb.gmra.mxu3 %vm1585_vm12, %v1746_v51  ;;  %v764_v51 = vadd.f32 %v6223_v12, %v657_v20 }
 0x3f0   :  { %2759 = vmatpush.msrb.mxu3 %v6728_v4 }
 0x3f2   :  { %2760 = vmatpush.msrb.mxu3 %v6742_v19 }
 0x3f4   :  { %2761 = vmatpush.msrb.mxu3 %v6749_v22 }
 0x3f6   :  { %2762 = vmatpush.msrb.mxu3 %v6764_v43 }
 0x3f7   :  { %4411 = vmatmul.msk.f32.gmra.mxu3 %vm1585_vm12, %v1748_v7 }
 0x40e   :  { %v1750_v28 = vpop.permute.xlu0 %1749 }
 0x40f   :  { %4412 = vmatmul.msk.f32.gmra.mxu3 %vm1585_vm12, %v1750_v28 }
 0x472   :  { %v1774_v62 = vpop.f32.mrf.mxu3 }
 0x473   :  { %v1843_v39 = vadd.f32 %v1774_v62, %v6893_v57  ;;  %v1783_v42 = vadd.f32 %v1774_v62, %v6964_v14  ;;  %v790_v62 = vadd.f32 %v6239_v18, %v764_v51 }
 0x475   :  { %1849 = vrot.lane.b32.xlu1 %v1843_v39, %s4825_s26  ;;  %v4413_v58 = vmul.f32 -1.442695, %v1783_v42 }
 0x47a   :  { %v1777_v23 = vpop.f32.mrf.mxu3 }
 0x47b   :  { %v1844_v60 = vadd.f32 %v1777_v23, %v6893_v57  ;;  %v1784_v2 = vadd.f32 %v1777_v23, %v6959_v47 }
 0x47d   :  { %1851 = vrot.lane.b32.xlu2 %v1844_v60, %s4825_s26  ;;  %v4414_v45 = vmul.f32 -1.442695, %v1784_v2 }
 0x47f   :  { %4534 = vpow2.f32 %v4414_v45 }
 0x485   :  { %v4535_v52 = vpop.eup %4534 }
 0x486   :  { %v1796_v15 = vadd.f32 1.0, %v4535_v52 }
 0x488   :  { %4536 = vrcp.f32 %v1796_v15  ;;  %v1824_v35 = vand.u32 2147483648, %v1796_v15  ;;  %vm1818_vm14 = vweird.f32 %v1796_v15  ;;  %v1822_v28 = vand.u32 2147483647, %v1796_v15 }
 0x489   :  { %4538 = vpow2.f32 %v4413_v58 }
 0x48a   :  { %v1825_v60 = vor.u32 1.1754944e-38, %v1824_v35  ;;  %vm1823_vm0 = vcmp.eq.f32.partialorder %v1822_v28, 8.507059e+37 }
 0x48e   :  { %v4537_v54 = vpop.eup %4536 }
 0x48f   :  { %v4539_v46 = vpop.eup %4538  ;;  %v1814_v56 = vmul.f32 %v4537_v54, %v1796_v15  ;;  %vm1819_vm13 = vweird.f32 %v4537_v54 }
 0x490   :  { %v1795_v59 = vadd.f32 1.0, %v4539_v46  ;;  %vm1820_vm15 = vmor %vm1818_vm14, %vm1819_vm13 }
 0x491   :  { %v1815_v50 = vsub.f32 1.0, %v1814_v56 }
 0x492   :  { %v1780_v30 = vpop.f32.mrf.mxu3  ;;  %4540 = vrcp.f32 %v1795_v59  ;;  %v1809_v42 = vand.u32 2147483648, %v1795_v59  ;;  %vm1803_vm2 = vweird.f32 %v1795_v59  ;;  %v1807_v15 = vand.u32 2147483647, %v1795_v59 }
 0x493   :  { %v1845_v31 = vadd.f32 %v1780_v30, %v6893_v57  ;;  %v1816_v40 = vmul.f32 %v4537_v54, %v1815_v50 }
 0x494   :  { %vm1808_vm4 = vcmp.eq.f32.partialorder %v1807_v15, 8.507059e+37 }
 0x495   :  { %1853 = vrot.lane.b32.xlu0 %v1845_v31, %s4825_s26  ;;  %v1817_v34 = vadd.f32 %v4537_v54, %v1816_v40  ;;  %v1785_v31 = vadd.f32 %v1780_v30, %v790_v62 }
 0x497   :  { %v1821_v39 = vsel %vm1820_vm15, %v4537_v54, %v1817_v34  ;;  %v4415_v52 = vmul.f32 -1.442695, %v1785_v31  ;;  %v1810_v54 = vor.u32 1.1754944e-38, %v1809_v42 }
 0x498   :  { %v4541_v7 = vpop.eup %4540  ;;  %v1826_v2 = vsel %vm1823_vm0, %v1825_v60, %v1821_v39 }
 0x499   :  { %v1799_v23 = vmul.f32 %v4541_v7, %v1795_v59  ;;  %4542 = vpow2.f32 %v4415_v52  ;;  %vm1804_vm1 = vweird.f32 %v4541_v7 }
 0x49a   :  { %vm1805_vm3 = vmor %vm1803_vm2, %vm1804_vm1 }
 0x49b   :  { %v1800_v8 = vsub.f32 1.0, %v1799_v23 }
 0x49d   :  { %v1801_v12 = vmul.f32 %v4541_v7, %v1800_v8 }
 0x49f   :  { %v1802_v20 = vadd.f32 %v4541_v7, %v1801_v12  ;;  %v4543_v18 = vpop.eup %4542 }
 0x4a0   :  { %v1797_v30 = vadd.f32 1.0, %v4543_v18 }
 0x4a1   :  { %v1806_v58 = vsel %vm1805_vm3, %v4541_v7, %v1802_v20 }
 0x4a2   :  { %v1811_v56 = vsel %vm1808_vm4, %v1810_v54, %v1806_v58  ;;  %4544 = vrcp.f32 %v1797_v30  ;;  %v1839_v39 = vand.u32 2147483648, %v1797_v30  ;;  %vm1833_vm6 = vweird.f32 %v1797_v30 }
 0x4a3   :  { %v1837_v59 = vand.u32 2147483647, %v1797_v30  ;;  %v1880_v54 = vsub.f32 1.0, %v1826_v2 }
 0x4a4   :  { %v1840_v23 = vor.u32 1.1754944e-38, %v1839_v39 }
 0x4a5   :  { %vm1838_vm8 = vcmp.eq.f32.partialorder %v1837_v59, 8.507059e+37 }
 0x4a8   :  { %v4545_v40 = vpop.eup %4544 }
 0x4a9   :  { %v1829_v51 = vmul.f32 %v4545_v40, %v1797_v30  ;;  %vm1834_vm5 = vweird.f32 %v4545_v40 }
 0x4aa   :  { %vm1835_vm7 = vmor %vm1833_vm6, %vm1834_vm5 }
 0x4ab   :  { %v1830_v34 = vsub.f32 1.0, %v1829_v51  ;;  %v1897_v51 = vmul.f32 %v1811_v56, %v6935_v55 }
 0x4ad   :  { %v1831_v35 = vmul.f32 %v4545_v40, %v1830_v34 }
 0x4af   :  { %v1832_v28 = vadd.f32 %v4545_v40, %v1831_v35 }
 0x4b1   :  { %v1836_v7 = vsel %vm1835_vm7, %v4545_v40, %v1832_v28 }
 0x4b2   :  { %v1841_v31 = vsel %vm1838_vm8, %v1840_v23, %v1836_v7 }
 0x4b3   :  { %v1881_v35 = vsub.f32 1.0, %v1841_v31 }
 0x4d7   :  { %v1852_v53 = vpop.permute.xlu2 %1851 }
 0x4d8   :  { %v1859_v45 = vmul.f32 %v1852_v53, %v1826_v2 }
 0x4da   :  { %1866 = vrot.lane.b32.xlu2 %v1859_v45, %s4825_s26 }
 0x4e7   :  { %v1850_v46 = vpop.permute.xlu1 %1849 }
 0x4e8   :  { %v1858_v50 = vmul.f32 %v1850_v46, %v1811_v56 }
 0x4ea   :  { %1864 = vrot.lane.b32.xlu1 %v1858_v50, %s4825_s26 }
 0x507   :  { %v1854_v60 = vpop.permute.xlu0 %1853 }
 0x508   :  { %v1860_v53 = vmul.f32 %v1854_v60, %v1841_v31 }
 0x50a   :  { %1868 = vrot.lane.b32.xlu0 %v1860_v53, %s4825_s26 }
 0x534   :  { %v1867_v45 = vpop.permute.xlu2 %1866 }
 0x535   :  { %v1874_v8 = vadd.f32 %v1867_v45, %v6959_v47  ;;  %v1898_v47 = vmul.f32 %v1826_v2, %v6931_v21  ;;  %v1899_v21 = vmul.f32 %v1841_v31, %v6939_v37 }
 0x537   :  { %4546 = vtanh.f32 %v1874_v8 }
 0x53d   :  { %v4547_v52 = vpop.eup %4546 }
 0x53e   :  { %1887 = vrot.lane.b32.xlu2 %v4547_v52, %s4827_s13 }
 0x55c   :  { %v1865_v12 = vpop.permute.xlu1 %1864 }
 0x55d   :  { %v1873_v20 = vadd.f32 %v1865_v12, %v6964_v14  ;;  %v1879_v14 = vsub.f32 1.0, %v1811_v56 }
 0x55f   :  { %4548 = vtanh.f32 %v1873_v20 }
 0x565   :  { %v4549_v42 = vpop.eup %4548 }
 0x566   :  { %1885 = vrot.lane.b32.xlu1 %v4549_v42, %s4827_s13 }
 0x57c   :  { %v1869_v15 = vpop.permute.xlu0 %1868 }
 0x57d   :  { %v1875_v18 = vadd.f32 %v1869_v15, %v790_v62 }
 0x57f   :  { %4550 = vtanh.f32 %v1875_v18 }
 0x585   :  { %v4551_v58 = vpop.eup %4550 }
 0x586   :  { %1889 = vrot.lane.b32.xlu0 %v4551_v58, %s4827_s13 }
 0x598   :  { %v1888_v30 = vpop.permute.xlu2 %1887 }
 0x599   :  { %v1895_v46 = vmul.f32 %v1888_v30, %v1880_v54 }
 0x59b   :  { %v6978_v50 = vadd.f32 %v1898_v47, %v1895_v46 }
 0x59d   :  { %1912 = vrot.lane.b32.xlu2 %v6978_v50, %s4827_s13 }
 0x5d8   :  { %v1886_v40 = vpop.permute.xlu1 %1885 }
 0x5d9   :  { %v1894_v34 = vmul.f32 %v1886_v40, %v1879_v14 }
 0x5db   :  { %v6983_v62 = vadd.f32 %v1897_v51, %v1894_v34 }
 0x5dd   :  { %1910 = vrot.lane.b32.xlu1 %v6983_v62, %s4827_s13 }
 0x5f7   :  { %v1913_v55 = vpop.permute.xlu2 %1912 }
 0x5f8   :  { %v1890_v28 = vpop.permute.xlu0 %1889 }
 0x5f9   :  { %v1896_v2 = vmul.f32 %v1890_v28, %v1881_v35 }
 0x5fb   :  { %v6988_v39 = vadd.f32 %v1899_v21, %v1896_v2 }
 0x5fd   :  { %1914 = vrot.lane.b32.xlu0 %v6988_v39, %s4827_s13 }
 0x64f   :  { %v1911_v59 = vpop.permute.xlu1 %1910 }
 0x650   :  { %4416 = vmatmul.msk.f32.vlgmr.msrb.gmra.mxu2 %vm1585_vm12, %v1911_v59 }
 0x651   :  { %3254 = vmatpush.msrb.mxu2 %v6728_v4 }
 0x653   :  { %3255 = vmatpush.msrb.mxu2 %v6742_v19 }
 0x655   :  { %3256 = vmatpush.msrb.mxu2 %v6749_v22 }
 0x657   :  { %3257 = vmatpush.msrb.mxu2 %v6764_v43  ;;  %v658_v43 = vperm.slane %v6904_v63, 2 }
 0x658   :  { %4417 = vmatmul.msk.f32.gmra.mxu2 %vm1585_vm12, %v1913_v55 }
 0x659   :  { %v813_v60 = vadd.f32 %v6411_v29, %v658_v43  ;;  %v810_v8 = vadd.f32 %v6351_v3, %v658_v43  ;;  %v816_v47 = vadd.f32 %v6479_v5, %v658_v43 }
 0x65b   :  { %v7008_v31 = vadd.f32 %v6427_v38, %v813_v60  ;;  %v7013_v12 = vadd.f32 %v6367_v9, %v810_v8  ;;  %v842_v40 = vadd.f32 %v6489_v11, %v816_v47 }
 0x66f   :  { %v1915_v37 = vpop.permute.xlu0 %1914 }
 0x670   :  { %4418 = vmatmul.msk.f32.gmra.mxu2 %vm1585_vm12, %v1915_v37 }
 0x6d3   :  { %v1939_v56 = vpop.f32.mrf.mxu2 }
 0x6d4   :  { %v2008_v7 = vadd.f32 %v1939_v56, %v6893_v57  ;;  %v1948_v20 = vadd.f32 %v1939_v56, %v7013_v12 }
 0x6d6   :  { %2014 = vrot.lane.b32.xlu1 %v2008_v7, %s4825_s26  ;;  %v4419_v15 = vmul.f32 -1.442695, %v1948_v20 }
 0x6db   :  { %v1942_v23 = vpop.f32.mrf.mxu2 }
 0x6dc   :  { %v2009_v4 = vadd.f32 %v1942_v23, %v6893_v57  ;;  %v1949_v53 = vadd.f32 %v1942_v23, %v7008_v31 }
 0x6de   :  { %2016 = vrot.lane.b32.xlu2 %v2009_v4, %s4825_s26  ;;  %v4420_v45 = vmul.f32 -1.442695, %v1949_v53 }
 0x6e0   :  { %4552 = vpow2.f32 %v4420_v45 }
 0x6e6   :  { %v4553_v52 = vpop.eup %4552 }
 0x6e7   :  { %v1961_v42 = vadd.f32 1.0, %v4553_v52 }
 0x6e9   :  { %4554 = vrcp.f32 %v1961_v42  ;;  %v1989_v9 = vand.u32 2147483648, %v1961_v42  ;;  %vm1983_vm10 = vweird.f32 %v1961_v42  ;;  %v1987_v14 = vand.u32 2147483647, %v1961_v42 }
 0x6ea   :  { %4556 = vpow2.f32 %v4419_v15 }
 0x6eb   :  { %v1990_v35 = vor.u32 1.1754944e-38, %v1989_v9  ;;  %vm1988_vm13 = vcmp.eq.f32.partialorder %v1987_v14, 8.507059e+37 }
 0x6ef   :  { %v4555_v29 = vpop.eup %4554 }
 0x6f0   :  { %v4557_v18 = vpop.eup %4556  ;;  %v1979_v38 = vmul.f32 %v4555_v29, %v1961_v42  ;;  %vm1984_vm9 = vweird.f32 %v4555_v29 }
 0x6f1   :  { %v1960_v58 = vadd.f32 1.0, %v4557_v18  ;;  %vm1985_vm11 = vmor %vm1983_vm10, %vm1984_vm9 }
 0x6f2   :  { %v1980_v54 = vsub.f32 1.0, %v1979_v38 }
 0x6f3   :  { %v1945_v19 = vpop.f32.mrf.mxu2  ;;  %4558 = vrcp.f32 %v1960_v58  ;;  %v1974_v7 = vand.u32 2147483648, %v1960_v58  ;;  %vm1968_vm15 = vweird.f32 %v1960_v58  ;;  %v1972_v23 = vand.u32 2147483647, %v1960_v58 }
 0x6f4   :  { %v2010_v22 = vadd.f32 %v1945_v19, %v6893_v57  ;;  %v1981_v30 = vmul.f32 %v4555_v29, %v1980_v54  ;;  %v1950_v28 = vadd.f32 %v1945_v19, %v842_v40 }
 0x6f5   :  { %vm1973_vm1 = vcmp.eq.f32.partialorder %v1972_v23, 8.507059e+37 }
 0x6f6   :  { %2018 = vrot.lane.b32.xlu0 %v2010_v22, %s4825_s26  ;;  %v1982_v3 = vadd.f32 %v4555_v29, %v1981_v30  ;;  %v4421_v37 = vmul.f32 -1.442695, %v1950_v28  ;;  %v1975_v22 = vor.u32 1.1754944e-38, %v1974_v7 }
 0x6f8   :  { %v1986_v51 = vsel %vm1985_vm11, %v4555_v29, %v1982_v3  ;;  %4560 = vpow2.f32 %v4421_v37 }
 0x6f9   :  { %v4559_v46 = vpop.eup %4558  ;;  %v1991_v2 = vsel %vm1988_vm13, %v1990_v35, %v1986_v51 }
 0x6fa   :  { %v1964_v34 = vmul.f32 %v4559_v46, %v1960_v58  ;;  %vm1969_vm14 = vweird.f32 %v4559_v46 }
 0x6fb   :  { %vm1970_vm0 = vmor %vm1968_vm15, %vm1969_vm14 }
 0x6fc   :  { %v1965_v55 = vsub.f32 1.0, %v1964_v34 }
 0x6fe   :  { %v1966_v5 = vmul.f32 %v4559_v46, %v1965_v55  ;;  %v4561_v11 = vpop.eup %4560 }
 0x6ff   :  { %v1962_v19 = vadd.f32 1.0, %v4561_v11 }
 0x700   :  { %v1967_v56 = vadd.f32 %v4559_v46, %v1966_v5 }
 0x701   :  { %4562 = vrcp.f32 %v1962_v19  ;;  %v2004_v15 = vand.u32 2147483648, %v1962_v19  ;;  %vm1998_vm3 = vweird.f32 %v1962_v19  ;;  %v2002_v29 = vand.u32 2147483647, %v1962_v19 }
 0x702   :  { %v1971_v4 = vsel %vm1970_vm0, %v4559_v46, %v1967_v56 }
 0x703   :  { %v1976_v60 = vsel %vm1973_vm1, %v1975_v22, %v1971_v4  ;;  %v2005_v38 = vor.u32 1.1754944e-38, %v2004_v15  ;;  %vm2003_vm5 = vcmp.eq.f32.partialorder %v2002_v29, 8.507059e+37  ;;  %v659_v29 = vperm.slane %v6904_v63, 3 }
 0x704   :  { %v2062_v56 = vmul.f32 %v1976_v60, %v6983_v62  ;;  %v7045_v62 = vld [vmem:[%s7812_s5 + $0x18] sm:$0xff] }
 0x707   :  { %v4563_v45 = vpop.eup %4562 }
 0x708   :  { %v1994_v8 = vmul.f32 %v4563_v45, %v1962_v19  ;;  %vm1999_vm2 = vweird.f32 %v4563_v45  ;;  %v7057_v19 = vld [vmem:[%s7812_s5 + $0x8] sm:$0xff] }
 0x709   :  { %vm2000_vm4 = vmor %vm1998_vm3, %vm1999_vm2 }
 0x70a   :  { %v1995_v52 = vsub.f32 1.0, %v1994_v8 }
 0x70c   :  { %v1996_v20 = vmul.f32 %v4563_v45, %v1995_v52 }
 0x70e   :  { %v1997_v42 = vadd.f32 %v4563_v45, %v1996_v20 }
 0x710   :  { %v2001_v18 = vsel %vm2000_vm4, %v4563_v45, %v1997_v42 }
 0x711   :  { %v2006_v54 = vsel %vm2003_vm5, %v2005_v38, %v2001_v18  ;;  %v865_v18 = vadd.f32 %v6343_v0, %v659_v29 }
 0x712   :  { %v2046_v23 = vsub.f32 1.0, %v2006_v54 }
 0x713   :  { %v7077_v38 = vadd.f32 %v6359_v6, %v865_v18 }
 0x738   :  { %v2017_v21 = vpop.permute.xlu2 %2016 }
 0x739   :  { %v2024_v59 = vmul.f32 %v2017_v21, %v1991_v2  ;;  %v2045_v21 = vsub.f32 1.0, %v1991_v2 }
 0x73b   :  { %2031 = vrot.lane.b32.xlu2 %v2024_v59, %s4825_s26 }
 0x748   :  { %v2015_v43 = vpop.permute.xlu1 %2014 }
 0x749   :  { %v2023_v53 = vmul.f32 %v2015_v43, %v1976_v60 }
 0x74b   :  { %2029 = vrot.lane.b32.xlu1 %v2023_v53, %s4825_s26 }
 0x768   :  { %v2019_v58 = vpop.permute.xlu0 %2018 }
 0x769   :  { %v2025_v30 = vmul.f32 %v2019_v58, %v2006_v54 }
 0x76b   :  { %2033 = vrot.lane.b32.xlu0 %v2025_v30, %s4825_s26  ;;  %v862_v30 = vadd.f32 %v6283_v36, %v659_v29 }
 0x795   :  { %v2032_v47 = vpop.permute.xlu2 %2031 }
 0x796   :  { %v2039_v3 = vadd.f32 %v2032_v47, %v7008_v31  ;;  %v2063_v31 = vmul.f32 %v1991_v2, %v6978_v50  ;;  %v2064_v50 = vmul.f32 %v2006_v54, %v6988_v39  ;;  %v7051_v39 = vld [vmem:[%s7812_s5 + $0x10] sm:$0xff] }
 0x798   :  { %4564 = vtanh.f32 %v2039_v3  ;;  %v7082_v3 = vadd.f32 %v6299_v44, %v862_v30 }
 0x79e   :  { %v4565_v46 = vpop.eup %4564 }
 0x79f   :  { %2052 = vrot.lane.b32.xlu2 %v4565_v46, %s4827_s13 }
 0x7bd   :  { %v2030_v9 = vpop.permute.xlu1 %2029 }
 0x7be   :  { %v2038_v14 = vadd.f32 %v2030_v9, %v7013_v12  ;;  %v2044_v12 = vsub.f32 1.0, %v1976_v60  ;;  %v7063_v60 = vld [vmem:[%s7812_s5] sm:$0xff] }
 0x7c0   :  { %4566 = vtanh.f32 %v2038_v14 }
 0x7c6   :  { %v4567_v51 = vpop.eup %4566 }
 0x7c7   :  { %2050 = vrot.lane.b32.xlu1 %v4567_v51, %s4827_s13 }
 0x7dd   :  { %v2034_v34 = vpop.permute.xlu0 %2033 }
 0x7de   :  { %v2040_v35 = vadd.f32 %v2034_v34, %v842_v40 }
 0x7e0   :  { %4568 = vtanh.f32 %v2040_v35 }
 0x7e6   :  { %v4569_v28 = vpop.eup %4568 }
 0x7e7   :  { %2054 = vrot.lane.b32.xlu0 %v4569_v28, %s4827_s13  ;;  %v868_v28 = vadd.f32 %v6403_v26, %v659_v29 }
 0x7f9   :  { %v2053_v59 = vpop.permute.xlu2 %2052 }
 0x7fa   :  { %v2060_v55 = vmul.f32 %v2053_v59, %v2045_v21 }
 0x7fc   :  { %v7027_v37 = vadd.f32 %v2063_v31, %v2060_v55  ;;  %v894_v31 = vadd.f32 %v6419_v32, %v868_v28 }
 0x7fe   :  { %2077 = vrot.lane.b32.xlu2 %v7027_v37, %s4827_s13 }
 0x839   :  { %v2051_v5 = vpop.permute.xlu1 %2050 }
 0x83a   :  { %v2059_v7 = vmul.f32 %v2051_v5, %v2044_v12 }
 0x83c   :  { %v7032_v40 = vadd.f32 %v2062_v56, %v2059_v7 }
 0x83e   :  { %2075 = vrot.lane.b32.xlu1 %v7032_v40, %s4827_s13 }
 0x858   :  { %v2078_v43 = vpop.permute.xlu2 %2077 }
 0x859   :  { %v2055_v11 = vpop.permute.xlu0 %2054 }
 0x85a   :  { %v2061_v2 = vmul.f32 %v2055_v11, %v2046_v23 }
 0x85c   :  { %v7037_v4 = vadd.f32 %v2064_v50, %v2061_v2 }
 0x85e   :  { %2079 = vrot.lane.b32.xlu0 %v7037_v4, %s4827_s13 }
 0x8b0   :  { %v2076_v22 = vpop.permute.xlu1 %2075 }
 0x8b1   :  { %4422 = vmatmul.msk.f32.vlgmr.msra.gmra.mxu3 %vm1585_vm12, %v2076_v22 }
 0x8b2   :  { %3419 = vmatpush.msra.mxu3 %v7045_v62 }
 0x8b4   :  { %3420 = vmatpush.msra.mxu3 %v7051_v39 }
 0x8b6   :  { %3421 = vmatpush.msra.mxu3 %v7057_v19 }
 0x8b8   :  { %3422 = vmatpush.msra.mxu3 %v7063_v60 }
 0x8b9   :  { %4423 = vmatmul.msk.f32.gmra.mxu3 %vm1585_vm12, %v2078_v43 }
 0x8d0   :  { %v2080_v53 = vpop.permute.xlu0 %2079 }
 0x8d1   :  { %4424 = vmatmul.msk.f32.gmra.mxu3 %vm1585_vm12, %v2080_v53 }
 0x934   :  { %v2104_v45 = vpop.f32.mrf.mxu3 }
 0x935   :  { %v2173_v8 = vadd.f32 %v2104_v45, %v6893_v57  ;;  %v2113_v46 = vadd.f32 %v2104_v45, %v7082_v3 }
 0x937   :  { %2179 = vrot.lane.b32.xlu1 %v2173_v8, %s4825_s26  ;;  %v4425_v14 = vmul.f32 -1.442695, %v2113_v46 }
 0x93c   :  { %v2107_v52 = vpop.f32.mrf.mxu3 }
 0x93d   :  { %v2174_v20 = vadd.f32 %v2107_v52, %v6893_v57  ;;  %v2114_v58 = vadd.f32 %v2107_v52, %v7077_v38 }
 0x93f   :  { %2181 = vrot.lane.b32.xlu2 %v2174_v20, %s4825_s26  ;;  %v4426_v54 = vmul.f32 -1.442695, %v2114_v58 }
 0x941   :  { %4570 = vpow2.f32 %v4426_v54 }
 0x947   :  { %v4571_v47 = vpop.eup %4570 }
 0x948   :  { %v2126_v9 = vadd.f32 1.0, %v4571_v47 }
 0x94a   :  { %4572 = vrcp.f32 %v2126_v9  ;;  %v2154_v44 = vand.u32 2147483648, %v2126_v9  ;;  %vm2148_vm7 = vweird.f32 %v2126_v9  ;;  %v2152_v59 = vand.u32 2147483647, %v2126_v9 }
 0x94b   :  { %4574 = vpow2.f32 %v4425_v14 }
 0x94c   :  { %v2155_v5 = vor.u32 1.1754944e-38, %v2154_v44  ;;  %vm2153_vm9 = vcmp.eq.f32.partialorder %v2152_v59, 8.507059e+37 }
 0x950   :  { %v4573_v0 = vpop.eup %4572 }
 0x951   :  { %v4575_v63 = vpop.eup %4574  ;;  %v2144_v6 = vmul.f32 %v4573_v0, %v2126_v9  ;;  %vm2149_vm6 = vweird.f32 %v4573_v0 }
 0x952   :  { %v2125_v51 = vadd.f32 1.0, %v4575_v63  ;;  %vm2150_vm8 = vmor %vm2148_vm7, %vm2149_vm6 }
 0x953   :  { %v2145_v34 = vsub.f32 1.0, %v2144_v6 }
 0x954   :  { %v2110_v42 = vpop.f32.mrf.mxu3  ;;  %4576 = vrcp.f32 %v2125_v51  ;;  %v2139_v43 = vand.u32 2147483648, %v2125_v51  ;;  %vm2133_vm11 = vweird.f32 %v2125_v51  ;;  %v2137_v53 = vand.u32 2147483647, %v2125_v51 }
 0x955   :  { %v2175_v15 = vadd.f32 %v2110_v42, %v6893_v57  ;;  %v2146_v35 = vmul.f32 %v4573_v0, %v2145_v34  ;;  %v2115_v56 = vadd.f32 %v2110_v42, %v894_v31 }
 0x956   :  { %v2140_v8 = vor.u32 1.1754944e-38, %v2139_v43  ;;  %vm2138_vm14 = vcmp.eq.f32.partialorder %v2137_v53, 8.507059e+37 }
 0x957   :  { %2183 = vrot.lane.b32.xlu0 %v2175_v15, %s4825_s26  ;;  %v2147_v36 = vadd.f32 %v4573_v0, %v2146_v35  ;;  %v4427_v2 = vmul.f32 -1.442695, %v2115_v56 }
 0x959   :  { %v2151_v55 = vsel %vm2150_vm8, %v4573_v0, %v2147_v36  ;;  %4578 = vpow2.f32 %v4427_v2 }
 0x95a   :  { %v4577_v21 = vpop.eup %4576  ;;  %v2156_v23 = vsel %vm2153_vm9, %v2155_v5, %v2151_v55 }
 0x95b   :  { %v2129_v12 = vmul.f32 %v4577_v21, %v2125_v51  ;;  %vm2134_vm10 = vweird.f32 %v4577_v21 }
 0x95c   :  { %vm2135_vm13 = vmor %vm2133_vm11, %vm2134_vm10 }
 0x95d   :  { %v2130_v50 = vsub.f32 1.0, %v2129_v12  ;;  %v2210_v12 = vsub.f32 1.0, %v2156_v23 }
 0x95f   :  { %v2131_v26 = vmul.f32 %v4577_v21, %v2130_v50  ;;  %v4579_v32 = vpop.eup %4578 }
 0x960   :  { %v2127_v52 = vadd.f32 1.0, %v4579_v32  ;;  %v7117_v32 = vpop.f32.mrf.mxu0 }
 0x961   :  { %v2132_v22 = vadd.f32 %v4577_v21, %v2131_v26 }
 0x962   :  { %4580 = vrcp.f32 %v2127_v52  ;;  %v2169_v47 = vand.u32 2147483648, %v2127_v52  ;;  %vm2163_vm0 = vweird.f32 %v2127_v52  ;;  %v2167_v46 = vand.u32 2147483647, %v2127_v52 }
 0x963   :  { %v2136_v45 = vsel %vm2135_vm13, %v4577_v21, %v2132_v22 }
 0x964   :  { %v2141_v42 = vsel %vm2138_vm14, %v2140_v8, %v2136_v45  ;;  %v2170_v14 = vor.u32 1.1754944e-38, %v2169_v47  ;;  %vm2168_vm2 = vcmp.eq.f32.partialorder %v2167_v46, 8.507059e+37 }
 0x965   :  { %v2227_v50 = vmul.f32 %v2141_v42, %v7032_v40 }
 0x968   :  { %v4581_v29 = vpop.eup %4580 }
 0x969   :  { %v2159_v18 = vmul.f32 %v4581_v29, %v2127_v52  ;;  %vm2164_vm15 = vweird.f32 %v4581_v29  ;;  %v7128_v52 = vld [vmem:[%s7813_s4] sm:$0xff] }
 0x96a   :  { %vm2165_vm1 = vmor %vm2163_vm0, %vm2164_vm15 }
 0x96b   :  { %v2160_v58 = vsub.f32 1.0, %v2159_v18 }
 0x96d   :  { %v2161_v54 = vmul.f32 %v4581_v29, %v2160_v58 }
 0x96f   :  { %v2162_v30 = vadd.f32 %v4581_v29, %v2161_v54 }
 0x971   :  { %v2166_v9 = vsel %vm2165_vm1, %v4581_v29, %v2162_v30 }
 0x972   :  { %v2171_v63 = vsel %vm2168_vm2, %v2170_v14, %v2166_v9 }
 0x973   :  { %v2211_v26 = vsub.f32 1.0, %v2171_v63 }
 0x999   :  { %v2182_v7 = vpop.permute.xlu2 %2181 }
 0x99a   :  { %v2189_v11 = vmul.f32 %v2182_v7, %v2156_v23 }
 0x99c   :  { %2196 = vrot.lane.b32.xlu2 %v2189_v11, %s4825_s26 }
 0x9a9   :  { %v2180_v20 = vpop.permute.xlu1 %2179 }
 0x9aa   :  { %v2188_v15 = vmul.f32 %v2180_v20, %v2141_v42  ;;  %v660_v20 = vperm.slane %v7128_v52, 4 }
 0x9ac   :  { %2194 = vrot.lane.b32.xlu1 %v2188_v15, %s4825_s26  ;;  %v914_v58 = vadd.f32 %v6539_v41, %v660_v20 }
 0x9ae   :  { %v7138_v30 = vadd.f32 %v6549_v49, %v914_v58 }
 0x9c9   :  { %v2184_v0 = vpop.permute.xlu0 %2183 }
 0x9ca   :  { %v2190_v6 = vmul.f32 %v2184_v0, %v2171_v63 }
 0x9cc   :  { %2198 = vrot.lane.b32.xlu0 %v2190_v6, %s4825_s26 }
 0x9f6   :  { %v2197_v51 = vpop.permute.xlu2 %2196 }
 0x9f7   :  { %v2204_v34 = vadd.f32 %v2197_v51, %v7077_v38  ;;  %v2228_v38 = vmul.f32 %v2156_v23, %v7027_v37  ;;  %v2229_v37 = vmul.f32 %v2171_v63, %v7037_v4  ;;  %v920_v51 = vadd.f32 %v6659_v61, %v660_v20 }
 0x9f9   :  { %4582 = vtanh.f32 %v2204_v34 }
 0x9ff   :  { %v4583_v35 = vpop.eup %4582 }
 0xa00   :  { %2217 = vrot.lane.b32.xlu2 %v4583_v35, %s4827_s13 }
 0xa1e   :  { %v2195_v28 = vpop.permute.xlu1 %2194 }
 0xa1f   :  { %v2203_v36 = vadd.f32 %v2195_v28, %v7082_v3  ;;  %v2209_v3 = vsub.f32 1.0, %v2141_v42  ;;  %v917_v42 = vadd.f32 %v6599_v17, %v660_v20  ;;  %v946_v28 = vadd.f32 %v6675_v16, %v920_v51 }
 0xa21   :  { %4584 = vtanh.f32 %v2203_v36  ;;  %v7133_v15 = vadd.f32 %v6609_v25, %v917_v42 }
 0xa27   :  { %v4585_v21 = vpop.eup %4584 }
 0xa28   :  { %2215 = vrot.lane.b32.xlu1 %v4585_v21, %s4827_s13 }
 0xa3e   :  { %v2199_v44 = vpop.permute.xlu0 %2198 }
 0xa3f   :  { %v2205_v59 = vadd.f32 %v2199_v44, %v894_v31 }
 0xa41   :  { %4586 = vtanh.f32 %v2205_v59 }
 0xa47   :  { %v4587_v55 = vpop.eup %4586 }
 0xa48   :  { %2219 = vrot.lane.b32.xlu0 %v4587_v55, %s4827_s13 }
 0xa5a   :  { %v2218_v5 = vpop.permute.xlu2 %2217 }
 0xa5b   :  { %v2225_v56 = vmul.f32 %v2218_v5, %v2210_v12 }
 0xa5d   :  { %v7096_v7 = vadd.f32 %v2228_v38, %v2225_v56 }
 0xa5f   :  { %2242 = vrot.lane.b32.xlu2 %v7096_v7, %s4827_s13 }
 0xa9a   :  { %v2216_v11 = vpop.permute.xlu1 %2215 }
 0xa9b   :  { %v2224_v2 = vmul.f32 %v2216_v11, %v2209_v3 }
 0xa9d   :  { %v7101_v31 = vadd.f32 %v2227_v50, %v2224_v2 }
 0xa9f   :  { %2240 = vrot.lane.b32.xlu1 %v7101_v31, %s4827_s13 }
 0xab9   :  { %v2243_v40 = vpop.permute.xlu2 %2242 }
 0xaba   :  { %v2220_v22 = vpop.permute.xlu0 %2219 }
 0xabb   :  { %v2226_v23 = vmul.f32 %v2220_v22, %v2211_v26 }
 0xabd   :  { %v7106_v43 = vadd.f32 %v2229_v37, %v2226_v23 }
 0xabf   :  { %2244 = vrot.lane.b32.xlu0 %v7106_v43, %s4827_s13 }
 0xb11   :  { %v2241_v53 = vpop.permute.xlu1 %2240 }
 0xb12   :  { %4428 = vmatmul.msk.f32.vlgmr.msrb.gmra.mxu0 %vm1585_vm12, %v2241_v53 }
 0xb13   :  { %3584 = vmatpush.msrb.mxu0 %v7045_v62 }
 0xb15   :  { %3585 = vmatpush.msrb.mxu0 %v7051_v39 }
 0xb17   :  { %3586 = vmatpush.msrb.mxu0 %v7057_v19 }
 0xb19   :  { %3587 = vmatpush.msrb.mxu0 %v7063_v60 }
 0xb1a   :  { %4429 = vmatmul.msk.f32.gmra.mxu0 %vm1585_vm12, %v2243_v40 }
 0xb31   :  { %v2245_v4 = vpop.permute.xlu0 %2244 }
 0xb32   :  { %4430 = vmatmul.msk.f32.gmra.mxu0 %vm1585_vm12, %v2245_v4 }
 0xb8f   :  { %v2269_v45 = vpop.f32.mrf.mxu0 }
 0xb90   :  { %v2338_v8 = vadd.f32 %v2269_v45, %v6893_v57  ;;  %v2278_v47 = vadd.f32 %v2269_v45, %v7138_v30 }
 0xb92   :  { %2344 = vrot.lane.b32.xlu1 %v2338_v8, %s4825_s26  ;;  %v4431_v9 = vmul.f32 -1.442695, %v2278_v47 }
 0xb97   :  { %v2272_v62 = vpop.f32.mrf.mxu0 }
 0xb98   :  { %v2339_v39 = vadd.f32 %v2272_v62, %v6893_v57  ;;  %v2279_v29 = vadd.f32 %v2272_v62, %v7133_v15 }
 0xb9a   :  { %2346 = vrot.lane.b32.xlu2 %v2339_v39, %s4825_s26  ;;  %v4432_v18 = vmul.f32 -1.442695, %v2279_v29 }
 0xb9c   :  { %4588 = vpow2.f32 %v4432_v18 }
 0xba2   :  { %v4589_v54 = vpop.eup %4588 }
 0xba3   :  { %v2291_v46 = vadd.f32 1.0, %v4589_v54 }
 0xba5   :  { %4590 = vrcp.f32 %v2291_v46  ;;  %v2319_v49 = vand.u32 2147483648, %v2291_v46  ;;  %vm2313_vm4 = vweird.f32 %v2291_v46  ;;  %v2317_v35 = vand.u32 2147483647, %v2291_v46 }
 0xba6   :  { %4592 = vpow2.f32 %v4431_v9 }
 0xba7   :  { %v2320_v44 = vor.u32 1.1754944e-38, %v2319_v49  ;;  %vm2318_vm6 = vcmp.eq.f32.partialorder %v2317_v35, 8.507059e+37 }
 0xbab   :  { %v4591_v17 = vpop.eup %4590 }
 0xbac   :  { %v4593_v14 = vpop.eup %4592  ;;  %v2309_v25 = vmul.f32 %v4591_v17, %v2291_v46  ;;  %vm2314_vm3 = vweird.f32 %v4591_v17 }
 0xbad   :  { %v2290_v0 = vadd.f32 1.0, %v4593_v14  ;;  %vm2315_vm5 = vmor %vm2313_vm4, %vm2314_vm3 }
 0xbae   :  { %v2310_v63 = vsub.f32 1.0, %v2309_v25 }
 0xbaf   :  { %v2275_v19 = vpop.f32.mrf.mxu0  ;;  %4594 = vrcp.f32 %v2290_v0  ;;  %v2304_v11 = vand.u32 2147483648, %v2290_v0  ;;  %vm2298_vm8 = vweird.f32 %v2290_v0  ;;  %v2302_v50 = vand.u32 2147483647, %v2290_v0 }
 0xbb0   :  { %v2340_v60 = vadd.f32 %v2275_v19, %v6893_v57  ;;  %v2311_v6 = vmul.f32 %v4591_v17, %v2310_v63  ;;  %v2280_v59 = vadd.f32 %v2275_v19, %v946_v28 }
 0xbb1   :  { %v2305_v26 = vor.u32 1.1754944e-38, %v2304_v11  ;;  %vm2303_vm10 = vcmp.eq.f32.partialorder %v2302_v50, 8.507059e+37  ;;  %v661_v50 = vperm.slane %v7128_v52, 5 }
 0xbb2   :  { %2348 = vrot.lane.b32.xlu0 %v2340_v60, %s4825_s26  ;;  %v2312_v41 = vadd.f32 %v4591_v17, %v2311_v6  ;;  %v4433_v56 = vmul.f32 -1.442695, %v2280_v59 }
 0xbb4   :  { %v2316_v36 = vsel %vm2315_vm5, %v4591_v17, %v2312_v41  ;;  %4596 = vpow2.f32 %v4433_v56 }
 0xbb5   :  { %v4595_v34 = vpop.eup %4594  ;;  %v2321_v12 = vsel %vm2318_vm6, %v2320_v44, %v2316_v36 }
 0xbb6   :  { %v2294_v21 = vmul.f32 %v4595_v34, %v2290_v0  ;;  %vm2299_vm7 = vweird.f32 %v4595_v34  ;;  %v2375_v63 = vsub.f32 1.0, %v2321_v12 }
 0xbb7   :  { %vm2300_vm9 = vmor %vm2298_vm8, %vm2299_vm7 }
 0xbb8   :  { %v2295_v38 = vsub.f32 1.0, %v2294_v21 }
 0xbba   :  { %v2296_v61 = vmul.f32 %v4595_v34, %v2295_v38  ;;  %v4597_v16 = vpop.eup %4596 }
 0xbbb   :  { %v2292_v22 = vadd.f32 1.0, %v4597_v16  ;;  %v969_v16 = vadd.f32 %v6531_v33, %v661_v50 }
 0xbbc   :  { %v2297_v3 = vadd.f32 %v4595_v34, %v2296_v61 }
 0xbbd   :  { %4598 = vrcp.f32 %v2292_v22  ;;  %v2334_v39 = vand.u32 2147483648, %v2292_v22  ;;  %vm2328_vm13 = vweird.f32 %v2292_v22  ;;  %v2332_v19 = vand.u32 2147483647, %v2292_v22 }
 0xbbe   :  { %v2301_v2 = vsel %vm2300_vm9, %v4595_v34, %v2297_v3 }
 0xbbf   :  { %v2306_v23 = vsel %vm2303_vm10, %v2305_v26, %v2301_v2  ;;  %v2335_v20 = vor.u32 1.1754944e-38, %v2334_v39  ;;  %vm2333_vm15 = vcmp.eq.f32.partialorder %v2332_v19, 8.507059e+37  ;;  %v7180_v2 = vadd.f32 %v6547_v48, %v969_v16 }
 0xbc0   :  { %v2392_v49 = vmul.f32 %v2306_v23, %v7101_v31 }
 0xbc3   :  { %v4599_v40 = vpop.eup %4598 }
 0xbc4   :  { %v2324_v4 = vmul.f32 %v4599_v40, %v2292_v22  ;;  %vm2329_vm11 = vweird.f32 %v4599_v40 }
 0xbc5   :  { %vm2330_vm14 = vmor %vm2328_vm13, %vm2329_vm11 }
 0xbc6   :  { %v2325_v45 = vsub.f32 1.0, %v2324_v4 }
 0xbc8   :  { %v2326_v8 = vmul.f32 %v4599_v40, %v2325_v45 }
 0xbca   :  { %v2327_v62 = vadd.f32 %v4599_v40, %v2326_v8 }
 0xbcc   :  { %v2331_v60 = vsel %vm2330_vm14, %v4599_v40, %v2327_v62 }
 0xbcd   :  { %v2336_v29 = vsel %vm2333_vm15, %v2335_v20, %v2331_v60  ;;  %v972_v60 = vadd.f32 %v6591_v13, %v661_v50 }
 0xbce   :  { %v2376_v36 = vsub.f32 1.0, %v2336_v29 }
 0xbf4   :  { %v2347_v55 = vpop.permute.xlu2 %2346 }
 0xbf5   :  { %v2354_v5 = vmul.f32 %v2347_v55, %v2321_v12 }
 0xbf7   :  { %2361 = vrot.lane.b32.xlu2 %v2354_v5, %s4825_s26  ;;  %v7169_v5 = vpop.f32.mrf.mxu1 }
 0xc04   :  { %v2345_v37 = vpop.permute.xlu1 %2344 }
 0xc05   :  { %v2353_v53 = vmul.f32 %v2345_v37, %v2306_v23  ;;  %v966_v37 = vadd.f32 %v6471_v1, %v661_v50 }
 0xc07   :  { %2359 = vrot.lane.b32.xlu1 %v2353_v53, %s4825_s26  ;;  %v7185_v53 = vadd.f32 %v6487_v10, %v966_v37 }
 0xc24   :  { %v2349_v42 = vpop.permute.xlu0 %2348 }
 0xc25   :  { %v2355_v18 = vmul.f32 %v2349_v42, %v2336_v29 }
 0xc27   :  { %2363 = vrot.lane.b32.xlu0 %v2355_v18, %s4825_s26 }
 0xc51   :  { %v2362_v58 = vpop.permute.xlu2 %2361 }
 0xc52   :  { %v2369_v54 = vadd.f32 %v2362_v58, %v7133_v15  ;;  %v2393_v15 = vmul.f32 %v2321_v12, %v7096_v7  ;;  %v2394_v7 = vmul.f32 %v2336_v29, %v7106_v43  ;;  %v998_v29 = vadd.f32 %v6607_v24, %v972_v60 }
 0xc54   :  { %4600 = vtanh.f32 %v2369_v54 }
 0xc5a   :  { %v4601_v47 = vpop.eup %4600 }
 0xc5b   :  { %2382 = vrot.lane.b32.xlu2 %v4601_v47, %s4827_s13 }
 0xc79   :  { %v2360_v46 = vpop.permute.xlu1 %2359 }
 0xc7a   :  { %v2368_v9 = vadd.f32 %v2360_v46, %v7138_v30  ;;  %v2374_v30 = vsub.f32 1.0, %v2306_v23 }
 0xc7c   :  { %4602 = vtanh.f32 %v2368_v9 }
 0xc82   :  { %v4603_v17 = vpop.eup %4602 }
 0xc83   :  { %2380 = vrot.lane.b32.xlu1 %v4603_v17, %s4827_s13 }
 0xc99   :  { %v2364_v14 = vpop.permute.xlu0 %2363 }
 0xc9a   :  { %v2370_v25 = vadd.f32 %v2364_v14, %v946_v28 }
 0xc9c   :  { %4604 = vtanh.f32 %v2370_v25 }
 0xca2   :  { %v4605_v0 = vpop.eup %4604 }
 0xca3   :  { %2384 = vrot.lane.b32.xlu0 %v4605_v0, %s4827_s13 }
 0xcb5   :  { %v2383_v6 = vpop.permute.xlu2 %2382 }
 0xcb6   :  { %v2390_v51 = vmul.f32 %v2383_v6, %v2375_v63 }
 0xcb8   :  { %v7152_v41 = vadd.f32 %v2393_v15, %v2390_v51 }
 0xcba   :  { %2407 = vrot.lane.b32.xlu2 %v7152_v41, %s4827_s13 }
 0xcf5   :  { %v2381_v34 = vpop.permute.xlu1 %2380 }
 0xcf6   :  { %v2389_v35 = vmul.f32 %v2381_v34, %v2374_v30 }
 0xcf8   :  { %v7157_v28 = vadd.f32 %v2392_v49, %v2389_v35 }
 0xcfa   :  { %2405 = vrot.lane.b32.xlu1 %v7157_v28, %s4827_s13 }
 0xd14   :  { %v2408_v31 = vpop.permute.xlu2 %2407 }
 0xd15   :  { %v2385_v21 = vpop.permute.xlu0 %2384 }
 0xd16   :  { %v2391_v44 = vmul.f32 %v2385_v21, %v2376_v36 }
 0xd18   :  { %v7162_v59 = vadd.f32 %v2394_v7, %v2391_v44 }
 0xd1a   :  { %2409 = vrot.lane.b32.xlu0 %v7162_v59, %s4827_s13 }
 0xd6c   :  { %v2406_v55 = vpop.permute.xlu1 %2405 }
 0xd6d   :  { %4434 = vmatmul.msk.f32.vlgmr.msrb.gmra.mxu1 %vm1585_vm12, %v2406_v55 }
 0xd75   :  { %4435 = vmatmul.msk.f32.gmra.mxu1 %vm1585_vm12, %v2408_v31 }
 0xd8c   :  { %v2410_v12 = vpop.permute.xlu0 %2409 }
 0xd8d   :  { %4436 = vmatmul.msk.f32.gmra.mxu1 %vm1585_vm12, %v2410_v12 }
 0xdea   :  { %v2434_v38 = vpop.f32.mrf.mxu1 }
 0xdeb   :  { %v2503_v43 = vadd.f32 %v2434_v38, %v6893_v57  ;;  %v2443_v40 = vadd.f32 %v2434_v38, %v7185_v53 }
 0xded   :  { %2509 = vrot.lane.b32.xlu1 %v2503_v43, %s4825_s26  ;;  %v4437_v45 = vmul.f32 -1.442695, %v2443_v40 }
 0xdf2   :  { %v2437_v56 = vpop.f32.mrf.mxu1 }
 0xdf3   :  { %v2504_v61 = vadd.f32 %v2437_v56, %v6893_v57  ;;  %v2444_v26 = vadd.f32 %v2437_v56, %v7180_v2 }
 0xdf5   :  { %2511 = vrot.lane.b32.xlu2 %v2504_v61, %s4825_s26  ;;  %v4438_v22 = vmul.f32 -1.442695, %v2444_v26 }
 0xdf7   :  { %4606 = vpow2.f32 %v4438_v22 }
 0xdfd   :  { %v4607_v23 = vpop.eup %4606 }
 0xdfe   :  { %v2456_v4 = vadd.f32 1.0, %v4607_v23 }
 0xe00   :  { %4608 = vrcp.f32 %v2456_v4  ;;  %v2484_v10 = vand.u32 2147483648, %v2456_v4  ;;  %vm2478_vm1 = vweird.f32 %v2456_v4  ;;  %v2482_v42 = vand.u32 2147483647, %v2456_v4 }
 0xe01   :  { %4610 = vpow2.f32 %v4437_v45 }
 0xe02   :  { %v2485_v54 = vor.u32 1.1754944e-38, %v2484_v10  ;;  %vm2483_vm3 = vcmp.eq.f32.partialorder %v2482_v42, 8.507059e+37 }
 0xe06   :  { %v4609_v33 = vpop.eup %4608 }
 0xe07   :  { %v4611_v8 = vpop.eup %4610  ;;  %v2474_v48 = vmul.f32 %v4609_v33, %v2456_v4  ;;  %vm2479_vm0 = vweird.f32 %v4609_v33 }
 0xe08   :  { %v2455_v62 = vadd.f32 1.0, %v4611_v8  ;;  %vm2480_vm2 = vmor %vm2478_vm1, %vm2479_vm0 }
 0xe09   :  { %v2475_v39 = vsub.f32 1.0, %v2474_v48 }
 0xe0a   :  { %v2440_v3 = vpop.f32.mrf.mxu1  ;;  %4612 = vrcp.f32 %v2455_v62  ;;  %v2469_v63 = vand.u32 2147483648, %v2455_v62  ;;  %vm2463_vm5 = vweird.f32 %v2455_v62  ;;  %v2467_v6 = vand.u32 2147483647, %v2455_v62 }
 0xe0b   :  { %v2505_v11 = vadd.f32 %v2440_v3, %v6893_v57  ;;  %v2476_v19 = vmul.f32 %v4609_v33, %v2475_v39  ;;  %v2445_v47 = vadd.f32 %v2440_v3, %v998_v29 }
 0xe0c   :  { %v2470_v51 = vor.u32 1.1754944e-38, %v2469_v63  ;;  %vm2468_vm7 = vcmp.eq.f32.partialorder %v2467_v6, 8.507059e+37  ;;  %v7885_v6 = vld [vmem:[#allocation6_spill] sm:$0xff] }
 0xe0d   :  { %2513 = vrot.lane.b32.xlu0 %v2505_v11, %s4825_s26  ;;  %v2477_v1 = vadd.f32 %v4609_v33, %v2476_v19  ;;  %v4439_v25 = vmul.f32 -1.442695, %v2445_v47 }
 0xe0f   :  { %v2481_v18 = vsel %vm2480_vm2, %v4609_v33, %v2477_v1  ;;  %4614 = vpow2.f32 %v4439_v25  ;;  %v7884_v25 = vld [vmem:[#allocation11_spill] sm:$0xff] }
 0xe10   :  { %v4613_v20 = vpop.eup %4612  ;;  %v2486_v9 = vsel %vm2483_vm3, %v2485_v54, %v2481_v18 }
 0xe11   :  { %v2459_v58 = vmul.f32 %v4613_v20, %v2455_v62  ;;  %vm2464_vm4 = vweird.f32 %v4613_v20  ;;  %v2540_v45 = vsub.f32 1.0, %v2486_v9 }
 0xe12   :  { %vm2465_vm6 = vmor %vm2463_vm5, %vm2464_vm4 }
 0xe13   :  { %v2460_v14 = vsub.f32 1.0, %v2459_v58 }
 0xe15   :  { %v2461_v13 = vmul.f32 %v4613_v20, %v2460_v14  ;;  %v4615_v24 = vpop.eup %4614 }
 0xe16   :  { %v2457_v30 = vadd.f32 1.0, %v4615_v24 }
 0xe17   :  { %v2462_v0 = vadd.f32 %v4613_v20, %v2461_v13 }
 0xe18   :  { %4616 = vrcp.f32 %v2457_v30  ;;  %v2499_v31 = vand.u32 2147483648, %v2457_v30  ;;  %vm2493_vm9 = vweird.f32 %v2457_v30  ;;  %v2497_v12 = vand.u32 2147483647, %v2457_v30 }
 0xe19   :  { %v2466_v15 = vsel %vm2465_vm6, %v4613_v20, %v2462_v0 }
 0xe1a   :  { %v2471_v49 = vsel %vm2468_vm7, %v2470_v51, %v2466_v15  ;;  %v2500_v43 = vor.u32 1.1754944e-38, %v2499_v31  ;;  %vm2498_vm11 = vcmp.eq.f32.partialorder %v2497_v12, 8.507059e+37  ;;  %v7886_v51 = vld [vmem:[#allocation8_spill] sm:$0xff] }
 0xe1b   :  { %v2557_v39 = vmul.f32 %v2471_v49, %v7157_v28  ;;  %v7887_v31 = vld [vmem:[#allocation12_spill] sm:$0xff] }
 0xe1e   :  { %v4617_v36 = vpop.eup %4616 }
 0xe1f   :  { %v2489_v21 = vmul.f32 %v4617_v36, %v2457_v30  ;;  %vm2494_vm8 = vweird.f32 %v4617_v36 }
 0xe20   :  { %vm2495_vm10 = vmor %vm2493_vm9, %vm2494_vm8 }
 0xe21   :  { %v2490_v7 = vsub.f32 1.0, %v2489_v21 }
 0xe23   :  { %v2491_v44 = vmul.f32 %v4617_v36, %v2490_v7 }
 0xe25   :  { %v2492_v55 = vadd.f32 %v4617_v36, %v2491_v44 }
 0xe27   :  { %v2496_v38 = vsel %vm2495_vm10, %v4617_v36, %v2492_v55 }
 0xe28   :  { %v2501_v61 = vsel %vm2498_vm11, %v2500_v43, %v2496_v38 }
 0xe29   :  { %v2541_v1 = vsub.f32 1.0, %v2501_v61 }
 0xe4f   :  { %v2512_v46 = vpop.permute.xlu2 %2511 }
 0xe50   :  { %v2519_v17 = vmul.f32 %v2512_v46, %v2486_v9 }
 0xe52   :  { %2526 = vrot.lane.b32.xlu2 %v2519_v17, %s4825_s26  ;;  %v662_v17 = vperm.slane %v7128_v52, 6 }
 0xe54   :  { %v1021_v14 = vadd.f32 %v6766_v27, %v662_v17  ;;  %v1018_v24 = vadd.f32 %v7885_v6, %v662_v17  ;;  %v1024_v12 = vadd.f32 %v7887_v31, %v662_v17 }
 0xe56   :  { %v7225_v13 = vadd.f32 %v7884_v25, %v1021_v14  ;;  %v7230_v30 = vadd.f32 %v7886_v51, %v1018_v24 }
 0xe5f   :  { %v2510_v34 = vpop.permute.xlu1 %2509 }
 0xe60   :  { %v2518_v35 = vmul.f32 %v2510_v34, %v2471_v49 }
 0xe62   :  { %2524 = vrot.lane.b32.xlu1 %v2518_v35, %s4825_s26 }
 0xe7f   :  { %v2514_v56 = vpop.permute.xlu0 %2513 }
 0xe80   :  { %v2520_v3 = vmul.f32 %v2514_v56, %v2501_v61 }
 0xe82   :  { %2528 = vrot.lane.b32.xlu0 %v2520_v3, %s4825_s26  ;;  %v7888_v3 = vld [vmem:[#allocation13_spill] sm:$0xff] }
 0xeac   :  { %v2527_v11 = vpop.permute.xlu2 %2526 }
 0xead   :  { %v2534_v50 = vadd.f32 %v2527_v11, %v7180_v2  ;;  %v2558_v2 = vmul.f32 %v2486_v9, %v7152_v41  ;;  %v2559_v41 = vmul.f32 %v2501_v61, %v7162_v59  ;;  %v1050_v11 = vadd.f32 %v7888_v3, %v1024_v12 }
 0xeaf   :  { %4618 = vtanh.f32 %v2534_v50 }
 0xeb5   :  { %v4619_v16 = vpop.eup %4618 }
 0xeb6   :  { %2547 = vrot.lane.b32.xlu2 %v4619_v16, %s4827_s13 }
 0xed4   :  { %v2525_v26 = vpop.permute.xlu1 %2524 }
 0xed5   :  { %v2533_v22 = vadd.f32 %v2525_v26, %v7185_v53  ;;  %v2539_v53 = vsub.f32 1.0, %v2471_v49 }
 0xed7   :  { %4620 = vtanh.f32 %v2533_v22 }
 0xedd   :  { %v4621_v37 = vpop.eup %4620 }
 0xede   :  { %2545 = vrot.lane.b32.xlu1 %v4621_v37, %s4827_s13 }
 0xef4   :  { %v2529_v23 = vpop.permute.xlu0 %2528 }
 0xef5   :  { %v2535_v40 = vadd.f32 %v2529_v23, %v998_v29 }
 0xef7   :  { %4622 = vtanh.f32 %v2535_v40 }
 0xefd   :  { %v4623_v4 = vpop.eup %4622 }
 0xefe   :  { %2549 = vrot.lane.b32.xlu0 %v4623_v4, %s4827_s13 }
 0xf10   :  { %v2548_v33 = vpop.permute.xlu2 %2547 }
 0xf11   :  { %v2555_v8 = vmul.f32 %v2548_v33, %v2540_v45 }
 0xf13   :  { %v7199_v48 = vadd.f32 %v2558_v2, %v2555_v8 }
 0xf15   :  { %2572 = vrot.lane.b32.xlu2 %v7199_v48, %s4827_s13 }
 0xf50   :  { %v2546_v62 = vpop.permute.xlu1 %2545 }
 0xf51   :  { %v2554_v19 = vmul.f32 %v2546_v62, %v2539_v53 }
 0xf53   :  { %v7204_v60 = vadd.f32 %v2557_v39, %v2554_v19 }
 0xf55   :  { %2570 = vrot.lane.b32.xlu1 %v7204_v60, %s4827_s13 }
 0xf6f   :  { %v2573_v28 = vpop.permute.xlu2 %2572 }
 0xf70   :  { %v2550_v20 = vpop.permute.xlu0 %2549 }
 0xf71   :  { %v2556_v10 = vmul.f32 %v2550_v20, %v2541_v1 }
 0xf73   :  { %v7209_v42 = vadd.f32 %v2559_v41, %v2556_v10 }
 0xf75   :  { %2574 = vrot.lane.b32.xlu0 %v7209_v42, %s4827_s13 }
 0xfc7   :  { %v2571_v29 = vpop.permute.xlu1 %2570 }
 0xfc8   :  { %4440 = vmatmul.msk.f32.vlgmr.msra.gmra.mxu2 %vm1585_vm12, %v2571_v29 }
 0xfd0   :  { %4441 = vmatmul.msk.f32.gmra.mxu2 %vm1585_vm12, %v2573_v28 }
 0xfe7   :  { %v2575_v18 = vpop.permute.xlu0 %2574 }
 0xfe8   :  { %4442 = vmatmul.msk.f32.gmra.mxu2 %vm1585_vm12, %v2575_v18 }
0x104b   :  { %v2599_v58 = vpop.f32.mrf.mxu2 }
0x104c   :  { %v2668_v54 = vadd.f32 %v2599_v58, %v6893_v57  ;;  %v2608_v34 = vadd.f32 %v2599_v58, %v7230_v30 }
0x104e   :  { %2674 = vrot.lane.b32.xlu1 %v2668_v54, %s4825_s26  ;;  %v4443_v35 = vmul.f32 -1.442695, %v2608_v34 }
0x1053   :  { %v2602_v59 = vpop.f32.mrf.mxu2 }
0x1054   :  { %v2669_v47 = vadd.f32 %v2602_v59, %v6893_v57  ;;  %v2609_v0 = vadd.f32 %v2602_v59, %v7225_v13 }
0x1056   :  { %2676 = vrot.lane.b32.xlu2 %v2669_v47, %s4825_s26  ;;  %v4444_v63 = vmul.f32 -1.442695, %v2609_v0 }
0x1058   :  { %4624 = vpow2.f32 %v4444_v63 }
0x105e   :  { %v4625_v15 = vpop.eup %4624 }
0x105f   :  { %v2621_v49 = vadd.f32 1.0, %v4625_v15 }
0x1061   :  { %4626 = vrcp.f32 %v2621_v49  ;;  %v2649_v56 = vand.u32 2147483648, %v2621_v49  ;;  %vm2643_vm14 = vweird.f32 %v2621_v49  ;;  %v2647_v61 = vand.u32 2147483647, %v2621_v49 }
0x1062   :  { %4628 = vpow2.f32 %v4443_v35 }
0x1063   :  { %v2650_v26 = vor.u32 1.1754944e-38, %v2649_v56  ;;  %vm2648_vm0 = vcmp.eq.f32.partialorder %v2647_v61, 8.507059e+37 }
0x1067   :  { %v4627_v27 = vpop.eup %4626 }
0x1068   :  { %v4629_v36 = vpop.eup %4628  ;;  %v2639_v21 = vmul.f32 %v4627_v27, %v2621_v49  ;;  %vm2644_vm13 = vweird.f32 %v4627_v27 }
0x1069   :  { %v2620_v7 = vadd.f32 1.0, %v4629_v36  ;;  %vm2645_vm15 = vmor %vm2643_vm14, %vm2644_vm13 }
0x106a   :  { %v2640_v44 = vsub.f32 1.0, %v2639_v21 }
0x106b   :  { %v2605_v46 = vpop.f32.mrf.mxu2  ;;  %4630 = vrcp.f32 %v2620_v7  ;;  %v2634_v8 = vand.u32 2147483648, %v2620_v7  ;;  %vm2628_vm2 = vweird.f32 %v2620_v7  ;;  %v2632_v53 = vand.u32 2147483647, %v2620_v7 }
0x106c   :  { %v2670_v9 = vadd.f32 %v2605_v46, %v6893_v57  ;;  %v2641_v55 = vmul.f32 %v4627_v27, %v2640_v44  ;;  %v2610_v22 = vadd.f32 %v2605_v46, %v1050_v11 }
0x106d   :  { %v2635_v19 = vor.u32 1.1754944e-38, %v2634_v8  ;;  %vm2633_vm4 = vcmp.eq.f32.partialorder %v2632_v53, 8.507059e+37  ;;  %v7891_v53 = vld [vmem:[#allocation3_spill] sm:$0xff] }
0x106e   :  { %2678 = vrot.lane.b32.xlu0 %v2670_v9, %s4825_s26  ;;  %v2642_v38 = vadd.f32 %v4627_v27, %v2641_v55  ;;  %v4445_v45 = vmul.f32 -1.442695, %v2610_v22 }
0x1070   :  { %v2646_v50 = vsel %vm2645_vm15, %v4627_v27, %v2642_v38  ;;  %4632 = vpow2.f32 %v4445_v45  ;;  %v7890_v45 = vld [vmem:[#allocation7_spill] sm:$0xff] }
0x1071   :  { %v4631_v43 = vpop.eup %4630  ;;  %v2651_v23 = vsel %vm2648_vm0, %v2650_v26, %v2646_v50 }
0x1072   :  { %v2624_v16 = vmul.f32 %v4631_v43, %v2620_v7  ;;  %vm2629_vm1 = vweird.f32 %v4631_v43  ;;  %v2705_v27 = vsub.f32 1.0, %v2651_v23 }
0x1073   :  { %vm2630_vm3 = vmor %vm2628_vm2, %vm2629_vm1 }
0x1074   :  { %v2625_v4 = vsub.f32 1.0, %v2624_v16 }
0x1076   :  { %v2626_v33 = vmul.f32 %v4631_v43, %v2625_v4  ;;  %v4633_v62 = vpop.eup %4632 }
0x1077   :  { %v2622_v1 = vadd.f32 1.0, %v4633_v62 }
0x1078   :  { %v2627_v2 = vadd.f32 %v4631_v43, %v2626_v33 }
0x1079   :  { %4634 = vrcp.f32 %v2622_v1  ;;  %v2664_v59 = vand.u32 2147483648, %v2622_v1  ;;  %vm2658_vm6 = vweird.f32 %v2622_v1  ;;  %v2662_v47 = vand.u32 2147483647, %v2622_v1 }
0x107a   :  { %v2631_v39 = vsel %vm2630_vm3, %v4631_v43, %v2627_v2 }
0x107b   :  { %v2636_v41 = vsel %vm2633_vm4, %v2635_v19, %v2631_v39  ;;  %v2665_v9 = vor.u32 1.1754944e-38, %v2664_v59  ;;  %vm2663_vm8 = vcmp.eq.f32.partialorder %v2662_v47, 8.507059e+37  ;;  %v7892_v19 = vld [vmem:[#allocation4_spill] sm:$0xff]  ;;  %v7893_v59 = vld [vmem:[#allocation9_spill] sm:$0xff] }
0x107c   :  { %v2722_v55 = vmul.f32 %v2636_v41, %v7204_v60 }
0x107f   :  { %v4635_v29 = vpop.eup %4634 }
0x1080   :  { %v2654_v28 = vmul.f32 %v4635_v29, %v2622_v1  ;;  %vm2659_vm5 = vweird.f32 %v4635_v29 }
0x1081   :  { %vm2660_vm7 = vmor %vm2658_vm6, %vm2659_vm5 }
0x1082   :  { %v2655_v18 = vsub.f32 1.0, %v2654_v28 }
0x1084   :  { %v2656_v58 = vmul.f32 %v4635_v29, %v2655_v18 }
0x1086   :  { %v2657_v54 = vadd.f32 %v4635_v29, %v2656_v58 }
0x1088   :  { %v2661_v46 = vsel %vm2660_vm7, %v4635_v29, %v2657_v54 }
0x1089   :  { %v2666_v14 = vsel %vm2663_vm8, %v2665_v9, %v2661_v46 }
0x108a   :  { %v2706_v38 = vsub.f32 1.0, %v2666_v14 }
0x10b0   :  { %v2677_v37 = vpop.permute.xlu2 %2676 }
0x10b1   :  { %v2684_v40 = vmul.f32 %v2677_v37, %v2651_v23 }
0x10b3   :  { %2691 = vrot.lane.b32.xlu2 %v2684_v40, %s4825_s26  ;;  %v7889_v40 = vld [vmem:[#allocation5_spill] sm:$0xff] }
0x10c0   :  { %v2675_v20 = vpop.permute.xlu1 %2674 }
0x10c1   :  { %v2683_v10 = vmul.f32 %v2675_v20, %v2636_v41 }
0x10c3   :  { %2689 = vrot.lane.b32.xlu1 %v2683_v10, %s4825_s26 }
0x10e0   :  { %v2679_v17 = vpop.permute.xlu0 %2678 }
0x10e1   :  { %v2685_v25 = vmul.f32 %v2679_v17, %v2666_v14 }
0x10e3   :  { %2693 = vrot.lane.b32.xlu0 %v2685_v25, %s4825_s26  ;;  %v7894_v25 = vld [vmem:[#allocation10_spill] sm:$0xff] }
0x110d   :  { %v2692_v0 = vpop.permute.xlu2 %2691 }
0x110e   :  { %v2699_v63 = vadd.f32 %v2692_v0, %v7225_v13  ;;  %v2723_v13 = vmul.f32 %v2651_v23, %v7199_v48  ;;  %v2724_v48 = vmul.f32 %v2666_v14, %v7209_v42  ;;  %v663_v23 = vperm.slane %v7128_v52, 7 }
0x1110   :  { %4636 = vtanh.f32 %v2699_v63  ;;  %v1073_v4 = vadd.f32 %v7889_v40, %v663_v23  ;;  %v1070_v62 = vadd.f32 %v7891_v53, %v663_v23  ;;  %v1076_v47 = vadd.f32 %v7893_v59, %v663_v23 }
0x1112   :  { %v7270_v33 = vadd.f32 %v7890_v45, %v1073_v4  ;;  %v7275_v1 = vadd.f32 %v7892_v19, %v1070_v62  ;;  %v1102_v0 = vadd.f32 %v7894_v25, %v1076_v47 }
0x1116   :  { %v4637_v6 = vpop.eup %4636 }
0x1117   :  { %2712 = vrot.lane.b32.xlu2 %v4637_v6, %s4827_s13 }
0x1135   :  { %v2690_v24 = vpop.permute.xlu1 %2689 }
0x1136   :  { %v2698_v15 = vadd.f32 %v2690_v24, %v7230_v30  ;;  %v2704_v30 = vsub.f32 1.0, %v2636_v41 }
0x1138   :  { %4638 = vtanh.f32 %v2698_v15 }
0x113e   :  { %v4639_v51 = vpop.eup %4638 }
0x113f   :  { %2710 = vrot.lane.b32.xlu1 %v4639_v51, %s4827_s13 }
0x1155   :  { %v2694_v34 = vpop.permute.xlu0 %2693 }
0x1156   :  { %v2700_v49 = vadd.f32 %v2694_v34, %v1050_v11 }
0x1158   :  { %4640 = vtanh.f32 %v2700_v49 }
0x115e   :  { %v4641_v35 = vpop.eup %4640 }
0x115f   :  { %2714 = vrot.lane.b32.xlu0 %v4641_v35, %s4827_s13 }
0x1171   :  { %v2713_v36 = vpop.permute.xlu2 %2712 }
0x1172   :  { %v2720_v21 = vmul.f32 %v2713_v36, %v2705_v27 }
0x1174   :  { %v7244_v7 = vadd.f32 %v2723_v13, %v2720_v21 }
0x1176   :  { %2737 = vrot.lane.b32.xlu2 %v7244_v7, %s4827_s13 }
0x11b1   :  { %v2711_v44 = vpop.permute.xlu1 %2710 }
0x11b2   :  { %v2719_v31 = vmul.f32 %v2711_v44, %v2704_v30 }
0x11b4   :  { %v7249_v12 = vadd.f32 %v2722_v55, %v2719_v31 }
0x11b6   :  { %2735 = vrot.lane.b32.xlu1 %v7249_v12, %s4827_s13 }
0x11d0   :  { %v2738_v60 = vpop.permute.xlu2 %2737 }
0x11d1   :  { %v2715_v43 = vpop.permute.xlu0 %2714 }
0x11d2   :  { %v2721_v56 = vmul.f32 %v2715_v43, %v2706_v38 }
0x11d4   :  { %v7254_v61 = vadd.f32 %v2724_v48, %v2721_v56 }
0x11d6   :  { %2739 = vrot.lane.b32.xlu0 %v7254_v61, %s4827_s13 }
0x1228   :  { %v2736_v3 = vpop.permute.xlu1 %2735 }
0x1229   :  { %4446 = vmatmul.msk.f32.vlgmr.msrb.gmra.mxu3 %vm1585_vm12, %v2736_v3 }
0x1231   :  { %4447 = vmatmul.msk.f32.gmra.mxu3 %vm1585_vm12, %v2738_v60 }
0x1248   :  { %v2740_v11 = vpop.permute.xlu0 %2739 }
0x1249   :  { %4448 = vmatmul.msk.f32.gmra.mxu3 %vm1585_vm12, %v2740_v11 }
0x12ac   :  { %v2764_v50 = vpop.f32.mrf.mxu3 }
0x12ad   :  { %v2833_v16 = vadd.f32 %v2764_v50, %v6893_v57  ;;  %v2773_v20 = vadd.f32 %v2764_v50, %v7275_v1 }
0x12af   :  { %2839 = vrot.lane.b32.xlu1 %v2833_v16, %s4825_s26  ;;  %v4449_v10 = vmul.f32 -1.442695, %v2773_v20 }
0x12b4   :  { %v2767_v42 = vpop.f32.mrf.mxu3 }
0x12b5   :  { %v2834_v26 = vadd.f32 %v2767_v42, %v6893_v57  ;;  %v2774_v2 = vadd.f32 %v2767_v42, %v7270_v33 }
0x12b7   :  { %2841 = vrot.lane.b32.xlu2 %v2834_v26, %s4825_s26  ;;  %v4450_v8 = vmul.f32 -1.442695, %v2774_v2 }
0x12b9   :  { %4642 = vpow2.f32 %v4450_v8 }
0x12bf   :  { %v4643_v39 = vpop.eup %4642 }
0x12c0   :  { %v2786_v41 = vadd.f32 1.0, %v4643_v39 }
0x12c2   :  { %4644 = vrcp.f32 %v2786_v41  ;;  %v2814_v17 = vand.u32 2147483648, %v2786_v41  ;;  %vm2808_vm10 = vweird.f32 %v2786_v41  ;;  %v2812_v14 = vand.u32 2147483647, %v2786_v41 }
0x12c3   :  { %4646 = vpow2.f32 %v4449_v10 }
0x12c4   :  { %v2815_v24 = vor.u32 1.1754944e-38, %v2814_v17  ;;  %vm2813_vm13 = vcmp.eq.f32.partialorder %v2812_v14, 8.507059e+37 }
0x12c8   :  { %v4645_v52 = vpop.eup %4644 }
0x12c9   :  { %v4647_v29 = vpop.eup %4646  ;;  %v2804_v28 = vmul.f32 %v4645_v52, %v2786_v41  ;;  %vm2809_vm9 = vweird.f32 %v4645_v52 }
0x12ca   :  { %v2785_v18 = vadd.f32 1.0, %v4647_v29  ;;  %vm2810_vm11 = vmor %vm2808_vm10, %vm2809_vm9 }
0x12cb   :  { %v2805_v58 = vsub.f32 1.0, %v2804_v28 }
0x12cc   :  { %v2770_v22 = vpop.f32.mrf.mxu3  ;;  %4648 = vrcp.f32 %v2785_v18  ;;  %v2799_v21 = vand.u32 2147483648, %v2785_v18  ;;  %vm2793_vm15 = vweird.f32 %v2785_v18  ;;  %v2797_v30 = vand.u32 2147483647, %v2785_v18 }
0x12cd   :  { %v2835_v37 = vadd.f32 %v2770_v22, %v6893_v57  ;;  %v2806_v54 = vmul.f32 %v4645_v52, %v2805_v58  ;;  %v2775_v15 = vadd.f32 %v2770_v22, %v1102_v0 }
0x12ce   :  { %v2800_v31 = vor.u32 1.1754944e-38, %v2799_v21  ;;  %vm2798_vm1 = vcmp.eq.f32.partialorder %v2797_v30, 8.507059e+37  ;;  %v7897_v30 = vld [vmem:[#allocation15_spill] sm:$0xff] }
0x12cf   :  { %2843 = vrot.lane.b32.xlu0 %v2835_v37, %s4825_s26  ;;  %v2807_v46 = vadd.f32 %v4645_v52, %v2806_v54  ;;  %v4451_v27 = vmul.f32 -1.442695, %v2775_v15 }
0x12d1   :  { %v2811_v63 = vsel %vm2810_vm11, %v4645_v52, %v2807_v46  ;;  %4650 = vpow2.f32 %v4451_v27  ;;  %v7896_v27 = vld [vmem:[#allocation19_spill] sm:$0xff] }
0x12d2   :  { %v4649_v9 = vpop.eup %4648  ;;  %v2816_v34 = vsel %vm2813_vm13, %v2815_v24, %v2811_v63 }
0x12d3   :  { %v2789_v6 = vmul.f32 %v4649_v9, %v2785_v18  ;;  %vm2794_vm14 = vweird.f32 %v4649_v9  ;;  %v2870_v10 = vsub.f32 1.0, %v2816_v34 }
0x12d4   :  { %vm2795_vm0 = vmor %vm2793_vm15, %vm2794_vm14 }
0x12d5   :  { %v2790_v35 = vsub.f32 1.0, %v2789_v6 }
0x12d7   :  { %v2791_v36 = vmul.f32 %v4649_v9, %v2790_v35  ;;  %v4651_v44 = vpop.eup %4650 }
0x12d8   :  { %v2787_v38 = vadd.f32 1.0, %v4651_v44 }
0x12d9   :  { %v2792_v13 = vadd.f32 %v4649_v9, %v2791_v36 }
0x12da   :  { %4652 = vrcp.f32 %v2787_v38  ;;  %v2829_v42 = vand.u32 2147483648, %v2787_v38  ;;  %vm2823_vm3 = vweird.f32 %v2787_v38  ;;  %v2827_v26 = vand.u32 2147483647, %v2787_v38 }
0x12db   :  { %v2796_v55 = vsel %vm2795_vm0, %v4649_v9, %v2792_v13 }
0x12dc   :  { %v2801_v48 = vsel %vm2798_vm1, %v2800_v31, %v2796_v55  ;;  %v2830_v37 = vor.u32 1.1754944e-38, %v2829_v42  ;;  %vm2828_vm5 = vcmp.eq.f32.partialorder %v2827_v26, 8.507059e+37  ;;  %v7898_v31 = vld [vmem:[#allocation16_spill] sm:$0xff]  ;;  %v7899_v26 = vld [vmem:[#allocation21_spill] sm:$0xff] }
0x12dd   :  { %v2887_v58 = vmul.f32 %v2801_v48, %v7249_v12 }
0x12e0   :  { %v4653_v3 = vpop.eup %4652 }
0x12e1   :  { %v2819_v60 = vmul.f32 %v4653_v3, %v2787_v38  ;;  %vm2824_vm2 = vweird.f32 %v4653_v3 }
0x12e2   :  { %vm2825_vm4 = vmor %vm2823_vm3, %vm2824_vm2 }
0x12e3   :  { %v2820_v11 = vsub.f32 1.0, %v2819_v60 }
0x12e5   :  { %v2821_v50 = vmul.f32 %v4653_v3, %v2820_v11 }
0x12e7   :  { %v2822_v16 = vadd.f32 %v4653_v3, %v2821_v50 }
0x12e9   :  { %v2826_v22 = vsel %vm2825_vm4, %v4653_v3, %v2822_v16 }
0x12ea   :  { %v2831_v40 = vsel %vm2828_vm5, %v2830_v37, %v2826_v22 }
0x12eb   :  { %v2871_v47 = vsub.f32 1.0, %v2831_v40 }
0x1311   :  { %v2842_v51 = vpop.permute.xlu2 %2841 }
0x1312   :  { %v2849_v49 = vmul.f32 %v2842_v51, %v2816_v34  ;;  %v4821_v51 = vld [vmem:[%s7813_s4 + $0x8] sm:$0xff] }
0x1314   :  { %2856 = vrot.lane.b32.xlu2 %v2849_v49, %s4825_s26  ;;  %v7895_v49 = vld [vmem:[#allocation18_spill] sm:$0xff] }
0x1321   :  { %v2840_v43 = vpop.permute.xlu1 %2839 }
0x1322   :  { %v2848_v56 = vmul.f32 %v2840_v43, %v2801_v48 }
0x1324   :  { %2854 = vrot.lane.b32.xlu1 %v2848_v56, %s4825_s26 }
0x1341   :  { %v2844_v23 = vpop.permute.xlu0 %2843 }
0x1342   :  { %v2850_v4 = vmul.f32 %v2844_v23, %v2831_v40 }
0x1344   :  { %2858 = vrot.lane.b32.xlu0 %v2850_v4, %s4825_s26 }
0x136e   :  { %v2857_v45 = vpop.permute.xlu2 %2856 }
0x136f   :  { %v2864_v2 = vadd.f32 %v2857_v45, %v7270_v33  ;;  %v2888_v33 = vmul.f32 %v2816_v34, %v7244_v7  ;;  %v2889_v7 = vmul.f32 %v2831_v40, %v7254_v61  ;;  %v664_v34 = vperm.slane %v4821_v51, 0  ;;  %v7900_v45 = vld [vmem:[#allocation22_spill] sm:$0xff] }
0x1371   :  { %4654 = vtanh.f32 %v2864_v2  ;;  %v1125_v35 = vadd.f32 %v7895_v49, %v664_v34  ;;  %v1122_v44 = vadd.f32 %v7897_v30, %v664_v34  ;;  %v1128_v22 = vadd.f32 %v7899_v26, %v664_v34 }
0x1373   :  { %v7317_v36 = vadd.f32 %v7896_v27, %v1125_v35  ;;  %v7322_v38 = vadd.f32 %v7898_v31, %v1122_v44  ;;  %v1154_v2 = vadd.f32 %v7900_v45, %v1128_v22  ;;  %v1574_v45 = vld [vmem:[%s7814_s7 + $0x10] sm:$0xff] }
0x1377   :  { %v4655_v8 = vpop.eup %4654 }
0x1378   :  { %2877 = vrot.lane.b32.xlu2 %v4655_v8, %s4827_s13 }
0x1396   :  { %v2855_v53 = vpop.permute.xlu1 %2854 }
0x1397   :  { %v2863_v62 = vadd.f32 %v2855_v53, %v7275_v1  ;;  %v2869_v1 = vsub.f32 1.0, %v2801_v48 }
0x1399   :  { %4656 = vtanh.f32 %v2863_v62 }
0x139f   :  { %v4657_v39 = vpop.eup %4656 }
0x13a0   :  { %2875 = vrot.lane.b32.xlu1 %v4657_v39, %s4827_s13 }
0x13b6   :  { %v2859_v19 = vpop.permute.xlu0 %2858 }
0x13b7   :  { %v2865_v20 = vadd.f32 %v2859_v19, %v1102_v0 }
0x13b9   :  { %4658 = vtanh.f32 %v2865_v20 }
0x13bf   :  { %v4659_v41 = vpop.eup %4658 }
0x13c0   :  { %2879 = vrot.lane.b32.xlu0 %v4659_v41, %s4827_s13 }
0x13d2   :  { %v2878_v52 = vpop.permute.xlu2 %2877 }
0x13d3   :  { %v2885_v29 = vmul.f32 %v2878_v52, %v2870_v10 }
0x13d5   :  { %v7289_v28 = vadd.f32 %v2888_v33, %v2885_v29 }
0x13d7   :  { %2902 = vrot.lane.b32.xlu2 %v7289_v28, %s4827_s13 }
0x1412   :  { %v2876_v18 = vpop.permute.xlu1 %2875 }
0x1413   :  { %v2884_v54 = vmul.f32 %v2876_v18, %v2869_v1 }
0x1415   :  { %v7294_v59 = vadd.f32 %v2887_v58, %v2884_v54 }
0x1417   :  { %2900 = vrot.lane.b32.xlu1 %v7294_v59, %s4827_s13 }
0x1431   :  { %v2903_v12 = vpop.permute.xlu2 %2902 }
0x1432   :  { %v2880_v46 = vpop.permute.xlu0 %2879 }
0x1433   :  { %v2886_v9 = vmul.f32 %v2880_v46, %v2871_v47 }
0x1435   :  { %v7299_v17 = vadd.f32 %v2889_v7, %v2886_v9 }
0x1437   :  { %2904 = vrot.lane.b32.xlu0 %v7299_v17, %s4827_s13 }
0x1489   :  { %v2901_v14 = vpop.permute.xlu1 %2900 }
0x148a   :  { %4452 = vmatmul.msk.f32.vlgmr.msra.gmra.mxu0 %vm1585_vm12, %v2901_v14 }
0x1492   :  { %4453 = vmatmul.msk.f32.gmra.mxu0 %vm1585_vm12, %v2903_v12 }
0x14a9   :  { %v2905_v25 = vpop.permute.xlu0 %2904 }
0x14aa   :  { %4454 = vmatmul.msk.f32.gmra.mxu0 %vm1585_vm12, %v2905_v25 }
0x1507   :  { %v2929_v0 = vpop.f32.mrf.mxu0 }
0x1508   :  { %v2998_v63 = vadd.f32 %v2929_v0, %v6893_v57  ;;  %v2938_v43 = vadd.f32 %v2929_v0, %v7322_v38 }
0x150a   :  { %3004 = vrot.lane.b32.xlu1 %v2998_v63, %s4825_s26  ;;  %v4455_v56 = vmul.f32 -1.442695, %v2938_v43 }
0x150f   :  { %v2932_v61 = vpop.f32.mrf.mxu0 }
0x1510   :  { %v2999_v6 = vadd.f32 %v2932_v61, %v6893_v57  ;;  %v2939_v13 = vadd.f32 %v2932_v61, %v7317_v36 }
0x1512   :  { %3006 = vrot.lane.b32.xlu2 %v2999_v6, %s4825_s26  ;;  %v4456_v21 = vmul.f32 -1.442695, %v2939_v13 }
0x1514   :  { %4660 = vpow2.f32 %v4456_v21 }
0x151a   :  { %v4661_v55 = vpop.eup %4660 }
0x151b   :  { %v2951_v48 = vadd.f32 1.0, %v4661_v55 }
0x151d   :  { %4662 = vrcp.f32 %v2951_v48  ;;  %v2979_v40 = vand.u32 2147483648, %v2951_v48  ;;  %vm2973_vm7 = vweird.f32 %v2951_v48  ;;  %v2977_v4 = vand.u32 2147483647, %v2951_v48 }
0x151e   :  { %4664 = vpow2.f32 %v4455_v56 }
0x151f   :  { %v2980_v62 = vor.u32 1.1754944e-38, %v2979_v40  ;;  %vm2978_vm9 = vcmp.eq.f32.partialorder %v2977_v4, 8.507059e+37 }
0x1523   :  { %v4663_v3 = vpop.eup %4662 }
0x1524   :  { %v4665_v60 = vpop.eup %4664  ;;  %v2969_v11 = vmul.f32 %v4663_v3, %v2951_v48  ;;  %vm2974_vm6 = vweird.f32 %v4663_v3 }
0x1525   :  { %v2950_v50 = vadd.f32 1.0, %v4665_v60  ;;  %vm2975_vm8 = vmor %vm2973_vm7, %vm2974_vm6 }
0x1526   :  { %v2970_v16 = vsub.f32 1.0, %v2969_v11 }
0x1527   :  { %v2935_v24 = vpop.f32.mrf.mxu0  ;;  %4666 = vrcp.f32 %v2950_v50  ;;  %v2964_v1 = vand.u32 2147483648, %v2950_v50  ;;  %vm2958_vm11 = vweird.f32 %v2950_v50  ;;  %v2962_v18 = vand.u32 2147483647, %v2950_v50 }
0x1528   :  { %v3000_v15 = vadd.f32 %v2935_v24, %v6893_v57  ;;  %v2971_v42 = vmul.f32 %v4663_v3, %v2970_v16  ;;  %v2940_v39 = vadd.f32 %v2935_v24, %v1154_v2 }
0x1529   :  { %v2965_v47 = vor.u32 1.1754944e-38, %v2964_v1  ;;  %vm2963_vm14 = vcmp.eq.f32.partialorder %v2962_v18, 8.507059e+37 }
0x152a   :  { %3008 = vrot.lane.b32.xlu0 %v3000_v15, %s4825_s26  ;;  %v2972_v37 = vadd.f32 %v4663_v3, %v2971_v42  ;;  %v4457_v52 = vmul.f32 -1.442695, %v2940_v39 }
0x152c   :  { %v2976_v8 = vsel %vm2975_vm8, %v4663_v3, %v2972_v37  ;;  %4668 = vpow2.f32 %v4457_v52 }
0x152d   :  { %v4667_v23 = vpop.eup %4666  ;;  %v2981_v20 = vsel %vm2978_vm9, %v2980_v62, %v2976_v8  ;;  %v7901_v62 = vmov 0.0  }
0x152e   :  { %v2954_v53 = vmul.f32 %v4667_v23, %v2950_v50  ;;  %vm2959_vm10 = vweird.f32 %v4667_v23  ;;  %v3035_v56 = vsub.f32 1.0, %v2981_v20 }
0x152f   :  { %vm2960_vm13 = vmor %vm2958_vm11, %vm2959_vm10 }
0x1530   :  { %v2955_v10 = vsub.f32 1.0, %v2954_v53 }
0x1532   :  { %v2956_v33 = vmul.f32 %v4667_v23, %v2955_v10  ;;  %v4669_v58 = vpop.eup %4668 }
0x1533   :  { %v2952_v46 = vadd.f32 1.0, %v4669_v58  ;;  %v7903_v58 = vld [vmem:[#allocation14_spill] sm:$0xff] }
0x1534   :  { %v2957_v29 = vadd.f32 %v4667_v23, %v2956_v33  ;;  %v7902_v33 = vld [vmem:[#allocation17_spill] sm:$0xff] }
0x1535   :  { %4670 = vrcp.f32 %v2952_v46  ;;  %v2994_v6 = vand.u32 2147483648, %v2952_v46  ;;  %vm2988_vm0 = vweird.f32 %v2952_v46  ;;  %v2992_v24 = vand.u32 2147483647, %v2952_v46 }
0x1536   :  { %v2961_v54 = vsel %vm2960_vm13, %v4667_v23, %v2957_v29 }
0x1537   :  { %v2966_v9 = vsel %vm2963_vm14, %v2965_v47, %v2961_v54  ;;  %v2995_v51 = vor.u32 1.1754944e-38, %v2994_v6  ;;  %vm2993_vm2 = vcmp.eq.f32.partialorder %v2992_v24, 8.507059e+37 }
0x1538   :  { %v3052_v16 = vmul.f32 %v2966_v9, %v7294_v59  ;;  %v1575_v59 = vld [vmem:[%s7814_s7 + $0x18] sm:$0xff] }
0x1539   :  { %3734 = vmatpush.msrb.mxu1 %v1575_v59  ;;  %3902 = vmatpush.msra.mxu2 %v1575_v59 }
0x153a   :  { %4067 = vmatpush.msrb.mxu3 %v1575_v59 }
0x153b   :  { %v4671_v12 = vpop.eup %4670  ;;  %3735 = vmatpush.msrb.mxu1 %v1574_v45  ;;  %3903 = vmatpush.msra.mxu2 %v1574_v45 }
0x153c   :  { %v2984_v25 = vmul.f32 %v4671_v12, %v2952_v46  ;;  %vm2989_vm15 = vweird.f32 %v4671_v12  ;;  %4068 = vmatpush.msrb.mxu3 %v1574_v45 }
0x153d   :  { %vm2990_vm1 = vmor %vm2988_vm0, %vm2989_vm15 }
0x153e   :  { %v2985_v0 = vsub.f32 1.0, %v2984_v25 }
0x1540   :  { %v2986_v63 = vmul.f32 %v4671_v12, %v2985_v0 }
0x1542   :  { %v2987_v61 = vadd.f32 %v4671_v12, %v2986_v63 }
0x1544   :  { %v2991_v15 = vsel %vm2990_vm1, %v4671_v12, %v2987_v61 }
0x1545   :  { %v2996_v49 = vsel %vm2993_vm2, %v2995_v51, %v2991_v15 }
0x1546   :  { %v3036_v22 = vsub.f32 1.0, %v2996_v49 }
0x156c   :  { %v3007_v19 = vpop.permute.xlu2 %3006 }
0x156d   :  { %v3014_v41 = vmul.f32 %v3007_v19, %v2981_v20 }
0x156f   :  { %3021 = vrot.lane.b32.xlu2 %v3014_v41, %s4825_s26 }
0x157c   :  { %v3005_v7 = vpop.permute.xlu1 %3004 }
0x157d   :  { %v3013_v14 = vmul.f32 %v3005_v7, %v2966_v9 }
0x157f   :  { %3019 = vrot.lane.b32.xlu1 %v3013_v14, %s4825_s26 }
0x159c   :  { %v3009_v34 = vpop.permute.xlu0 %3008 }
0x159d   :  { %v3015_v35 = vmul.f32 %v3009_v34, %v2996_v49 }
0x159f   :  { %3023 = vrot.lane.b32.xlu0 %v3015_v35, %s4825_s26 }
0x15c9   :  { %v3022_v27 = vpop.permute.xlu2 %3021 }
0x15ca   :  { %v3029_v13 = vadd.f32 %v3022_v27, %v7317_v36  ;;  %v3053_v36 = vmul.f32 %v2981_v20, %v7289_v28  ;;  %v3054_v28 = vmul.f32 %v2996_v49, %v7299_v17  ;;  %v1573_v17 = vld [vmem:[%s7814_s7 + $0x8] sm:$0xff] }
0x15cb   :  { %3736 = vmatpush.msrb.mxu1 %v1573_v17  ;;  %3904 = vmatpush.msra.mxu2 %v1573_v17  ;;  %v7904_v49 = vld [vmem:[#allocation20_spill] sm:$0xff] }
0x15cc   :  { %4672 = vtanh.f32 %v3029_v13  ;;  %4069 = vmatpush.msrb.mxu3 %v1573_v17 }
0x15d2   :  { %v4673_v21 = vpop.eup %4672 }
0x15d3   :  { %3042 = vrot.lane.b32.xlu2 %v4673_v21, %s4827_s13 }
0x15f1   :  { %v3020_v30 = vpop.permute.xlu1 %3019 }
0x15f2   :  { %v3028_v44 = vadd.f32 %v3020_v30, %v7322_v38  ;;  %v3034_v38 = vsub.f32 1.0, %v2966_v9 }
0x15f4   :  { %4674 = vtanh.f32 %v3028_v44 }
0x15fa   :  { %v4675_v55 = vpop.eup %4674 }
0x15fb   :  { %3040 = vrot.lane.b32.xlu1 %v4675_v55, %s4827_s13 }
0x1611   :  { %v3024_v31 = vpop.permute.xlu0 %3023 }
0x1612   :  { %v3030_v43 = vadd.f32 %v3024_v31, %v1154_v2  ;;  %v1572_v2 = vld [vmem:[%s7814_s7] sm:$0xff] }
0x1613   :  { %3737 = vmatpush.msrb.mxu1 %v1572_v2  ;;  %3905 = vmatpush.msra.mxu2 %v1572_v2 }
0x1614   :  { %4676 = vtanh.f32 %v3030_v43  ;;  %4070 = vmatpush.msrb.mxu3 %v1572_v2 }
0x161a   :  { %v4677_v48 = vpop.eup %4676 }
0x161b   :  { %3044 = vrot.lane.b32.xlu0 %v4677_v48, %s4827_s13 }
0x162d   :  { %v3043_v3 = vpop.permute.xlu2 %3042 }
0x162e   :  { %v3050_v60 = vmul.f32 %v3043_v3, %v3035_v56 }
0x1630   :  { %v7336_v11 = vadd.f32 %v3053_v36, %v3050_v60 }
0x1632   :  { %3067 = vrot.lane.b32.xlu2 %v7336_v11, %s4827_s13 }
0x166d   :  { %v3041_v50 = vpop.permute.xlu1 %3040 }
0x166e   :  { %v3049_v42 = vmul.f32 %v3041_v50, %v3034_v38 }
0x1670   :  { %v7341_v26 = vadd.f32 %v3052_v16, %v3049_v42 }
0x1672   :  { %3065 = vrot.lane.b32.xlu1 %v7341_v26, %s4827_s13 }
0x168c   :  { %v3068_v8 = vpop.permute.xlu2 %3067 }
0x168d   :  { %v3045_v37 = vpop.permute.xlu0 %3044 }
0x168e   :  { %v3051_v23 = vmul.f32 %v3045_v37, %v3036_v22 }
0x1690   :  { %v7346_v40 = vadd.f32 %v3054_v28, %v3051_v23 }
0x1692   :  { %3069 = vrot.lane.b32.xlu0 %v7346_v40, %s4827_s13 }
0x16e4   :  { %v3066_v4 = vpop.permute.xlu1 %3065 }
0x16e5   :  { %4458 = vmatmul.msk.f32.vlgmr.msra.gmra.mxu1 %vm1585_vm12, %v3066_v4 }
0x16ed   :  { %4459 = vmatmul.msk.f32.gmra.mxu1 %vm1585_vm12, %v3068_v8 }
0x1704   :  { %v3070_v53 = vpop.permute.xlu0 %3069 }
0x1705   :  { %4460 = vmatmul.msk.f32.gmra.mxu1 %vm1585_vm12, %v3070_v53 }
0x170d   :  { %3738 = vmatmul.f32.vlgmr.msrb.gmra.mxu1 %v7901_v62 }
0x1715   :  { %3741 = vmatmul.f32.gmra.mxu1 %v7901_v62 }
0x171d   :  { %3744 = vmatmul.f32.gmra.mxu1 %v7901_v62 }
0x1762   :  { %v3094_v39 = vpop.f32.mrf.mxu1 }
0x1763   :  { %v3163_v19 = vadd.f32 %v3094_v39, %v6893_v57  ;;  %v3103_v54 = vadd.f32 %v3094_v39, %v7903_v58 }
0x1765   :  { %3169 = vrot.lane.b32.xlu1 %v3163_v19, %s4825_s26  ;;  %v4461_v46 = vmul.f32 -1.442695, %v3103_v54 }
0x176a   :  { %v3097_v20 = vpop.f32.mrf.mxu1 }
0x176b   :  { %v3164_v41 = vadd.f32 %v3097_v20, %v6893_v57  ;;  %v3104_v29 = vadd.f32 %v3097_v20, %v7902_v33 }
0x176d   :  { %3171 = vrot.lane.b32.xlu2 %v3164_v41, %s4825_s26  ;;  %v4462_v1 = vmul.f32 -1.442695, %v3104_v29 }
0x176f   :  { %4678 = vpow2.f32 %v4462_v1 }
0x1775   :  { %v4679_v18 = vpop.eup %4678 }
0x1776   :  { %v3116_v47 = vadd.f32 1.0, %v4679_v18 }
0x1778   :  { %4680 = vrcp.f32 %v3116_v47  ;;  %v3144_v6 = vand.u32 2147483648, %v3116_v47  ;;  %vm3138_vm4 = vweird.f32 %v3116_v47  ;;  %v3142_v24 = vand.u32 2147483647, %v3116_v47 }
0x1779   :  { %4682 = vpow2.f32 %v4461_v46 }
0x177a   :  { %v3145_v34 = vor.u32 1.1754944e-38, %v3144_v6  ;;  %vm3143_vm6 = vcmp.eq.f32.partialorder %v3142_v24, 8.507059e+37 }
0x177e   :  { %v4681_v7 = vpop.eup %4680 }
0x177f   :  { %v4683_v9 = vpop.eup %4682  ;;  %v3134_v14 = vmul.f32 %v4681_v7, %v3116_v47  ;;  %vm3139_vm3 = vweird.f32 %v4681_v7 }
0x1780   :  { %v3115_v12 = vadd.f32 1.0, %v4683_v9  ;;  %vm3140_vm5 = vmor %vm3138_vm4, %vm3139_vm3 }
0x1781   :  { %v3135_v25 = vsub.f32 1.0, %v3134_v14 }
0x1782   :  { %v3100_v10 = vpop.f32.mrf.mxu1  ;;  %4684 = vrcp.f32 %v3115_v12  ;;  %v3129_v43 = vand.u32 2147483648, %v3115_v12  ;;  %vm3123_vm8 = vweird.f32 %v3115_v12  ;;  %v3127_v48 = vand.u32 2147483647, %v3115_v12 }
0x1783   :  { %v3165_v52 = vadd.f32 %v3100_v10, %v6893_v57  ;;  %v3136_v0 = vmul.f32 %v4681_v7, %v3135_v25  ;;  %v3105_v35 = vadd.f32 %v3100_v10, %v7904_v49 }
0x1784   :  { %v3130_v36 = vor.u32 1.1754944e-38, %v3129_v43  ;;  %vm3128_vm10 = vcmp.eq.f32.partialorder %v3127_v48, 8.507059e+37 }
0x1785   :  { %3173 = vrot.lane.b32.xlu0 %v3165_v52, %s4825_s26  ;;  %v3137_v63 = vadd.f32 %v4681_v7, %v3136_v0  ;;  %v4463_v44 = vmul.f32 -1.442695, %v3105_v35 }
0x1787   :  { %v3141_v15 = vsel %vm3140_vm5, %v4681_v7, %v3137_v63  ;;  %4686 = vpow2.f32 %v4463_v44 }
0x1788   :  { %v4685_v61 = vpop.eup %4684  ;;  %v3146_v13 = vsel %vm3143_vm6, %v3145_v34, %v3141_v15 }
0x1789   :  { %v3119_v51 = vmul.f32 %v4685_v61, %v3115_v12  ;;  %vm3124_vm7 = vweird.f32 %v4685_v61  ;;  %v3200_v18 = vsub.f32 1.0, %v3146_v13  ;;  %v3218_v54 = vmul.f32 %v3146_v13, %v7336_v11  ;;  %v4514_v11 = vld [vmem:[%s7815_s8] ss:$0 sm:$0xff] }
0x178a   :  { %vm3125_vm9 = vmor %vm3123_vm8, %vm3124_vm7 }
0x178b   :  { %v3120_v30 = vsub.f32 1.0, %v3119_v51 }
0x178d   :  { %v3121_v55 = vmul.f32 %v4685_v61, %v3120_v30  ;;  %v4687_v56 = vpop.eup %4686 }
0x178e   :  { %v3117_v60 = vadd.f32 1.0, %v4687_v56 }
0x178f   :  { %v3122_v31 = vadd.f32 %v4685_v61, %v3121_v55  ;;  %v7906_v55 = vld [vmem:[#allocation34_spill] sm:$0xff] }
0x1790   :  { %4688 = vrcp.f32 %v3117_v60  ;;  %v3159_v4 = vand.u32 2147483648, %v3117_v60  ;;  %vm3153_vm13 = vweird.f32 %v3117_v60  ;;  %v3157_v59 = vand.u32 2147483647, %v3117_v60 }
0x1791   :  { %v3126_v3 = vsel %vm3125_vm9, %v4685_v61, %v3122_v31 }
0x1792   :  { %v3131_v50 = vsel %vm3128_vm10, %v3130_v36, %v3126_v3  ;;  %v3160_v17 = vor.u32 1.1754944e-38, %v3159_v4  ;;  %vm3158_vm15 = vcmp.eq.f32.partialorder %v3157_v59, 8.507059e+37 }
0x1793   :  { %v3217_v9 = vmul.f32 %v3131_v50, %v7341_v26  ;;  %v3739_v26 = vpop.f32.mrf.mxu1 }
0x1796   :  { %v4689_v42 = vpop.eup %4688 }
0x1797   :  { %v3149_v22 = vmul.f32 %v4689_v42, %v3117_v60  ;;  %vm3154_vm11 = vweird.f32 %v4689_v42 }
0x1798   :  { %vm3155_vm14 = vmor %vm3153_vm13, %vm3154_vm11 }
0x1799   :  { %v3150_v37 = vsub.f32 1.0, %v3149_v22 }
0x179b   :  { %v3151_v28 = vmul.f32 %v4689_v42, %v3150_v37  ;;  %v3742_v15 = vpop.f32.mrf.mxu1 }
0x179c   :  { %v3749_v31 = vadd.f32 %v3742_v15, %v7906_v55 }
0x179d   :  { %v3152_v23 = vadd.f32 %v4689_v42, %v3151_v28 }
0x179e   :  { %v4483_v48 = vmul.f32 -1.442695, %v3749_v31 }
0x179f   :  { %v3156_v45 = vsel %vm3155_vm14, %v4689_v42, %v3152_v23 }
0x17a0   :  { %v3161_v8 = vsel %vm3158_vm15, %v3160_v17, %v3156_v45 }
0x17a1   :  { %v3201_v25 = vsub.f32 1.0, %v3161_v8  ;;  %v3219_v63 = vmul.f32 %v3161_v8, %v7346_v40 }
0x17c7   :  { %v3172_v27 = vpop.permute.xlu2 %3171 }
0x17c8   :  { %v3179_v21 = vmul.f32 %v3172_v27, %v3146_v13  ;;  %v7905_v27 = vld [vmem:[#allocation32_spill] sm:$0xff] }
0x17c9   :  { %v3748_v13 = vadd.f32 %v3739_v26, %v7905_v27 }
0x17ca   :  { %3186 = vrot.lane.b32.xlu2 %v3179_v21, %s4825_s26 }
0x17cb   :  { %v4482_v21 = vmul.f32 -1.442695, %v3748_v13  ;;  %v7912_v13 = vld [vmem:[#allocation36_spill] sm:$0xff] }
0x17d7   :  { %v3170_v38 = vpop.permute.xlu1 %3169 }
0x17d8   :  { %v3178_v16 = vmul.f32 %v3170_v38, %v3131_v50 }
0x17da   :  { %3184 = vrot.lane.b32.xlu1 %v3178_v16, %s4825_s26  ;;  %v3745_v16 = vpop.f32.mrf.mxu1 }
0x17f7   :  { %v3174_v2 = vpop.permute.xlu0 %3173 }
0x17f8   :  { %v3180_v53 = vmul.f32 %v3174_v2, %v3161_v8 }
0x17fa   :  { %3188 = vrot.lane.b32.xlu0 %v3180_v53, %s4825_s26 }
0x1824   :  { %v3187_v62 = vpop.permute.xlu2 %3186 }
0x1825   :  { %v3194_v39 = vadd.f32 %v3187_v62, %v7902_v33 }
0x1827   :  { %4690 = vtanh.f32 %v3194_v39 }
0x182d   :  { %v4691_v19 = vpop.eup %4690 }
0x182e   :  { %3207 = vrot.lane.b32.xlu2 %v4691_v19, %s4827_s13 }
0x184c   :  { %v3185_v20 = vpop.permute.xlu1 %3184 }
0x184d   :  { %v3193_v41 = vadd.f32 %v3185_v20, %v7903_v58  ;;  %v3199_v58 = vsub.f32 1.0, %v3131_v50 }
0x184f   :  { %4692 = vtanh.f32 %v3193_v41 }
0x1855   :  { %v4693_v10 = vpop.eup %4692 }
0x1856   :  { %3205 = vrot.lane.b32.xlu1 %v4693_v10, %s4827_s13 }
0x186c   :  { %v3189_v52 = vpop.permute.xlu0 %3188 }
0x186d   :  { %v3195_v29 = vadd.f32 %v3189_v52, %v7904_v49 }
0x186f   :  { %4694 = vtanh.f32 %v3195_v29 }
0x1870   :  { %4696 = vpow2.f32 %v4482_v21  ;;  %v3750_v21 = vadd.f32 %v3745_v16, %v7912_v13 }
0x1875   :  { %v4695_v1 = vpop.eup %4694 }
0x1876   :  { %3209 = vrot.lane.b32.xlu0 %v4695_v1, %s4827_s13  ;;  %v4697_v30 = vpop.eup %4696 }
0x1877   :  { %v3760_v44 = vadd.f32 1.0, %v4697_v30 }
0x1879   :  { %4698 = vrcp.f32 %v3760_v44  ;;  %v3774_v4 = vand.u32 2147483648, %v3760_v44  ;;  %vm3768_vm1 = vweird.f32 %v3760_v44  ;;  %v3772_v59 = vand.u32 2147483647, %v3760_v44 }
0x187a   :  { %4700 = vpow2.f32 %v4483_v48 }
0x187b   :  { %v3775_v2 = vor.u32 1.1754944e-38, %v3774_v4  ;;  %vm3773_vm3 = vcmp.eq.f32.partialorder %v3772_v59, 8.507059e+37 }
0x187f   :  { %v4699_v43 = vpop.eup %4698 }
0x1880   :  { %v3764_v56 = vmul.f32 %v4699_v43, %v3760_v44  ;;  %v4701_v38 = vpop.eup %4700  ;;  %vm3769_vm0 = vweird.f32 %v4699_v43  ;;  %v4484_v44 = vmul.f32 -1.442695, %v3750_v21 }
0x1881   :  { %v3761_v22 = vadd.f32 1.0, %v4701_v38  ;;  %vm3770_vm2 = vmor %vm3768_vm1, %vm3769_vm0 }
0x1882   :  { %v3765_v36 = vsub.f32 1.0, %v3764_v56 }
0x1883   :  { %4702 = vrcp.f32 %v3761_v22  ;;  %v3789_v29 = vand.u32 2147483648, %v3761_v22  ;;  %vm3783_vm5 = vweird.f32 %v3761_v22  ;;  %v3787_v1 = vand.u32 2147483647, %v3761_v22 }
0x1884   :  { %v3766_v50 = vmul.f32 %v4699_v43, %v3765_v36 }
0x1885   :  { %vm3788_vm7 = vcmp.eq.f32.partialorder %v3787_v1, 8.507059e+37 }
0x1886   :  { %v3767_v28 = vadd.f32 %v4699_v43, %v3766_v50 }
0x1888   :  { %v3208_v33 = vpop.permute.xlu2 %3207  ;;  %v3771_v45 = vsel %vm3770_vm2, %v4699_v43, %v3767_v28 }
0x1889   :  { %v3215_v47 = vmul.f32 %v3208_v33, %v3200_v18  ;;  %v7422_v8 = vsel %vm3773_vm3, %v3775_v2, %v3771_v45  ;;  %v4703_v62 = vpop.eup %4702 }
0x188a   :  { %v3779_v39 = vmul.f32 %v4703_v62, %v3761_v22  ;;  %vm3784_vm4 = vweird.f32 %v4703_v62 }
0x188b   :  { %v7387_v46 = vadd.f32 %v3218_v54, %v3215_v47  ;;  %vm3785_vm6 = vmor %vm3783_vm5, %vm3784_vm4  ;;  %v3790_v54 = vor.u32 1.1754944e-38, %v3789_v29 }
0x188c   :  { %v3780_v19 = vsub.f32 1.0, %v3779_v39 }
0x188d   :  { %3232 = vrot.lane.b32.xlu2 %v7387_v46, %s4827_s13 }
0x188e   :  { %v3781_v20 = vmul.f32 %v4703_v62, %v3780_v19 }
0x1890   :  { %v3782_v10 = vadd.f32 %v4703_v62, %v3781_v20 }
0x1892   :  { %v3786_v18 = vsel %vm3785_vm6, %v4703_v62, %v3782_v10 }
0x1893   :  { %v7428_v47 = vsel %vm3788_vm7, %v3790_v54, %v3786_v18 }
0x18c8   :  { %v3206_v7 = vpop.permute.xlu1 %3205 }
0x18c9   :  { %v3214_v14 = vmul.f32 %v3206_v7, %v3199_v58  ;;  %v7907_v7 = vld [vmem:[#allocation30_spill] sm:$0xff] }
0x18cb   :  { %v7392_v12 = vadd.f32 %v3217_v9, %v3214_v14  ;;  %v7908_v9 = vld [vmem:[#allocation27_spill] sm:$0xff] }
0x18cc   :  { %v1229_v14 = vadd.f32 %v7908_v9, %v7907_v7 }
0x18cd   :  { %3230 = vrot.lane.b32.xlu1 %v7392_v12, %s4827_s13 }
0x18d5   :  { %3808 = vrot.lane.b32.xlu1 %v4514_v11, %s4825_s26  ;;  %v7909_v11 = vld [vmem:[#allocation28_spill] sm:$0xff] }
0x18e7   :  { %v3233_v51 = vpop.permute.xlu2 %3232 }
0x18e8   :  { %v3210_v0 = vpop.permute.xlu0 %3209 }
0x18e9   :  { %v3216_v61 = vmul.f32 %v3210_v0, %v3201_v25  ;;  %v7435_v25 = vadd.f32 %v7909_v11, %v1229_v14 }
0x18eb   :  { %v7401_v6 = vadd.f32 %v3219_v63, %v3216_v61  ;;  %v7910_v61 = vld [vmem:[#allocation24_spill] sm:$0xff] }
0x18ed   :  { %3234 = vrot.lane.b32.xlu0 %v7401_v6, %s4827_s13 }
0x193f   :  { %v3231_v24 = vpop.permute.xlu1 %3230 }
0x1940   :  { %4464 = vmatmul.msk.f32.vlgmr.msrb.gmra.mxu2 %vm1585_vm12, %v3231_v24 }
0x1947   :  { %v7406_v34 = vpop.permute.xlu1 %3808 }
0x1948   :  { %4465 = vmatmul.msk.f32.gmra.mxu2 %vm1585_vm12, %v3233_v51  ;;  %v3811_v49 = vadd.f32 %v7406_v34, %v3739_v26  ;;  %v3812_v40 = vadd.f32 %v7406_v34, %v3742_v15  ;;  %v3813_v42 = vadd.f32 %v7406_v34, %v3745_v16  ;;  %v1226_v26 = vadd.f32 %v7910_v61, %v7907_v7  ;;  %v7911_v15 = vld [vmem:[#allocation25_spill] sm:$0xff] }
0x194a   :  { %3817 = vrot.lane.b32.xlu2 %v3811_v49, %s4825_s26  ;;  %3819 = vrot.lane.b32.xlu1 %v3812_v40, %s4825_s26  ;;  %v7441_v51 = vadd.f32 %v7911_v15, %v1226_v26 }
0x195f   :  { %v3235_v35 = vpop.permute.xlu0 %3234 }
0x1960   :  { %4466 = vmatmul.msk.f32.gmra.mxu2 %vm1585_vm12, %v3235_v35 }
0x19a4   :  { %v3818_v17 = vpop.permute.xlu2 %3817 }
0x19a5   :  { %v3826_v53 = vmul.f32 %v3818_v17, %v7422_v8 }
0x19bc   :  { %v3820_v33 = vpop.permute.xlu1 %3819 }
0x19bd   :  { %v3827_v58 = vmul.f32 %v3820_v33, %v7428_v47 }
0x19c3   :  { %v3259_v3 = vpop.f32.mrf.mxu2 }
0x19c4   :  { %v3328_v60 = vadd.f32 %v3259_v3, %v6893_v57  ;;  %v3268_v49 = vadd.f32 %v3259_v3, %v7441_v51 }
0x19c6   :  { %3334 = vrot.lane.b32.xlu0 %v3328_v60, %s4825_s26  ;;  %v4467_v35 = vmul.f32 -1.442695, %v3268_v49 }
0x19cb   :  { %v3262_v37 = vpop.f32.mrf.mxu2 }
0x19cc   :  { %v3329_v23 = vadd.f32 %v3262_v37, %v6893_v57  ;;  %v3269_v0 = vadd.f32 %v3262_v37, %v7435_v25 }
0x19ce   :  { %3336 = vrot.lane.b32.xlu2 %v3329_v23, %s4825_s26  ;;  %3821 = vrot.lane.b32.xlu0 %v3813_v42, %s4825_s26  ;;  %v4468_v63 = vmul.f32 -1.442695, %v3269_v0  ;;  %v7913_v23 = vld [vmem:[#allocation31_spill] sm:$0xff] }
0x19d0   :  { %4704 = vpow2.f32 %v4468_v63 }
0x19d6   :  { %3832 = vrot.lane.b32.xlu2 %v3826_v53, %s4825_s26  ;;  %v4705_v24 = vpop.eup %4704 }
0x19d7   :  { %v3281_v40 = vadd.f32 1.0, %v4705_v24 }
0x19d9   :  { %4706 = vrcp.f32 %v3281_v40  ;;  %v3309_v42 = vand.u32 2147483648, %v3281_v40  ;;  %vm3303_vm9 = vweird.f32 %v3281_v40  ;;  %v3307_v22 = vand.u32 2147483647, %v3281_v40 }
0x19da   :  { %4708 = vpow2.f32 %v4467_v35 }
0x19db   :  { %4710 = vpow2.f32 %v4484_v44  ;;  %v3310_v28 = vor.u32 1.1754944e-38, %v3309_v42  ;;  %vm3308_vm11 = vcmp.eq.f32.partialorder %v3307_v22, 8.507059e+37 }
0x19df   :  { %v4707_v30 = vpop.eup %4706 }
0x19e0   :  { %v4709_v31 = vpop.eup %4708  ;;  %v3299_v43 = vmul.f32 %v4707_v30, %v3281_v40  ;;  %vm3304_vm8 = vweird.f32 %v4707_v30 }
0x19e1   :  { %v3280_v48 = vadd.f32 1.0, %v4709_v31  ;;  %v4711_v36 = vpop.eup %4710  ;;  %vm3305_vm10 = vmor %vm3303_vm9, %vm3304_vm8 }
0x19e2   :  { %v3300_v56 = vsub.f32 1.0, %v3299_v43  ;;  %v3762_v38 = vadd.f32 1.0, %v4711_v36 }
0x19e3   :  { %v3265_v41 = vpop.f32.mrf.mxu2  ;;  %4712 = vrcp.f32 %v3280_v48  ;;  %v3294_v29 = vand.u32 2147483648, %v3280_v48  ;;  %vm3288_vm14 = vweird.f32 %v3280_v48  ;;  %v3292_v1 = vand.u32 2147483647, %v3280_v48 }
0x19e4   :  { %v3330_v52 = vadd.f32 %v3265_v41, %v6893_v57  ;;  %v3301_v60 = vmul.f32 %v4707_v30, %v3300_v56  ;;  %4714 = vrcp.f32 %v3762_v38  ;;  %v3270_v4 = vadd.f32 %v3265_v41, %v7913_v23 }
0x19e5   :  { %vm3293_vm0 = vcmp.eq.f32.partialorder %v3292_v1, 8.507059e+37  ;;  %v3804_v63 = vand.u32 2147483648, %v3762_v38  ;;  %vm3798_vm2 = vweird.f32 %v3762_v38  ;;  %v3802_v61 = vand.u32 2147483647, %v3762_v38 }
0x19e6   :  { %3338 = vrot.lane.b32.xlu1 %v3330_v52, %s4825_s26  ;;  %v3302_v50 = vadd.f32 %v4707_v30, %v3301_v60  ;;  %v4469_v62 = vmul.f32 -1.442695, %v3270_v4  ;;  %v3847_v4 = vsub.f32 1.0, %v7422_v8 }
0x19e7   :  { %v3805_v24 = vor.u32 1.1754944e-38, %v3804_v63  ;;  %vm3803_vm4 = vcmp.eq.f32.partialorder %v3802_v61, 8.507059e+37 }
0x19e8   :  { %v3306_v16 = vsel %vm3305_vm10, %v4707_v30, %v3302_v50  ;;  %4716 = vpow2.f32 %v4469_v62 }
0x19e9   :  { %v4713_v3 = vpop.eup %4712  ;;  %v7446_v59 = vsel %vm3308_vm11, %v3310_v28, %v3306_v16 }
0x19ea   :  { %v3284_v37 = vmul.f32 %v4713_v3, %v3280_v48  ;;  %v4715_v53 = vpop.eup %4714  ;;  %vm3289_vm13 = vweird.f32 %v4713_v3 }
0x19eb   :  { %v3794_v19 = vmul.f32 %v4715_v53, %v3762_v38  ;;  %vm3290_vm15 = vmor %vm3288_vm14, %vm3289_vm13  ;;  %vm3799_vm1 = vweird.f32 %v4715_v53 }
0x19ec   :  { %v3285_v2 = vsub.f32 1.0, %v3284_v37  ;;  %vm3800_vm3 = vmor %vm3798_vm2, %vm3799_vm1 }
0x19ed   :  { %v3795_v41 = vsub.f32 1.0, %v3794_v19 }
0x19ee   :  { %3834 = vrot.lane.b32.xlu1 %v3827_v58, %s4825_s26  ;;  %v3286_v39 = vmul.f32 %v4713_v3, %v3285_v2  ;;  %v4717_v18 = vpop.eup %4716  ;;  %v3295_v58 = vor.u32 1.1754944e-38, %v3294_v29  ;;  %v3866_v29 = vmul.f32 0.0, %v7428_v47 }
0x19ef   :  { %v3796_v54 = vmul.f32 %v4715_v53, %v3795_v41  ;;  %v3282_v7 = vadd.f32 1.0, %v4717_v18  ;;  %v3365_v18 = vsub.f32 1.0, %v7446_v59 }
0x19f0   :  { %v3287_v52 = vadd.f32 %v4713_v3, %v3286_v39 }
0x19f1   :  { %v3797_v0 = vadd.f32 %v4715_v53, %v3796_v54  ;;  %v3324_v43 = vand.u32 2147483648, %v3282_v7  ;;  %vm3318_vm6 = vweird.f32 %v3282_v7  ;;  %v3322_v48 = vand.u32 2147483647, %v3282_v7 }
0x19f2   :  { %v3291_v33 = vsel %vm3290_vm15, %v4713_v3, %v3287_v52 }
0x19f3   :  { %v7451_v9 = vsel %vm3293_vm0, %v3295_v58, %v3291_v33  ;;  %v3801_v26 = vsel %vm3800_vm3, %v4715_v53, %v3797_v0  ;;  %v3325_v36 = vor.u32 1.1754944e-38, %v3324_v43  ;;  %vm3323_vm8 = vcmp.eq.f32.partialorder %v3322_v48, 8.507059e+37 }
0x19f4   :  { %v7456_v15 = vsel %vm3803_vm4, %v3805_v24, %v3801_v26 }
0x19f5   :  { %v3867_v63 = vmul.f32 0.0, %v7456_v15 }
0x1a28   :  { %v3337_v45 = vpop.permute.xlu2 %3336 }
0x1a29   :  { %v3344_v17 = vmul.f32 %v3337_v45, %v7446_v59 }
0x1a2b   :  { %3351 = vrot.lane.b32.xlu2 %v3344_v17, %s4825_s26  ;;  %v3865_v17 = vmul.f32 0.0, %v7422_v8 }
0x1a30   :  { %v3833_v20 = vpop.permute.xlu2 %3832 }
0x1a31   :  { %v3841_v10 = vadd.f32 %v3833_v20, %v7905_v27 }
0x1a33   :  { %4718 = vtanh.f32 %v3841_v10 }
0x1a34   :  { %4720 = vrcp.f32 %v3282_v7 }
0x1a38   :  { %v3335_v14 = vpop.permute.xlu0 %3334 }
0x1a39   :  { %v4719_v11 = vpop.eup %4718  ;;  %v3343_v27 = vmul.f32 %v3335_v14, %v7451_v9 }
0x1a3a   :  { %3853 = vrot.lane.b32.xlu2 %v4719_v11, %s4827_s13  ;;  %v4721_v35 = vpop.eup %4720  ;;  %v3382_v11 = vmul.f32 %v7451_v9, %v7392_v12 }
0x1a3b   :  { %3349 = vrot.lane.b32.xlu0 %v3343_v27, %s4825_s26  ;;  %v3314_v21 = vmul.f32 %v4721_v35, %v3282_v7  ;;  %vm3319_vm5 = vweird.f32 %v4721_v35 }
0x1a3c   :  { %vm3320_vm7 = vmor %vm3318_vm6, %vm3319_vm5 }
0x1a3d   :  { %v3315_v30 = vsub.f32 1.0, %v3314_v21 }
0x1a3f   :  { %v3316_v44 = vmul.f32 %v4721_v35, %v3315_v30 }
0x1a40   :  { %v3822_v49 = vpop.permute.xlu0 %3821 }
0x1a41   :  { %v3828_v40 = vmul.f32 %v3822_v49, %v7456_v15  ;;  %v3317_v31 = vadd.f32 %v4721_v35, %v3316_v44 }
0x1a43   :  { %3836 = vrot.lane.b32.xlu0 %v3828_v40, %s4825_s26  ;;  %v3321_v56 = vsel %vm3320_vm7, %v4721_v35, %v3317_v31 }
0x1a44   :  { %v7460_v38 = vsel %vm3323_vm8, %v3325_v36, %v3321_v56  ;;  %v7914_v56 = vld [vmem:[#allocation40_spill] sm:$0xff] }
0x1a45   :  { %v3366_v24 = vsub.f32 1.0, %v7460_v38 }
0x1a58   :  { %v3339_v60 = vpop.permute.xlu1 %3338 }
0x1a59   :  { %v3345_v50 = vmul.f32 %v3339_v60, %v7460_v38 }
0x1a5b   :  { %3353 = vrot.lane.b32.xlu1 %v3345_v50, %s4825_s26 }
0x1a60   :  { %v3835_v3 = vpop.permute.xlu1 %3834 }
0x1a61   :  { %v3842_v42 = vadd.f32 %v3835_v3, %v7906_v55  ;;  %v7915_v3 = vld [vmem:[#allocation42_spill] sm:$0xff] }
0x1a63   :  { %4722 = vtanh.f32 %v3842_v42 }
0x1a69   :  { %v4723_v22 = vpop.eup %4722 }
0x1a6a   :  { %3855 = vrot.lane.b32.xlu1 %v4723_v22, %s4827_s13 }
0x1a85   :  { %v3352_v16 = vpop.permute.xlu2 %3351 }
0x1a86   :  { %v3359_v37 = vadd.f32 %v3352_v16, %v7435_v25 }
0x1a88   :  { %4724 = vtanh.f32 %v3359_v37 }
0x1a8e   :  { %v4725_v28 = vpop.eup %4724 }
0x1a8f   :  { %3372 = vrot.lane.b32.xlu2 %v4725_v28, %s4827_s13 }
0x1a94   :  { %v3854_v45 = vpop.permute.xlu2 %3853 }
0x1a95   :  { %v3862_v2 = vmul.f32 %v3854_v45, %v3847_v4 }
0x1a97   :  { %v7470_v53 = vadd.f32 %v3865_v17, %v3862_v2 }
0x1a99   :  { %3878 = vrot.lane.b32.xlu2 %v7470_v53, %s4827_s13 }
0x1aad   :  { %v3350_v55 = vpop.permute.xlu0 %3349 }
0x1aae   :  { %v3358_v62 = vadd.f32 %v3350_v55, %v7441_v51  ;;  %v3848_v51 = vsub.f32 1.0, %v7428_v47  ;;  %v3364_v47 = vsub.f32 1.0, %v7451_v9  ;;  %v3384_v9 = vmul.f32 %v7460_v38, %v7401_v6 }
0x1ab0   :  { %4726 = vtanh.f32 %v3358_v62 }
0x1ab5   :  { %v3837_v25 = vpop.permute.xlu0 %3836 }
0x1ab6   :  { %v4727_v39 = vpop.eup %4726  ;;  %v3843_v19 = vadd.f32 %v3837_v25, %v7912_v13 }
0x1ab7   :  { %3370 = vrot.lane.b32.xlu0 %v4727_v39, %s4827_s13 }
0x1ab8   :  { %4728 = vtanh.f32 %v3843_v19 }
0x1abe   :  { %v4729_v20 = vpop.eup %4728 }
0x1abf   :  { %3857 = vrot.lane.b32.xlu0 %v4729_v20, %s4827_s13 }
0x1acd   :  { %v3354_v8 = vpop.permute.xlu1 %3353 }
0x1ace   :  { %v3360_v10 = vadd.f32 %v3354_v8, %v7913_v23  ;;  %v3383_v23 = vmul.f32 %v7446_v59, %v7387_v46  ;;  %v3849_v46 = vsub.f32 1.0, %v7456_v15 }
0x1ad0   :  { %4730 = vtanh.f32 %v3360_v10 }
0x1ad6   :  { %v4731_v52 = vpop.eup %4730 }
0x1ad7   :  { %3374 = vrot.lane.b32.xlu1 %v4731_v52, %s4827_s13 }
0x1adc   :  { %v3856_v41 = vpop.permute.xlu1 %3855 }
0x1add   :  { %v3863_v1 = vmul.f32 %v3856_v41, %v3848_v51 }
0x1adf   :  { %v7482_v13 = vadd.f32 %v3866_v29, %v3863_v1 }
0x1ae1   :  { %3880 = vrot.lane.b32.xlu1 %v7482_v13, %s4827_s13 }
0x1ae9   :  { %v3373_v33 = vpop.permute.xlu2 %3372 }
0x1aea   :  { %v3380_v54 = vmul.f32 %v3373_v33, %v3365_v18 }
0x1aec   :  { %v7489_v58 = vadd.f32 %v3383_v23, %v3380_v54 }
0x1aee   :  { %3397 = vrot.lane.b32.xlu2 %v7489_v58, %s4827_s13 }
0x1af3   :  { %v3879_v7 = vpop.permute.xlu2 %3878 }
0x1af4   :  { %4485 = vmatmul.msk.f32.vlgmr.msra.gmra.mxu2 %vm1585_vm12, %v3879_v7 }
0x1b29   :  { %v3371_v14 = vpop.permute.xlu0 %3370 }
0x1b2a   :  { %v3379_v27 = vmul.f32 %v3371_v14, %v3364_v47 }
0x1b2c   :  { %v7497_v0 = vadd.f32 %v3382_v11, %v3379_v27 }
0x1b2e   :  { %3395 = vrot.lane.b32.xlu0 %v7497_v0, %s4827_s13 }
0x1b31   :  { %v3858_v59 = vpop.permute.xlu0 %3857 }
0x1b32   :  { %v3864_v61 = vmul.f32 %v3858_v59, %v3849_v46 }
0x1b34   :  { %v7503_v26 = vadd.f32 %v3867_v63, %v3864_v61 }
0x1b36   :  { %3882 = vrot.lane.b32.xlu0 %v7503_v26, %s4827_s13 }
0x1b48   :  { %v3398_v44 = vpop.permute.xlu2 %3397 }
0x1b49   :  { %v3375_v12 = vpop.permute.xlu1 %3374 }
0x1b4a   :  { %v3381_v49 = vmul.f32 %v3375_v12, %v3366_v24  ;;  %v7916_v12 = vld [vmem:[#allocation26_spill] sm:$0xff] }
0x1b4c   :  { %v7510_v40 = vadd.f32 %v3384_v9, %v3381_v49 }
0x1b4e   :  { %3399 = vrot.lane.b32.xlu1 %v7510_v40, %s4827_s13 }
0x1b53   :  { %v3881_v35 = vpop.permute.xlu1 %3880 }
0x1b54   :  { %4486 = vmatmul.msk.f32.gmra.mxu2 %vm1585_vm12, %v3881_v35 }
0x1b77   :  { %v3907_v15 = vpop.f32.mrf.mxu2 }
0x1b78   :  { %v3976_v21 = vadd.f32 %v3907_v15, %v7406_v34  ;;  %v3916_v36 = vadd.f32 %v3907_v15, %v7914_v56  ;;  %v7917_v15 = vld [vmem:[#allocation23_spill] sm:$0xff] }
0x1b7a   :  { %3982 = vrot.lane.b32.xlu2 %v3976_v21, %s4825_s26  ;;  %v4488_v60 = vmul.f32 -1.442695, %v3916_v36 }
0x1b7c   :  { %4732 = vpow2.f32 %v4488_v60 }
0x1b82   :  { %v4733_v38 = vpop.eup %4732 }
0x1b83   :  { %v3928_v50 = vadd.f32 1.0, %v4733_v38 }
0x1b85   :  { %4734 = vrcp.f32 %v3928_v50  ;;  %v3942_v8 = vand.u32 2147483648, %v3928_v50  ;;  %vm3936_vm10 = vweird.f32 %v3928_v50  ;;  %v3940_v10 = vand.u32 2147483647, %v3928_v50 }
0x1b87   :  { %v3943_v41 = vor.u32 1.1754944e-38, %v3942_v8  ;;  %vm3941_vm13 = vcmp.eq.f32.partialorder %v3940_v10, 8.507059e+37 }
0x1b8b   :  { %v4735_v22 = vpop.eup %4734 }
0x1b8c   :  { %v3932_v37 = vmul.f32 %v4735_v22, %v3928_v50  ;;  %vm3937_vm9 = vweird.f32 %v4735_v22 }
0x1b8d   :  { %vm3938_vm11 = vmor %vm3936_vm10, %vm3937_vm9 }
0x1b8e   :  { %v3933_v4 = vsub.f32 1.0, %v3932_v37 }
0x1b90   :  { %v3934_v2 = vmul.f32 %v4735_v22, %v3933_v4 }
0x1b92   :  { %v3935_v39 = vadd.f32 %v4735_v22, %v3934_v2 }
0x1b94   :  { %v3939_v52 = vsel %vm3938_vm11, %v4735_v22, %v3935_v39 }
0x1b95   :  { %v7531_v29 = vsel %vm3941_vm13, %v3943_v41, %v3939_v52 }
0x1ba0   :  { %v3396_v30 = vpop.permute.xlu0 %3395 }
0x1ba1   :  { %4470 = vmatmul.msk.f32.vlgmr.msra.gmra.mxu3 %vm1585_vm12, %v3396_v30 }
0x1ba8   :  { %v3883_v31 = vpop.permute.xlu0 %3882 }
0x1ba9   :  { %4471 = vmatmul.msk.f32.gmra.mxu3 %vm1585_vm12, %v3398_v44  ;;  %4487 = vmatmul.msk.f32.gmra.mxu2 %vm1585_vm12, %v3883_v31  ;;  %v7918_v31 = vld [vmem:[#allocation43_spill] sm:$0xff] }
0x1bc0   :  { %v3400_v6 = vpop.permute.xlu1 %3399 }
0x1bc1   :  { %4472 = vmatmul.msk.f32.gmra.mxu3 %vm1585_vm12, %v3400_v6 }
0x1bd4   :  { %v3983_v51 = vpop.permute.xlu2 %3982 }
0x1bd5   :  { %v3991_v1 = vmul.f32 %v3983_v51, %v7531_v29 }
0x1bd7   :  { %v3910_v43 = vpop.f32.mrf.mxu2 }
0x1bd8   :  { %v3977_v48 = vadd.f32 %v3910_v43, %v7406_v34  ;;  %v3917_v42 = vadd.f32 %v3910_v43, %v7915_v3 }
0x1bda   :  { %3984 = vrot.lane.b32.xlu1 %v3977_v48, %s4825_s26  ;;  %v4489_v16 = vmul.f32 -1.442695, %v3917_v42 }
0x1bdc   :  { %4736 = vpow2.f32 %v4489_v16 }
0x1be2   :  { %v4737_v17 = vpop.eup %4736 }
0x1be3   :  { %v3929_v55 = vadd.f32 1.0, %v4737_v17 }
0x1be5   :  { %4738 = vrcp.f32 %v3929_v55  ;;  %v3957_v11 = vand.u32 2147483648, %v3929_v55  ;;  %vm3951_vm15 = vweird.f32 %v3929_v55  ;;  %v3955_v27 = vand.u32 2147483647, %v3929_v55 }
0x1be7   :  { %v3958_v59 = vor.u32 1.1754944e-38, %v3957_v11  ;;  %vm3956_vm1 = vcmp.eq.f32.partialorder %v3955_v27, 8.507059e+37 }
0x1beb   :  { %v4739_v18 = vpop.eup %4738 }
0x1bec   :  { %v3947_v33 = vmul.f32 %v4739_v18, %v3929_v55  ;;  %vm3952_vm14 = vweird.f32 %v4739_v18 }
0x1bed   :  { %vm3953_vm0 = vmor %vm3951_vm15, %vm3952_vm14 }
0x1bee   :  { %v3948_v23 = vsub.f32 1.0, %v3947_v33 }
0x1bf0   :  { %v3949_v54 = vmul.f32 %v4739_v18, %v3948_v23 }
0x1bf2   :  { %v3950_v14 = vadd.f32 %v4739_v18, %v3949_v54 }
0x1bf4   :  { %v3954_v46 = vsel %vm3953_vm0, %v4739_v18, %v3950_v14 }
0x1bf5   :  { %v7537_v63 = vsel %vm3956_vm1, %v3958_v59, %v3954_v46 }
0x1c24   :  { %v3424_v28 = vpop.f32.mrf.mxu3 }
0x1c25   :  { %v3493_v45 = vadd.f32 %v3424_v28, %v6893_v57  ;;  %v3433_v21 = vadd.f32 %v3424_v28, %v7917_v15 }
0x1c27   :  { %3499 = vrot.lane.b32.xlu0 %v3493_v45, %s4825_s26  ;;  %v4473_v44 = vmul.f32 -1.442695, %v3433_v21 }
0x1c2c   :  { %v3427_v62 = vpop.f32.mrf.mxu3  ;;  %v3913_v25 = vpop.f32.mrf.mxu2 }
0x1c2d   :  { %v3494_v19 = vadd.f32 %v3427_v62, %v6893_v57  ;;  %v3978_v20 = vadd.f32 %v3913_v25, %v7406_v34  ;;  %v3434_v9 = vadd.f32 %v3427_v62, %v7916_v12  ;;  %v3918_v6 = vadd.f32 %v3913_v25, %v7918_v31  ;;  %v7919_v62 = vld [vmem:[#allocation29_spill] sm:$0xff] }
0x1c2f   :  { %3501 = vrot.lane.b32.xlu2 %v3494_v19, %s4825_s26  ;;  %3986 = vrot.lane.b32.xlu0 %v3978_v20, %s4825_s26  ;;  %v4474_v49 = vmul.f32 -1.442695, %v3434_v9  ;;  %v4490_v48 = vmul.f32 -1.442695, %v3918_v6 }
0x1c31   :  { %4740 = vpow2.f32 %v4474_v49 }
0x1c37   :  { %3997 = vrot.lane.b32.xlu2 %v3991_v1, %s4825_s26  ;;  %v4741_v35 = vpop.eup %4740 }
0x1c38   :  { %v3446_v30 = vadd.f32 1.0, %v4741_v35 }
0x1c3a   :  { %4742 = vrcp.f32 %v3446_v30  ;;  %v3474_v4 = vand.u32 2147483648, %v3446_v30  ;;  %vm3468_vm3 = vweird.f32 %v3446_v30  ;;  %v3472_v45 = vand.u32 2147483647, %v3446_v30 }
0x1c3b   :  { %4744 = vpow2.f32 %v4473_v44 }
0x1c3c   :  { %4746 = vpow2.f32 %v4490_v48  ;;  %v3475_v55 = vor.u32 1.1754944e-38, %v3474_v4  ;;  %vm3473_vm5 = vcmp.eq.f32.partialorder %v3472_v45, 8.507059e+37 }
0x1c40   :  { %v4743_v43 = vpop.eup %4742 }
0x1c41   :  { %v4745_v36 = vpop.eup %4744  ;;  %v3464_v60 = vmul.f32 %v4743_v43, %v3446_v30  ;;  %vm3469_vm2 = vweird.f32 %v4743_v43 }
0x1c42   :  { %v3445_v38 = vadd.f32 1.0, %v4745_v36  ;;  %v4747_v42 = vpop.eup %4746  ;;  %vm3470_vm4 = vmor %vm3468_vm3, %vm3469_vm2 }
0x1c43   :  { %v3465_v50 = vsub.f32 1.0, %v3464_v60  ;;  %v3930_v16 = vadd.f32 1.0, %v4747_v42 }
0x1c44   :  { %v3430_v7 = vpop.f32.mrf.mxu3  ;;  %4748 = vrcp.f32 %v3445_v38  ;;  %v3459_v54 = vand.u32 2147483648, %v3445_v38  ;;  %vm3453_vm7 = vweird.f32 %v3445_v38 }
0x1c45   :  { %v3495_v47 = vadd.f32 %v3430_v7, %v6893_v57  ;;  %v3466_v22 = vmul.f32 %v4743_v43, %v3465_v50  ;;  %4750 = vrcp.f32 %v3930_v16  ;;  %v3435_v25 = vadd.f32 %v3430_v7, %v7919_v62 }
0x1c46   :  { %v3457_v7 = vand.u32 2147483647, %v3445_v38  ;;  %v3460_v27 = vor.u32 1.1754944e-38, %v3459_v54  ;;  %v3972_v49 = vand.u32 2147483648, %v3930_v16  ;;  %vm3966_vm11 = vweird.f32 %v3930_v16 }
0x1c47   :  { %3503 = vrot.lane.b32.xlu1 %v3495_v47, %s4825_s26  ;;  %v3467_v37 = vadd.f32 %v4743_v43, %v3466_v22  ;;  %v4475_v52 = vmul.f32 -1.442695, %v3435_v25  ;;  %v3970_v35 = vand.u32 2147483647, %v3930_v16 }
0x1c48   :  { %vm3458_vm9 = vcmp.eq.f32.partialorder %v3457_v7, 8.507059e+37  ;;  %v3973_v30 = vor.u32 1.1754944e-38, %v3972_v49 }
0x1c49   :  { %v3471_v17 = vsel %vm3470_vm4, %v4743_v43, %v3467_v37  ;;  %4752 = vpow2.f32 %v4475_v52  ;;  %vm3971_vm14 = vcmp.eq.f32.partialorder %v3970_v35, 8.507059e+37  ;;  %v4030_v52 = vmul.f32 %v7531_v29, %v7470_v53 }
0x1c4a   :  { %v4749_v28 = vpop.eup %4748  ;;  %v7545_v19 = vsel %vm3473_vm5, %v3475_v55, %v3471_v17 }
0x1c4b   :  { %v3449_v2 = vmul.f32 %v4749_v28, %v3445_v38  ;;  %v4751_v10 = vpop.eup %4750  ;;  %vm3454_vm6 = vweird.f32 %v4749_v28 }
0x1c4c   :  { %v3985_v61 = vpop.permute.xlu1 %3984  ;;  %v3962_v41 = vmul.f32 %v4751_v10, %v3930_v16  ;;  %vm3455_vm8 = vmor %vm3453_vm7, %vm3454_vm6  ;;  %vm3967_vm10 = vweird.f32 %v4751_v10 }
0x1c4d   :  { %v3992_v24 = vmul.f32 %v3985_v61, %v7537_v63  ;;  %v3450_v8 = vsub.f32 1.0, %v3449_v2  ;;  %vm3968_vm13 = vmor %vm3966_vm11, %vm3967_vm10 }
0x1c4e   :  { %v3963_v23 = vsub.f32 1.0, %v3962_v41 }
0x1c4f   :  { %3999 = vrot.lane.b32.xlu1 %v3992_v24, %s4825_s26  ;;  %v3451_v51 = vmul.f32 %v4749_v28, %v3450_v8  ;;  %v4753_v47 = vpop.eup %4752  ;;  %v4012_v8 = vsub.f32 1.0, %v7531_v29 }
0x1c50   :  { %v3964_v11 = vmul.f32 %v4751_v10, %v3963_v23  ;;  %v3447_v46 = vadd.f32 1.0, %v4753_v47  ;;  %v4031_v47 = vmul.f32 %v7537_v63, %v7482_v13 }
0x1c51   :  { %v3452_v33 = vadd.f32 %v4749_v28, %v3451_v51 }
0x1c52   :  { %v3965_v9 = vadd.f32 %v4751_v10, %v3964_v11  ;;  %v3489_v42 = vand.u32 2147483648, %v3447_v46  ;;  %vm3483_vm0 = vweird.f32 %v3447_v46  ;;  %v3487_v22 = vand.u32 2147483647, %v3447_v46 }
0x1c53   :  { %v3456_v14 = vsel %vm3455_vm8, %v4749_v28, %v3452_v33  ;;  %v3530_v11 = vsub.f32 1.0, %v7545_v19 }
0x1c54   :  { %v7550_v59 = vsel %vm3458_vm9, %v3460_v27, %v3456_v14  ;;  %v3969_v21 = vsel %vm3968_vm13, %v4751_v10, %v3965_v9  ;;  %v3490_v37 = vor.u32 1.1754944e-38, %v3489_v42  ;;  %vm3488_vm2 = vcmp.eq.f32.partialorder %v3487_v22, 8.507059e+37  ;;  %v7920_v42 = vld [vmem:[#allocation39_spill] sm:$0xff] }
0x1c55   :  { %v7555_v44 = vsel %vm3971_vm14, %v3973_v30, %v3969_v21  ;;  %v3529_v13 = vsub.f32 1.0, %v7550_v59 }
0x1c56   :  { %v4032_v35 = vmul.f32 %v7555_v44, %v7503_v26 }
0x1c89   :  { %v3502_v39 = vpop.permute.xlu2 %3501 }
0x1c8a   :  { %v3509_v20 = vmul.f32 %v3502_v39, %v7545_v19 }
0x1c8c   :  { %3516 = vrot.lane.b32.xlu2 %v3509_v20, %s4825_s26 }
0x1c91   :  { %v3998_v1 = vpop.permute.xlu2 %3997 }
0x1c92   :  { %v4006_v18 = vadd.f32 %v3998_v1, %v7914_v56 }
0x1c94   :  { %4754 = vtanh.f32 %v4006_v18 }
0x1c95   :  { %4756 = vrcp.f32 %v3447_v46 }
0x1c99   :  { %v3500_v61 = vpop.permute.xlu0 %3499 }
0x1c9a   :  { %v4755_v24 = vpop.eup %4754  ;;  %v3508_v56 = vmul.f32 %v3500_v61, %v7550_v59 }
0x1c9b   :  { %4018 = vrot.lane.b32.xlu2 %v4755_v24, %s4827_s13  ;;  %v4757_v48 = vpop.eup %4756 }
0x1c9c   :  { %3514 = vrot.lane.b32.xlu0 %v3508_v56, %s4825_s26  ;;  %v3479_v36 = vmul.f32 %v4757_v48, %v3447_v46  ;;  %vm3484_vm15 = vweird.f32 %v4757_v48  ;;  %v3547_v56 = vmul.f32 %v7550_v59, %v7497_v0 }
0x1c9d   :  { %vm3485_vm1 = vmor %vm3483_vm0, %vm3484_vm15 }
0x1c9e   :  { %v3480_v60 = vsub.f32 1.0, %v3479_v36 }
0x1ca0   :  { %v3481_v38 = vmul.f32 %v4757_v48, %v3480_v60 }
0x1ca1   :  { %v3987_v6 = vpop.permute.xlu0 %3986 }
0x1ca2   :  { %v3993_v43 = vmul.f32 %v3987_v6, %v7555_v44  ;;  %v3482_v50 = vadd.f32 %v4757_v48, %v3481_v38 }
0x1ca4   :  { %4001 = vrot.lane.b32.xlu0 %v3993_v43, %s4825_s26  ;;  %v3486_v16 = vsel %vm3485_vm1, %v4757_v48, %v3482_v50 }
0x1ca5   :  { %v7559_v4 = vsel %vm3488_vm2, %v3490_v37, %v3486_v16 }
0x1ca6   :  { %v3531_v0 = vsub.f32 1.0, %v7559_v4  ;;  %v3549_v6 = vmul.f32 %v7559_v4, %v7510_v40 }
0x1cb9   :  { %v3504_v28 = vpop.permute.xlu1 %3503 }
0x1cba   :  { %v3510_v45 = vmul.f32 %v3504_v28, %v7559_v4 }
0x1cbc   :  { %3518 = vrot.lane.b32.xlu1 %v3510_v45, %s4825_s26 }
0x1cc1   :  { %v4000_v17 = vpop.permute.xlu1 %3999 }
0x1cc2   :  { %v4007_v2 = vadd.f32 %v4000_v17, %v7915_v3 }
0x1cc4   :  { %4758 = vtanh.f32 %v4007_v2 }
0x1cca   :  { %v4759_v55 = vpop.eup %4758 }
0x1ccb   :  { %4020 = vrot.lane.b32.xlu1 %v4759_v55, %s4827_s13 }
0x1ce6   :  { %v3517_v25 = vpop.permute.xlu2 %3516 }
0x1ce7   :  { %v3524_v39 = vadd.f32 %v3517_v25, %v7916_v12 }
0x1ce9   :  { %4760 = vtanh.f32 %v3524_v39 }
0x1cef   :  { %v4761_v20 = vpop.eup %4760 }
0x1cf0   :  { %3537 = vrot.lane.b32.xlu2 %v4761_v20, %s4827_s13 }
0x1cf5   :  { %v4019_v10 = vpop.permute.xlu2 %4018 }
0x1cf6   :  { %v4027_v51 = vmul.f32 %v4019_v10, %v4012_v8 }
0x1cf8   :  { %v7570_v41 = vadd.f32 %v4030_v52, %v4027_v51 }
0x1cfa   :  { %4043 = vrot.lane.b32.xlu2 %v7570_v41, %s4827_s13 }
0x1d0e   :  { %v3515_v3 = vpop.permute.xlu0 %3514 }
0x1d0f   :  { %v3523_v1 = vadd.f32 %v3515_v3, %v7917_v15  ;;  %v4013_v15 = vsub.f32 1.0, %v7537_v63 }
0x1d11   :  { %4762 = vtanh.f32 %v3523_v1 }
0x1d16   :  { %v4002_v12 = vpop.permute.xlu0 %4001 }
0x1d17   :  { %v4763_v18 = vpop.eup %4762  ;;  %v4008_v33 = vadd.f32 %v4002_v12, %v7918_v31 }
0x1d18   :  { %3535 = vrot.lane.b32.xlu0 %v4763_v18, %s4827_s13 }
0x1d19   :  { %4764 = vtanh.f32 %v4008_v33 }
0x1d1f   :  { %v4765_v23 = vpop.eup %4764 }
0x1d20   :  { %4022 = vrot.lane.b32.xlu0 %v4765_v23, %s4827_s13 }
0x1d2e   :  { %v3519_v53 = vpop.permute.xlu1 %3518 }
0x1d2f   :  { %v3525_v29 = vadd.f32 %v3519_v53, %v7919_v62  ;;  %v3548_v62 = vmul.f32 %v7545_v19, %v7489_v58  ;;  %v4014_v58 = vsub.f32 1.0, %v7555_v44 }
0x1d31   :  { %4766 = vtanh.f32 %v3525_v29 }
0x1d37   :  { %v4767_v54 = vpop.eup %4766 }
0x1d38   :  { %3539 = vrot.lane.b32.xlu1 %v4767_v54, %s4827_s13 }
0x1d3d   :  { %v4021_v7 = vpop.permute.xlu1 %4020 }
0x1d3e   :  { %v4028_v31 = vmul.f32 %v4021_v7, %v4013_v15  ;;  %v7921_v15 = vld [vmem:[#allocation33_spill] sm:$0xff] }
0x1d40   :  { %v7583_v14 = vadd.f32 %v4031_v47, %v4028_v31 }
0x1d42   :  { %4045 = vrot.lane.b32.xlu1 %v7583_v14, %s4827_s13 }
0x1d4a   :  { %v3538_v27 = vpop.permute.xlu2 %3537 }
0x1d4b   :  { %v3545_v46 = vmul.f32 %v3538_v27, %v3530_v11 }
0x1d4d   :  { %v7590_v61 = vadd.f32 %v3548_v62, %v3545_v46 }
0x1d4f   :  { %3562 = vrot.lane.b32.xlu2 %v7590_v61, %s4827_s13 }
0x1d54   :  { %v4044_v24 = vpop.permute.xlu2 %4043 }
0x1d55   :  { %4491 = vmatmul.msk.f32.vlgmr.msrb.gmra.mxu3 %vm1585_vm12, %v4044_v24 }
0x1d8a   :  { %v3536_v63 = vpop.permute.xlu0 %3535 }
0x1d8b   :  { %v3544_v9 = vmul.f32 %v3536_v63, %v3529_v13 }
0x1d8d   :  { %v7598_v49 = vadd.f32 %v3547_v56, %v3544_v9  ;;  %v7923_v56 = vld [vmem:[#allocation35_spill] sm:$0xff] }
0x1d8f   :  { %3560 = vrot.lane.b32.xlu0 %v7598_v49, %s4827_s13 }
0x1d92   :  { %v4023_v19 = vpop.permute.xlu0 %4022 }
0x1d93   :  { %v4029_v21 = vmul.f32 %v4023_v19, %v4014_v58  ;;  %v7924_v58 = vld [vmem:[#allocation38_spill] sm:$0xff] }
0x1d94   :  { %v1492_v19 = vadd.f32 %v7117_v32, %v7924_v58 }
0x1d95   :  { %v7605_v30 = vadd.f32 %v4032_v35, %v4029_v21 }
0x1d97   :  { %4047 = vrot.lane.b32.xlu0 %v7605_v30, %s4827_s13 }
0x1da9   :  { %v3563_v38 = vpop.permute.xlu2 %3562 }
0x1daa   :  { %v3540_v59 = vpop.permute.xlu1 %3539 }
0x1dab   :  { %v3546_v43 = vmul.f32 %v3540_v59, %v3531_v0  ;;  %v7647_v59 = vadd.f32 %v7169_v5, %v1492_v19 }
0x1dad   :  { %v7612_v48 = vadd.f32 %v3549_v6, %v3546_v43 }
0x1daf   :  { %3564 = vrot.lane.b32.xlu1 %v7612_v48, %s4827_s13 }
0x1db4   :  { %v4046_v36 = vpop.permute.xlu1 %4045 }
0x1db5   :  { %4492 = vmatmul.msk.f32.gmra.mxu3 %vm1585_vm12, %v4046_v36 }
0x1dd8   :  { %v4072_v26 = vpop.f32.mrf.mxu3 }
0x1dd9   :  { %v4141_v44 = vadd.f32 %v4072_v26, %v7406_v34  ;;  %v4081_v22 = vadd.f32 %v4072_v26, %v7920_v42 }
0x1ddb   :  { %4147 = vrot.lane.b32.xlu0 %v4141_v44, %s4825_s26  ;;  %v4494_v16 = vmul.f32 -1.442695, %v4081_v22 }
0x1ddd   :  { %4768 = vpow2.f32 %v4494_v16 }
0x1de3   :  { %v4769_v4 = vpop.eup %4768 }
0x1de4   :  { %v4093_v17 = vadd.f32 1.0, %v4769_v4 }
0x1de6   :  { %4770 = vrcp.f32 %v4093_v17  ;;  %v4107_v18 = vand.u32 2147483648, %v4093_v17  ;;  %vm4101_vm4 = vweird.f32 %v4093_v17  ;;  %v4105_v33 = vand.u32 2147483647, %v4093_v17 }
0x1de8   :  { %v4108_v23 = vor.u32 1.1754944e-38, %v4107_v18  ;;  %vm4106_vm6 = vcmp.eq.f32.partialorder %v4105_v33, 8.507059e+37 }
0x1dec   :  { %v4771_v8 = vpop.eup %4770 }
0x1ded   :  { %v4097_v10 = vmul.f32 %v4771_v8, %v4093_v17  ;;  %vm4102_vm3 = vweird.f32 %v4771_v8 }
0x1dee   :  { %vm4103_vm5 = vmor %vm4101_vm4, %vm4102_vm3 }
0x1def   :  { %v4098_v52 = vsub.f32 1.0, %v4097_v10 }
0x1df1   :  { %v4099_v51 = vmul.f32 %v4771_v8, %v4098_v52 }
0x1df3   :  { %v4100_v1 = vadd.f32 %v4771_v8, %v4099_v51 }
0x1e01   :  { %v3561_v60 = vpop.permute.xlu0 %3560 }
0x1e02   :  { %4476 = vmatmul.msk.f32.vlgmr.msrb.gmra.mxu0 %vm1585_vm12, %v3561_v60 }
0x1e09   :  { %v4048_v50 = vpop.permute.xlu0 %4047 }
0x1e0a   :  { %4477 = vmatmul.msk.f32.gmra.mxu0 %vm1585_vm12, %v3563_v38  ;;  %4493 = vmatmul.msk.f32.gmra.mxu3 %vm1585_vm12, %v4048_v50 }
0x1e21   :  { %v3565_v40 = vpop.permute.xlu1 %3564 }
0x1e22   :  { %4478 = vmatmul.msk.f32.gmra.mxu0 %vm1585_vm12, %v3565_v40 }
0x1e38   :  { %v4075_v45 = vpop.f32.mrf.mxu3 }
0x1e39   :  { %v4142_v55 = vadd.f32 %v4075_v45, %v7406_v34 }
0x1e4d   :  { %v4148_v53 = vpop.permute.xlu0 %4147 }
0x1e7f   :  { %v3589_v37 = vpop.f32.mrf.mxu0 }
0x1e80   :  { %v3658_v28 = vadd.f32 %v3589_v37, %v6893_v57  ;;  %v3598_v7 = vadd.f32 %v3589_v37, %v7921_v15 }
0x1e82   :  { %3664 = vrot.lane.b32.xlu2 %v3658_v28, %s4825_s26  ;;  %v4479_v47 = vmul.f32 -1.442695, %v3598_v7 }
0x1e84   :  { %4772 = vpow2.f32 %v4479_v47 }
0x1e87   :  { %v3592_v2 = vpop.f32.mrf.mxu0 }
0x1e88   :  { %v3659_v25 = vadd.f32 %v3592_v2, %v6893_v57  ;;  %v3599_v9 = vadd.f32 %v3592_v2, %v7923_v56 }
0x1e8a   :  { %4149 = vrot.lane.b32.xlu2 %v4142_v55, %s4825_s26  ;;  %3666 = vrot.lane.b32.xlu1 %v3659_v25, %s4825_s26  ;;  %v4773_v27 = vpop.eup %4772  ;;  %v4480_v0 = vmul.f32 -1.442695, %v3599_v9 }
0x1e8b   :  { %v3610_v62 = vadd.f32 1.0, %v4773_v27 }
0x1e8d   :  { %v4078_v39 = vpop.f32.mrf.mxu3  ;;  %v3624_v60 = vand.u32 2147483648, %v3610_v62  ;;  %vm3618_vm8 = vweird.f32 %v3610_v62  ;;  %v3622_v50 = vand.u32 2147483647, %v3610_v62 }
0x1e8e   :  { %v4143_v20 = vadd.f32 %v4078_v39, %v7406_v34  ;;  %v4104_v34 = vsel %vm4103_vm5, %v4771_v8, %v4100_v1  ;;  %v4083_v36 = vadd.f32 %v4078_v39, %v7647_v59 }
0x1e8f   :  { %v7637_v29 = vsel %vm4106_vm6, %v4108_v23, %v4104_v34  ;;  %v3625_v16 = vor.u32 1.1754944e-38, %v3624_v60  ;;  %vm3623_vm10 = vcmp.eq.f32.partialorder %v3622_v50, 8.507059e+37 }
0x1e90   :  { %v4156_v54 = vmul.f32 %v4148_v53, %v7637_v29  ;;  %v4496_v38 = vmul.f32 -1.442695, %v4083_v36 }
0x1e92   :  { %4151 = vrot.lane.b32.xlu1 %v4143_v20, %s4825_s26  ;;  %v7925_v20 = vld [vmem:[#allocation37_spill] sm:$0xff] }
0x1e9f   :  { %v7632_v3 = vpop.f32.mrf.mxu0 }
0x1ea0   :  { %v3660_v12 = vadd.f32 %v7632_v3, %v6893_v57  ;;  %v7922_v57 = vld [vmem:[#allocation41_spill] sm:$0xff]  ;;  %v3600_v8 = vadd.f32 %v7632_v3, %v7925_v20 }
0x1ea1   :  { %v4082_v31 = vadd.f32 %v4075_v45, %v7922_v57 }
0x1ea2   :  { %3668 = vrot.lane.b32.xlu0 %v3660_v12, %s4825_s26  ;;  %v4481_v18 = vmul.f32 -1.442695, %v3600_v8 }
0x1ea3   :  { %v4495_v11 = vmul.f32 -1.442695, %v4082_v31 }
0x1ea5   :  { %4774 = vpow2.f32 %v4495_v11 }
0x1ea6   :  { %4776 = vrcp.f32 %v3610_v62 }
0x1eaa   :  { %4162 = vrot.lane.b32.xlu0 %v4156_v54, %s4825_s26 }
0x1eab   :  { %v4775_v46 = vpop.eup %4774 }
0x1eac   :  { %v4094_v24 = vadd.f32 1.0, %v4775_v46  ;;  %v4777_v13 = vpop.eup %4776 }
0x1ead   :  { %v3614_v63 = vmul.f32 %v4777_v13, %v3610_v62  ;;  %vm3619_vm7 = vweird.f32 %v4777_v13 }
0x1eae   :  { %4778 = vrcp.f32 %v4094_v24  ;;  %vm3620_vm9 = vmor %vm3618_vm8, %vm3619_vm7  ;;  %v4122_v17 = vand.u32 2147483648, %v4094_v24  ;;  %vm4116_vm13 = vweird.f32 %v4094_v24  ;;  %v4120_v2 = vand.u32 2147483647, %v4094_v24 }
0x1eaf   :  { %v3615_v35 = vsub.f32 1.0, %v3614_v63  ;;  %4780 = vpow2.f32 %v4480_v0 }
0x1eb0   :  { %4782 = vpow2.f32 %v4496_v38  ;;  %v4123_v39 = vor.u32 1.1754944e-38, %v4122_v17  ;;  %vm4121_vm15 = vcmp.eq.f32.partialorder %v4120_v2, 8.507059e+37 }
0x1eb1   :  { %v3616_v6 = vmul.f32 %v4777_v13, %v3615_v35 }
0x1eb3   :  { %v3617_v26 = vadd.f32 %v4777_v13, %v3616_v6 }
0x1eb4   :  { %v4779_v21 = vpop.eup %4778 }
0x1eb5   :  { %v4112_v43 = vmul.f32 %v4779_v21, %v4094_v24  ;;  %v4781_v32 = vpop.eup %4780  ;;  %v3621_v40 = vsel %vm3620_vm9, %v4777_v13, %v3617_v26  ;;  %vm4117_vm11 = vweird.f32 %v4779_v21 }
0x1eb6   :  { %v3611_v5 = vadd.f32 1.0, %v4781_v32  ;;  %v7650_v28 = vsel %vm3623_vm10, %v3625_v16, %v3621_v40  ;;  %vm4118_vm14 = vmor %vm4116_vm13, %vm4117_vm11  ;;  %v4783_v55 = vpop.eup %4782 }
0x1eb7   :  { %v4113_v44 = vsub.f32 1.0, %v4112_v43  ;;  %v4095_v10 = vadd.f32 1.0, %v4783_v55 }
0x1eb8   :  { %4784 = vrcp.f32 %v3611_v5  ;;  %v3639_v11 = vand.u32 2147483648, %v3611_v5  ;;  %vm3633_vm1 = vweird.f32 %v3611_v5  ;;  %v3637_v27 = vand.u32 2147483647, %v3611_v5 }
0x1eb9   :  { %v4114_v22 = vmul.f32 %v4779_v21, %v4113_v44  ;;  %4786 = vrcp.f32 %v4095_v10  ;;  %v4137_v35 = vand.u32 2147483648, %v4095_v10  ;;  %vm4131_vm5 = vweird.f32 %v4095_v10 }
0x1eba   :  { %4788 = vpow2.f32 %v4481_v18  ;;  %v3640_v24 = vor.u32 1.1754944e-38, %v3639_v11  ;;  %vm3638_vm3 = vcmp.eq.f32.partialorder %v3637_v27, 8.507059e+37 }
0x1ebb   :  { %v4115_v45 = vadd.f32 %v4779_v21, %v4114_v22  ;;  %v4138_v43 = vor.u32 1.1754944e-38, %v4137_v35  ;;  %v4301_v35 = vld [vmem:[%s7817_s11 + $0x50] sm:$0xff] }
0x1ebd   :  { %v4119_v25 = vsel %vm4118_vm14, %v4779_v21, %v4115_v45  ;;  %v4135_v21 = vand.u32 2147483647, %v4095_v10 }
0x1ebe   :  { %v7656_v52 = vsel %vm4121_vm15, %v4123_v39, %v4119_v25  ;;  %v4785_v12 = vpop.eup %4784 }
0x1ebf   :  { %v3629_v33 = vmul.f32 %v4785_v12, %v3611_v5  ;;  %v4787_v23 = vpop.eup %4786  ;;  %vm3634_vm0 = vweird.f32 %v4785_v12  ;;  %vm4136_vm7 = vcmp.eq.f32.partialorder %v4135_v21, 8.507059e+37  ;;  %v4178_v27 = vsub.f32 1.0, %v7656_v52  ;;  %v4300_v21 = vld [vmem:[%s7817_s11 + $0x48] sm:$0xff] }
0x1ec0   :  { %v4789_v53 = vpop.eup %4788  ;;  %v4127_v7 = vmul.f32 %v4787_v23, %v4095_v10  ;;  %vm3635_vm2 = vmor %vm3633_vm1, %vm3634_vm0  ;;  %vm4132_vm4 = vweird.f32 %v4787_v23 }
0x1ec1   :  { %v3630_v34 = vsub.f32 1.0, %v3629_v33  ;;  %v3612_v3 = vadd.f32 1.0, %v4789_v53  ;;  %vm4133_vm6 = vmor %vm4131_vm5, %vm4132_vm4 }
0x1ec2   :  { %v4128_v31 = vsub.f32 1.0, %v4127_v7 }
0x1ec3   :  { %v3631_v54 = vmul.f32 %v4785_v12, %v3630_v34  ;;  %4790 = vrcp.f32 %v3612_v3  ;;  %v3654_v32 = vand.u32 2147483648, %v3612_v3  ;;  %vm3648_vm9 = vweird.f32 %v3612_v3 }
0x1ec4   :  { %v4129_v46 = vmul.f32 %v4787_v23, %v4128_v31  ;;  %v3652_v40 = vand.u32 2147483647, %v3612_v3 }
0x1ec5   :  { %v3632_v47 = vadd.f32 %v4785_v12, %v3631_v54  ;;  %v3655_v16 = vor.u32 1.1754944e-38, %v3654_v32  ;;  %v4195_v54 = vmul.f32 %v7637_v29, %v7570_v41  ;;  %v4196_v41 = vmul.f32 %v7656_v52, %v7583_v14  ;;  %v4305_v14 = vld [vmem:[%s7817_s11 + $0x70] sm:$0xff] }
0x1ec6   :  { %v4130_v58 = vadd.f32 %v4787_v23, %v4129_v46  ;;  %vm3653_vm11 = vcmp.eq.f32.partialorder %v3652_v40, 8.507059e+37  ;;  %v4293_v40 = vld [vmem:[%s7817_s11 + $0x10] sm:$0xff] }
0x1ec7   :  { %v3636_v62 = vsel %vm3635_vm2, %v4785_v12, %v3632_v47 }
0x1ec8   :  { %v7660_v63 = vsel %vm3638_vm3, %v3640_v24, %v3636_v62  ;;  %v4134_v0 = vsel %vm4133_vm6, %v4787_v23, %v4130_v58  ;;  %v4208_v24 = vld [vmem:[%s7816_s9 + $0x38] sm:$0xff]  ;;  %v4303_v58 = vld [vmem:[%s7817_s11 + $0x60] sm:$0xff] }
0x1ec9   :  { %v4791_v19 = vpop.eup %4790  ;;  %v7664_v26 = vsel %vm4136_vm7, %v4138_v43, %v4134_v0  ;;  %4236 = vmatpush.msra.mxu0 %v4208_v24  ;;  %v4299_v0 = vld [vmem:[%s7817_s11 + $0x40] sm:$0xff]  ;;  %v4297_v43 = vld [vmem:[%s7817_s11 + $0x30] sm:$0xff]  ;;  %v3695_v32 = vsub.f32 1.0, %v7660_v63 }
0x1eca   :  { %v3644_v6 = vmul.f32 %v4791_v19, %v3612_v3  ;;  %vm3649_vm8 = vweird.f32 %v4791_v19  ;;  %v3694_v3 = vsub.f32 1.0, %v7650_v28 }
0x1ecb   :  { %vm3650_vm10 = vmor %vm3648_vm9, %vm3649_vm8 }
0x1ecc   :  { %v3645_v60 = vsub.f32 1.0, %v3644_v6  ;;  %v4298_v6 = vld [vmem:[%s7817_s11 + $0x38] sm:$0xff] }
0x1ece   :  { %v3646_v38 = vmul.f32 %v4791_v19, %v3645_v60  ;;  %v4294_v60 = vld [vmem:[%s7817_s11 + $0x18] sm:$0xff] }
0x1ed0   :  { %v3647_v50 = vadd.f32 %v4791_v19, %v3646_v38  ;;  %v4204_v38 = vld [vmem:[%s7816_s9 + $0x18] sm:$0xff] }
0x1ed1   :  { %4277 = vmatpush.msra.mxu1 %v4204_v38 }
0x1ed2   :  { %v3651_v22 = vsel %vm3650_vm10, %v4791_v19, %v3647_v50  ;;  %v4302_v19 = vld [vmem:[%s7817_s11 + $0x58] sm:$0xff]  ;;  %v4203_v50 = vld [vmem:[%s7816_s9 + $0x10] sm:$0xff] }
0x1ed3   :  { %v7668_v5 = vsel %vm3653_vm11, %v3655_v16, %v3651_v22  ;;  %v4202_v22 = vld [vmem:[%s7816_s9 + $0x8] sm:$0xff]  ;;  %4278 = vmatpush.msra.mxu1 %v4203_v50 }
0x1ed5   :  { %4279 = vmatpush.msra.mxu1 %v4202_v22 }
0x1edc   :  { %v3665_v37 = vpop.permute.xlu2 %3664 }
0x1edd   :  { %v3673_v4 = vmul.f32 %v3665_v37, %v7650_v28 }
0x1edf   :  { %3679 = vrot.lane.b32.xlu2 %v3673_v4, %s4825_s26 }
0x1ee4   :  { %v4150_v51 = vpop.permute.xlu2 %4149 }
0x1ee5   :  { %v4157_v1 = vmul.f32 %v4150_v51, %v7656_v52  ;;  %v4206_v52 = vld [vmem:[%s7816_s9 + $0x28] sm:$0xff] }
0x1ee7   :  { %4164 = vrot.lane.b32.xlu2 %v4157_v1, %s4825_s26 }
0x1efc   :  { %v3667_v13 = vpop.permute.xlu1 %3666 }
0x1efd   :  { %v3674_v9 = vmul.f32 %v3667_v13, %v7660_v63  ;;  %v4304_v13 = vld [vmem:[%s7817_s11 + $0x68] sm:$0xff] }
0x1eff   :  { %3681 = vrot.lane.b32.xlu1 %v3674_v9, %s4825_s26  ;;  %v4205_v9 = vld [vmem:[%s7816_s9 + $0x20] sm:$0xff] }
0x1f04   :  { %v4152_v36 = vpop.permute.xlu1 %4151 }
0x1f05   :  { %v4158_v44 = vmul.f32 %v4152_v36, %v7664_v26  ;;  %v4296_v36 = vld [vmem:[%s7817_s11 + $0x28] sm:$0xff] }
0x1f07   :  { %4166 = vrot.lane.b32.xlu1 %v4158_v44, %s4825_s26  ;;  %v4295_v44 = vld [vmem:[%s7817_s11 + $0x20] sm:$0xff] }
0x1f14   :  { %v3669_v37 = vpop.permute.xlu0 %3668 }
0x1f15   :  { %v3675_v4 = vmul.f32 %v3669_v37, %v7668_v5  ;;  %v3713_v37 = vmul.f32 %v7660_v63, %v7590_v61  ;;  %v4179_v61 = vsub.f32 1.0, %v7664_v26  ;;  %v4822_v63 = vld [vmem:[%s7809_s0] sm:$0xff] }
0x1f17   :  { %3683 = vrot.lane.b32.xlu0 %v3675_v4, %s4825_s26 }
0x1f1c   :  { %v4163_v45 = vpop.permute.xlu0 %4162 }
0x1f1d   :  { %v4171_v17 = vadd.f32 %v4163_v45, %v7920_v42  ;;  %v4292_v45 = vld [vmem:[%s7817_s11 + $0x8] sm:$0xff] }
0x1f1f   :  { %4792 = vtanh.f32 %v4171_v17  ;;  %v4201_v17 = vld [vmem:[%s7816_s9] sm:$0xff] }
0x1f20   :  { %4280 = vmatpush.msra.mxu1 %v4201_v17 }
0x1f25   :  { %v4793_v2 = vpop.eup %4792 }
0x1f26   :  { %4183 = vrot.lane.b32.xlu0 %v4793_v2, %s4827_s13 }
0x1f39   :  { %v3680_v55 = vpop.permute.xlu2 %3679 }
0x1f3a   :  { %v3688_v25 = vadd.f32 %v3680_v55, %v7921_v15  ;;  %v4291_v55 = vld [vmem:[%s7817_s11] sm:$0xff] }
0x1f3c   :  { %4794 = vtanh.f32 %v3688_v25 }
0x1f41   :  { %v4165_v39 = vpop.permute.xlu2 %4164 }
0x1f42   :  { %v4795_v8 = vpop.eup %4794  ;;  %v4172_v10 = vadd.f32 %v4165_v39, %v7922_v57  ;;  %v4197_v39 = vmul.f32 %v7664_v26, %v7605_v30  ;;  %v3714_v26 = vmul.f32 %v7668_v5, %v7612_v48 }
0x1f43   :  { %3700 = vrot.lane.b32.xlu2 %v4795_v8, %s4827_s13 }
0x1f44   :  { %4796 = vtanh.f32 %v4172_v10 }
0x1f4a   :  { %v4797_v51 = vpop.eup %4796 }
0x1f4b   :  { %4185 = vrot.lane.b32.xlu2 %v4797_v51, %s4827_s13 }
0x1f71   :  { %v3682_v1 = vpop.permute.xlu1 %3681 }
0x1f72   :  { %v3689_v42 = vadd.f32 %v3682_v1, %v7923_v56  ;;  %v4177_v56 = vsub.f32 1.0, %v7637_v29  ;;  %v4823_v1 = vld [vmem:[%s7809_s0 + $0x8] sm:$0xff] }
0x1f74   :  { %4798 = vtanh.f32 %v3689_v42  ;;  %v3696_v42 = vsub.f32 1.0, %v7668_v5 }
0x1f79   :  { %v4167_v12 = vpop.permute.xlu1 %4166 }
0x1f7a   :  { %v4799_v18 = vpop.eup %4798  ;;  %v4173_v33 = vadd.f32 %v4167_v12, %v7647_v59  ;;  %v4824_v12 = vld [vmem:[%s7809_s0 + $0x10] sm:$0xff] }
0x1f7b   :  { %3702 = vrot.lane.b32.xlu1 %v4799_v18, %s4827_s13 }
0x1f7c   :  { %4800 = vtanh.f32 %v4173_v33 }
0x1f82   :  { %v4801_v15 = vpop.eup %4800 }
0x1f83   :  { %4187 = vrot.lane.b32.xlu1 %v4801_v15, %s4827_s13 }
0x1f89   :  { %v3684_v57 = vpop.permute.xlu0 %3683 }
0x1f8a   :  { %v3690_v34 = vadd.f32 %v3684_v57, %v7925_v20  ;;  %v3712_v20 = vmul.f32 %v7650_v28, %v7598_v49  ;;  %v4306_v49 = vld [vmem:[%s7817_s11 + $0x78] sm:$0xff]  ;;  %v4207_v28 = vld [vmem:[%s7816_s9 + $0x30] sm:$0xff] }
0x1f8b   :  { %4307 = vmatpush.msrb.mxu2 %v4306_v49  ;;  %4237 = vmatpush.msra.mxu0 %v4207_v28 }
0x1f8c   :  { %4802 = vtanh.f32 %v3690_v34 }
0x1f8d   :  { %4308 = vmatpush.msrb.mxu2 %v4305_v14  ;;  %4238 = vmatpush.msra.mxu0 %v4206_v52 }
0x1f8f   :  { %4309 = vmatpush.msrb.mxu2 %v4304_v13  ;;  %4239 = vmatpush.msra.mxu0 %v4205_v9 }
0x1f91   :  { %4310 = vmatpush.msrb.mxu2 %v4303_v58 }
0x1f92   :  { %v4803_v23 = vpop.eup %4802 }
0x1f93   :  { %3704 = vrot.lane.b32.xlu0 %v4803_v23, %s4827_s13  ;;  %4311 = vmatpush.msrb.mxu2 %v4302_v19 }
0x1f95   :  { %4312 = vmatpush.msrb.mxu2 %v4301_v35 }
0x1f97   :  { %4313 = vmatpush.msrb.mxu2 %v4300_v21 }
0x1f98   :  { %v4184_v53 = vpop.permute.xlu0 %4183 }
0x1f99   :  { %v4192_v59 = vmul.f32 %v4184_v53, %v4177_v56  ;;  %4314 = vmatpush.msrb.mxu2 %v4299_v0 }
0x1f9b   :  { %v4198_v7 = vadd.f32 %v4195_v54, %v4192_v59  ;;  %4315 = vmatpush.msrb.mxu2 %v4298_v6  ;;  %v4515_v59 = vld [vmem:[%s7818_s10] ss:$0 sm:$0xff] }
0x1f9d   :  { %v3701_v47 = vpop.permute.xlu2 %3700  ;;  %4212 = vrot.lane.b32.xlu2 %v4198_v7, %s4827_s13  ;;  %4316 = vmatpush.msrb.mxu2 %v4297_v43 }
0x1f9e   :  { %v3709_v31 = vmul.f32 %v3701_v47, %v3694_v3 }
0x1f9f   :  { %4317 = vmatpush.msrb.mxu2 %v4296_v36 }
0x1fa0   :  { %v3715_v11 = vadd.f32 %v3712_v20, %v3709_v31 }
0x1fa1   :  { %4318 = vmatpush.msrb.mxu2 %v4295_v44 }
0x1fa2   :  { %4253 = vrot.lane.b32.xlu0 %v3715_v11, %s4827_s13 }
0x1fa3   :  { %4319 = vmatpush.msrb.mxu2 %v4294_v60 }
0x1fa5   :  { %v4186_v62 = vpop.permute.xlu2 %4185  ;;  %4320 = vmatpush.msrb.mxu2 %v4293_v40 }
0x1fa6   :  { %v4193_v29 = vmul.f32 %v4186_v62, %v4178_v27 }
0x1fa7   :  { %4321 = vmatpush.msrb.mxu2 %v4292_v45 }
0x1fa8   :  { %v4199_v46 = vadd.f32 %v4196_v41, %v4193_v29 }
0x1fa9   :  { %4322 = vmatpush.msrb.mxu2 %v4291_v55 }
0x1faa   :  { %4214 = vrot.lane.b32.xlu1 %v4199_v46, %s4827_s13  ;;  %4323 = vmatmul.f32.vlgmr.msrb.gmra.mxu2 %v4822_v63 }
0x1fb2   :  { %4326 = vmatmul.f32.gmra.mxu2 %v4823_v1 }
0x1fba   :  { %4329 = vmatmul.f32.gmra.mxu2 %v4824_v12 }
0x1fed   :  { %v3703_v16 = vpop.permute.xlu1 %3702 }
0x1fee   :  { %v3710_v4 = vmul.f32 %v3703_v16, %v3695_v32 }
0x1ff0   :  { %v3716_v2 = vadd.f32 %v3713_v37, %v3710_v4 }
0x1ff2   :  { %4255 = vrot.lane.b32.xlu2 %v3716_v2, %s4827_s13 }
0x1ff5   :  { %v4188_v25 = vpop.permute.xlu1 %4187 }
0x1ff6   :  { %v4194_v8 = vmul.f32 %v4188_v25, %v4179_v61 }
0x1ff7   :  { %v4213_v10 = vpop.permute.xlu2 %4212 }
0x1ff8   :  { %v4200_v51 = vadd.f32 %v4197_v39, %v4194_v8  ;;  %4497 = vmatmul.msk.f32.vlgmr.msra.gmra.mxu0 %vm1585_vm12, %v4213_v10 }
0x1ffa   :  { %4216 = vrot.lane.b32.xlu0 %v4200_v51, %s4827_s13 }
0x2005   :  { %v3705_v30 = vpop.permute.xlu0 %3704 }
0x2006   :  { %v3711_v18 = vmul.f32 %v3705_v30, %v3696_v42 }
0x2008   :  { %v3717_v33 = vadd.f32 %v3714_v26, %v3711_v18 }
0x200a   :  { %4257 = vrot.lane.b32.xlu1 %v3717_v33, %s4827_s13 }
0x2014   :  { %v4254_v15 = vpop.permute.xlu0 %4253 }
0x2015   :  { %4500 = vmatmul.msk.f32.vlgmr.msra.gmra.mxu1 %vm1585_vm12, %v4254_v15 }
0x201c   :  { %v4215_v57 = vpop.permute.xlu1 %4214 }
0x201d   :  { %4498 = vmatmul.msk.f32.gmra.mxu0 %vm1585_vm12, %v4215_v57 }
0x202d   :  { %v4324_v53 = vpop.f32.mrf.mxu2 }
0x2035   :  { %v4327_v9 = vpop.f32.mrf.mxu2 }
0x203d   :  { %v4330_v37 = vpop.f32.mrf.mxu2 }
0x204c   :  { %v4256_v34 = vpop.permute.xlu2 %4255 }
0x204d   :  { %4501 = vmatmul.msk.f32.gmra.mxu1 %vm1585_vm12, %v4256_v34 }
0x206c   :  { %v4217_v23 = vpop.permute.xlu0 %4216 }
0x206d   :  { %4499 = vmatmul.msk.f32.gmra.mxu0 %vm1585_vm12, %v4217_v23 }
0x2075   :  { %v4241_v48 = vpop.f32.mrf.mxu0 }
0x207c   :  { %v4258_v56 = vpop.permute.xlu1 %4257 }
0x207d   :  { %4502 = vmatmul.msk.f32.gmra.mxu1 %vm1585_vm12, %v4258_v56 }
0x2092   :  { %v4282_v5 = vpop.f32.mrf.mxu1 }
0x2093   :  { %v4283_v54 = vadd.f32 %v4282_v5, %v4241_v48 }
0x2095   :  { %v4333_v7 = vadd.f32 %v4324_v53, %v4283_v54 }
0x2097   :  { %v4340_v3 = vadd.f32 %v4515_v59, %v4333_v7 }
0x2099   :  { %v4503_v47 = vmul.f32 -1.442695, %v4340_v3 }
0x209a   :  { %v4244_v52 = vpop.f32.mrf.mxu0 }
0x209b   :  { %4804 = vpow2.f32 %v4503_v47 }
0x20a1   :  { %v4805_v20 = vpop.eup %4804 }
0x20a2   :  { %v4352_v31 = vadd.f32 1.0, %v4805_v20 }
0x20a4   :  { %4806 = vrcp.f32 %v4352_v31  ;;  %v4366_v41 = vand.u32 2147483648, %v4352_v31  ;;  %v4364_v46 = vand.u32 2147483647, %v4352_v31  ;;  %vm4360_vm13 = vweird.f32 %v4352_v31 }
0x20a6   :  { %v4367_v49 = vor.u32 1.1754944e-38, %v4366_v41  ;;  %vm4365_vm15 = vcmp.eq.f32.partialorder %v4364_v46, 8.507059e+37 }
0x20aa   :  { %v4807_v11 = vpop.eup %4806 }
0x20ab   :  { %v4356_v27 = vmul.f32 %v4807_v11, %v4352_v31  ;;  %vm4361_vm12 = vweird.f32 %v4807_v11 }
0x20ac   :  { %vm4362_vm14 = vmor %vm4360_vm13, %vm4361_vm12 }
0x20ad   :  { %v4357_v62 = vsub.f32 1.0, %v4356_v27 }
0x20af   :  { %v4358_v29 = vmul.f32 %v4807_v11, %v4357_v62 }
0x20b1   :  { %v4359_v24 = vadd.f32 %v4807_v11, %v4358_v29 }
0x20b3   :  { %v4363_v28 = vsel %vm4362_vm14, %v4807_v11, %v4359_v24 }
0x20b4   :  { %v4368_v14 = vsel %vm4365_vm15, %v4367_v49, %v4363_v28 }
0x20b5   :  { %4400 = vst [vmem:[%s7819_s12] sm:$0xff] %v4368_v14 }
0x20ca   :  { %v4285_v13 = vpop.f32.mrf.mxu1 }
0x20cb   :  { %v4286_v58 = vadd.f32 %v4285_v13, %v4244_v52 }
0x20cd   :  { %v4334_v19 = vadd.f32 %v4327_v9, %v4286_v58 }
0x20cf   :  { %v4341_v35 = vadd.f32 %v4515_v59, %v4334_v19 }
0x20d1   :  { %v4504_v21 = vmul.f32 -1.442695, %v4341_v35 }
0x20d3   :  { %4808 = vpow2.f32 %v4504_v21 }
0x20d9   :  { %v4809_v0 = vpop.eup %4808 }
0x20da   :  { %v4353_v6 = vadd.f32 1.0, %v4809_v0 }
0x20dc   :  { %4810 = vrcp.f32 %v4353_v6  ;;  %v4381_v60 = vand.u32 2147483648, %v4353_v6  ;;  %v4379_v50 = vand.u32 2147483647, %v4353_v6  ;;  %vm4375_vm1 = vweird.f32 %v4353_v6 }
0x20de   :  { %v4382_v40 = vor.u32 1.1754944e-38, %v4381_v60  ;;  %vm4380_vm3 = vcmp.eq.f32.partialorder %v4379_v50, 8.507059e+37 }
0x20e2   :  { %v4811_v43 = vpop.eup %4810 }
0x20e3   :  { %v4371_v36 = vmul.f32 %v4811_v43, %v4353_v6  ;;  %vm4376_vm0 = vweird.f32 %v4811_v43 }
0x20e4   :  { %vm4377_vm2 = vmor %vm4375_vm1, %vm4376_vm0 }
0x20e5   :  { %v4372_v44 = vsub.f32 1.0, %v4371_v36 }
0x20e7   :  { %v4373_v38 = vmul.f32 %v4811_v43, %v4372_v44 }
0x20e9   :  { %v4374_v32 = vadd.f32 %v4811_v43, %v4373_v38 }
0x20ea   :  { %v4247_v4 = vpop.f32.mrf.mxu0 }
0x20eb   :  { %v4378_v22 = vsel %vm4377_vm2, %v4811_v43, %v4374_v32 }
0x20ec   :  { %v4383_v16 = vsel %vm4380_vm3, %v4382_v40, %v4378_v22 }
0x20ed   :  { %4401 = vst [vmem:[%s7819_s12 + $0x8] sm:$0xff] %v4383_v16 }
0x20fa   :  { %v4288_v45 = vpop.f32.mrf.mxu1 }
0x20fb   :  { %v4289_v17 = vadd.f32 %v4288_v45, %v4247_v4 }
0x20fd   :  { %v4335_v2 = vadd.f32 %v4330_v37, %v4289_v17 }
0x20ff   :  { %v4342_v55 = vadd.f32 %v4515_v59, %v4335_v2 }
0x2101   :  { %v4505_v61 = vmul.f32 -1.442695, %v4342_v55 }
0x2103   :  { %4812 = vpow2.f32 %v4505_v61 }
0x2109   :  { %v4813_v63 = vpop.eup %4812 }
0x210a   :  { %v4354_v25 = vadd.f32 1.0, %v4813_v63 }
0x210c   :  { %4814 = vrcp.f32 %v4354_v25  ;;  %v4396_v51 = vand.u32 2147483648, %v4354_v25  ;;  %v4394_v42 = vand.u32 2147483647, %v4354_v25  ;;  %vm4390_vm5 = vweird.f32 %v4354_v25 }
0x210e   :  { %v4397_v30 = vor.u32 1.1754944e-38, %v4396_v51  ;;  %vm4395_vm7 = vcmp.eq.f32.partialorder %v4394_v42, 8.507059e+37 }
0x2112   :  { %v4815_v39 = vpop.eup %4814 }
0x2113   :  { %v4386_v8 = vmul.f32 %v4815_v39, %v4354_v25  ;;  %vm4391_vm4 = vweird.f32 %v4815_v39 }
0x2114   :  { %vm4392_vm6 = vmor %vm4390_vm5, %vm4391_vm4 }
0x2115   :  { %v4387_v10 = vsub.f32 1.0, %v4386_v8 }
0x2117   :  { %v4388_v1 = vmul.f32 %v4815_v39, %v4387_v10 }
0x2119   :  { %v4389_v12 = vadd.f32 %v4815_v39, %v4388_v1 }
0x211b   :  { %v4393_v26 = vsel %vm4392_vm6, %v4815_v39, %v4389_v12 }
0x211c   :  { %v4398_v18 = vsel %vm4395_vm7, %v4397_v30, %v4393_v26 }
0x211d   :  { %4402 = vst [vmem:[%s7819_s12 + $0x10] sm:$0xff] %v4398_v18 }

</bundles_post_ra>
